<compile_context>
chip_gen: v6e
topology: v6e:2x2x1
jax: 0.10.0
libtpu: 0.0.40
codegen_flags: <defaults>
</compile_context>

<pallas_src>
import functools

import jax
import jax.numpy as jnp
from jax.experimental import pallas as pl
from jax.experimental.pallas import tpu as pltpu

# Edge types grouped by destination node type (gene-dst first, then drug-dst).
# HeteroConv aggr='sum' is order-invariant, so regrouping preserves semantics.
EDGE_TYPES = [
    ("gene", "PPI", "gene"),
    ("gene", "GSEA", "gene"),
    ("gene", "PCC", "gene"),
    ("drug", "DTI", "gene"),
    ("drug", "DDS", "drug"),
    ("gene", "DTI", "drug"),
]
NODE_SLOT = {"gene": 0, "drug": 1}

SRC_SLOT = [NODE_SLOT[et[0]] for et in EDGE_TYPES]
DST_SLOT = [NODE_SLOT[et[2]] for et in EDGE_TYPES]
_cnt = {0: 0, 1: 0}
SRC_POS = []
for _s in SRC_SLOT:
    SRC_POS.append(_cnt[_s])
    _cnt[_s] += 1
MAX_SRC_RELS = max(_cnt.values())        # 4 (gene-sourced relations)
ROOT_BLK = MAX_SRC_RELS                  # column-block index of the lin_r (root) term

COMPUTE_DTYPE = jnp.bfloat16             # bf16 MXU inputs, f32 accumulation
VMEM_LIMIT_BYTES = 48 * 1024 * 1024      # <= v7x's 64 MiB physical VMEM


def _round_up(x, m):
    return ((x + m - 1) // m) * m


# ----------------------------- Pallas kernels ------------------------------ #

def _proj_kernel(x_ref, wt_ref, b_ref, o_ref):
    # o = x @ W^T + b for one (node-type, row-tile) grid cell (no ReLU).
    o_ref[0] = (
        jnp.dot(x_ref[0], wt_ref[0], preferred_element_type=jnp.float32) + b_ref[0]
    ).astype(o_ref.dtype)


def _transform_kernel(x_ref, wcat_ref, y_ref):
    # Feature-first lin_l (+ root) transform: Y = X @ Wcat, N = (MAX_SRC_RELS+1)*H.
    y_ref[0] = jnp.dot(
        x_ref[0], wcat_ref[0], preferred_element_type=jnp.float32
    ).astype(y_ref.dtype)


def _agg_kernel(src_ref, dst_ref, pos_ref, first_ref, last_ref,   # SMEM (prefetched)
                a_ref, ysrc_ref, yroot_ref, bsum_ref,
                o_ref, acc_ref):
    """One fused HeteroConv layer (aggregation only; lin_l already applied in Y).

    grid = (dst row tile i [parallel], edge type k [arbitrary], src tile j [arbitrary])

      acc  = Y_root[dst(k), i-tile] + sum_k b_k        once per dst group
      acc += A_k[i-tile, j-tile] @ Y[src(k), j-tile, pos(k)]
      out  = relu(acc)                                 on the group's last relation
    """
    k = pl.program_id(1)
    j = pl.program_id(2)
    last_j = j == pl.num_programs(2) - 1

    @pl.when(jnp.logical_and(first_ref[k] == 1, j == 0))
    def _init_acc():
        acc_ref[...] = yroot_ref[0].astype(jnp.float32) + bsum_ref[0]

    acc_ref[...] += jnp.dot(a_ref[0], ysrc_ref[0], preferred_element_type=jnp.float32)

    @pl.when(jnp.logical_and(last_j, last_ref[k] == 1))
    def _store():
        o_ref[0] = jnp.maximum(acc_ref[...], 0.0).astype(o_ref.dtype)


# ------------------------------ wrappers ----------------------------------- #

def fused_projection(x_slab, proj_wt, proj_b, *, row_tile):
    t, npad, din = x_slab.shape
    h = proj_wt.shape[-1]
    return pl.pallas_call(
        _proj_kernel,
        out_shape=jax.ShapeDtypeStruct((t, npad, h), x_slab.dtype),
        grid_spec=pltpu.PrefetchScalarGridSpec(
            num_scalar_prefetch=0,
            grid=(t, npad // row_tile),
            in_specs=[
                pl.BlockSpec((1, row_tile, din), lambda s, i: (s, i, 0)),
                pl.BlockSpec((1, din, h), lambda s, i: (s, 0, 0)),
                pl.BlockSpec((1, 1, h), lambda s, i: (s, 0, 0)),
            ],
            out_specs=pl.BlockSpec((1, row_tile, h), lambda s, i: (s, i, 0)),
        ),
        compiler_params=pltpu.CompilerParams(
            dimension_semantics=("parallel", "parallel"),
            vmem_limit_bytes=VMEM_LIMIT_BYTES,
        ),
    )(x_slab, proj_wt, proj_b)


def fused_relation_transform(x_slab, wcat, *, row_tile):
    t, npad, h = x_slab.shape
    nw = wcat.shape[-1]
    return pl.pallas_call(
        _transform_kernel,
        out_shape=jax.ShapeDtypeStruct((t, npad, nw), x_slab.dtype),
        grid_spec=pltpu.PrefetchScalarGridSpec(
            num_scalar_prefetch=0,
            grid=(t, npad // row_tile),
            in_specs=[
                pl.BlockSpec((1, row_tile, h), lambda s, i: (s, i, 0)),
                pl.BlockSpec((1, h, nw), lambda s, i: (s, 0, 0)),
            ],
            out_specs=pl.BlockSpec((1, row_tile, nw), lambda s, i: (s, i, 0)),
        ),
        compiler_params=pltpu.CompilerParams(
            dimension_semantics=("parallel", "parallel"),
            vmem_limit_bytes=VMEM_LIMIT_BYTES,
        ),
    )(x_slab, wcat)


def fused_hetero_layer(meta, a_stack, y_slab, b_sum, *, row_tile, src_tile, hidden):
    src_sel, dst_sel, pos_sel, first_flag, last_flag = meta
    k_rel, npad, _ = a_stack.shape
    h = hidden
    grid = (npad // row_tile, k_rel, npad // src_tile)
    return pl.pallas_call(
        _agg_kernel,
        out_shape=jax.ShapeDtypeStruct((2, npad, h), y_slab.dtype),
        grid_spec=pltpu.PrefetchScalarGridSpec(
            num_scalar_prefetch=5,
            grid=grid,
            in_specs=[
                # A_k row stripe                     [row_tile, src_tile]
                pl.BlockSpec((1, row_tile, src_tile),
                             lambda i, k, j, s, d, p, f, l: (k, i, j)),
                # Y[src(k)] transformed features     [src_tile, H]  (column block pos(k))
                pl.BlockSpec((1, src_tile, h),
                             lambda i, k, j, s, d, p, f, l: (s[k], j, p[k])),
                # Y[dst(k)] root (lin_r sum) block   [row_tile, H]
                pl.BlockSpec((1, row_tile, h),
                             lambda i, k, j, s, d, p, f, l: (d[k], i, ROOT_BLK)),
                # sum_k b_k (per dst type)           [1, H]
                pl.BlockSpec((1, 1, h),
                             lambda i, k, j, s, d, p, f, l: (d[k], 0, 0)),
            ],
            # Output block index is constant over (k within dst group, j) ->
            # accumulator-resident; only written on the group's last relation.
            out_specs=pl.BlockSpec((1, row_tile, h),
                                   lambda i, k, j, s, d, p, f, l: (d[k], i, 0)),
            scratch_shapes=[
                pltpu.VMEM((row_tile, h), jnp.float32),   # acc over relations + src tiles
            ],
        ),
        compiler_params=pltpu.CompilerParams(
            dimension_semantics=("parallel", "arbitrary", "arbitrary"),
            vmem_limit_bytes=VMEM_LIMIT_BYTES,
        ),
    )(src_sel, dst_sel, pos_sel, first_flag, last_flag,
      a_stack, y_slab, y_slab, b_sum)


# ------------------------------ model glue ---------------------------------- #

def init_params(key, node_input_dim, hidden_dim, num_layers):
    n_keys = 4 + num_layers * len(EDGE_TYPES) * 3
    keys = iter(jax.random.split(key, n_keys))

    def lin(fan_in, fan_out, bias=True):
        w = 0.05 * jax.random.normal(next(keys), (fan_out, fan_in), jnp.float32)
        b = (0.05 * jax.random.normal(next(keys), (fan_out,), jnp.float32)
             if bias else None)
        return w, b

    params = {
        "gene_lin": lin(node_input_dim, hidden_dim),
        "drug_lin": lin(node_input_dim, hidden_dim),
        "convs": [],
    }
    for _ in range(num_layers):
        layer = {}
        for et in EDGE_TYPES:
            wl, bl = lin(hidden_dim, hidden_dim, bias=True)   # SAGEConv.lin_l (bias)
            wr, _ = lin(hidden_dim, hidden_dim, bias=False)   # SAGEConv.lin_r (no bias)
            layer[et] = (wl, bl, wr)
        params["convs"].append(layer)
    # TODO(synk): relation_predictors / predict_* heads are not used by forward().
    return params


def pack_params(params):
    """Pre-transpose, concatenate lin_l^T by src type (+ root Wr_sum^T), pre-sum biases."""
    (wg, bg), (wd, bd) = params["gene_lin"], params["drug_lin"]
    h = wg.shape[0]
    nw = (MAX_SRC_RELS + 1) * h
    packed = {
        "proj_wt": jnp.stack([wg.T, wd.T]).astype(COMPUTE_DTYPE),        # [2, Din, H]
        "proj_b": jnp.stack([bg, bd])[:, None, :].astype(jnp.float32),   # [2, 1, H]
        "layers": [],
    }
    for layer in params["convs"]:
        wcat = jnp.zeros((2, h, nw), jnp.float32)
        bsum = jnp.zeros((2, 1, h), jnp.float32)
        for k, et in enumerate(EDGE_TYPES):
            wl, bl, wr = layer[et]
            s, d, p = SRC_SLOT[k], DST_SLOT[k], SRC_POS[k]
            wcat = wcat.at[s, :, p * h:(p + 1) * h].set(wl.T)
            # root path is additive across relations targeting dst type d
            wcat = wcat.at[d, :, ROOT_BLK * h:(ROOT_BLK + 1) * h].add(wr.T)
            bsum = bsum.at[d, 0].add(bl)
        packed["layers"].append({"wcat": wcat.astype(COMPUTE_DTYPE), "bsum": bsum})
    return packed


def build_relation_meta():
    kk = len(EDGE_TYPES)
    first = [1 if k == 0 or DST_SLOT[k] != DST_SLOT[k - 1] else 0 for k in range(kk)]
    last = [1 if k == kk - 1 or DST_SLOT[k] != DST_SLOT[k + 1] else 0 for k in range(kk)]
    to_i32 = lambda v: jnp.asarray(v, jnp.int32)
    return (to_i32(SRC_SLOT), to_i32(DST_SLOT), to_i32(SRC_POS),
            to_i32(first), to_i32(last))


def edge_index_to_mean_adj(edge_index, npad):
    """Dense row-normalised A[dst, src] (zero-padded) reproducing scatter-mean."""
    src, dst = edge_index[0], edge_index[1]
    adj = jnp.zeros((npad, npad), jnp.float32).at[dst, src].add(1.0)
    deg = adj.sum(axis=1, keepdims=True)
    return adj / jnp.maximum(deg, 1.0)   # zero in-degree rows stay all-zero


def hetero_gnn_forward(packed, meta, x_slab, a_stack, *, row_tile, src_tile):
    # 1 projection call + (1 transform + 1 aggregation) call per layer.
    x = fused_projection(x_slab, packed["proj_wt"], packed["proj_b"],
                         row_tile=row_tile)
    h = x.shape[-1]
    for layer in packed["layers"]:
        y = fused_relation_transform(x, layer["wcat"], row_tile=row_tile)
        x = fused_hetero_layer(meta, a_stack, y, layer["bsum"],
                               row_tile=row_tile, src_tile=src_tile, hidden=h)
    return x   # [2, Npad, H]; slice [:num_genes] / [:num_drugs] outside.
    # TODO(synk): for graphs that are sparse at very large scale, replace the
    # dense A stream with a scalar-prefetch gather formulation (O(E) bytes).


def reference_forward(params, x_gene, x_drug, adjs_f32, num_nodes):
    """Pure-JAX f32 reference of the PyTorch forward (for a loose sanity check)."""
    xs = {"gene": x_gene @ params["gene_lin"][0].T + params["gene_lin"][1],
          "drug": x_drug @ params["drug_lin"][0].T + params["drug_lin"][1]}
    for layer in params["convs"]:
        new = {t: jnp.zeros((num_nodes[t], xs[t].shape[1]), jnp.float32)
               for t in ("gene", "drug")}
        for k, et in enumerate(EDGE_TYPES):
            s_t, _, d_t = et
            wl, bl, wr = layer[et]
            a = adjs_f32[k][:num_nodes[d_t], :num_nodes[s_t]]
            new[d_t] = new[d_t] + (a @ xs[s_t]) @ wl.T + bl + xs[d_t] @ wr.T
        xs = {t: jnp.maximum(v, 0.0) for t, v in new.items()}
    return xs


# --------------------------------- main ------------------------------------ #

if __name__ == "__main__":
    NUM_GENES, NUM_DRUGS = 160, 40
    NODE_INPUT_DIM, HIDDEN_DIM, NUM_LAYERS = 512, 128, 2

    ROW_TILE = 256                                             # fills MXU M dim
    NPAD = _round_up(max(NUM_GENES, NUM_DRUGS), 2 * ROW_TILE)  # >=2 i-tiles (v7x: 2 TCs)
    SRC_TILE = NPAD                                            # collapse j axis at this size

    key = jax.random.PRNGKey(0)
    k_feat_g, k_feat_d, k_params, k_edges = jax.random.split(key, 4)

    x_gene = jax.random.normal(k_feat_g, (NUM_GENES, NODE_INPUT_DIM), jnp.float32)
    x_drug = jax.random.normal(k_feat_d, (NUM_DRUGS, NODE_INPUT_DIM), jnp.float32)

    # All node features in one padded bf16 slab: slot 0 = gene, slot 1 = drug.
    x_slab = jnp.zeros((2, NPAD, NODE_INPUT_DIM), COMPUTE_DTYPE)
    x_slab = x_slab.at[0, :NUM_GENES].set(x_gene.astype(COMPUTE_DTYPE))
    x_slab = x_slab.at[1, :NUM_DRUGS].set(x_drug.astype(COMPUTE_DTYPE))

    # Synthetic edge_index_dict (PyG layout: [2, E] with rows (src, dst)).
    num_nodes = {"gene": NUM_GENES, "drug": NUM_DRUGS}
    edge_counts = {"PPI": 400, "GSEA": 300, "PCC": 300, "DDS": 80, "DTI": 200}
    ekeys = jax.random.split(k_edges, len(EDGE_TYPES))
    adjs = []
    for et, ek in zip(EDGE_TYPES, ekeys):
        src_t, rel, dst_t = et
        e = edge_counts[rel]
        ks, kd = jax.random.split(ek)
        src = jax.random.randint(ks, (e,), 0, num_nodes[src_t])
        dst = jax.random.randint(kd, (e,), 0, num_nodes[dst_t])
        adjs.append(edge_index_to_mean_adj(jnp.stack([src, dst], axis=0), NPAD))
    a_f32 = jnp.stack(adjs)                                  # [K, NPAD, NPAD] f32
    a_stack = a_f32.astype(COMPUTE_DTYPE)                    # bf16 stream for the kernel

    params = init_params(k_params, NODE_INPUT_DIM, HIDDEN_DIM, NUM_LAYERS)
    packed = pack_params(params)
    meta = build_relation_meta()

    fwd = jax.jit(functools.partial(hetero_gnn_forward,
                                    row_tile=ROW_TILE, src_tile=SRC_TILE))
    out_slab = fwd(packed, meta, x_slab, a_stack)
    jax.block_until_ready(out_slab)

    out_gene = out_slab[0, :NUM_GENES].astype(jnp.float32)
    out_drug = out_slab[1, :NUM_DRUGS].astype(jnp.float32)
    assert out_gene.shape == (NUM_GENES, HIDDEN_DIM)
    assert out_drug.shape == (NUM_DRUGS, HIDDEN_DIM)
    assert bool(jnp.all(jnp.isfinite(out_gene))), "non-finite gene output"
    assert bool(jnp.all(jnp.isfinite(out_drug))), "non-finite drug output"

    # Loose sanity check vs a pure-f32 JAX reference (bf16 kernel -> generous tol).
    ref = reference_forward(params, x_gene, x_drug, a_f32, num_nodes)
    for name, got, want in (("gene", out_gene, ref["gene"]),
                            ("drug", out_drug, ref["drug"])):
        err = float(jnp.max(jnp.abs(got - want)))
        scale = float(jnp.max(jnp.abs(want))) + 1e-6
        assert err <= 0.1 * scale + 0.1, f"{name} mismatch: err={err} scale={scale}"

    print("KERNEL_OK")
</pallas_src>

<mosaic_0001>
module attributes {stable_mosaic.version = 11 : i64} {
  func.func @_transform_kernel(%arg0: i32, %arg1: i32, %arg2: memref<1x256x128xbf16, #tpu.memory_space<vmem>>, %arg3: memref<1x128x640xbf16, #tpu.memory_space<vmem>>, %arg4: memref<1x256x640xbf16, #tpu.memory_space<vmem>>) attributes {dimension_semantics = [#tpu.dimension_semantics<parallel>, #tpu.dimension_semantics<parallel>], iteration_bounds = array<i64: 2, 2>, scalar_prefetch = 0 : i64, scratch_operands = 0 : i64, tpu.core_type = #tpu.core_type<tc>, window_params = [{transform_indices = @transform_0, window_bounds = array<i64: 1, 256, 128>}, {transform_indices = @transform_1, window_bounds = array<i64: 1, 128, 640>}, {transform_indices = @transform_2, window_bounds = array<i64: 1, 256, 640>}]} {
    %c0 = arith.constant 0 : index
    %c0_0 = arith.constant 0 : index
    %c0_1 = arith.constant 0 : index
    %0 = vector.load %arg2[%c0, %c0_0, %c0_1] : memref<1x256x128xbf16, #tpu.memory_space<vmem>>, vector<1x256x128xbf16>
    %1 = vector.shape_cast %0 : vector<1x256x128xbf16> to vector<256x128xbf16>
    %c0_2 = arith.constant 0 : index
    %c0_3 = arith.constant 0 : index
    %c0_4 = arith.constant 0 : index
    %2 = vector.load %arg3[%c0_2, %c0_3, %c0_4] : memref<1x128x640xbf16, #tpu.memory_space<vmem>>, vector<1x128x640xbf16>
    %3 = vector.shape_cast %2 : vector<1x128x640xbf16> to vector<128x640xbf16>
    %cst = arith.constant dense<0.000000e+00> : vector<256x640xf32>
    %4 = tpu.matmul %1, %3, %cst {dimension_numbers = #tpu.dot_dimension_numbers<[1], [0], [0], [1], [0, 0, 1, 1], [], []>} : vector<256x128xbf16>, vector<128x640xbf16>, vector<256x640xf32> -> vector<256x640xf32>
    %5 = arith.truncf %4 : vector<256x640xf32> to vector<256x640xbf16>
    %c0_5 = arith.constant 0 : index
    %c0_6 = arith.constant 0 : index
    %c0_7 = arith.constant 0 : index
    %6 = vector.load %arg4[%c0_5, %c0_6, %c0_7] : memref<1x256x640xbf16, #tpu.memory_space<vmem>>, vector<1x256x640xbf16>
    %7 = vector.shape_cast %6 : vector<1x256x640xbf16> to vector<256x640xbf16>
    %8 = vector.shape_cast %5 : vector<256x640xbf16> to vector<1x256x640xbf16>
    tpu.vector_store %arg4[%c0_5, %c0_6, %c0_7], %8 {strides = array<i32>} : memref<1x256x640xbf16, #tpu.memory_space<vmem>>, vector<1x256x640xbf16>,
    return
  }
  func.func @transform_0(%arg0: i32, %arg1: i32) -> (i32, i32, i32) {
    %c0_i32 = arith.constant 0 : i32
    %c0_i32_0 = arith.constant 0 : i32
    return %arg0, %arg1, %c0_i32 : i32, i32, i32
  }
  func.func @transform_1(%arg0: i32, %arg1: i32) -> (i32, i32, i32) {
    %c0_i32 = arith.constant 0 : i32
    %c0_i32_0 = arith.constant 0 : i32
    %c0_i32_1 = arith.constant 0 : i32
    return %arg0, %c0_i32, %c0_i32_0 : i32, i32, i32
  }
  func.func @transform_2(%arg0: i32, %arg1: i32) -> (i32, i32, i32) {
    %c0_i32 = arith.constant 0 : i32
    %c0_i32_0 = arith.constant 0 : i32
    return %arg0, %arg1, %c0_i32 : i32, i32, i32
  }
}

module attributes {stable_mosaic.version = 11 : i64} {
  func.func @_agg_kernel(%arg0: i32, %arg1: i32, %arg2: i32, %arg3: memref<6xi32, #tpu.memory_space<smem>>, %arg4: memref<6xi32, #tpu.memory_space<smem>>, %arg5: memref<6xi32, #tpu.memory_space<smem>>, %arg6: memref<6xi32, #tpu.memory_space<smem>>, %arg7: memref<6xi32, #tpu.memory_space<smem>>, %arg8: memref<1x256x512xbf16, #tpu.memory_space<vmem>>, %arg9: memref<1x512x128xbf16, #tpu.memory_space<vmem>>, %arg10: memref<1x256x128xbf16, #tpu.memory_space<vmem>>, %arg11: memref<1x1x128xf32, #tpu.memory_space<vmem>>, %arg12: memref<1x256x128xbf16, #tpu.memory_space<vmem>>, %arg13: memref<256x128xf32, #tpu.memory_space<vmem>>) attributes {dimension_semantics = [#tpu.dimension_semantics<parallel>, #tpu.dimension_semantics<arbitrary>, #tpu.dimension_semantics<arbitrary>], iteration_bounds = array<i64: 2, 6, 1>, scalar_prefetch = 5 : i64, scratch_operands = 1 : i64, tpu.core_type = #tpu.core_type<tc>, window_params = [{transform_indices = @transform_0, window_bounds = array<i64: 1, 256, 512>}, {transform_indices = @transform_1, window_bounds = array<i64: 1, 512, 128>}, {transform_indices = @transform_2, window_bounds = array<i64: 1, 256, 128>}, {transform_indices = @transform_3, window_bounds = array<i64: 1, 1, 128>}, {transform_indices = @transform_4, window_bounds = array<i64: 1, 256, 128>}]} {
    %c0_i32 = arith.constant 0 : i32
    %0 = arith.cmpi eq, %arg2, %c0_i32 : i32
    %1 = arith.index_cast %arg1 : i32 to index
    %2 = memref.load %arg6[%1] : memref<6xi32, #tpu.memory_space<smem>>
    %c1_i32 = arith.constant 1 : i32
    %3 = arith.cmpi eq, %2, %c1_i32 : i32
    %c0_i32_0 = arith.constant 0 : i32
    %4 = arith.cmpi eq, %arg2, %c0_i32_0 : i32
    %5 = arith.andi %3, %4 : i1
    %6 = arith.extui %5 : i1 to i32
    %c0_i32_1 = arith.constant 0 : i32
    %7 = arith.cmpi ne, %6, %c0_i32_1 : i32
    scf.if %7 {
      %c0_13 = arith.constant 0 : index
      %c0_14 = arith.constant 0 : index
      %c0_15 = arith.constant 0 : index
      %22 = vector.load %arg10[%c0_13, %c0_14, %c0_15] : memref<1x256x128xbf16, #tpu.memory_space<vmem>>, vector<1x256x128xbf16>
      %23 = vector.shape_cast %22 : vector<1x256x128xbf16> to vector<256x128xbf16>
      %24 = arith.extf %23 : vector<256x128xbf16> to vector<256x128xf32>
      %c0_16 = arith.constant 0 : index
      %c0_17 = arith.constant 0 : index
      %c0_18 = arith.constant 0 : index
      %25 = vector.load %arg11[%c0_16, %c0_17, %c0_18] : memref<1x1x128xf32, #tpu.memory_space<vmem>>, vector<1x1x128xf32>
      %26 = vector.shape_cast %25 : vector<1x1x128xf32> to vector<1x128xf32>
      %27 = vector.broadcast %26 : vector<1x128xf32> to vector<256x128xf32>
      %28 = arith.addf %24, %27 : vector<256x128xf32>
      %c0_19 = arith.constant 0 : index
      %c0_20 = arith.constant 0 : index
      %29 = vector.load %arg13[%c0_19, %c0_20] : memref<256x128xf32, #tpu.memory_space<vmem>>, vector<256x128xf32>
      tpu.vector_store %arg13[%c0_19, %c0_20], %28 {strides = array<i32>} : memref<256x128xf32, #tpu.memory_space<vmem>>, vector<256x128xf32>,
    } else {
    }
    %c0 = arith.constant 0 : index
    %c0_2 = arith.constant 0 : index
    %8 = vector.load %arg13[%c0, %c0_2] : memref<256x128xf32, #tpu.memory_space<vmem>>, vector<256x128xf32>
    %c0_3 = arith.constant 0 : index
    %c0_4 = arith.constant 0 : index
    %c0_5 = arith.constant 0 : index
    %9 = vector.load %arg8[%c0_3, %c0_4, %c0_5] : memref<1x256x512xbf16, #tpu.memory_space<vmem>>, vector<1x256x512xbf16>
    %10 = vector.shape_cast %9 : vector<1x256x512xbf16> to vector<256x512xbf16>
    %c0_6 = arith.constant 0 : index
    %c0_7 = arith.constant 0 : index
    %c0_8 = arith.constant 0 : index
    %11 = vector.load %arg9[%c0_6, %c0_7, %c0_8] : memref<1x512x128xbf16, #tpu.memory_space<vmem>>, vector<1x512x128xbf16>
    %12 = vector.shape_cast %11 : vector<1x512x128xbf16> to vector<512x128xbf16>
    %cst = arith.constant dense<0.000000e+00> : vector<256x128xf32>
    %13 = tpu.matmul %10, %12, %cst {dimension_numbers = #tpu.dot_dimension_numbers<[1], [0], [0], [1], [0, 0, 1, 1], [], []>} : vector<256x512xbf16>, vector<512x128xbf16>, vector<256x128xf32> -> vector<256x128xf32>
    %14 = arith.addf %8, %13 : vector<256x128xf32>
    %c0_9 = arith.constant 0 : index
    %c0_10 = arith.constant 0 : index
    %15 = vector.load %arg13[%c0_9, %c0_10] : memref<256x128xf32, #tpu.memory_space<vmem>>, vector<256x128xf32>
    tpu.vector_store %arg13[%c0_9, %c0_10], %14 {strides = array<i32>} : memref<256x128xf32, #tpu.memory_space<vmem>>, vector<256x128xf32>,
    %16 = arith.index_cast %arg1 : i32 to index
    %17 = memref.load %arg7[%16] : memref<6xi32, #tpu.memory_space<smem>>
    %c1_i32_11 = arith.constant 1 : i32
    %18 = arith.cmpi eq, %17, %c1_i32_11 : i32
    %19 = arith.andi %0, %18 : i1
    %20 = arith.extui %19 : i1 to i32
    %c0_i32_12 = arith.constant 0 : i32
    %21 = arith.cmpi ne, %20, %c0_i32_12 : i32
    scf.if %21 {
      %c0_13 = arith.constant 0 : index
      %c0_14 = arith.constant 0 : index
      %22 = vector.load %arg13[%c0_13, %c0_14] : memref<256x128xf32, #tpu.memory_space<vmem>>, vector<256x128xf32>
      %cst_15 = arith.constant 0.000000e+00 : f32
      %23 = vector.broadcast %cst_15 : f32 to vector<256x128xf32>
      %24 = arith.maximumf %22, %23 : vector<256x128xf32>
      %25 = arith.truncf %24 : vector<256x128xf32> to vector<256x128xbf16>
      %c0_16 = arith.constant 0 : index
      %c0_17 = arith.constant 0 : index
      %c0_18 = arith.constant 0 : index
      %26 = vector.load %arg12[%c0_16, %c0_17, %c0_18] : memref<1x256x128xbf16, #tpu.memory_space<vmem>>, vector<1x256x128xbf16>
      %27 = vector.shape_cast %26 : vector<1x256x128xbf16> to vector<256x128xbf16>
      %28 = vector.shape_cast %25 : vector<256x128xbf16> to vector<1x256x128xbf16>
      tpu.vector_store %arg12[%c0_16, %c0_17, %c0_18], %28 {strides = array<i32>} : memref<1x256x128xbf16, #tpu.memory_space<vmem>>, vector<1x256x128xbf16>,
    } else {
    }
    return
  }
  func.func @transform_0(%arg0: i32, %arg1: i32, %arg2: i32, %arg3: memref<6xi32, #tpu.memory_space<smem>>, %arg4: memref<6xi32, #tpu.memory_space<smem>>, %arg5: memref<6xi32, #tpu.memory_space<smem>>, %arg6: memref<6xi32, #tpu.memory_space<smem>>, %arg7: memref<6xi32, #tpu.memory_space<smem>>) -> (i32, i32, i32) {
    %c0_i32 = arith.constant 0 : i32
    return %arg1, %arg0, %arg2 : i32, i32, i32
  }
  func.func @transform_1(%arg0: i32, %arg1: i32, %arg2: i32, %arg3: memref<6xi32, #tpu.memory_space<smem>>, %arg4: memref<6xi32, #tpu.memory_space<smem>>, %arg5: memref<6xi32, #tpu.memory_space<smem>>, %arg6: memref<6xi32, #tpu.memory_space<smem>>, %arg7: memref<6xi32, #tpu.memory_space<smem>>) -> (i32, i32, i32) {
    %0 = arith.index_cast %arg1 : i32 to index
    %1 = memref.load %arg3[%0] : memref<6xi32, #tpu.memory_space<smem>>
    %2 = arith.index_cast %arg1 : i32 to index
    %3 = memref.load %arg5[%2] : memref<6xi32, #tpu.memory_space<smem>>
    %c0_i32 = arith.constant 0 : i32
    return %1, %arg2, %3 : i32, i32, i32
  }
  func.func @transform_2(%arg0: i32, %arg1: i32, %arg2: i32, %arg3: memref<6xi32, #tpu.memory_space<smem>>, %arg4: memref<6xi32, #tpu.memory_space<smem>>, %arg5: memref<6xi32, #tpu.memory_space<smem>>, %arg6: memref<6xi32, #tpu.memory_space<smem>>, %arg7: memref<6xi32, #tpu.memory_space<smem>>) -> (i32, i32, i32) {
    %0 = arith.index_cast %arg1 : i32 to index
    %1 = memref.load %arg4[%0] : memref<6xi32, #tpu.memory_space<smem>>
    %c4_i32 = arith.constant 4 : i32
    %c0_i32 = arith.constant 0 : i32
    return %1, %arg0, %c4_i32 : i32, i32, i32
  }
  func.func @transform_3(%arg0: i32, %arg1: i32, %arg2: i32, %arg3: memref<6xi32, #tpu.memory_space<smem>>, %arg4: memref<6xi32, #tpu.memory_space<smem>>, %arg5: memref<6xi32, #tpu.memory_space<smem>>, %arg6: memref<6xi32, #tpu.memory_space<smem>>, %arg7: memref<6xi32, #tpu.memory_space<smem>>) -> (i32, i32, i32) {
    %0 = arith.index_cast %arg1 : i32 to index
    %1 = memref.load %arg4[%0] : memref<6xi32, #tpu.memory_space<smem>>
    %c0_i32 = arith.constant 0 : i32
    %c0_i32_0 = arith.constant 0 : i32
    %c0_i32_1 = arith.constant 0 : i32
    return %1, %c0_i32, %c0_i32_0 : i32, i32, i32
  }
  func.func @transform_4(%arg0: i32, %arg1: i32, %arg2: i32, %arg3: memref<6xi32, #tpu.memory_space<smem>>, %arg4: memref<6xi32, #tpu.memory_space<smem>>, %arg5: memref<6xi32, #tpu.memory_space<smem>>, %arg6: memref<6xi32, #tpu.memory_space<smem>>, %arg7: memref<6xi32, #tpu.memory_space<smem>>) -> (i32, i32, i32) {
    %0 = arith.index_cast %arg1 : i32 to index
    %1 = memref.load %arg4[%0] : memref<6xi32, #tpu.memory_space<smem>>
    %c0_i32 = arith.constant 0 : i32
    %c0_i32_0 = arith.constant 0 : i32
    return %1, %arg0, %c0_i32 : i32, i32, i32
  }
}

module attributes {stable_mosaic.version = 11 : i64} {
  func.func @_proj_kernel(%arg0: i32, %arg1: i32, %arg2: memref<1x256x512xbf16, #tpu.memory_space<vmem>>, %arg3: memref<1x512x128xbf16, #tpu.memory_space<vmem>>, %arg4: memref<1x1x128xf32, #tpu.memory_space<vmem>>, %arg5: memref<1x256x128xbf16, #tpu.memory_space<vmem>>) attributes {dimension_semantics = [#tpu.dimension_semantics<parallel>, #tpu.dimension_semantics<parallel>], iteration_bounds = array<i64: 2, 2>, scalar_prefetch = 0 : i64, scratch_operands = 0 : i64, tpu.core_type = #tpu.core_type<tc>, window_params = [{transform_indices = @transform_0, window_bounds = array<i64: 1, 256, 512>}, {transform_indices = @transform_1, window_bounds = array<i64: 1, 512, 128>}, {transform_indices = @transform_2, window_bounds = array<i64: 1, 1, 128>}, {transform_indices = @transform_3, window_bounds = array<i64: 1, 256, 128>}]} {
    %c0 = arith.constant 0 : index
    %c0_0 = arith.constant 0 : index
    %c0_1 = arith.constant 0 : index
    %0 = vector.load %arg2[%c0, %c0_0, %c0_1] : memref<1x256x512xbf16, #tpu.memory_space<vmem>>, vector<1x256x512xbf16>
    %1 = vector.shape_cast %0 : vector<1x256x512xbf16> to vector<256x512xbf16>
    %c0_2 = arith.constant 0 : index
    %c0_3 = arith.constant 0 : index
    %c0_4 = arith.constant 0 : index
    %2 = vector.load %arg3[%c0_2, %c0_3, %c0_4] : memref<1x512x128xbf16, #tpu.memory_space<vmem>>, vector<1x512x128xbf16>
    %3 = vector.shape_cast %2 : vector<1x512x128xbf16> to vector<512x128xbf16>
    %cst = arith.constant dense<0.000000e+00> : vector<256x128xf32>
    %4 = tpu.matmul %1, %3, %cst {dimension_numbers = #tpu.dot_dimension_numbers<[1], [0], [0], [1], [0, 0, 1, 1], [], []>} : vector<256x512xbf16>, vector<512x128xbf16>, vector<256x128xf32> -> vector<256x128xf32>
    %c0_5 = arith.constant 0 : index
    %c0_6 = arith.constant 0 : index
    %c0_7 = arith.constant 0 : index
    %5 = vector.load %arg4[%c0_5, %c0_6, %c0_7] : memref<1x1x128xf32, #tpu.memory_space<vmem>>, vector<1x1x128xf32>
    %6 = vector.shape_cast %5 : vector<1x1x128xf32> to vector<1x128xf32>
    %7 = vector.broadcast %6 : vector<1x128xf32> to vector<256x128xf32>
    %8 = arith.addf %4, %7 : vector<256x128xf32>
    %9 = arith.truncf %8 : vector<256x128xf32> to vector<256x128xbf16>
    %c0_8 = arith.constant 0 : index
    %c0_9 = arith.constant 0 : index
    %c0_10 = arith.constant 0 : index
    %10 = vector.load %arg5[%c0_8, %c0_9, %c0_10] : memref<1x256x128xbf16, #tpu.memory_space<vmem>>, vector<1x256x128xbf16>
    %11 = vector.shape_cast %10 : vector<1x256x128xbf16> to vector<256x128xbf16>
    %12 = vector.shape_cast %9 : vector<256x128xbf16> to vector<1x256x128xbf16>
    tpu.vector_store %arg5[%c0_8, %c0_9, %c0_10], %12 {strides = array<i32>} : memref<1x256x128xbf16, #tpu.memory_space<vmem>>, vector<1x256x128xbf16>,
    return
  }
  func.func @transform_0(%arg0: i32, %arg1: i32) -> (i32, i32, i32) {
    %c0_i32 = arith.constant 0 : i32
    %c0_i32_0 = arith.constant 0 : i32
    return %arg0, %arg1, %c0_i32 : i32, i32, i32
  }
  func.func @transform_1(%arg0: i32, %arg1: i32) -> (i32, i32, i32) {
    %c0_i32 = arith.constant 0 : i32
    %c0_i32_0 = arith.constant 0 : i32
    %c0_i32_1 = arith.constant 0 : i32
    return %arg0, %c0_i32, %c0_i32_0 : i32, i32, i32
  }
  func.func @transform_2(%arg0: i32, %arg1: i32) -> (i32, i32, i32) {
    %c0_i32 = arith.constant 0 : i32
    %c0_i32_0 = arith.constant 0 : i32
    %c0_i32_1 = arith.constant 0 : i32
    return %arg0, %c0_i32, %c0_i32_0 : i32, i32, i32
  }
  func.func @transform_3(%arg0: i32, %arg1: i32) -> (i32, i32, i32) {
    %c0_i32 = arith.constant 0 : i32
    %c0_i32_0 = arith.constant 0 : i32
    return %arg0, %arg1, %c0_i32 : i32, i32, i32
  }
}

module attributes {stable_mosaic.version = 11 : i64} {
  func.func @_agg_kernel(%arg0: i32, %arg1: i32, %arg2: i32, %arg3: memref<6xi32, #tpu.memory_space<smem>>, %arg4: memref<6xi32, #tpu.memory_space<smem>>, %arg5: memref<6xi32, #tpu.memory_space<smem>>, %arg6: memref<6xi32, #tpu.memory_space<smem>>, %arg7: memref<6xi32, #tpu.memory_space<smem>>, %arg8: memref<1x256x512xbf16, #tpu.memory_space<vmem>>, %arg9: memref<1x512x128xbf16, #tpu.memory_space<vmem>>, %arg10: memref<1x256x128xbf16, #tpu.memory_space<vmem>>, %arg11: memref<1x1x128xf32, #tpu.memory_space<vmem>>, %arg12: memref<1x256x128xbf16, #tpu.memory_space<vmem>>, %arg13: memref<256x128xf32, #tpu.memory_space<vmem>>) attributes {dimension_semantics = [#tpu.dimension_semantics<parallel>, #tpu.dimension_semantics<arbitrary>, #tpu.dimension_semantics<arbitrary>], iteration_bounds = array<i64: 2, 6, 1>, scalar_prefetch = 5 : i64, scratch_operands = 1 : i64, tpu.core_type = #tpu.core_type<tc>, window_params = [{transform_indices = @transform_0, window_bounds = array<i64: 1, 256, 512>}, {transform_indices = @transform_1, window_bounds = array<i64: 1, 512, 128>}, {transform_indices = @transform_2, window_bounds = array<i64: 1, 256, 128>}, {transform_indices = @transform_3, window_bounds = array<i64: 1, 1, 128>}, {transform_indices = @transform_4, window_bounds = array<i64: 1, 256, 128>}]} {
    %c0_i32 = arith.constant 0 : i32
    %0 = arith.cmpi eq, %arg2, %c0_i32 : i32
    %1 = arith.index_cast %arg1 : i32 to index
    %2 = memref.load %arg6[%1] : memref<6xi32, #tpu.memory_space<smem>>
    %c1_i32 = arith.constant 1 : i32
    %3 = arith.cmpi eq, %2, %c1_i32 : i32
    %c0_i32_0 = arith.constant 0 : i32
    %4 = arith.cmpi eq, %arg2, %c0_i32_0 : i32
    %5 = arith.andi %3, %4 : i1
    %6 = arith.extui %5 : i1 to i32
    %c0_i32_1 = arith.constant 0 : i32
    %7 = arith.cmpi ne, %6, %c0_i32_1 : i32
    scf.if %7 {
      %c0_13 = arith.constant 0 : index
      %c0_14 = arith.constant 0 : index
      %c0_15 = arith.constant 0 : index
      %22 = vector.load %arg10[%c0_13, %c0_14, %c0_15] : memref<1x256x128xbf16, #tpu.memory_space<vmem>>, vector<1x256x128xbf16>
      %23 = vector.shape_cast %22 : vector<1x256x128xbf16> to vector<256x128xbf16>
      %24 = arith.extf %23 : vector<256x128xbf16> to vector<256x128xf32>
      %c0_16 = arith.constant 0 : index
      %c0_17 = arith.constant 0 : index
      %c0_18 = arith.constant 0 : index
      %25 = vector.load %arg11[%c0_16, %c0_17, %c0_18] : memref<1x1x128xf32, #tpu.memory_space<vmem>>, vector<1x1x128xf32>
      %26 = vector.shape_cast %25 : vector<1x1x128xf32> to vector<1x128xf32>
      %27 = vector.broadcast %26 : vector<1x128xf32> to vector<256x128xf32>
      %28 = arith.addf %24, %27 : vector<256x128xf32>
      %c0_19 = arith.constant 0 : index
      %c0_20 = arith.constant 0 : index
      %29 = vector.load %arg13[%c0_19, %c0_20] : memref<256x128xf32, #tpu.memory_space<vmem>>, vector<256x128xf32>
      tpu.vector_store %arg13[%c0_19, %c0_20], %28 {strides = array<i32>} : memref<256x128xf32, #tpu.memory_space<vmem>>, vector<256x128xf32>,
    } else {
    }
    %c0 = arith.constant 0 : index
    %c0_2 = arith.constant 0 : index
    %8 = vector.load %arg13[%c0, %c0_2] : memref<256x128xf32, #tpu.memory_space<vmem>>, vector<256x128xf32>
    %c0_3 = arith.constant 0 : index
    %c0_4 = arith.constant 0 : index
    %c0_5 = arith.constant 0 : index
    %9 = vector.load %arg8[%c0_3, %c0_4, %c0_5] : memref<1x256x512xbf16, #tpu.memory_space<vmem>>, vector<1x256x512xbf16>
    %10 = vector.shape_cast %9 : vector<1x256x512xbf16> to vector<256x512xbf16>
    %c0_6 = arith.constant 0 : index
    %c0_7 = arith.constant 0 : index
    %c0_8 = arith.constant 0 : index
    %11 = vector.load %arg9[%c0_6, %c0_7, %c0_8] : memref<1x512x128xbf16, #tpu.memory_space<vmem>>, vector<1x512x128xbf16>
    %12 = vector.shape_cast %11 : vector<1x512x128xbf16> to vector<512x128xbf16>
    %cst = arith.constant dense<0.000000e+00> : vector<256x128xf32>
    %13 = tpu.matmul %10, %12, %cst {dimension_numbers = #tpu.dot_dimension_numbers<[1], [0], [0], [1], [0, 0, 1, 1], [], []>} : vector<256x512xbf16>, vector<512x128xbf16>, vector<256x128xf32> -> vector<256x128xf32>
    %14 = arith.addf %8, %13 : vector<256x128xf32>
    %c0_9 = arith.constant 0 : index
    %c0_10 = arith.constant 0 : index
    %15 = vector.load %arg13[%c0_9, %c0_10] : memref<256x128xf32, #tpu.memory_space<vmem>>, vector<256x128xf32>
    tpu.vector_store %arg13[%c0_9, %c0_10], %14 {strides = array<i32>} : memref<256x128xf32, #tpu.memory_space<vmem>>, vector<256x128xf32>,
    %16 = arith.index_cast %arg1 : i32 to index
    %17 = memref.load %arg7[%16] : memref<6xi32, #tpu.memory_space<smem>>
    %c1_i32_11 = arith.constant 1 : i32
    %18 = arith.cmpi eq, %17, %c1_i32_11 : i32
    %19 = arith.andi %0, %18 : i1
    %20 = arith.extui %19 : i1 to i32
    %c0_i32_12 = arith.constant 0 : i32
    %21 = arith.cmpi ne, %20, %c0_i32_12 : i32
    scf.if %21 {
      %c0_13 = arith.constant 0 : index
      %c0_14 = arith.constant 0 : index
      %22 = vector.load %arg13[%c0_13, %c0_14] : memref<256x128xf32, #tpu.memory_space<vmem>>, vector<256x128xf32>
      %cst_15 = arith.constant 0.000000e+00 : f32
      %23 = vector.broadcast %cst_15 : f32 to vector<256x128xf32>
      %24 = arith.maximumf %22, %23 : vector<256x128xf32>
      %25 = arith.truncf %24 : vector<256x128xf32> to vector<256x128xbf16>
      %c0_16 = arith.constant 0 : index
      %c0_17 = arith.constant 0 : index
      %c0_18 = arith.constant 0 : index
      %26 = vector.load %arg12[%c0_16, %c0_17, %c0_18] : memref<1x256x128xbf16, #tpu.memory_space<vmem>>, vector<1x256x128xbf16>
      %27 = vector.shape_cast %26 : vector<1x256x128xbf16> to vector<256x128xbf16>
      %28 = vector.shape_cast %25 : vector<256x128xbf16> to vector<1x256x128xbf16>
      tpu.vector_store %arg12[%c0_16, %c0_17, %c0_18], %28 {strides = array<i32>} : memref<1x256x128xbf16, #tpu.memory_space<vmem>>, vector<1x256x128xbf16>,
    } else {
    }
    return
  }
  func.func @transform_0(%arg0: i32, %arg1: i32, %arg2: i32, %arg3: memref<6xi32, #tpu.memory_space<smem>>, %arg4: memref<6xi32, #tpu.memory_space<smem>>, %arg5: memref<6xi32, #tpu.memory_space<smem>>, %arg6: memref<6xi32, #tpu.memory_space<smem>>, %arg7: memref<6xi32, #tpu.memory_space<smem>>) -> (i32, i32, i32) {
    %c0_i32 = arith.constant 0 : i32
    return %arg1, %arg0, %arg2 : i32, i32, i32
  }
  func.func @transform_1(%arg0: i32, %arg1: i32, %arg2: i32, %arg3: memref<6xi32, #tpu.memory_space<smem>>, %arg4: memref<6xi32, #tpu.memory_space<smem>>, %arg5: memref<6xi32, #tpu.memory_space<smem>>, %arg6: memref<6xi32, #tpu.memory_space<smem>>, %arg7: memref<6xi32, #tpu.memory_space<smem>>) -> (i32, i32, i32) {
    %0 = arith.index_cast %arg1 : i32 to index
    %1 = memref.load %arg3[%0] : memref<6xi32, #tpu.memory_space<smem>>
    %2 = arith.index_cast %arg1 : i32 to index
    %3 = memref.load %arg5[%2] : memref<6xi32, #tpu.memory_space<smem>>
    %c0_i32 = arith.constant 0 : i32
    return %1, %arg2, %3 : i32, i32, i32
  }
  func.func @transform_2(%arg0: i32, %arg1: i32, %arg2: i32, %arg3: memref<6xi32, #tpu.memory_space<smem>>, %arg4: memref<6xi32, #tpu.memory_space<smem>>, %arg5: memref<6xi32, #tpu.memory_space<smem>>, %arg6: memref<6xi32, #tpu.memory_space<smem>>, %arg7: memref<6xi32, #tpu.memory_space<smem>>) -> (i32, i32, i32) {
    %0 = arith.index_cast %arg1 : i32 to index
    %1 = memref.load %arg4[%0] : memref<6xi32, #tpu.memory_space<smem>>
    %c4_i32 = arith.constant 4 : i32
    %c0_i32 = arith.constant 0 : i32
    return %1, %arg0, %c4_i32 : i32, i32, i32
  }
  func.func @transform_3(%arg0: i32, %arg1: i32, %arg2: i32, %arg3: memref<6xi32, #tpu.memory_space<smem>>, %arg4: memref<6xi32, #tpu.memory_space<smem>>, %arg5: memref<6xi32, #tpu.memory_space<smem>>, %arg6: memref<6xi32, #tpu.memory_space<smem>>, %arg7: memref<6xi32, #tpu.memory_space<smem>>) -> (i32, i32, i32) {
    %0 = arith.index_cast %arg1 : i32 to index
    %1 = memref.load %arg4[%0] : memref<6xi32, #tpu.memory_space<smem>>
    %c0_i32 = arith.constant 0 : i32
    %c0_i32_0 = arith.constant 0 : i32
    %c0_i32_1 = arith.constant 0 : i32
    return %1, %c0_i32, %c0_i32_0 : i32, i32, i32
  }
  func.func @transform_4(%arg0: i32, %arg1: i32, %arg2: i32, %arg3: memref<6xi32, #tpu.memory_space<smem>>, %arg4: memref<6xi32, #tpu.memory_space<smem>>, %arg5: memref<6xi32, #tpu.memory_space<smem>>, %arg6: memref<6xi32, #tpu.memory_space<smem>>, %arg7: memref<6xi32, #tpu.memory_space<smem>>) -> (i32, i32, i32) {
    %0 = arith.index_cast %arg1 : i32 to index
    %1 = memref.load %arg4[%0] : memref<6xi32, #tpu.memory_space<smem>>
    %c0_i32 = arith.constant 0 : i32
    %c0_i32_0 = arith.constant 0 : i32
    return %1, %arg0, %c0_i32 : i32, i32, i32
  }
}

</mosaic_0001>

<bundles_post_ra>
// kernel: hetero_gnn_forward.9
= control target key start
LH: loop header
LB: loop body
LE: loop exit
PB: predicated region body
PF: predicated region fallthrough
CT: control target
= control target key end

     0   :  { %s4161_s0 = inlined_call_operand.vmem [shape: s32[6], index: 0, kind: input, shape index: {}]   ;;  %s4162_s5 = inlined_call_operand.vmem [shape: bf16[6,512,512], index: 5, kind: input, shape index: {}]   ;;  %s4163_s6 = inlined_call_operand.vmem [shape: bf16[2,512,640], index: 6, kind: input, shape index: {}, may-alias: {6,7}]   ;;  %s4164_s7 = inlined_call_operand.vmem [shape: bf16[2,512,640], index: 7, kind: input, shape index: {}, may-alias: {6,7}]   ;;  %s4165_s8 = inlined_call_operand.vmem [shape: f32[2,1,128], index: 8, kind: input, shape index: {}]   ;;  %s4166_s9 = inlined_call_operand.hbm [shape: bf16[2,512,128], index: 9, kind: output, shape index: {}]   ;;  %s4167_s1 = inlined_call_operand.vmem [shape: s32[6], index: 1, kind: input, shape index: {}]   ;;  %s4168_s2 = inlined_call_operand.vmem [shape: s32[6], index: 2, kind: input, shape index: {}]   ;;  %s4169_s3 = inlined_call_operand.vmem [shape: s32[6], index: 3, kind: input, shape index: {}]   ;;  %s4170_s4 = inlined_call_operand.vmem [shape: s32[6], index: 4, kind: input, shape index: {}]  }
   0x1   :  { %4180 = sst [smem:[#allocation25_spill]] %s4162_s5  ;;  %s14_s11 = sshll.u32 %s4161_s0, 4  ;;  %s15_s11 = int_to_ptr.vmem [resolvable:$true] %s14_s11 }
   0x2   :  { %4181 = sst [smem:[#allocation26_spill]] %s4163_s6  ;;  %s18_s14 = sshll.u32 %s4167_s1, 4  ;;  %s19_s14 = int_to_ptr.vmem [resolvable:$true] %s18_s14 }
   0x3   :  { %4182 = sst [smem:[#allocation27_spill]] %s4164_s7  ;;  %s3286_s15 = scalar_lea.vmem %s15_s11, 16 }
   0x4   :  { %4183 = sst [smem:[#allocation28_spill]] %s4165_s8  ;;  %p3287_p0 = scmp.ne.s32.totalorder %s15_s11, %s3286_s15 }
   0x5   :  { %4184 = sst [smem:[#allocation29_spill]] %s4166_s9  ;;  %p3291_p1 = scmp.lt.s32.totalorder %s15_s11, %s15_s11 }
   0x6   :  { %p3292_p2 = scmp.lt.s32.totalorder %s3286_s15, %s3286_s15 }
   0x8   :  { %p3293_p3 = por %p3292_p2, %p3291_p1 }
   0xa   :  { %p3294_p4 = pnand %p3293_p3, %p3287_p0 }
   0xc   :  { %3297 = shalt.err (!%p3294_p4)  }
   0xd   :  { %s3474_s16 = smov [#allocation4]   ;;  %s3298_s17 = scalar_lea.vmem %s19_s14, 16 }
   0xe   :  { %17 = dma.vmem_to_smem %s15_s11, 16, %s3474_s16, [#allocation3] }
   0xf   :  { %p3299_p5 = scmp.ne.s32.totalorder %s19_s14, %s3298_s17  ;;  %p3303_p6 = scmp.lt.s32.totalorder %s19_s14, %s19_s14 }
  0x10   :  { %p3304_p7 = scmp.lt.s32.totalorder %s3298_s17, %s3298_s17 }
  0x12   :  { %p3305_p8 = por %p3304_p7, %p3303_p6 }
  0x14   :  { %p3306_p9 = pnand %p3305_p8, %p3299_p5 }
  0x16   :  { %3309 = shalt.err (!%p3306_p9)  }
  0x17   :  { %s3475_s0 = smov [#allocation5]   ;;  %s22_s19 = sshll.u32 %s4168_s2, 4  ;;  %s23_s19 = int_to_ptr.vmem [resolvable:$true] %s22_s19 }
  0x18   :  { %21 = dma.vmem_to_smem %s19_s14, 16, %s3475_s0, [#allocation3] }
  0x19   :  { %s26_s22 = sshll.u32 %s4169_s3, 4  ;;  %s3310_s23 = scalar_lea.vmem %s23_s19, 16  ;;  %s27_s22 = int_to_ptr.vmem [resolvable:$true] %s26_s22 }
  0x1a   :  { %p3311_p10 = scmp.ne.s32.totalorder %s23_s19, %s3310_s23  ;;  %p3315_p11 = scmp.lt.s32.totalorder %s23_s19, %s23_s19 }
  0x1b   :  { %p3316_p12 = scmp.lt.s32.totalorder %s3310_s23, %s3310_s23 }
  0x1d   :  { %p3317_p13 = por %p3316_p12, %p3315_p11 }
  0x1f   :  { %p3318_p0 = pnand %p3317_p13, %p3311_p10 }
  0x21   :  { %3321 = shalt.err (!%p3318_p0)  }
  0x22   :  { %s3476_s24 = smov [#allocation6]   ;;  %s3322_s25 = scalar_lea.vmem %s27_s22, 16 }
  0x23   :  { %25 = dma.vmem_to_smem %s23_s19, 16, %s3476_s24, [#allocation3] }
  0x24   :  { %p3323_p1 = scmp.ne.s32.totalorder %s27_s22, %s3322_s25  ;;  %p3327_p2 = scmp.lt.s32.totalorder %s27_s22, %s27_s22 }
  0x25   :  { %p3328_p3 = scmp.lt.s32.totalorder %s3322_s25, %s3322_s25 }
  0x27   :  { %p3329_p4 = por %p3328_p3, %p3327_p2 }
  0x29   :  { %p3330_p5 = pnand %p3329_p4, %p3323_p1 }
  0x2b   :  { %3333 = shalt.err (!%p3330_p5)  }
  0x2c   :  { %s3477_s2 = smov [#allocation7]   ;;  %s30_s27 = sshll.u32 %s4170_s4, 4  ;;  %s31_s27 = int_to_ptr.vmem [resolvable:$true] %s30_s27 }
  0x2d   :  { %29 = dma.vmem_to_smem %s27_s22, 16, %s3477_s2, [#allocation3] }
  0x2e   :  { %s3334_s28 = scalar_lea.vmem %s31_s27, 16  ;;  %p3339_p7 = scmp.lt.s32.totalorder %s31_s27, %s31_s27 }
  0x2f   :  { %p3335_p6 = scmp.ne.s32.totalorder %s31_s27, %s3334_s28  ;;  %p3340_p8 = scmp.lt.s32.totalorder %s3334_s28, %s3334_s28 }
  0x31   :  { %p3341_p9 = por %p3340_p8, %p3339_p7 }
  0x33   :  { %p3342_p10 = pnand %p3341_p9, %p3335_p6 }
  0x35   :  { %3345 = shalt.err (!%p3342_p10)  }
  0x36   :  { %s3478_s29 = smov [#allocation8]  }
  0x37   :  { %33 = dma.vmem_to_smem %s31_s27, 16, %s3478_s29, [#allocation3] }
  0x38   :  { %3420 = dma.done.wait [#allocation3], 80 }
  0x39   :  { %3421 = vsyncadd [#allocation3], 4294967216 }
  0x3a   :  { %35 = sfence }
  0x3b   :  { %36 = vsyncpa [#allocation12], 0 }
  0x3c   :  { %38 = vsyncpa [#allocation12 + $0x1], 0  ;;  %s3547_s30 = smov 0   ;;  %s3549_s10 = smov 0  }
  0x3d   :  { %s3551_s4 = smov 0   ;;  %s3553_s11 = smov 0  }
  0x3e   :  { %s3555_s12 = smov 0   ;;  %s3557_s13 = smov 0  }
  0x3f   :  { %s3559_s14 = smov 0   ;;  %s3561_s15 = smov 0  }
  0x40   :  { %s3563_s16 = smov 0   ;;  %s3565_s17 = smov 0  }
  0x41   :  { %s3567_s0 = smov 0   ;;  %s3569_s1 = smov 0  }
  0x42 LB: > { %4185 = sst [smem:[#allocation16_spill]] %s3448_s13  ;;  %s59_s20 = sadd.s32 1, %s3464_s17  ;;  %s3472_s1 = sphi %s3569_s1, %s44_s1   ;;  %s3468_s0 = sphi %s3567_s0, %s4216_s0   ;;  %s3464_s17 = sphi %s3565_s17, %s4215_s17   ;;  %s3460_s16 = sphi %s3563_s16, %s4222_s16   ;;  %s3456_s15 = sphi %s3561_s15, %s4213_s15   ;;  %s3452_s14 = sphi %s3559_s14, %s4212_s14   ;;  %s3448_s13 = sphi %s3557_s13, %s4211_s13   ;;  %s3444_s12 = sphi %s3555_s12, %s4221_s12   ;;  %s3440_s11 = sphi %s3553_s11, %s4220_s11   ;;  %s3436_s4 = sphi %s3551_s4, %s4219_s4   ;;  %s3432_s10 = sphi %s3549_s10, %s4218_s10   ;;  %s3428_s30 = sphi %s3547_s30, %s4217_s30  }
  0x43   : > { %4186 = sst [smem:[#allocation17_spill]] %s3452_s14  ;;  %s63_s21 = sadd.s32 1, %s3468_s0 }
  0x44   : > { %4187 = sst [smem:[#allocation18_spill]] %s3456_s15  ;;  %p61_p11 = scmp.ge.s32.totalorder %s59_s20, 6 }
  0x45   : > { %4188 = sst [smem:[#allocation19_spill]] %s3460_s16  ;;  %s108_s24 = sadd.s32 1, %s3452_s14 }
  0x46   : > { %4189 = sst [smem:[#allocation20_spill]] %s3464_s17  ;;  %s4224_s20 = smov (%p61_p11, %s59_s20), 0 }
  0x47   : > { %4190 = sst [smem:[#allocation21_spill]] %s3468_s0  ;;  %s4226_s21 = smov (!%p61_p11, %s63_s21), %s3468_s0 }
  0x48   : > { %s97_s22 = sld [smem:[#allocation4 + %s3464_s17]]  ;;  %p115_p12 = scmp.ne.s32.totalorder %s3452_s14, %s3448_s13 }
  0x49   : > { %s98_s23 = sld [smem:[#allocation6 + %s3464_s17]]  ;;  %p65_p13 = scmp.ge.s32.totalorder %s4226_s21, 2 }
  0x4a   : > { %4191 = sst [smem:[#allocation22_spill]] %s4224_s20  ;;  %p116_p0 = scmp.eq.s32.totalorder %s3472_s1, 0 }
  0x4b   : > { %s99_s25 = sld [smem:[#allocation4 + %s4224_s20]]  ;;  %s4228_s21 = smov (%p65_p13, %s4226_s21), 0 }
  0x4c   : > { %s100_s2 = sld [smem:[#allocation6 + %s4224_s20]]  ;;  %p3625_p1 = por %p116_p0, %p115_p12 }
  0x4d   : > { %s131_s3 = sld [smem:[#allocation5 + %s3464_s17]]  ;;  %s134_s28 = ssub.s32 %s3468_s0, %s4228_s21 }
  0x4e   : > { %4192 = sst [smem:[#allocation23_spill]] %s4228_s21  ;;  %s138_s29 = sadd.s32 1, %s3444_s12 }
  0x4f   : > { %s132_s27 = sld [smem:[#allocation5 + %s4224_s20]]  ;;  %p145_p2 = scmp.ne.s32.totalorder %s3444_s12, %s3440_s11 }
  0x50   : > { %s189_s9 = sld [smem:[#allocation5 + %s3464_s17]]  ;;  %s196_s21 = sadd.s32 1, %s3436_s4 }
  0x51   : > { %s101_s19 = ssub.s32 %s97_s22, %s99_s25  ;;  %p3636_p3 = por %p145_p2, %p116_p0 }
  0x52   : > { %s104_s18 = ssub.s32 %s98_s23, %s100_s2  ;;  %s190_s15 = sld [smem:[#allocation5 + %s4224_s20]] }
  0x53   : > { %s105_s8 = sor.u32 %s104_s18, %s101_s19  ;;  %p206_p5 = scmp.ne.s32.totalorder %s3436_s4, %s3432_s10 }
  0x54   : > { %p106_p4 = scmp.eq.s32.totalorder %s105_s8, 0  ;;  %s4196_s22 = sadd.s32 4294967295, %s3472_s1  }
  0x55   : > { %s133_s16 = ssub.s32 %s131_s3, %s132_s27  ;;  %p207_p7 = scmp.eq.s32.totalorder %s4196_s22, 11 }
  0x56   : > { %s3643_s13 = scalar_select %p106_p4, %s3452_s14, %s108_s24  }
  0x57   : > { %s135_s7 = sor.u32 %s134_s28, %s133_s16  ;;  %p212_p8 = scmp.ne.s32.totalorder %s3432_s10, %s3428_s30 }
  0x58   : > { %4195 = sst [smem:[#allocation24_spill]] %s3643_s13  ;;  %p136_p6 = scmp.eq.s32.totalorder %s135_s7, 0 }
  0x59   : > { %s4197_s23 = sadd.s32 4294967294, %s3472_s1   ;;  %s191_s19 = ssub.s32 %s189_s9, %s190_s15 }
  0x5a   : > { %p213_p9 = scmp.eq.s32.totalorder %s4197_s23, 11  ;;  %p3656_p10 = por %p207_p7, %p206_p5 }
  0x5b   : > { %s3654_s18 = scalar_select %p136_p6, %s3444_s12, %s138_s29  }
  0x5c   : > { %s193_s8 = sor.u32 %s191_s19, %s134_s28  ;;  %p3660_p11 = por %p213_p9, %p212_p8 }
  0x5d   : > { %p194_p12 = scmp.eq.s32.totalorder %s193_s8, 0  ;;  %p2431_p13 = scmp.ge.s32.totalorder %s3472_s1, 12 }
  0x5f   : > { %s3665_s16 = scalar_select %p194_p12, %s3436_s4, %s196_s21  }
  0x60   : > { %229 = sbr.rel (%p2431_p13) target bundleno = 188 (0xbc), region = 16 }
  0x65   : > { %251 = sbr.rel (!%p3625_p1) target bundleno = 155 (0x9b), region = 24  ;;  %s256_s7 = sld [smem:[#allocation4 + %s3464_s17]] (%p3625_p1) }
  0x66   : > { %s257_s9 = sld [smem:[#allocation6 + %s3464_s17]] (%p3625_p1)  ;;  %s253_s15 = sand.u32 (%p3625_p1), 1, %s3452_s14  }
  0x67   : > { %s2432_s24 = sshll.u32 (%p3625_p1), %s253_s15, 8  ;;  %s4200_s6 = sld [smem:[#allocation26_spill]] (%p3625_p1) }
  0x68   : > { %s3681_s26 = scalar_lea.vmem (%p3625_p1), [#allocation9], %s2432_s24 }
  0x6b   : > { %s3045_s3 = smul.u32 320, %s256_s7 }
  0x6d   : > { %s262_s27 = sadd.s32 %s3045_s3, %s257_s9 }
  0x6e   : > { %s2433_s28 = sshll.u32 %s262_s27, 2 }
  0x6f   : > { %s3676_s21 = scalar_lea.vmem %s4200_s6, %s2433_s28 }
  0x70   : > { %v281_v0 = vld [vmem:[%s3676_s21] sm:$0xf]  ;;  %v283_v1 = vld [vmem:[%s3676_s21 + $0x14] sm:$0xf]  ;;  %v285_v2 = vld [vmem:[%s3676_s21 + $0x28] sm:$0xf] }
  0x71   : > { %282 = vst [vmem:[%s3681_s26] sm:$0xf] %v281_v0  ;;  %284 = vst [vmem:[%s3681_s26 + $0x4] sm:$0xf] %v283_v1  ;;  %v287_v3 = vld [vmem:[%s3676_s21 + $0x3c] sm:$0xf] }
  0x72   : > { %286 = vst [vmem:[%s3681_s26 + $0x8] sm:$0xf] %v285_v2  ;;  %v289_v4 = vld [vmem:[%s3676_s21 + $0x50] sm:$0xf]  ;;  %v291_v5 = vld [vmem:[%s3676_s21 + $0x64] sm:$0xf] }
  0x73   : > { %288 = vst [vmem:[%s3681_s26 + $0xc] sm:$0xf] %v287_v3  ;;  %290 = vst [vmem:[%s3681_s26 + $0x10] sm:$0xf] %v289_v4  ;;  %v293_v6 = vld [vmem:[%s3676_s21 + $0x78] sm:$0xf] }
  0x74   : > { %292 = vst [vmem:[%s3681_s26 + $0x14] sm:$0xf] %v291_v5  ;;  %v295_v7 = vld [vmem:[%s3676_s21 + $0x8c] sm:$0xf]  ;;  %v297_v8 = vld [vmem:[%s3676_s21 + $0xa0] sm:$0xf] }
  0x75   : > { %294 = vst [vmem:[%s3681_s26 + $0x18] sm:$0xf] %v293_v6  ;;  %296 = vst [vmem:[%s3681_s26 + $0x1c] sm:$0xf] %v295_v7  ;;  %v299_v9 = vld [vmem:[%s3676_s21 + $0xb4] sm:$0xf] }
  0x76   : > { %298 = vst [vmem:[%s3681_s26 + $0x20] sm:$0xf] %v297_v8  ;;  %v301_v10 = vld [vmem:[%s3676_s21 + $0xc8] sm:$0xf]  ;;  %v303_v11 = vld [vmem:[%s3676_s21 + $0xdc] sm:$0xf] }
  0x77   : > { %300 = vst [vmem:[%s3681_s26 + $0x24] sm:$0xf] %v299_v9  ;;  %302 = vst [vmem:[%s3681_s26 + $0x28] sm:$0xf] %v301_v10  ;;  %v305_v12 = vld [vmem:[%s3676_s21 + $0xf0] sm:$0xf] }
  0x78   : > { %304 = vst [vmem:[%s3681_s26 + $0x2c] sm:$0xf] %v303_v11  ;;  %v307_v13 = vld [vmem:[%s3676_s21 + $0x104] sm:$0xf]  ;;  %v309_v14 = vld [vmem:[%s3676_s21 + $0x118] sm:$0xf] }
  0x79   : > { %306 = vst [vmem:[%s3681_s26 + $0x30] sm:$0xf] %v305_v12  ;;  %308 = vst [vmem:[%s3681_s26 + $0x34] sm:$0xf] %v307_v13  ;;  %v311_v15 = vld [vmem:[%s3676_s21 + $0x12c] sm:$0xf] }
  0x7a   : > { %310 = vst [vmem:[%s3681_s26 + $0x38] sm:$0xf] %v309_v14  ;;  %v313_v16 = vld [vmem:[%s3676_s21 + $0x140] sm:$0xf]  ;;  %v315_v17 = vld [vmem:[%s3676_s21 + $0x154] sm:$0xf] }
  0x7b   : > { %312 = vst [vmem:[%s3681_s26 + $0x3c] sm:$0xf] %v311_v15  ;;  %314 = vst [vmem:[%s3681_s26 + $0x40] sm:$0xf] %v313_v16  ;;  %v317_v18 = vld [vmem:[%s3676_s21 + $0x168] sm:$0xf] }
  0x7c   : > { %316 = vst [vmem:[%s3681_s26 + $0x44] sm:$0xf] %v315_v17  ;;  %v319_v19 = vld [vmem:[%s3676_s21 + $0x17c] sm:$0xf]  ;;  %v321_v20 = vld [vmem:[%s3676_s21 + $0x190] sm:$0xf] }
  0x7d   : > { %318 = vst [vmem:[%s3681_s26 + $0x48] sm:$0xf] %v317_v18  ;;  %320 = vst [vmem:[%s3681_s26 + $0x4c] sm:$0xf] %v319_v19  ;;  %v323_v21 = vld [vmem:[%s3676_s21 + $0x1a4] sm:$0xf] }
  0x7e   : > { %322 = vst [vmem:[%s3681_s26 + $0x50] sm:$0xf] %v321_v20  ;;  %v325_v22 = vld [vmem:[%s3676_s21 + $0x1b8] sm:$0xf]  ;;  %v327_v23 = vld [vmem:[%s3676_s21 + $0x1cc] sm:$0xf] }
  0x7f   : > { %324 = vst [vmem:[%s3681_s26 + $0x54] sm:$0xf] %v323_v21  ;;  %326 = vst [vmem:[%s3681_s26 + $0x58] sm:$0xf] %v325_v22  ;;  %v329_v24 = vld [vmem:[%s3676_s21 + $0x1e0] sm:$0xf] }
  0x80   : > { %328 = vst [vmem:[%s3681_s26 + $0x5c] sm:$0xf] %v327_v23  ;;  %v331_v25 = vld [vmem:[%s3676_s21 + $0x1f4] sm:$0xf]  ;;  %v333_v26 = vld [vmem:[%s3676_s21 + $0x208] sm:$0xf] }
  0x81   : > { %330 = vst [vmem:[%s3681_s26 + $0x60] sm:$0xf] %v329_v24  ;;  %332 = vst [vmem:[%s3681_s26 + $0x64] sm:$0xf] %v331_v25  ;;  %v335_v27 = vld [vmem:[%s3676_s21 + $0x21c] sm:$0xf] }
  0x82   : > { %334 = vst [vmem:[%s3681_s26 + $0x68] sm:$0xf] %v333_v26  ;;  %v337_v28 = vld [vmem:[%s3676_s21 + $0x230] sm:$0xf]  ;;  %v339_v29 = vld [vmem:[%s3676_s21 + $0x244] sm:$0xf] }
  0x83   : > { %336 = vst [vmem:[%s3681_s26 + $0x6c] sm:$0xf] %v335_v27  ;;  %338 = vst [vmem:[%s3681_s26 + $0x70] sm:$0xf] %v337_v28  ;;  %v341_v30 = vld [vmem:[%s3676_s21 + $0x258] sm:$0xf] }
  0x84   : > { %340 = vst [vmem:[%s3681_s26 + $0x74] sm:$0xf] %v339_v29  ;;  %v343_v31 = vld [vmem:[%s3676_s21 + $0x26c] sm:$0xf]  ;;  %v345_v32 = vld [vmem:[%s3676_s21 + $0x280] sm:$0xf] }
  0x85   : > { %342 = vst [vmem:[%s3681_s26 + $0x78] sm:$0xf] %v341_v30  ;;  %344 = vst [vmem:[%s3681_s26 + $0x7c] sm:$0xf] %v343_v31  ;;  %v347_v33 = vld [vmem:[%s3676_s21 + $0x294] sm:$0xf] }
  0x86   : > { %346 = vst [vmem:[%s3681_s26 + $0x80] sm:$0xf] %v345_v32  ;;  %v349_v34 = vld [vmem:[%s3676_s21 + $0x2a8] sm:$0xf]  ;;  %v351_v35 = vld [vmem:[%s3676_s21 + $0x2bc] sm:$0xf] }
  0x87   : > { %348 = vst [vmem:[%s3681_s26 + $0x84] sm:$0xf] %v347_v33  ;;  %350 = vst [vmem:[%s3681_s26 + $0x88] sm:$0xf] %v349_v34  ;;  %v353_v36 = vld [vmem:[%s3676_s21 + $0x2d0] sm:$0xf] }
  0x88   : > { %352 = vst [vmem:[%s3681_s26 + $0x8c] sm:$0xf] %v351_v35  ;;  %v355_v37 = vld [vmem:[%s3676_s21 + $0x2e4] sm:$0xf]  ;;  %v357_v38 = vld [vmem:[%s3676_s21 + $0x2f8] sm:$0xf] }
  0x89   : > { %354 = vst [vmem:[%s3681_s26 + $0x90] sm:$0xf] %v353_v36  ;;  %356 = vst [vmem:[%s3681_s26 + $0x94] sm:$0xf] %v355_v37  ;;  %v359_v39 = vld [vmem:[%s3676_s21 + $0x30c] sm:$0xf] }
  0x8a   : > { %358 = vst [vmem:[%s3681_s26 + $0x98] sm:$0xf] %v357_v38  ;;  %v361_v40 = vld [vmem:[%s3676_s21 + $0x320] sm:$0xf]  ;;  %v363_v41 = vld [vmem:[%s3676_s21 + $0x334] sm:$0xf] }
  0x8b   : > { %360 = vst [vmem:[%s3681_s26 + $0x9c] sm:$0xf] %v359_v39  ;;  %362 = vst [vmem:[%s3681_s26 + $0xa0] sm:$0xf] %v361_v40  ;;  %v365_v42 = vld [vmem:[%s3676_s21 + $0x348] sm:$0xf] }
  0x8c   : > { %364 = vst [vmem:[%s3681_s26 + $0xa4] sm:$0xf] %v363_v41  ;;  %v367_v43 = vld [vmem:[%s3676_s21 + $0x35c] sm:$0xf]  ;;  %v369_v44 = vld [vmem:[%s3676_s21 + $0x370] sm:$0xf] }
  0x8d   : > { %366 = vst [vmem:[%s3681_s26 + $0xa8] sm:$0xf] %v365_v42  ;;  %368 = vst [vmem:[%s3681_s26 + $0xac] sm:$0xf] %v367_v43  ;;  %v371_v45 = vld [vmem:[%s3676_s21 + $0x384] sm:$0xf] }
  0x8e   : > { %370 = vst [vmem:[%s3681_s26 + $0xb0] sm:$0xf] %v369_v44  ;;  %v373_v46 = vld [vmem:[%s3676_s21 + $0x398] sm:$0xf]  ;;  %v375_v47 = vld [vmem:[%s3676_s21 + $0x3ac] sm:$0xf] }
  0x8f   : > { %372 = vst [vmem:[%s3681_s26 + $0xb4] sm:$0xf] %v371_v45  ;;  %374 = vst [vmem:[%s3681_s26 + $0xb8] sm:$0xf] %v373_v46  ;;  %v377_v48 = vld [vmem:[%s3676_s21 + $0x3c0] sm:$0xf] }
  0x90   : > { %376 = vst [vmem:[%s3681_s26 + $0xbc] sm:$0xf] %v375_v47  ;;  %v379_v49 = vld [vmem:[%s3676_s21 + $0x3d4] sm:$0xf]  ;;  %v381_v50 = vld [vmem:[%s3676_s21 + $0x3e8] sm:$0xf] }
  0x91   : > { %378 = vst [vmem:[%s3681_s26 + $0xc0] sm:$0xf] %v377_v48  ;;  %380 = vst [vmem:[%s3681_s26 + $0xc4] sm:$0xf] %v379_v49  ;;  %v383_v51 = vld [vmem:[%s3676_s21 + $0x3fc] sm:$0xf] }
  0x92   : > { %382 = vst [vmem:[%s3681_s26 + $0xc8] sm:$0xf] %v381_v50  ;;  %v385_v52 = vld [vmem:[%s3676_s21 + $0x410] sm:$0xf]  ;;  %v387_v53 = vld [vmem:[%s3676_s21 + $0x424] sm:$0xf] }
  0x93   : > { %384 = vst [vmem:[%s3681_s26 + $0xcc] sm:$0xf] %v383_v51  ;;  %386 = vst [vmem:[%s3681_s26 + $0xd0] sm:$0xf] %v385_v52  ;;  %v389_v54 = vld [vmem:[%s3676_s21 + $0x438] sm:$0xf] }
  0x94   : > { %388 = vst [vmem:[%s3681_s26 + $0xd4] sm:$0xf] %v387_v53  ;;  %v391_v55 = vld [vmem:[%s3676_s21 + $0x44c] sm:$0xf]  ;;  %v393_v56 = vld [vmem:[%s3676_s21 + $0x460] sm:$0xf] }
  0x95   : > { %390 = vst [vmem:[%s3681_s26 + $0xd8] sm:$0xf] %v389_v54  ;;  %392 = vst [vmem:[%s3681_s26 + $0xdc] sm:$0xf] %v391_v55  ;;  %v395_v57 = vld [vmem:[%s3676_s21 + $0x474] sm:$0xf] }
  0x96   : > { %394 = vst [vmem:[%s3681_s26 + $0xe0] sm:$0xf] %v393_v56  ;;  %v397_v58 = vld [vmem:[%s3676_s21 + $0x488] sm:$0xf]  ;;  %v399_v59 = vld [vmem:[%s3676_s21 + $0x49c] sm:$0xf] }
  0x97   : > { %396 = vst [vmem:[%s3681_s26 + $0xe4] sm:$0xf] %v395_v57  ;;  %398 = vst [vmem:[%s3681_s26 + $0xe8] sm:$0xf] %v397_v58  ;;  %v401_v60 = vld [vmem:[%s3676_s21 + $0x4b0] sm:$0xf] }
  0x98   : > { %400 = vst [vmem:[%s3681_s26 + $0xec] sm:$0xf] %v399_v59  ;;  %v403_v61 = vld [vmem:[%s3676_s21 + $0x4c4] sm:$0xf]  ;;  %v405_v62 = vld [vmem:[%s3676_s21 + $0x4d8] sm:$0xf] }
  0x99   : > { %402 = vst [vmem:[%s3681_s26 + $0xf0] sm:$0xf] %v401_v60  ;;  %404 = vst [vmem:[%s3681_s26 + $0xf4] sm:$0xf] %v403_v61  ;;  %v407_v63 = vld [vmem:[%s3676_s21 + $0x4ec] sm:$0xf] }
  0x9a   : > { %406 = vst [vmem:[%s3681_s26 + $0xf8] sm:$0xf] %v405_v62  ;;  %408 = vst [vmem:[%s3681_s26 + $0xfc] sm:$0xf] %v407_v63 }
  0x9b PF: > { %560 = sbr.rel (!%p3636_p3) target bundleno = 188 (0xbc), region = 65  ;;  %s565_s23 = sld [smem:[#allocation5 + %s3464_s17]] (%p3636_p3) }
  0x9c   : > { %s562_s19 = sand.u32 (%p3636_p3), 1, %s3444_s12   ;;  %s2324_s8 = smul.u32 (%p3636_p3), 160, %s3468_s0 }
  0x9d   : > { %s2434_s7 = sshll.u32 (%p3636_p3), %s562_s19, 7  ;;  %s4201_s28 = sld [smem:[#allocation27_spill]] (%p3636_p3) }
  0x9e   : > { %s3821_s5 = scalar_lea.vmem (%p3636_p3), [#allocation10], %s2434_s7 }
  0xa1   : > { %s2325_s9 = smul.u32 320, %s565_s23 }
  0xa3   : > { %s2326_s15 = sadd.s32 %s2325_s9, %s2324_s8 }
  0xa4   : > { %s2435_s24 = sshll.u32 %s2326_s15, 2 }
  0xa5   : > { %s3816_s29 = scalar_lea.vmem %s4201_s28, %s2435_s24 }
  0xa6   : > { %v2436_v0 = vld [vmem:[%s3816_s29 + $0x10] sm:$0xf]  ;;  %v2437_v1 = vld [vmem:[%s3816_s29 + $0x24] sm:$0xf]  ;;  %v2438_v2 = vld [vmem:[%s3816_s29 + $0x38] sm:$0xf] }
  0xa7   : > { %590 = vst [vmem:[%s3821_s5] sm:$0xf] %v2436_v0  ;;  %592 = vst [vmem:[%s3821_s5 + $0x4] sm:$0xf] %v2437_v1  ;;  %v2439_v3 = vld [vmem:[%s3816_s29 + $0x4c] sm:$0xf] }
  0xa8   : > { %594 = vst [vmem:[%s3821_s5 + $0x8] sm:$0xf] %v2438_v2  ;;  %v2440_v4 = vld [vmem:[%s3816_s29 + $0x60] sm:$0xf]  ;;  %v2441_v5 = vld [vmem:[%s3816_s29 + $0x74] sm:$0xf] }
  0xa9   : > { %596 = vst [vmem:[%s3821_s5 + $0xc] sm:$0xf] %v2439_v3  ;;  %598 = vst [vmem:[%s3821_s5 + $0x10] sm:$0xf] %v2440_v4  ;;  %v2442_v6 = vld [vmem:[%s3816_s29 + $0x88] sm:$0xf] }
  0xaa   : > { %600 = vst [vmem:[%s3821_s5 + $0x14] sm:$0xf] %v2441_v5  ;;  %v2443_v7 = vld [vmem:[%s3816_s29 + $0x9c] sm:$0xf]  ;;  %v2444_v8 = vld [vmem:[%s3816_s29 + $0xb0] sm:$0xf] }
  0xab   : > { %602 = vst [vmem:[%s3821_s5 + $0x18] sm:$0xf] %v2442_v6  ;;  %604 = vst [vmem:[%s3821_s5 + $0x1c] sm:$0xf] %v2443_v7  ;;  %v2445_v9 = vld [vmem:[%s3816_s29 + $0xc4] sm:$0xf] }
  0xac   : > { %606 = vst [vmem:[%s3821_s5 + $0x20] sm:$0xf] %v2444_v8  ;;  %v2446_v10 = vld [vmem:[%s3816_s29 + $0xd8] sm:$0xf]  ;;  %v2447_v11 = vld [vmem:[%s3816_s29 + $0xec] sm:$0xf] }
  0xad   : > { %608 = vst [vmem:[%s3821_s5 + $0x24] sm:$0xf] %v2445_v9  ;;  %610 = vst [vmem:[%s3821_s5 + $0x28] sm:$0xf] %v2446_v10  ;;  %v2448_v12 = vld [vmem:[%s3816_s29 + $0x100] sm:$0xf] }
  0xae   : > { %612 = vst [vmem:[%s3821_s5 + $0x2c] sm:$0xf] %v2447_v11  ;;  %v2449_v13 = vld [vmem:[%s3816_s29 + $0x114] sm:$0xf]  ;;  %v2450_v14 = vld [vmem:[%s3816_s29 + $0x128] sm:$0xf] }
  0xaf   : > { %614 = vst [vmem:[%s3821_s5 + $0x30] sm:$0xf] %v2448_v12  ;;  %616 = vst [vmem:[%s3821_s5 + $0x34] sm:$0xf] %v2449_v13  ;;  %v2451_v15 = vld [vmem:[%s3816_s29 + $0x13c] sm:$0xf] }
  0xb0   : > { %618 = vst [vmem:[%s3821_s5 + $0x38] sm:$0xf] %v2450_v14  ;;  %v2452_v16 = vld [vmem:[%s3816_s29 + $0x150] sm:$0xf]  ;;  %v2453_v17 = vld [vmem:[%s3816_s29 + $0x164] sm:$0xf] }
  0xb1   : > { %620 = vst [vmem:[%s3821_s5 + $0x3c] sm:$0xf] %v2451_v15  ;;  %622 = vst [vmem:[%s3821_s5 + $0x40] sm:$0xf] %v2452_v16  ;;  %v2454_v18 = vld [vmem:[%s3816_s29 + $0x178] sm:$0xf] }
  0xb2   : > { %624 = vst [vmem:[%s3821_s5 + $0x44] sm:$0xf] %v2453_v17  ;;  %v2455_v19 = vld [vmem:[%s3816_s29 + $0x18c] sm:$0xf]  ;;  %v2456_v20 = vld [vmem:[%s3816_s29 + $0x1a0] sm:$0xf] }
  0xb3   : > { %626 = vst [vmem:[%s3821_s5 + $0x48] sm:$0xf] %v2454_v18  ;;  %628 = vst [vmem:[%s3821_s5 + $0x4c] sm:$0xf] %v2455_v19  ;;  %v2457_v21 = vld [vmem:[%s3816_s29 + $0x1b4] sm:$0xf] }
  0xb4   : > { %630 = vst [vmem:[%s3821_s5 + $0x50] sm:$0xf] %v2456_v20  ;;  %v2458_v22 = vld [vmem:[%s3816_s29 + $0x1c8] sm:$0xf]  ;;  %v2459_v23 = vld [vmem:[%s3816_s29 + $0x1dc] sm:$0xf] }
  0xb5   : > { %632 = vst [vmem:[%s3821_s5 + $0x54] sm:$0xf] %v2457_v21  ;;  %634 = vst [vmem:[%s3821_s5 + $0x58] sm:$0xf] %v2458_v22  ;;  %v2460_v24 = vld [vmem:[%s3816_s29 + $0x1f0] sm:$0xf] }
  0xb6   : > { %636 = vst [vmem:[%s3821_s5 + $0x5c] sm:$0xf] %v2459_v23  ;;  %v2461_v25 = vld [vmem:[%s3816_s29 + $0x204] sm:$0xf]  ;;  %v2462_v26 = vld [vmem:[%s3816_s29 + $0x218] sm:$0xf] }
  0xb7   : > { %638 = vst [vmem:[%s3821_s5 + $0x60] sm:$0xf] %v2460_v24  ;;  %640 = vst [vmem:[%s3821_s5 + $0x64] sm:$0xf] %v2461_v25  ;;  %v2463_v27 = vld [vmem:[%s3816_s29 + $0x22c] sm:$0xf] }
  0xb8   : > { %642 = vst [vmem:[%s3821_s5 + $0x68] sm:$0xf] %v2462_v26  ;;  %v2464_v28 = vld [vmem:[%s3816_s29 + $0x240] sm:$0xf]  ;;  %v2465_v29 = vld [vmem:[%s3816_s29 + $0x254] sm:$0xf] }
  0xb9   : > { %644 = vst [vmem:[%s3821_s5 + $0x6c] sm:$0xf] %v2463_v27  ;;  %646 = vst [vmem:[%s3821_s5 + $0x70] sm:$0xf] %v2464_v28  ;;  %v2466_v30 = vld [vmem:[%s3816_s29 + $0x268] sm:$0xf] }
  0xba   : > { %648 = vst [vmem:[%s3821_s5 + $0x74] sm:$0xf] %v2465_v29  ;;  %v2467_v31 = vld [vmem:[%s3816_s29 + $0x27c] sm:$0xf]  ;;  %650 = vst [vmem:[%s3821_s5 + $0x78] sm:$0xf] %v2466_v30 }
  0xbb   : > { %652 = vst [vmem:[%s3821_s5 + $0x7c] sm:$0xf] %v2467_v31 }
  0xbc PF: > { %p2468_p0 = scmp.ge.s32.totalorder %s3472_s1, 1  ;;  %p747_p1 = scmp.lt.s32.totalorder %s3472_s1, 13 }
  0xbe   : > { %p748_p2 = pnand %p2468_p0, %p747_p1 }
  0xbf   : > { %s4202_s22 = sld [smem:[#allocation16_spill]] (!%p748_p2)  ;;  %s761_s19 = sand.u32 (!%p748_p2), 1, %s3440_s11  }
  0xc0   : > { %751 = sbr.rel (%p748_p2) target bundleno = 634 (0x27a), region = 110  ;;  %s4203_s21 = sld [smem:[#allocation19_spill]] (!%p748_p2) }
  0xc1   : > { %s4204_s26 = sld [smem:[#allocation18_spill]] (!%p748_p2)  ;;  %s2470_s7 = sshll.u32 (!%p748_p2), %s761_s19, 7 }
  0xc2   : > { %s4177_s9 = sand.u32 (!%p748_p2), 1, %s3432_s10   ;;  %s4205_s19 = sld [smem:[#allocation25_spill]] (!%p748_p2) }
  0xc3   : > { %s2471_s24 = sshll.u32 (!%p748_p2), %s4177_s9, 7  ;;  %s4206_s17 = sld [smem:[#allocation28_spill]] (!%p748_p2) }
  0xc5   : > { %s754_s23 = sand.u32 1, %s4202_s22  }
  0xc6   : > { %s2469_s8 = sshll.u32 %s754_s23, 8  ;;  %s3890_s15 = sshll.u32 %s4203_s21, 5 }
  0xc7   : > { %p810_p3 = scmp.lt.s32.totalorder %s4204_s26, 5  ;;  %p812_p4 = scmp.lt.s32.totalorder %s3890_s15, 63 }
  0xc8   : > { %s829_s29 = sld [smem:[#allocation5 + %s4204_s26]]  ;;  %s3908_s14 = scalar_lea.vmem [#allocation9], %s2469_s8 }
  0xc9   : > { %s811_s3 = scalar_select %p810_p3, %s4204_s26, 5 }
  0xca   : > { %s813_s27 = scalar_select %p812_p4, %s3890_s15, 63 }
  0xcb   : > { %s2474_s28 = sshll.u32 %s811_s3, 8  ;;  %s838_s6 = sld [smem:[#allocation7 + %s4204_s26]] }
  0xcc   : > { %s2473_s5 = sshll.u32 %s813_s27, 2  ;;  %s3910_s3 = scalar_lea.vmem [#allocation10], %s2470_s7 }
  0xcd   : > { %s819_s20 = sadd.s32 %s2474_s28, %s2473_s5  ;;  %s3912_s27 = scalar_lea.vmem [#allocation11], %s2471_s24 }
  0xce   : > { %s2475_s22 = sshll.u32 %s819_s20, 2  ;;  %p830_p5 = scmp.lt.s32.totalorder %s829_s29, 1 }
  0xcf   : > { %s3903_s0 = scalar_lea.vmem %s4205_s19, %s2475_s22 }
  0xd0   : > { %s4230_s29 = smov (!%p830_p5, %s829_s29), 1 }
  0xd1   : > { %p839_p6 = scmp.eq.s32.totalorder %s838_s6, 1  ;;  %s832_s13 = scalar_lea.vmem %s4206_s17, %s4230_s29 }
  0xd2   : > { %v2648_v32 = vld [vmem:[%s3910_s3] sm:$0xff] (%p839_p6)   ;;  %v2791_v34 = vld [vmem:[%s3910_s3 + $0x8] sm:$0xff] (%p839_p6)   ;;  %v2792_v39 = vld [vmem:[%s3910_s3 + $0x10] sm:$0xff] (%p839_p6)  }
  0xd3   : > { %843 = sbr.rel (!%p839_p6) target bundleno = 231 (0xe7), region = 122  ;;  %v3915_v33 = vld [vmem:[%s832_s13] ss:$0 sm:$0xff] (%p839_p6)  ;;  %v2649_v35 = vunpack.c.l.bf16 (%p839_p6), %v2648_v32  ;;  %v2650_v36 = vunpack.c.h.bf16 (%p839_p6), %v2648_v32  ;;  %v2653_v37 = vunpack.c.l.bf16 (%p839_p6), %v2791_v34  ;;  %v2654_v38 = vunpack.c.h.bf16 (%p839_p6), %v2791_v34  ;;  %v2793_v40 = vld [vmem:[%s3910_s3 + $0x18] sm:$0xff] (%p839_p6)   ;;  %v2795_v46 = vld [vmem:[%s3910_s3 + $0x28] sm:$0xff] (%p839_p6)  }
  0xd4   : > { %v2657_v41 = vunpack.c.l.bf16 (%p839_p6), %v2792_v39  ;;  %v2658_v42 = vunpack.c.h.bf16 (%p839_p6), %v2792_v39  ;;  %v2661_v43 = vunpack.c.l.bf16 (%p839_p6), %v2793_v40  ;;  %v2662_v44 = vunpack.c.h.bf16 (%p839_p6), %v2793_v40  ;;  %v2794_v45 = vld [vmem:[%s3910_s3 + $0x20] sm:$0xff] (%p839_p6)   ;;  %v2796_v51 = vld [vmem:[%s3910_s3 + $0x30] sm:$0xff] (%p839_p6)   ;;  %v2797_v52 = vld [vmem:[%s3910_s3 + $0x38] sm:$0xff] (%p839_p6)  }
  0xd5   : > { %v915_v47 = vadd.f32 (%p839_p6), %v2649_v35, %v3915_v33  ;;  %v916_v48 = vadd.f32 (%p839_p6), %v2650_v36, %v3915_v33  ;;  %v917_v49 = vadd.f32 (%p839_p6), %v2653_v37, %v3915_v33  ;;  %v918_v50 = vadd.f32 (%p839_p6), %v2654_v38, %v3915_v33  ;;  %v2798_v1 = vld [vmem:[%s3910_s3 + $0x40] sm:$0xff] (%p839_p6)   ;;  %v2799_v2 = vld [vmem:[%s3910_s3 + $0x48] sm:$0xff] (%p839_p6)   ;;  %v2800_v7 = vld [vmem:[%s3910_s3 + $0x50] sm:$0xff] (%p839_p6)  }
  0xd6   : > { %v919_v53 = vadd.f32 (%p839_p6), %v2657_v41, %v3915_v33  ;;  %v920_v54 = vadd.f32 (%p839_p6), %v2658_v42, %v3915_v33  ;;  %v921_v55 = vadd.f32 (%p839_p6), %v2661_v43, %v3915_v33  ;;  %v922_v56 = vadd.f32 (%p839_p6), %v2662_v44, %v3915_v33  ;;  %v2801_v8 = vld [vmem:[%s3910_s3 + $0x58] sm:$0xff] (%p839_p6)   ;;  %v2802_v21 = vld [vmem:[%s3910_s3 + $0x60] sm:$0xff] (%p839_p6)   ;;  %v2803_v22 = vld [vmem:[%s3910_s3 + $0x68] sm:$0xff] (%p839_p6)  }
  0xd7   : > { %947 = vst [vmem:[#allocation2 + $0xb0] sm:$0xff] (%p839_p6), %v915_v47  ;;  %948 = vst [vmem:[#allocation2] sm:$0xff] (%p839_p6), %v916_v48  ;;  %v2665_v57 = vunpack.c.l.bf16 (%p839_p6), %v2794_v45  ;;  %v2666_v58 = vunpack.c.h.bf16 (%p839_p6), %v2794_v45  ;;  %v2669_v59 = vunpack.c.l.bf16 (%p839_p6), %v2795_v46  ;;  %v2670_v60 = vunpack.c.h.bf16 (%p839_p6), %v2795_v46  ;;  %v2804_v27 = vld [vmem:[%s3910_s3 + $0x70] sm:$0xff] (%p839_p6)   ;;  %v2805_v28 = vld [vmem:[%s3910_s3 + $0x78] sm:$0xff] (%p839_p6)  }
  0xd8   : > { %949 = vst [vmem:[#allocation2 + $0xd8] sm:$0xff] %v917_v49  ;;  %950 = vst [vmem:[#allocation2 + $0x18] sm:$0xff] %v918_v50  ;;  %v2673_v61 = vunpack.c.l.bf16 %v2796_v51  ;;  %v2674_v62 = vunpack.c.h.bf16 %v2796_v51  ;;  %v2677_v63 = vunpack.c.l.bf16 %v2797_v52  ;;  %v2678_v0 = vunpack.c.h.bf16 %v2797_v52 }
  0xd9   : > { %951 = vst [vmem:[#allocation2 + $0x50] sm:$0xff] %v919_v53  ;;  %952 = vst [vmem:[#allocation2 + $0x68] sm:$0xff] %v920_v54  ;;  %v923_v3 = vadd.f32 %v2665_v57, %v3915_v33  ;;  %v924_v4 = vadd.f32 %v2666_v58, %v3915_v33  ;;  %v925_v5 = vadd.f32 %v2669_v59, %v3915_v33  ;;  %v2681_v13 = vunpack.c.l.bf16 %v2798_v1 }
  0xda   : > { %953 = vst [vmem:[#allocation2 + $0x30] sm:$0xff] %v921_v55  ;;  %954 = vst [vmem:[#allocation2 + $0x48] sm:$0xff] %v922_v56  ;;  %v926_v6 = vadd.f32 %v2670_v60, %v3915_v33  ;;  %v927_v9 = vadd.f32 %v2673_v61, %v3915_v33  ;;  %v928_v10 = vadd.f32 %v2674_v62, %v3915_v33  ;;  %v2682_v14 = vunpack.c.h.bf16 %v2798_v1 }
  0xdb   : > { %v929_v11 = vadd.f32 %v2677_v63, %v3915_v33  ;;  %v930_v12 = vadd.f32 %v2678_v0, %v3915_v33  ;;  %955 = vst [vmem:[#allocation2 + $0x80] sm:$0xff] %v923_v3  ;;  %956 = vst [vmem:[#allocation2 + $0x88] sm:$0xff] %v924_v4  ;;  %v2685_v15 = vunpack.c.l.bf16 %v2799_v2  ;;  %v2686_v16 = vunpack.c.h.bf16 %v2799_v2 }
  0xdc   : > { %957 = vst [vmem:[#allocation2 + $0xe8] sm:$0xff] %v925_v5  ;;  %958 = vst [vmem:[#allocation2 + $0xb8] sm:$0xff] %v926_v6  ;;  %v2689_v17 = vunpack.c.l.bf16 %v2800_v7  ;;  %v2690_v18 = vunpack.c.h.bf16 %v2800_v7  ;;  %v2693_v19 = vunpack.c.l.bf16 %v2801_v8  ;;  %v2694_v20 = vunpack.c.h.bf16 %v2801_v8 }
  0xdd   : > { %959 = vst [vmem:[#allocation2 + $0x60] sm:$0xff] %v927_v9  ;;  %960 = vst [vmem:[#allocation2 + $0xf0] sm:$0xff] %v928_v10  ;;  %v931_v23 = vadd.f32 %v2681_v13, %v3915_v33  ;;  %v932_v24 = vadd.f32 %v2682_v14, %v3915_v33  ;;  %v933_v25 = vadd.f32 %v2685_v15, %v3915_v33  ;;  %v2697_v34 = vunpack.c.l.bf16 %v2802_v21 }
  0xde   : > { %961 = vst [vmem:[#allocation2 + $0x8] sm:$0xff] %v929_v11  ;;  %962 = vst [vmem:[#allocation2 + $0x78] sm:$0xff] %v930_v12  ;;  %v934_v26 = vadd.f32 %v2686_v16, %v3915_v33  ;;  %v935_v29 = vadd.f32 %v2689_v17, %v3915_v33  ;;  %v936_v30 = vadd.f32 %v2690_v18, %v3915_v33  ;;  %v2698_v35 = vunpack.c.h.bf16 %v2802_v21 }
  0xdf   : > { %v937_v31 = vadd.f32 %v2693_v19, %v3915_v33  ;;  %v938_v32 = vadd.f32 %v2694_v20, %v3915_v33  ;;  %963 = vst [vmem:[#allocation2 + $0x38] sm:$0xff] %v931_v23  ;;  %964 = vst [vmem:[#allocation2 + $0x58] sm:$0xff] %v932_v24  ;;  %v2701_v36 = vunpack.c.l.bf16 %v2803_v22  ;;  %v2702_v37 = vunpack.c.h.bf16 %v2803_v22 }
  0xe0   : > { %965 = vst [vmem:[#allocation2 + $0x40] sm:$0xff] %v933_v25  ;;  %966 = vst [vmem:[#allocation2 + $0xc8] sm:$0xff] %v934_v26  ;;  %v2705_v38 = vunpack.c.l.bf16 %v2804_v27  ;;  %v2706_v39 = vunpack.c.h.bf16 %v2804_v27  ;;  %v2709_v40 = vunpack.c.l.bf16 %v2805_v28  ;;  %v2710_v41 = vunpack.c.h.bf16 %v2805_v28 }
  0xe1   : > { %967 = vst [vmem:[#allocation2 + $0xe0] sm:$0xff] %v935_v29  ;;  %968 = vst [vmem:[#allocation2 + $0x90] sm:$0xff] %v936_v30  ;;  %v939_v42 = vadd.f32 %v2697_v34, %v3915_v33  ;;  %v940_v43 = vadd.f32 %v2698_v35, %v3915_v33  ;;  %v941_v44 = vadd.f32 %v2701_v36, %v3915_v33 }
  0xe2   : > { %969 = vst [vmem:[#allocation2 + $0x70] sm:$0xff] %v937_v31  ;;  %970 = vst [vmem:[#allocation2 + $0xc0] sm:$0xff] %v938_v32  ;;  %v942_v45 = vadd.f32 %v2702_v37, %v3915_v33  ;;  %v943_v46 = vadd.f32 %v2705_v38, %v3915_v33  ;;  %v944_v47 = vadd.f32 %v2706_v39, %v3915_v33 }
  0xe3   : > { %v945_v48 = vadd.f32 %v2709_v40, %v3915_v33  ;;  %v946_v49 = vadd.f32 %v2710_v41, %v3915_v33  ;;  %971 = vst [vmem:[#allocation2 + $0xa8] sm:$0xff] %v939_v42  ;;  %972 = vst [vmem:[#allocation2 + $0xd0] sm:$0xff] %v940_v43 }
  0xe4   : > { %973 = vst [vmem:[#allocation2 + $0x10] sm:$0xff] %v941_v44  ;;  %974 = vst [vmem:[#allocation2 + $0x28] sm:$0xff] %v942_v45 }
  0xe5   : > { %975 = vst [vmem:[#allocation2 + $0xa0] sm:$0xff] %v943_v46  ;;  %976 = vst [vmem:[#allocation2 + $0xf8] sm:$0xff] %v944_v47 }
  0xe6   : > { %977 = vst [vmem:[#allocation2 + $0x20] sm:$0xff] %v945_v48  ;;  %978 = vst [vmem:[#allocation2 + $0x98] sm:$0xff] %v946_v49 }
  0xe7 PF: > { %v3158_v50 = vld [vmem:[%s3908_s14 + $0x78] sm:$0xff]   ;;  %v3162_v53 = vld [vmem:[%s3908_s14 + $0x70] sm:$0xff]   ;;  %v3166_v57 = vld [vmem:[%s3908_s14 + $0x68] sm:$0xff]   ;;  %s4207_s6 = sld [smem:[#allocation18_spill]] }
  0xe8   : > { %v3159_v33 = vld [vmem:[%s3908_s14 + $0xf8] sm:$0xff]   ;;  %2821 = vmatprep.subr.bf16.mxu0 %v3158_v50  ;;  %v3163_v54 = vld [vmem:[%s3908_s14 + $0xf0] sm:$0xff]   ;;  %v3167_v58 = vld [vmem:[%s3908_s14 + $0xe8] sm:$0xff]  }
  0xe9   : > { %v3160_v51 = vld [vmem:[%s3908_s14 + $0x38] sm:$0xff]   ;;  %2933 = vmatprep.subr.bf16.mxu1 %v3159_v33  ;;  %v3164_v55 = vld [vmem:[%s3908_s14 + $0x30] sm:$0xff]   ;;  %v3168_v59 = vld [vmem:[%s3908_s14 + $0x28] sm:$0xff]  }
  0xea   : > { %v3161_v52 = vld [vmem:[%s3908_s14 + $0xb8] sm:$0xff]   ;;  %2822 = vmatpush3.bf16.msra.mxu0 %v3160_v51  ;;  %v3165_v56 = vld [vmem:[%s3908_s14 + $0xb0] sm:$0xff]   ;;  %v3169_v60 = vld [vmem:[%s3908_s14 + $0xa8] sm:$0xff]  }
  0xeb   : > { %2934 = vmatpush3.bf16.msra.mxu1 %v3161_v52  ;;  %2823 = vmatprep.subr.bf16.mxu0 %v3162_v53  ;;  %v3170_v61 = vld [vmem:[%s3908_s14 + $0x60] sm:$0xff]   ;;  %v3174_v1 = vld [vmem:[%s3908_s14 + $0x58] sm:$0xff]   ;;  %v3178_v5 = vld [vmem:[%s3908_s14 + $0x50] sm:$0xff]  }
  0xec   : > { %2935 = vmatprep.subr.bf16.mxu1 %v3163_v54  ;;  %v3171_v62 = vld [vmem:[%s3908_s14 + $0xe0] sm:$0xff]   ;;  %v3175_v2 = vld [vmem:[%s3908_s14 + $0xd8] sm:$0xff]   ;;  %v3179_v6 = vld [vmem:[%s3908_s14 + $0xd0] sm:$0xff]  }
  0xed   : > { %v3172_v63 = vld [vmem:[%s3908_s14 + $0x20] sm:$0xff]   ;;  %v3176_v3 = vld [vmem:[%s3908_s14 + $0x18] sm:$0xff]   ;;  %v3180_v7 = vld [vmem:[%s3908_s14 + $0x10] sm:$0xff]   ;;  %s4061_s13 = sld [smem:[#allocation8 + %s4207_s6]] }
  0xee   : > { %2824 = vmatpush3.bf16.msra.mxu0 %v3164_v55  ;;  %v3173_v0 = vld [vmem:[%s3908_s14 + $0xa0] sm:$0xff]   ;;  %v3177_v4 = vld [vmem:[%s3908_s14 + $0x98] sm:$0xff]   ;;  %v3181_v8 = vld [vmem:[%s3908_s14 + $0x90] sm:$0xff]  }
  0xef   : > { %2936 = vmatpush3.bf16.msra.mxu1 %v3165_v56  ;;  %2825 = vmatprep.subr.bf16.mxu0 %v3166_v57  ;;  %v3182_v9 = vld [vmem:[%s3908_s14 + $0x48] sm:$0xff]   ;;  %v3186_v13 = vld [vmem:[%s3908_s14 + $0x40] sm:$0xff]  }
  0xf0   : > { %2937 = vmatprep.subr.bf16.mxu1 %v3167_v58  ;;  %v3183_v10 = vld [vmem:[%s3908_s14 + $0xc8] sm:$0xff]   ;;  %v3187_v14 = vld [vmem:[%s3908_s14 + $0xc0] sm:$0xff]  }
  0xf1   : > { %v3184_v11 = vld [vmem:[%s3908_s14 + $0x8] sm:$0xff]   ;;  %v3188_v15 = vld [vmem:[%s3908_s14] sm:$0xff]  }
  0xf2   : > { %2826 = vmatpush3.bf16.msra.mxu0 %v3168_v59  ;;  %v3185_v12 = vld [vmem:[%s3908_s14 + $0x88] sm:$0xff]   ;;  %v3189_v16 = vld [vmem:[%s3908_s14 + $0x80] sm:$0xff]  }
  0xf3   : > { %2938 = vmatpush3.bf16.msra.mxu1 %v3169_v60  ;;  %2827 = vmatprep.subr.bf16.mxu0 %v3170_v61  ;;  %v3190_v17 = vld [vmem:[%s3903_s0] ss:$16 sps:$4 sm:$0xff]   ;;  %v3192_v18 = vld [vmem:[%s3903_s0 + $0x4] ss:$16 sps:$4 sm:$0xff]   ;;  %v3193_v19 = vld [vmem:[%s3903_s0 + $0x8] ss:$16 sps:$4 sm:$0xff]  }
  0xf4   : > { %2939 = vmatprep.subr.bf16.mxu1 %v3171_v62  ;;  %v3195_v20 = vld [vmem:[%s3903_s0 + $0xc] ss:$16 sps:$4 sm:$0xff]   ;;  %1683 = vmatprep.mubr.bf16.mxu0 %v3192_v18  ;;  %v3196_v21 = vld [vmem:[%s3903_s0 + $0x24] ss:$16 sps:$4 sm:$0xff]   ;;  %v3200_v23 = vld [vmem:[%s3903_s0 + $0x20] ss:$16 sps:$4 sm:$0xff]  }
  0xf5   : > { %1844 = vmatprep.mubr.bf16.mxu1 %v3195_v20  ;;  %v3198_v22 = vld [vmem:[%s3903_s0 + $0x2c] ss:$16 sps:$4 sm:$0xff]   ;;  %v3201_v24 = vld [vmem:[%s3903_s0 + $0x28] ss:$16 sps:$4 sm:$0xff]   ;;  %v3202_v25 = vld [vmem:[%s3903_s0 + $0x44] ss:$16 sps:$4 sm:$0xff]  }
  0xf6   : > { %2828 = vmatpush3.bf16.msra.mxu0 %v3172_v63  ;;  %v3204_v26 = vld [vmem:[%s3903_s0 + $0x4c] ss:$16 sps:$4 sm:$0xff]   ;;  %v3206_v27 = vld [vmem:[%s3903_s0 + $0x40] ss:$16 sps:$4 sm:$0xff]   ;;  %v3207_v28 = vld [vmem:[%s3903_s0 + $0x48] ss:$16 sps:$4 sm:$0xff]  }
  0xf7   : > { %2940 = vmatpush3.bf16.msra.mxu1 %v3173_v0  ;;  %2829 = vmatprep.subr.bf16.mxu0 %v3174_v1  ;;  %v3208_v29 = vld [vmem:[%s3903_s0 + $0x64] ss:$16 sps:$4 sm:$0xff]   ;;  %v3210_v30 = vld [vmem:[%s3903_s0 + $0x6c] ss:$16 sps:$4 sm:$0xff]   ;;  %v3212_v31 = vld [vmem:[%s3903_s0 + $0x60] ss:$16 sps:$4 sm:$0xff]  }
  0xf8   : > { %2941 = vmatprep.subr.bf16.mxu1 %v3175_v2  ;;  %v3213_v32 = vld [vmem:[%s3903_s0 + $0x68] ss:$16 sps:$4 sm:$0xff]   ;;  %v3214_v34 = vld [vmem:[%s3903_s0 + $0x84] ss:$16 sps:$4 sm:$0xff]   ;;  %v3216_v35 = vld [vmem:[%s3903_s0 + $0x8c] ss:$16 sps:$4 sm:$0xff]  }
  0xf9   : > { %v3218_v36 = vld [vmem:[%s3903_s0 + $0x80] ss:$16 sps:$4 sm:$0xff]   ;;  %v3219_v37 = vld [vmem:[%s3903_s0 + $0x88] ss:$16 sps:$4 sm:$0xff]   ;;  %v3220_v38 = vld [vmem:[%s3903_s0 + $0xa4] ss:$16 sps:$4 sm:$0xff]  }
  0xfa   : > { %2830 = vmatpush3.bf16.msra.mxu0 %v3176_v3  ;;  %v3222_v39 = vld [vmem:[%s3903_s0 + $0xac] ss:$16 sps:$4 sm:$0xff]   ;;  %v3224_v40 = vld [vmem:[%s3903_s0 + $0xa0] ss:$16 sps:$4 sm:$0xff]   ;;  %v3225_v41 = vld [vmem:[%s3903_s0 + $0xa8] ss:$16 sps:$4 sm:$0xff]  }
  0xfb   : > { %2942 = vmatpush3.bf16.msra.mxu1 %v3177_v4  ;;  %2831 = vmatprep.subr.bf16.mxu0 %v3178_v5  ;;  %v3226_v42 = vld [vmem:[%s3903_s0 + $0xc4] ss:$16 sps:$4 sm:$0xff]   ;;  %v3228_v43 = vld [vmem:[%s3903_s0 + $0xcc] ss:$16 sps:$4 sm:$0xff]   ;;  %v3230_v44 = vld [vmem:[%s3903_s0 + $0xc0] ss:$16 sps:$4 sm:$0xff]  }
  0xfc   : > { %2943 = vmatprep.subr.bf16.mxu1 %v3179_v6  ;;  %v3231_v45 = vld [vmem:[%s3903_s0 + $0xc8] ss:$16 sps:$4 sm:$0xff]   ;;  %v3232_v46 = vld [vmem:[%s3903_s0 + $0xe4] ss:$16 sps:$4 sm:$0xff]   ;;  %v3234_v47 = vld [vmem:[%s3903_s0 + $0xec] ss:$16 sps:$4 sm:$0xff]  }
  0xfd   : > { %v3236_v48 = vld [vmem:[%s3903_s0 + $0xe0] ss:$16 sps:$4 sm:$0xff]   ;;  %v3237_v49 = vld [vmem:[%s3903_s0 + $0xe8] ss:$16 sps:$4 sm:$0xff]   ;;  %v3238_v50 = vld [vmem:[%s3903_s0 + $0x104] ss:$16 sps:$4 sm:$0xff]  }
  0xfe   : > { %2832 = vmatpush3.bf16.msra.mxu0 %v3180_v7  ;;  %v3240_v33 = vld [vmem:[%s3903_s0 + $0x10c] ss:$16 sps:$4 sm:$0xff]   ;;  %v3242_v51 = vld [vmem:[%s3903_s0 + $0x100] ss:$16 sps:$4 sm:$0xff]   ;;  %v3243_v52 = vld [vmem:[%s3903_s0 + $0x108] ss:$16 sps:$4 sm:$0xff]  }
  0xff   : > { %2944 = vmatpush3.bf16.msra.mxu1 %v3181_v8  ;;  %2833 = vmatprep.subr.bf16.mxu0 %v3182_v9  ;;  %v3244_v53 = vld [vmem:[%s3903_s0 + $0x124] ss:$16 sps:$4 sm:$0xff]   ;;  %v3246_v54 = vld [vmem:[%s3903_s0 + $0x12c] ss:$16 sps:$4 sm:$0xff]   ;;  %v3248_v55 = vld [vmem:[%s3903_s0 + $0x120] ss:$16 sps:$4 sm:$0xff]  }
 0x100   : > { %2945 = vmatprep.subr.bf16.mxu1 %v3183_v10  ;;  %v3249_v56 = vld [vmem:[%s3903_s0 + $0x128] ss:$16 sps:$4 sm:$0xff]   ;;  %v3250_v57 = vld [vmem:[%s3903_s0 + $0x144] ss:$16 sps:$4 sm:$0xff]   ;;  %v3252_v58 = vld [vmem:[%s3903_s0 + $0x14c] ss:$16 sps:$4 sm:$0xff]  }
 0x101   : > { %v3254_v59 = vld [vmem:[%s3903_s0 + $0x140] ss:$16 sps:$4 sm:$0xff]   ;;  %v3255_v60 = vld [vmem:[%s3903_s0 + $0x148] ss:$16 sps:$4 sm:$0xff]   ;;  %v3256_v61 = vld [vmem:[%s3903_s0 + $0x164] ss:$16 sps:$4 sm:$0xff]  }
 0x102   : > { %2834 = vmatpush3.bf16.msra.mxu0 %v3184_v11  ;;  %v3258_v62 = vld [vmem:[%s3903_s0 + $0x16c] ss:$16 sps:$4 sm:$0xff]   ;;  %v3260_v63 = vld [vmem:[%s3903_s0 + $0x160] ss:$16 sps:$4 sm:$0xff]   ;;  %v3261_v0 = vld [vmem:[%s3903_s0 + $0x168] ss:$16 sps:$4 sm:$0xff]  }
 0x103   : > { %2946 = vmatpush3.bf16.msra.mxu1 %v3185_v12  ;;  %2835 = vmatprep.subr.bf16.mxu0 %v3186_v13  ;;  %v3262_v1 = vld [vmem:[%s3903_s0 + $0x184] ss:$16 sps:$4 sm:$0xff]   ;;  %v3264_v2 = vld [vmem:[%s3903_s0 + $0x18c] ss:$16 sps:$4 sm:$0xff]   ;;  %v3266_v3 = vld [vmem:[%s3903_s0 + $0x180] ss:$16 sps:$4 sm:$0xff]  }
 0x104   : > { %2947 = vmatprep.subr.bf16.mxu1 %v3187_v14  ;;  %v3267_v4 = vld [vmem:[%s3903_s0 + $0x188] ss:$16 sps:$4 sm:$0xff]   ;;  %v3268_v5 = vld [vmem:[%s3903_s0 + $0x1a4] ss:$16 sps:$4 sm:$0xff]   ;;  %v3270_v6 = vld [vmem:[%s3903_s0 + $0x1ac] ss:$16 sps:$4 sm:$0xff]  }
 0x105   : > { %v3272_v7 = vld [vmem:[%s3903_s0 + $0x1a0] ss:$16 sps:$4 sm:$0xff]   ;;  %v3273_v8 = vld [vmem:[%s3903_s0 + $0x1a8] ss:$16 sps:$4 sm:$0xff]   ;;  %v3274_v9 = vld [vmem:[%s3903_s0 + $0x1c4] ss:$16 sps:$4 sm:$0xff]  }
 0x106   : > { %2836 = vmatpush3.bf16.msra.mxu0 %v3188_v15  ;;  %v3276_v10 = vld [vmem:[%s3903_s0 + $0x1cc] ss:$16 sps:$4 sm:$0xff]   ;;  %v3278_v11 = vld [vmem:[%s3903_s0 + $0x1c0] ss:$16 sps:$4 sm:$0xff]   ;;  %v3279_v12 = vld [vmem:[%s3903_s0 + $0x1c8] ss:$16 sps:$4 sm:$0xff]  }
 0x107   : > { %2948 = vmatpush3.bf16.msra.mxu1 %v3189_v16  ;;  %v3280_v13 = vld [vmem:[%s3903_s0 + $0x1e4] ss:$16 sps:$4 sm:$0xff]   ;;  %v3282_v14 = vld [vmem:[%s3903_s0 + $0x1ec] ss:$16 sps:$4 sm:$0xff]   ;;  %v3284_v15 = vld [vmem:[%s3903_s0 + $0x1e0] ss:$16 sps:$4 sm:$0xff]  }
 0x108   : > { %v3285_v16 = vld [vmem:[%s3903_s0 + $0x1e8] ss:$16 sps:$4 sm:$0xff]   ;;  %p2038_p7 = scmp.eq.s32.totalorder %s4061_s13, 1 }
 0x109   : > { %1684 = vmatmul.mubr.bf16.vlgmr.msra.gmra.mxu0 %v3190_v17 }
 0x10a   : > { %1845 = vmatmul.mubr.bf16.vlgmr.msra.gmra.mxu1 %v3193_v19  ;;  %1691 = vmatprep.mubr.bf16.mxu0 %v3196_v21 }
 0x10b   : > { %1852 = vmatprep.mubr.bf16.mxu1 %v3198_v22 }
 0x111   : > { %1692 = vmatmul.mubr.bf16.gmra.mxu0 %v3200_v23 }
 0x112   : > { %1853 = vmatmul.mubr.bf16.gmra.mxu1 %v3201_v24  ;;  %1699 = vmatprep.mubr.bf16.mxu0 %v3202_v25  ;;  %v979_v24 = vld [vmem:[#allocation2 + $0xb0] sm:$0xff] }
 0x113   : > { %1860 = vmatprep.mubr.bf16.mxu1 %v3204_v26 }
 0x119   : > { %1700 = vmatmul.mubr.bf16.gmra.mxu0 %v3206_v27 }
 0x11a   : > { %1861 = vmatmul.mubr.bf16.gmra.mxu1 %v3207_v28  ;;  %1707 = vmatprep.mubr.bf16.mxu0 %v3208_v29 }
 0x11b   : > { %1868 = vmatprep.mubr.bf16.mxu1 %v3210_v30 }
 0x121   : > { %1708 = vmatmul.mubr.bf16.gmra.mxu0 %v3212_v31 }
 0x122   : > { %1869 = vmatmul.mubr.bf16.gmra.mxu1 %v3213_v32  ;;  %1715 = vmatprep.mubr.bf16.mxu0 %v3214_v34  ;;  %v980_v34 = vld [vmem:[#allocation2] sm:$0xff] }
 0x123   : > { %1876 = vmatprep.mubr.bf16.mxu1 %v3216_v35 }
 0x129   : > { %1716 = vmatmul.mubr.bf16.gmra.mxu0 %v3218_v36 }
 0x12a   : > { %1877 = vmatmul.mubr.bf16.gmra.mxu1 %v3219_v37  ;;  %1723 = vmatprep.mubr.bf16.mxu0 %v3220_v38 }
 0x12b   : > { %1884 = vmatprep.mubr.bf16.mxu1 %v3222_v39 }
 0x131   : > { %1724 = vmatmul.mubr.bf16.gmra.mxu0 %v3224_v40 }
 0x132   : > { %1885 = vmatmul.mubr.bf16.gmra.mxu1 %v3225_v41  ;;  %1731 = vmatprep.mubr.bf16.mxu0 %v3226_v42 }
 0x133   : > { %1892 = vmatprep.mubr.bf16.mxu1 %v3228_v43  ;;  %v981_v43 = vld [vmem:[#allocation2 + $0xd8] sm:$0xff] }
 0x139   : > { %1732 = vmatmul.mubr.bf16.gmra.mxu0 %v3230_v44 }
 0x13a   : > { %1893 = vmatmul.mubr.bf16.gmra.mxu1 %v3231_v45  ;;  %1739 = vmatprep.mubr.bf16.mxu0 %v3232_v46 }
 0x13b   : > { %1900 = vmatprep.mubr.bf16.mxu1 %v3234_v47 }
 0x141   : > { %1740 = vmatmul.mubr.bf16.gmra.mxu0 %v3236_v48 }
 0x142   : > { %1901 = vmatmul.mubr.bf16.gmra.mxu1 %v3237_v49  ;;  %1747 = vmatprep.mubr.bf16.mxu0 %v3238_v50 }
 0x143   : > { %1908 = vmatprep.mubr.bf16.mxu1 %v3240_v33 }
 0x149   : > { %1748 = vmatmul.mubr.bf16.gmra.mxu0 %v3242_v51  ;;  %v982_v51 = vld [vmem:[#allocation2 + $0x18] sm:$0xff] }
 0x14a   : > { %1909 = vmatmul.mubr.bf16.gmra.mxu1 %v3243_v52  ;;  %1755 = vmatprep.mubr.bf16.mxu0 %v3244_v53 }
 0x14b   : > { %1916 = vmatprep.mubr.bf16.mxu1 %v3246_v54 }
 0x151   : > { %1756 = vmatmul.mubr.bf16.gmra.mxu0 %v3248_v55 }
 0x152   : > { %1917 = vmatmul.mubr.bf16.gmra.mxu1 %v3249_v56  ;;  %1763 = vmatprep.mubr.bf16.mxu0 %v3250_v57 }
 0x153   : > { %1924 = vmatprep.mubr.bf16.mxu1 %v3252_v58 }
 0x159   : > { %1764 = vmatmul.mubr.bf16.gmra.mxu0 %v3254_v59 }
 0x15a   : > { %1925 = vmatmul.mubr.bf16.gmra.mxu1 %v3255_v60  ;;  %1771 = vmatprep.mubr.bf16.mxu0 %v3256_v61  ;;  %v983_v60 = vld [vmem:[#allocation2 + $0x50] sm:$0xff] }
 0x15b   : > { %1932 = vmatprep.mubr.bf16.mxu1 %v3258_v62 }
 0x161   : > { %1772 = vmatmul.mubr.bf16.gmra.mxu0 %v3260_v63 }
 0x162   : > { %1933 = vmatmul.mubr.bf16.gmra.mxu1 %v3261_v0  ;;  %1779 = vmatprep.mubr.bf16.mxu0 %v3262_v1 }
 0x163   : > { %1940 = vmatprep.mubr.bf16.mxu1 %v3264_v2 }
 0x169   : > { %1780 = vmatmul.mubr.bf16.gmra.mxu0 %v3266_v3 }
 0x16a   : > { %1941 = vmatmul.mubr.bf16.gmra.mxu1 %v3267_v4  ;;  %1787 = vmatprep.mubr.bf16.mxu0 %v3268_v5  ;;  %v984_v5 = vld [vmem:[#allocation2 + $0x68] sm:$0xff] }
 0x16b   : > { %1948 = vmatprep.mubr.bf16.mxu1 %v3270_v6 }
 0x171   : > { %1788 = vmatmul.mubr.bf16.gmra.mxu0 %v3272_v7 }
 0x172   : > { %1949 = vmatmul.mubr.bf16.gmra.mxu1 %v3273_v8  ;;  %1795 = vmatprep.mubr.bf16.mxu0 %v3274_v9 }
 0x173   : > { %1956 = vmatprep.mubr.bf16.mxu1 %v3276_v10 }
 0x179   : > { %1796 = vmatmul.mubr.bf16.gmra.mxu0 %v3278_v11 }
 0x17a   : > { %1957 = vmatmul.mubr.bf16.gmra.mxu1 %v3279_v12  ;;  %1803 = vmatprep.mubr.bf16.mxu0 %v3280_v13 }
 0x17b   : > { %1964 = vmatprep.mubr.bf16.mxu1 %v3282_v14  ;;  %v985_v14 = vld [vmem:[#allocation2 + $0x30] sm:$0xff] }
 0x181   : > { %1804 = vmatmul.mubr.bf16.gmra.mxu0 %v3284_v15 }
 0x182   : > { %1965 = vmatmul.mubr.bf16.gmra.mxu1 %v3285_v16 }
 0x1c9   : > { %v2837_v17 = vpop.f32.mrf.mxu0 }
 0x1ca   : > { %v2949_v18 = vpop.f32.mrf.mxu1 }
 0x1cb   : > { %v2838_v19 = vpop.f32.mrf.mxu0 }
 0x1cc   : > { %v2839_v20 = vadd.f32 %v2838_v19, %v2837_v17  ;;  %v2950_v21 = vpop.f32.mrf.mxu1 }
 0x1cd   : > { %v2951_v22 = vadd.f32 %v2950_v21, %v2949_v18  ;;  %v2840_v23 = vpop.f32.mrf.mxu0 }
 0x1ce   : > { %v2952_v25 = vpop.f32.mrf.mxu1 }
 0x1cf   : > { %v1847_v26 = vadd.f32 %v2951_v22, %v2839_v20  ;;  %v2841_v27 = vpop.f32.mrf.mxu0 }
 0x1d0   : > { %v2842_v28 = vadd.f32 %v2841_v27, %v2840_v23  ;;  %v2953_v29 = vpop.f32.mrf.mxu1  ;;  %v986_v23 = vld [vmem:[#allocation2 + $0x48] sm:$0xff] }
 0x1d1   : > { %v1973_v30 = vadd.f32 %v1847_v26, %v979_v24  ;;  %v2954_v31 = vadd.f32 %v2953_v29, %v2952_v25  ;;  %v2843_v32 = vpop.f32.mrf.mxu0 }
 0x1d2   : > { %v2955_v35 = vpop.f32.mrf.mxu1 }
 0x1d3   : > { %2005 = vst [vmem:[#allocation2 + $0xb0] sm:$0xff] %v1973_v30  ;;  %v1850_v36 = vadd.f32 %v2954_v31, %v2842_v28  ;;  %v2844_v37 = vpop.f32.mrf.mxu0 }
 0x1d4   : > { %v2845_v38 = vadd.f32 %v2844_v37, %v2843_v32  ;;  %v2956_v39 = vpop.f32.mrf.mxu1  ;;  %v987_v32 = vld [vmem:[#allocation2 + $0x80] sm:$0xff] }
 0x1d5   : > { %v1974_v40 = vadd.f32 %v1850_v36, %v980_v34  ;;  %v2957_v41 = vadd.f32 %v2956_v39, %v2955_v35  ;;  %v2846_v42 = vpop.f32.mrf.mxu0 }
 0x1d6   : > { %v2958_v44 = vpop.f32.mrf.mxu1 }
 0x1d7   : > { %2006 = vst [vmem:[#allocation2] sm:$0xff] %v1974_v40  ;;  %v1855_v45 = vadd.f32 %v2957_v41, %v2845_v38  ;;  %v2847_v46 = vpop.f32.mrf.mxu0 }
 0x1d8   : > { %v2848_v47 = vadd.f32 %v2847_v46, %v2846_v42  ;;  %v2959_v48 = vpop.f32.mrf.mxu1  ;;  %v988_v42 = vld [vmem:[#allocation2 + $0x88] sm:$0xff] }
 0x1d9   : > { %v1975_v49 = vadd.f32 %v1855_v45, %v981_v43  ;;  %v2960_v50 = vadd.f32 %v2959_v48, %v2958_v44  ;;  %v2849_v33 = vpop.f32.mrf.mxu0 }
 0x1da   : > { %v2961_v52 = vpop.f32.mrf.mxu1 }
 0x1db   : > { %2007 = vst [vmem:[#allocation2 + $0xd8] sm:$0xff] %v1975_v49  ;;  %v1858_v53 = vadd.f32 %v2960_v50, %v2848_v47  ;;  %v2850_v54 = vpop.f32.mrf.mxu0 }
 0x1dc   : > { %v2851_v55 = vadd.f32 %v2850_v54, %v2849_v33  ;;  %v2962_v56 = vpop.f32.mrf.mxu1  ;;  %v989_v33 = vld [vmem:[#allocation2 + $0xe8] sm:$0xff] }
 0x1dd   : > { %v1976_v57 = vadd.f32 %v1858_v53, %v982_v51  ;;  %v2963_v58 = vadd.f32 %v2962_v56, %v2961_v52  ;;  %v2852_v59 = vpop.f32.mrf.mxu0 }
 0x1de   : > { %v2964_v61 = vpop.f32.mrf.mxu1 }
 0x1df   : > { %2008 = vst [vmem:[#allocation2 + $0x18] sm:$0xff] %v1976_v57  ;;  %v1863_v62 = vadd.f32 %v2963_v58, %v2851_v55  ;;  %v2853_v63 = vpop.f32.mrf.mxu0 }
 0x1e0   : > { %v2854_v0 = vadd.f32 %v2853_v63, %v2852_v59  ;;  %v2965_v1 = vpop.f32.mrf.mxu1  ;;  %v990_v59 = vld [vmem:[#allocation2 + $0xb8] sm:$0xff] }
 0x1e1   : > { %v1977_v2 = vadd.f32 %v1863_v62, %v983_v60  ;;  %v2966_v3 = vadd.f32 %v2965_v1, %v2964_v61  ;;  %v2855_v4 = vpop.f32.mrf.mxu0 }
 0x1e2   : > { %v2967_v6 = vpop.f32.mrf.mxu1 }
 0x1e3   : > { %2009 = vst [vmem:[#allocation2 + $0x50] sm:$0xff] %v1977_v2  ;;  %v1866_v7 = vadd.f32 %v2966_v3, %v2854_v0  ;;  %v2856_v8 = vpop.f32.mrf.mxu0 }
 0x1e4   : > { %v2857_v9 = vadd.f32 %v2856_v8, %v2855_v4  ;;  %v2968_v10 = vpop.f32.mrf.mxu1  ;;  %v991_v4 = vld [vmem:[#allocation2 + $0x60] sm:$0xff] }
 0x1e5   : > { %v1978_v11 = vadd.f32 %v1866_v7, %v984_v5  ;;  %v2969_v12 = vadd.f32 %v2968_v10, %v2967_v6  ;;  %v2858_v13 = vpop.f32.mrf.mxu0 }
 0x1e6   : > { %v2970_v15 = vpop.f32.mrf.mxu1 }
 0x1e7   : > { %2010 = vst [vmem:[#allocation2 + $0x68] sm:$0xff] %v1978_v11  ;;  %v1871_v16 = vadd.f32 %v2969_v12, %v2857_v9  ;;  %v2859_v17 = vpop.f32.mrf.mxu0 }
 0x1e8   : > { %v2860_v18 = vadd.f32 %v2859_v17, %v2858_v13  ;;  %v2971_v19 = vpop.f32.mrf.mxu1  ;;  %v992_v13 = vld [vmem:[#allocation2 + $0xf0] sm:$0xff] }
 0x1e9   : > { %v1979_v20 = vadd.f32 %v1871_v16, %v985_v14  ;;  %v2972_v21 = vadd.f32 %v2971_v19, %v2970_v15  ;;  %v2861_v22 = vpop.f32.mrf.mxu0 }
 0x1ea   : > { %v2973_v24 = vpop.f32.mrf.mxu1 }
 0x1eb   : > { %2011 = vst [vmem:[#allocation2 + $0x30] sm:$0xff] %v1979_v20  ;;  %v1874_v25 = vadd.f32 %v2972_v21, %v2860_v18  ;;  %v2862_v26 = vpop.f32.mrf.mxu0 }
 0x1ec   : > { %v2863_v27 = vadd.f32 %v2862_v26, %v2861_v22  ;;  %v2974_v28 = vpop.f32.mrf.mxu1  ;;  %v993_v22 = vld [vmem:[#allocation2 + $0x8] sm:$0xff] }
 0x1ed   : > { %v1980_v29 = vadd.f32 %v1874_v25, %v986_v23  ;;  %v2975_v30 = vadd.f32 %v2974_v28, %v2973_v24  ;;  %v2864_v31 = vpop.f32.mrf.mxu0 }
 0x1ee   : > { %v2976_v34 = vpop.f32.mrf.mxu1 }
 0x1ef   : > { %2012 = vst [vmem:[#allocation2 + $0x48] sm:$0xff] %v1980_v29  ;;  %v1879_v35 = vadd.f32 %v2975_v30, %v2863_v27  ;;  %v2865_v36 = vpop.f32.mrf.mxu0 }
 0x1f0   : > { %v2866_v37 = vadd.f32 %v2865_v36, %v2864_v31  ;;  %v2977_v38 = vpop.f32.mrf.mxu1  ;;  %v994_v31 = vld [vmem:[#allocation2 + $0x78] sm:$0xff] }
 0x1f1   : > { %v1981_v39 = vadd.f32 %v1879_v35, %v987_v32  ;;  %v2978_v40 = vadd.f32 %v2977_v38, %v2976_v34  ;;  %v2867_v41 = vpop.f32.mrf.mxu0 }
 0x1f2   : > { %v2979_v43 = vpop.f32.mrf.mxu1 }
 0x1f3   : > { %2013 = vst [vmem:[#allocation2 + $0x80] sm:$0xff] %v1981_v39  ;;  %v1882_v44 = vadd.f32 %v2978_v40, %v2866_v37  ;;  %v2868_v45 = vpop.f32.mrf.mxu0 }
 0x1f4   : > { %v2869_v46 = vadd.f32 %v2868_v45, %v2867_v41  ;;  %v2980_v47 = vpop.f32.mrf.mxu1  ;;  %v995_v41 = vld [vmem:[#allocation2 + $0x38] sm:$0xff] }
 0x1f5   : > { %v1982_v48 = vadd.f32 %v1882_v44, %v988_v42  ;;  %v2981_v49 = vadd.f32 %v2980_v47, %v2979_v43  ;;  %v2870_v50 = vpop.f32.mrf.mxu0 }
 0x1f6   : > { %v2982_v51 = vpop.f32.mrf.mxu1 }
 0x1f7   : > { %2014 = vst [vmem:[#allocation2 + $0x88] sm:$0xff] %v1982_v48  ;;  %v1887_v52 = vadd.f32 %v2981_v49, %v2869_v46  ;;  %v2871_v53 = vpop.f32.mrf.mxu0 }
 0x1f8   : > { %v2872_v54 = vadd.f32 %v2871_v53, %v2870_v50  ;;  %v2983_v55 = vpop.f32.mrf.mxu1  ;;  %v996_v50 = vld [vmem:[#allocation2 + $0x58] sm:$0xff] }
 0x1f9   : > { %v1983_v56 = vadd.f32 %v1887_v52, %v989_v33  ;;  %v2984_v57 = vadd.f32 %v2983_v55, %v2982_v51  ;;  %v2873_v58 = vpop.f32.mrf.mxu0 }
 0x1fa   : > { %v2985_v60 = vpop.f32.mrf.mxu1 }
 0x1fb   : > { %2015 = vst [vmem:[#allocation2 + $0xe8] sm:$0xff] %v1983_v56  ;;  %v1890_v61 = vadd.f32 %v2984_v57, %v2872_v54  ;;  %v2874_v62 = vpop.f32.mrf.mxu0 }
 0x1fc   : > { %v2875_v63 = vadd.f32 %v2874_v62, %v2873_v58  ;;  %v2986_v0 = vpop.f32.mrf.mxu1  ;;  %v997_v58 = vld [vmem:[#allocation2 + $0x40] sm:$0xff] }
 0x1fd   : > { %v1984_v1 = vadd.f32 %v1890_v61, %v990_v59  ;;  %v2987_v2 = vadd.f32 %v2986_v0, %v2985_v60  ;;  %v2876_v3 = vpop.f32.mrf.mxu0 }
 0x1fe   : > { %v2988_v5 = vpop.f32.mrf.mxu1 }
 0x1ff   : > { %2016 = vst [vmem:[#allocation2 + $0xb8] sm:$0xff] %v1984_v1  ;;  %v1895_v6 = vadd.f32 %v2987_v2, %v2875_v63  ;;  %v2877_v7 = vpop.f32.mrf.mxu0 }
 0x200   : > { %v2878_v8 = vadd.f32 %v2877_v7, %v2876_v3  ;;  %v2989_v9 = vpop.f32.mrf.mxu1  ;;  %v998_v3 = vld [vmem:[#allocation2 + $0xc8] sm:$0xff] }
 0x201   : > { %v1985_v10 = vadd.f32 %v1895_v6, %v991_v4  ;;  %v2990_v11 = vadd.f32 %v2989_v9, %v2988_v5  ;;  %v2879_v12 = vpop.f32.mrf.mxu0 }
 0x202   : > { %v2991_v14 = vpop.f32.mrf.mxu1 }
 0x203   : > { %2017 = vst [vmem:[#allocation2 + $0x60] sm:$0xff] %v1985_v10  ;;  %v1898_v15 = vadd.f32 %v2990_v11, %v2878_v8  ;;  %v2880_v16 = vpop.f32.mrf.mxu0 }
 0x204   : > { %v2881_v17 = vadd.f32 %v2880_v16, %v2879_v12  ;;  %v2992_v18 = vpop.f32.mrf.mxu1  ;;  %v999_v12 = vld [vmem:[#allocation2 + $0xe0] sm:$0xff] }
 0x205   : > { %v1986_v19 = vadd.f32 %v1898_v15, %v992_v13  ;;  %v2993_v20 = vadd.f32 %v2992_v18, %v2991_v14  ;;  %v2882_v21 = vpop.f32.mrf.mxu0 }
 0x206   : > { %v2994_v23 = vpop.f32.mrf.mxu1 }
 0x207   : > { %2018 = vst [vmem:[#allocation2 + $0xf0] sm:$0xff] %v1986_v19  ;;  %v1903_v24 = vadd.f32 %v2993_v20, %v2881_v17  ;;  %v2883_v25 = vpop.f32.mrf.mxu0 }
 0x208   : > { %v2884_v26 = vadd.f32 %v2883_v25, %v2882_v21  ;;  %v2995_v27 = vpop.f32.mrf.mxu1  ;;  %v1000_v21 = vld [vmem:[#allocation2 + $0x90] sm:$0xff] }
 0x209   : > { %v1987_v28 = vadd.f32 %v1903_v24, %v993_v22  ;;  %v2996_v29 = vadd.f32 %v2995_v27, %v2994_v23  ;;  %v2885_v30 = vpop.f32.mrf.mxu0 }
 0x20a   : > { %v2997_v32 = vpop.f32.mrf.mxu1 }
 0x20b   : > { %2019 = vst [vmem:[#allocation2 + $0x8] sm:$0xff] %v1987_v28  ;;  %v1906_v34 = vadd.f32 %v2996_v29, %v2884_v26  ;;  %v2886_v35 = vpop.f32.mrf.mxu0 }
 0x20c   : > { %v2887_v36 = vadd.f32 %v2886_v35, %v2885_v30  ;;  %v2998_v37 = vpop.f32.mrf.mxu1  ;;  %v1001_v30 = vld [vmem:[#allocation2 + $0x70] sm:$0xff] }
 0x20d   : > { %v1988_v38 = vadd.f32 %v1906_v34, %v994_v31  ;;  %v2999_v39 = vadd.f32 %v2998_v37, %v2997_v32  ;;  %v2888_v40 = vpop.f32.mrf.mxu0 }
 0x20e   : > { %v3000_v42 = vpop.f32.mrf.mxu1 }
 0x20f   : > { %2020 = vst [vmem:[#allocation2 + $0x78] sm:$0xff] %v1988_v38  ;;  %v1911_v43 = vadd.f32 %v2999_v39, %v2887_v36  ;;  %v2889_v44 = vpop.f32.mrf.mxu0 }
 0x210   : > { %v2890_v45 = vadd.f32 %v2889_v44, %v2888_v40  ;;  %v3001_v46 = vpop.f32.mrf.mxu1  ;;  %v1002_v40 = vld [vmem:[#allocation2 + $0xc0] sm:$0xff] }
 0x211   : > { %v1989_v47 = vadd.f32 %v1911_v43, %v995_v41  ;;  %v3002_v48 = vadd.f32 %v3001_v46, %v3000_v42  ;;  %v2891_v49 = vpop.f32.mrf.mxu0 }
 0x212   : > { %v3003_v33 = vpop.f32.mrf.mxu1 }
 0x213   : > { %2021 = vst [vmem:[#allocation2 + $0x38] sm:$0xff] %v1989_v47  ;;  %v1914_v51 = vadd.f32 %v3002_v48, %v2890_v45  ;;  %v2892_v52 = vpop.f32.mrf.mxu0 }
 0x214   : > { %v2893_v53 = vadd.f32 %v2892_v52, %v2891_v49  ;;  %v3004_v54 = vpop.f32.mrf.mxu1  ;;  %v1003_v49 = vld [vmem:[#allocation2 + $0xa8] sm:$0xff] }
 0x215   : > { %v1990_v55 = vadd.f32 %v1914_v51, %v996_v50  ;;  %v3005_v56 = vadd.f32 %v3004_v54, %v3003_v33  ;;  %v2894_v57 = vpop.f32.mrf.mxu0 }
 0x216   : > { %v3006_v59 = vpop.f32.mrf.mxu1 }
 0x217   : > { %2022 = vst [vmem:[#allocation2 + $0x58] sm:$0xff] %v1990_v55  ;;  %v1919_v60 = vadd.f32 %v3005_v56, %v2893_v53  ;;  %v2895_v61 = vpop.f32.mrf.mxu0 }
 0x218   : > { %v2896_v62 = vadd.f32 %v2895_v61, %v2894_v57  ;;  %v3007_v63 = vpop.f32.mrf.mxu1  ;;  %v1004_v57 = vld [vmem:[#allocation2 + $0xd0] sm:$0xff] }
 0x219   : > { %v1991_v0 = vadd.f32 %v1919_v60, %v997_v58  ;;  %v3008_v1 = vadd.f32 %v3007_v63, %v3006_v59  ;;  %v2897_v2 = vpop.f32.mrf.mxu0 }
 0x21a   : > { %v3009_v4 = vpop.f32.mrf.mxu1 }
 0x21b   : > { %2023 = vst [vmem:[#allocation2 + $0x40] sm:$0xff] %v1991_v0  ;;  %v1922_v5 = vadd.f32 %v3008_v1, %v2896_v62  ;;  %v2898_v6 = vpop.f32.mrf.mxu0 }
 0x21c   : > { %v2899_v7 = vadd.f32 %v2898_v6, %v2897_v2  ;;  %v3010_v8 = vpop.f32.mrf.mxu1  ;;  %v1005_v2 = vld [vmem:[#allocation2 + $0x10] sm:$0xff] }
 0x21d   : > { %v1992_v9 = vadd.f32 %v1922_v5, %v998_v3  ;;  %v3011_v10 = vadd.f32 %v3010_v8, %v3009_v4  ;;  %v2900_v11 = vpop.f32.mrf.mxu0 }
 0x21e   : > { %v3012_v13 = vpop.f32.mrf.mxu1 }
 0x21f   : > { %2024 = vst [vmem:[#allocation2 + $0xc8] sm:$0xff] %v1992_v9  ;;  %v1927_v14 = vadd.f32 %v3011_v10, %v2899_v7  ;;  %v2901_v15 = vpop.f32.mrf.mxu0 }
 0x220   : > { %v2902_v16 = vadd.f32 %v2901_v15, %v2900_v11  ;;  %v3013_v17 = vpop.f32.mrf.mxu1  ;;  %v1006_v11 = vld [vmem:[#allocation2 + $0x28] sm:$0xff] }
 0x221   : > { %v1993_v18 = vadd.f32 %v1927_v14, %v999_v12  ;;  %v3014_v19 = vadd.f32 %v3013_v17, %v3012_v13  ;;  %v2903_v20 = vpop.f32.mrf.mxu0 }
 0x222   : > { %v3015_v22 = vpop.f32.mrf.mxu1 }
 0x223   : > { %2025 = vst [vmem:[#allocation2 + $0xe0] sm:$0xff] %v1993_v18  ;;  %v1930_v23 = vadd.f32 %v3014_v19, %v2902_v16  ;;  %v2904_v24 = vpop.f32.mrf.mxu0 }
 0x224   : > { %v2905_v25 = vadd.f32 %v2904_v24, %v2903_v20  ;;  %v3016_v26 = vpop.f32.mrf.mxu1  ;;  %v1007_v20 = vld [vmem:[#allocation2 + $0xa0] sm:$0xff] }
 0x225   : > { %v1994_v27 = vadd.f32 %v1930_v23, %v1000_v21  ;;  %v3017_v28 = vadd.f32 %v3016_v26, %v3015_v22  ;;  %v2906_v29 = vpop.f32.mrf.mxu0 }
 0x226   : > { %v3018_v31 = vpop.f32.mrf.mxu1 }
 0x227   : > { %2026 = vst [vmem:[#allocation2 + $0x90] sm:$0xff] %v1994_v27  ;;  %v1935_v32 = vadd.f32 %v3017_v28, %v2905_v25  ;;  %v2907_v34 = vpop.f32.mrf.mxu0 }
 0x228   : > { %v2908_v35 = vadd.f32 %v2907_v34, %v2906_v29  ;;  %v3019_v36 = vpop.f32.mrf.mxu1  ;;  %v1008_v29 = vld [vmem:[#allocation2 + $0xf8] sm:$0xff] }
 0x229   : > { %v1995_v37 = vadd.f32 %v1935_v32, %v1001_v30  ;;  %v3020_v38 = vadd.f32 %v3019_v36, %v3018_v31  ;;  %v2909_v39 = vpop.f32.mrf.mxu0 }
 0x22a   : > { %v3021_v41 = vpop.f32.mrf.mxu1 }
 0x22b   : > { %2027 = vst [vmem:[#allocation2 + $0x70] sm:$0xff] %v1995_v37  ;;  %v1938_v42 = vadd.f32 %v3020_v38, %v2908_v35  ;;  %v2910_v43 = vpop.f32.mrf.mxu0 }
 0x22c   : > { %v2911_v44 = vadd.f32 %v2910_v43, %v2909_v39  ;;  %v3022_v45 = vpop.f32.mrf.mxu1  ;;  %v1009_v39 = vld [vmem:[#allocation2 + $0x20] sm:$0xff] }
 0x22d   : > { %v1996_v46 = vadd.f32 %v1938_v42, %v1002_v40  ;;  %v3023_v47 = vadd.f32 %v3022_v45, %v3021_v41  ;;  %v2912_v48 = vpop.f32.mrf.mxu0 }
 0x22e   : > { %v3024_v50 = vpop.f32.mrf.mxu1 }
 0x22f   : > { %2028 = vst [vmem:[#allocation2 + $0xc0] sm:$0xff] %v1996_v46  ;;  %v1943_v33 = vadd.f32 %v3023_v47, %v2911_v44  ;;  %v2913_v51 = vpop.f32.mrf.mxu0  ;;  %v1010_v47 = vld [vmem:[#allocation2 + $0x98] sm:$0xff] }
 0x230   : > { %v2914_v52 = vadd.f32 %v2913_v51, %v2912_v48  ;;  %v3025_v53 = vpop.f32.mrf.mxu1  ;;  %v2045_v51 = vld [vmem:[#allocation2 + $0xd8] sm:$0xff] (%p2038_p7) }
 0x231   : > { %v1997_v54 = vadd.f32 %v1943_v33, %v1003_v49  ;;  %v3026_v55 = vadd.f32 %v3025_v53, %v3024_v50  ;;  %v2915_v56 = vpop.f32.mrf.mxu0  ;;  %v2043_v50 = vld [vmem:[#allocation2 + $0xb0] sm:$0xff] (%p2038_p7)  ;;  %v2044_v33 = vld [vmem:[#allocation2] sm:$0xff] (%p2038_p7) }
 0x232   : > { %v3027_v58 = vpop.f32.mrf.mxu1  ;;  %v2076_v53 = vmax.f32 (%p2038_p7), %v2044_v33, 0.0 }
 0x233   : > { %2029 = vst [vmem:[#allocation2 + $0xa8] sm:$0xff] %v1997_v54  ;;  %v1946_v59 = vadd.f32 %v3026_v55, %v2914_v52  ;;  %v2916_v60 = vpop.f32.mrf.mxu0  ;;  %v2075_v52 = vmax.f32 (%p2038_p7), %v2043_v50, 0.0  ;;  %v2046_v54 = vld [vmem:[#allocation2 + $0x18] sm:$0xff] (%p2038_p7)  ;;  %v2077_v55 = vmax.f32 (%p2038_p7), %v2045_v51, 0.0 }
 0x234   : > { %v2917_v61 = vadd.f32 %v2916_v60, %v2915_v56  ;;  %v3028_v62 = vpop.f32.mrf.mxu1  ;;  %v2047_v56 = vld [vmem:[#allocation2 + $0x50] sm:$0xff] (%p2038_p7) }
 0x235   : > { %v1998_v63 = vadd.f32 %v1946_v59, %v1004_v57  ;;  %v3029_v0 = vadd.f32 %v3028_v62, %v3027_v58  ;;  %v2918_v1 = vpop.f32.mrf.mxu0  ;;  %v2048_v57 = vld [vmem:[#allocation2 + $0x68] sm:$0xff] (%p2038_p7)  ;;  %v2078_v58 = vmax.f32 (%p2038_p7), %v2046_v54, 0.0  ;;  %v2079_v59 = vmax.f32 (%p2038_p7), %v2047_v56, 0.0 }
 0x236   : > { %v3030_v3 = vpop.f32.mrf.mxu1  ;;  %v2080_v60 = vmax.f32 (%p2038_p7), %v2048_v57, 0.0  ;;  %v2050_v62 = vld [vmem:[#allocation2 + $0x48] sm:$0xff] (%p2038_p7) }
 0x237   : > { %2030 = vst [vmem:[#allocation2 + $0xd0] sm:$0xff] %v1998_v63  ;;  %v1951_v4 = vadd.f32 %v3029_v0, %v2917_v61  ;;  %v2919_v5 = vpop.f32.mrf.mxu0  ;;  %v2049_v61 = vld [vmem:[#allocation2 + $0x30] sm:$0xff] (%p2038_p7)  ;;  %v2051_v63 = vld [vmem:[#allocation2 + $0x80] sm:$0xff] (%p2038_p7)  ;;  %v2714_v0 = vpack.c.bf16 (%p2038_p7), %v2076_v53, %v2075_v52 }
 0x238   : > { %v2920_v6 = vadd.f32 %v2919_v5, %v2918_v1  ;;  %v3031_v7 = vpop.f32.mrf.mxu1  ;;  %v2081_v1 = vmax.f32 (%p2038_p7), %v2049_v61, 0.0  ;;  %v2053_v5 = vld [vmem:[#allocation2 + $0xe8] sm:$0xff] (%p2038_p7) }
 0x239   : > { %v1999_v8 = vadd.f32 %v1951_v4, %v1005_v2  ;;  %v3032_v9 = vadd.f32 %v3031_v7, %v3030_v3  ;;  %v2921_v10 = vpop.f32.mrf.mxu0  ;;  %v2082_v2 = vmax.f32 (%p2038_p7), %v2050_v62, 0.0  ;;  %v2052_v3 = vld [vmem:[#allocation2 + $0x88] sm:$0xff] (%p2038_p7)  ;;  %v2083_v4 = vmax.f32 (%p2038_p7), %v2051_v63, 0.0  ;;  %2715 = vst [vmem:[%s3912_s27] sm:$0xff] (%p2038_p7), %v2714_v0  }
 0x23a   : > { %v3033_v12 = vpop.f32.mrf.mxu1  ;;  %v2719_v7 = vpack.c.bf16 (%p2038_p7), %v2078_v58, %v2077_v55 }
 0x23b   : > { %2031 = vst [vmem:[#allocation2 + $0x10] sm:$0xff] %v1999_v8  ;;  %v1954_v13 = vadd.f32 %v3032_v9, %v2920_v6  ;;  %v2922_v14 = vpop.f32.mrf.mxu0  ;;  %v2054_v6 = vld [vmem:[#allocation2 + $0xb8] sm:$0xff] (%p2038_p7)  ;;  %v2724_v8 = vpack.c.bf16 (%p2038_p7), %v2080_v60, %v2079_v59  ;;  %v2084_v9 = vmax.f32 (%p2038_p7), %v2052_v3, 0.0 }
 0x23c   : > { %v2923_v15 = vadd.f32 %v2922_v14, %v2921_v10  ;;  %v3034_v16 = vpop.f32.mrf.mxu1  ;;  %v2085_v10 = vmax.f32 (%p2038_p7), %v2053_v5, 0.0  ;;  %v2729_v14 = vpack.c.bf16 (%p2038_p7), %v2082_v2, %v2081_v1  ;;  %2806 = vst [vmem:[%s3912_s27 + $0x8] sm:$0xff] (%p2038_p7), %v2719_v7  }
 0x23d   : > { %v2000_v17 = vadd.f32 %v1954_v13, %v1006_v11  ;;  %v3035_v18 = vadd.f32 %v3034_v16, %v3033_v12  ;;  %v2924_v19 = vpop.f32.mrf.mxu0  ;;  %v2055_v11 = vld [vmem:[#allocation2 + $0x60] sm:$0xff] (%p2038_p7)  ;;  %v2056_v12 = vld [vmem:[#allocation2 + $0xf0] sm:$0xff] (%p2038_p7)  ;;  %v2057_v13 = vld [vmem:[#allocation2 + $0x8] sm:$0xff] (%p2038_p7)  ;;  %2807 = vst [vmem:[%s3912_s27 + $0x10] sm:$0xff] (%p2038_p7), %v2724_v8  }
 0x23e   : > { %v3036_v21 = vpop.f32.mrf.mxu1  ;;  %v2087_v16 = vmax.f32 (%p2038_p7), %v2055_v11, 0.0  ;;  %2808 = vst [vmem:[%s3912_s27 + $0x18] sm:$0xff] (%p2038_p7), %v2729_v14  }
 0x23f   : > { %2032 = vst [vmem:[#allocation2 + $0x28] sm:$0xff] %v2000_v17  ;;  %v1959_v22 = vadd.f32 %v3035_v18, %v2923_v15  ;;  %v2925_v23 = vpop.f32.mrf.mxu0  ;;  %v2086_v15 = vmax.f32 (%p2038_p7), %v2054_v6, 0.0  ;;  %v2088_v17 = vmax.f32 (%p2038_p7), %v2056_v12, 0.0  ;;  %v2058_v18 = vld [vmem:[#allocation2 + $0x78] sm:$0xff] (%p2038_p7) }
 0x240   : > { %v2926_v24 = vadd.f32 %v2925_v23, %v2924_v19  ;;  %v3037_v25 = vpop.f32.mrf.mxu1  ;;  %v2059_v19 = vld [vmem:[#allocation2 + $0x38] sm:$0xff] (%p2038_p7)  ;;  %v2090_v23 = vmax.f32 (%p2038_p7), %v2058_v18, 0.0 }
 0x241   : > { %v2001_v26 = vadd.f32 %v1959_v22, %v1007_v20  ;;  %v3038_v27 = vadd.f32 %v3037_v25, %v3036_v21  ;;  %v2927_v28 = vpop.f32.mrf.mxu0  ;;  %v2060_v20 = vld [vmem:[#allocation2 + $0x58] sm:$0xff] (%p2038_p7)  ;;  %v2734_v21 = vpack.c.bf16 (%p2038_p7), %v2084_v9, %v2083_v4  ;;  %v2089_v22 = vmax.f32 (%p2038_p7), %v2057_v13, 0.0  ;;  %v2061_v25 = vld [vmem:[#allocation2 + $0x40] sm:$0xff] (%p2038_p7) }
 0x242   : > { %v3039_v30 = vpop.f32.mrf.mxu1 }
 0x243   : > { %2033 = vst [vmem:[#allocation2 + $0xa0] sm:$0xff] %v2001_v26  ;;  %v1962_v31 = vadd.f32 %v3038_v27, %v2926_v24  ;;  %v2928_v32 = vpop.f32.mrf.mxu0  ;;  %v2091_v24 = vmax.f32 (%p2038_p7), %v2059_v19, 0.0  ;;  %v2062_v26 = vld [vmem:[#allocation2 + $0xc8] sm:$0xff] (%p2038_p7)  ;;  %v2063_v27 = vld [vmem:[#allocation2 + $0xe0] sm:$0xff] (%p2038_p7)  ;;  %2809 = vst [vmem:[%s3912_s27 + $0x20] sm:$0xff] (%p2038_p7), %v2734_v21  }
 0x244   : > { %v2929_v34 = vadd.f32 %v2928_v32, %v2927_v28  ;;  %v3040_v35 = vpop.f32.mrf.mxu1  ;;  %v2739_v28 = vpack.c.bf16 (%p2038_p7), %v2086_v15, %v2085_v10  ;;  %v2064_v32 = vld [vmem:[#allocation2 + $0x90] sm:$0xff] (%p2038_p7) }
 0x245   : > { %v2002_v36 = vadd.f32 %v1962_v31, %v1008_v29  ;;  %v3041_v37 = vadd.f32 %v3040_v35, %v3039_v30  ;;  %v2930_v38 = vpop.f32.mrf.mxu0  ;;  %v2744_v29 = vpack.c.bf16 (%p2038_p7), %v2088_v17, %v2087_v16  ;;  %v2092_v30 = vmax.f32 (%p2038_p7), %v2060_v20, 0.0  ;;  %v2066_v35 = vld [vmem:[#allocation2 + $0xc0] sm:$0xff] (%p2038_p7) }
 0x246   : > { %v3042_v40 = vpop.f32.mrf.mxu1  ;;  %v2093_v31 = vmax.f32 (%p2038_p7), %v2061_v25, 0.0  ;;  %2810 = vst [vmem:[%s3912_s27 + $0x28] sm:$0xff] (%p2038_p7), %v2739_v28  }
 0x247   : > { %2034 = vst [vmem:[#allocation2 + $0xf8] sm:$0xff] %v2002_v36  ;;  %v1967_v41 = vadd.f32 %v3041_v37, %v2929_v34  ;;  %v2931_v42 = vpop.f32.mrf.mxu0  ;;  %v2065_v34 = vld [vmem:[#allocation2 + $0x70] sm:$0xff] (%p2038_p7)  ;;  %v2749_v36 = vpack.c.bf16 (%p2038_p7), %v2090_v23, %v2089_v22  ;;  %v2094_v37 = vmax.f32 (%p2038_p7), %v2062_v26, 0.0  ;;  %2811 = vst [vmem:[%s3912_s27 + $0x30] sm:$0xff] (%p2038_p7), %v2744_v29  }
 0x248   : > { %v2932_v43 = vadd.f32 %v2931_v42, %v2930_v38  ;;  %v3043_v44 = vpop.f32.mrf.mxu1  ;;  %v2095_v38 = vmax.f32 (%p2038_p7), %v2063_v27, 0.0  ;;  %v2069_v42 = vld [vmem:[#allocation2 + $0x10] sm:$0xff] (%p2038_p7) }
 0x249   : > { %v2003_v45 = vadd.f32 %v1967_v41, %v1009_v39  ;;  %v3044_v46 = vadd.f32 %v3043_v44, %v3042_v40  ;;  %v2096_v39 = vmax.f32 (%p2038_p7), %v2064_v32, 0.0  ;;  %v2067_v40 = vld [vmem:[#allocation2 + $0xa8] sm:$0xff] (%p2038_p7)  ;;  %v2068_v41 = vld [vmem:[#allocation2 + $0xd0] sm:$0xff] (%p2038_p7)  ;;  %v2097_v44 = vmax.f32 (%p2038_p7), %v2065_v34, 0.0  ;;  %2812 = vst [vmem:[%s3912_s27 + $0x38] sm:$0xff] (%p2038_p7), %v2749_v36  }
 0x24a   : > { %v2759_v50 = vpack.c.bf16 (%p2038_p7), %v2094_v37, %v2093_v31  ;;  %v2100_v51 = vmax.f32 (%p2038_p7), %v2068_v41, 0.0  ;;  %v2101_v52 = vmax.f32 (%p2038_p7), %v2069_v42, 0.0 }
 0x24b   : > { %2035 = vst [vmem:[#allocation2 + $0x20] sm:$0xff] %v2003_v45  ;;  %v1970_v48 = vadd.f32 %v3044_v46, %v2932_v43  ;;  %2042 = sbr.rel (!%p2038_p7) target bundleno = 604 (0x25c), region = 126  ;;  %v2754_v43 = vpack.c.bf16 (%p2038_p7), %v2092_v30, %v2091_v24  ;;  %v2098_v45 = vmax.f32 (%p2038_p7), %v2066_v35, 0.0  ;;  %v2099_v46 = vmax.f32 (%p2038_p7), %v2067_v40, 0.0 }
 0x24c   : > { %v2764_v33 = vpack.c.bf16 (%p2038_p7), %v2096_v39, %v2095_v38  ;;  %2814 = vst [vmem:[%s3912_s27 + $0x48] sm:$0xff] (%p2038_p7), %v2759_v50  }
 0x24d   : > { %v2004_v49 = vadd.f32 %v1970_v48, %v1010_v47  ;;  %v2070_v47 = vld [vmem:[#allocation2 + $0x28] sm:$0xff] (%p2038_p7)  ;;  %v2071_v48 = vld [vmem:[#allocation2 + $0xa0] sm:$0xff] (%p2038_p7)  ;;  %2813 = vst [vmem:[%s3912_s27 + $0x40] sm:$0xff] (%p2038_p7), %v2754_v43   ;;  %v2769_v55 = vpack.c.bf16 (%p2038_p7), %v2098_v45, %v2097_v44  ;;  %v2774_v59 = vpack.c.bf16 (%p2038_p7), %v2100_v51, %v2099_v46 }
 0x24e   : > { %v2102_v56 = vmax.f32 (%p2038_p7), %v2070_v47, 0.0  ;;  %v2103_v57 = vmax.f32 (%p2038_p7), %v2071_v48, 0.0  ;;  %2815 = vst [vmem:[%s3912_s27 + $0x50] sm:$0xff] (%p2038_p7), %v2764_v33  }
 0x24f   : > { %2036 = vst [vmem:[#allocation2 + $0x98] sm:$0xff] %v2004_v49  ;;  %v2072_v49 = vld [vmem:[#allocation2 + $0xf8] sm:$0xff] (%p2038_p7)  ;;  %2816 = vst [vmem:[%s3912_s27 + $0x58] sm:$0xff] (%p2038_p7), %v2769_v55  }
 0x250   : > { %v2104_v58 = vmax.f32 %v2072_v49, 0.0  ;;  %v2779_v62 = vpack.c.bf16 %v2102_v56, %v2101_v52  ;;  %2817 = vst [vmem:[%s3912_s27 + $0x60] sm:$0xff] %v2774_v59  }
 0x252   : > { %v2073_v53 = vld [vmem:[#allocation2 + $0x20] sm:$0xff]  ;;  %v2784_v63 = vpack.c.bf16 %v2104_v58, %v2103_v57  ;;  %2818 = vst [vmem:[%s3912_s27 + $0x68] sm:$0xff] %v2779_v62  }
 0x253   : > { %v2105_v60 = vmax.f32 %v2073_v53, 0.0 }
 0x254   : > { %2819 = vst [vmem:[%s3912_s27 + $0x70] sm:$0xff] %v2784_v63  }
 0x256   : > { %v2074_v54 = vld [vmem:[#allocation2 + $0x98] sm:$0xff] }
 0x257   : > { %v2106_v61 = vmax.f32 %v2074_v54, 0.0 }
 0x259   : > { %v2789_v0 = vpack.c.bf16 %v2106_v61, %v2105_v60 }
 0x25b   : > { %2820 = vst [vmem:[%s3912_s27 + $0x78] sm:$0xff] %v2789_v0  }
 0x25c PF: > { %s4208_s14 = sld [smem:[#allocation18_spill]]  ;;  %s2284_s20 = sshll.u32 %s3912_s27, 4  ;;  %s4088_s20 = int_to_ptr.vmem [resolvable:$true] %s2284_s20 }
 0x25d   : > { %s3046_s17 = scalar_select %p3656_p10, [#allocation5], [#allocation13] }
 0x25e   : > { %s4209_s28 = sld [smem:[#allocation29_spill]]  ;;  %s4210_s5 = sand.u32 1, %s3432_s10  }
 0x25f   : > { %s4098_s22 = scalar_lea.sflag [#allocation12], %s4210_s5  ;;  %s3346_s11 = scalar_lea.vmem %s4088_s20, 2048 }
 0x260   : > { %p3347_p8 = scmp.ne.s32.totalorder %s4088_s20, %s3346_s11  ;;  %s3479_s23 = smov [#allocation11]  }
 0x261   : > { %s3350_s19 = sshll.u32 %s3479_s23, 4  ;;  %s3351_s19 = int_to_ptr.vmem [resolvable:$false] %s3350_s19 }
 0x262   : > { %s4232_s14 = smov (!%p3656_p10, %s4208_s14), 0  ;;  %p3348_p9 = pnand %p3347_p8, %p3656_p10 }
 0x263   : > { %s2275_s0 = sld [smem:[%s3046_s17 + %s4232_s14]]  ;;  %s3352_s21 = scalar_lea.vmem %s3351_s19, 4096 }
 0x264   : > { %p3349_p12 = pneg %p3348_p9  ;;  %p3353_p13 = scmp.lt.s32.totalorder %s4088_s20, %s3351_s19 }
 0x265   : > { %p3354_p0 = scmp.lt.s32.totalorder %s3352_s21, %s3346_s11 }
 0x267   : > { %p3355_p1 = por %p3354_p0, %p3353_p13 }
 0x269   : > { %s2609_s26 = sshll.u32 %s2275_s0, 6  ;;  %p3356_p2 = pnand %p3355_p1, %p3349_p12 }
 0x26a   : > { %s2281_s8 = sadd.s32 %s2609_s26, %s3890_s15 }
 0x26b   : > { %s2610_s7 = sshll.u32 %s2281_s8, 6 }
 0x26c   : > { %s4094_s29 = scalar_lea.hbm %s4209_s28, %s2610_s7 }
 0x26d   : > { %3359 = shalt.err (!%p3356_p2)
}
 0x26e   : > { %s3360_s15 = scalar_lea.hbm %s4094_s29, 2048  ;;  %s3364_s6 = scalar_lea.hbm %s4209_s28, 8192 }
 0x26f   : > { %p3361_p3 = scmp.ne.s32.totalorder %s4094_s29, %s3360_s15  ;;  %p3365_p6 = scmp.lt.s32.totalorder %s4094_s29, %s4209_s28 }
 0x270   : > { %p3366_p7 = scmp.lt.s32.totalorder %s3364_s6, %s3360_s15 }
 0x271   : > { %p3362_p4 = pnand %p3361_p3, %p3656_p10 }
 0x272   : > { %p3367_p8 = por %p3366_p7, %p3365_p6 }
 0x273   : > { %p3363_p5 = pneg %p3362_p4 }
 0x275   : > { %p3368_p9 = pnand %p3367_p8, %p3363_p5 }
 0x277   : > { %3371 = shalt.err (!%p3368_p9)
}
 0x278   : > { %s3480_s17 = smov 64   ;;  %s3481_s0 = smov 4  }
 0x279   : > { %3048 = dma.vmem_to_hbm [thread:$0]  (%p3656_p10), %s4088_s20, 2048, %s4094_s29, %s4098_s22, %s3480_s17, %s3480_s17, %s3481_s0  }
 0x27a PF: > { %p3054_p12 = scmp.ge.s32.totalorder %s3472_s1, 2  ;;  %s2299_s26 = sand.u32 1, %s3428_s30  }
 0x27b   : > { %s2300_s8 = scalar_lea.sflag [#allocation12], %s2299_s26 }
 0x27c   : > { %p3051_p13 = pnand %p3054_p12, %p3660_p11 }
 0x27e   : > { %p3052_p0 = pneg %p3051_p13 }
 0x280   : > { %3423 = dma.done.wait (%p3052_p0), %s2300_s8, 2048  }
 0x281   : > { %3425 = vsyncadd (%p3052_p0), %s2300_s8, 4294965248  ;;  %s44_s1 = sadd.s32 1, %s3472_s1   ;;  %s4211_s13 = sld [smem:[#allocation17_spill]] }
 0x282   : > { %p41_p1 = scmp.ge.s32.totalorder %s44_s1, 14   ;;  %s4212_s14 = sld [smem:[#allocation24_spill]] }
 0x283   : > { %s4213_s15 = sld [smem:[#allocation20_spill]]  ;;  %s4217_s30 = smov %s3432_s10 }
 0x284   : > { %s4214_s25 = sld [smem:[#allocation21_spill]]  ;;  %s4218_s10 = smov %s3436_s4 }
 0x285   : > { %s4215_s17 = sld [smem:[#allocation22_spill]]  ;;  %s4219_s4 = smov %s3665_s16 }
 0x286   : > { %s4216_s0 = sld [smem:[#allocation23_spill]]  ;;  %s4220_s11 = smov %s3444_s12 }
 0x287   : > { %s4221_s12 = smov %s3654_s18  ;;  %43 = sbr.rel (!%p41_p1) target bundleno = 66 (0x42), region = 180 }
 0x28a   : > { %s4222_s16 = smov %s4214_s25 }
 0x28c   :  { %2305 = vsyncpa [#allocation12], 1 }
 0x28d   :  { %2307 = vsyncpa [#allocation12 + $0x1], 1 }

// kernel: hetero_gnn_forward.5
= control target key start
LH: loop header
LB: loop body
LE: loop exit
PB: predicated region body
PF: predicated region fallthrough
CT: control target
= control target key end

     0   :  { %s2887_s0 = inlined_call_operand.hbm [shape: bf16[2,512,512], index: 0, kind: input, shape index: {}]   ;;  %s2888_s1 = inlined_call_operand.hbm [shape: bf16[2,512,128], index: 1, kind: input, shape index: {}]   ;;  %s2889_s2 = inlined_call_operand.hbm [shape: f32[2,1,128], index: 2, kind: input, shape index: {}]   ;;  %s2890_s3 = inlined_call_operand.vmem [shape: bf16[2,512,128], index: 3, kind: output, shape index: {}]  }
   0x1   :  { %2902 = sst [smem:[#allocation15_spill]] %s2888_s1 }
   0x2   :  { %2903 = sst [smem:[#allocation16_spill]] %s2890_s3 }
   0x3   :  { %8 = vsyncpa [#allocation3], 0 }
   0x4   :  { %10 = vsyncpa [#allocation3 + $0x1], 0 }
   0x5   :  { %11 = vsyncpa [#allocation5], 0 }
   0x6   :  { %13 = vsyncpa [#allocation5 + $0x1], 0  ;;  %s2506_s12 = smov 0   ;;  %s2508_s13 = smov 0  }
   0x7   :  { %s2510_s14 = smov 0   ;;  %s2512_s15 = smov 0  }
   0x8   :  { %s2514_s16 = smov 0   ;;  %s2516_s17 = smov 0  }
   0x9   :  { %s2518_s18 = smov 0   ;;  %s2520_s19 = smov 0  }
   0xa   :  { %s2522_s20 = smov 0   ;;  %s2524_s21 = smov 0  }
   0xb   :  { %s2526_s22 = smov 0  }
   0xc LB: > { %2904 = sst [smem:[#allocation9_spill]] %s2441_s13  ;;  %s2891_s23 = sadd.s32 4294967295, %s2477_s22   ;;  %s2477_s22 = sphi %s2526_s22, %s19_s22   ;;  %s2473_s21 = sphi %s2524_s21, %s2936_s21   ;;  %s2469_s20 = sphi %s2522_s20, %s2929_s20   ;;  %s2465_s19 = sphi %s2520_s19, %s2935_s19   ;;  %s2461_s18 = sphi %s2518_s18, %s2928_s18   ;;  %s2457_s17 = sphi %s2516_s17, %s2934_s17   ;;  %s2453_s16 = sphi %s2514_s16, %s2933_s16   ;;  %s2449_s15 = sphi %s2512_s15, %s2932_s15   ;;  %s2445_s14 = sphi %s2510_s14, %s2931_s14   ;;  %s2441_s13 = sphi %s2508_s13, %s2930_s13   ;;  %s2437_s12 = sphi %s2506_s12, %s2927_s12  }
   0xd   : > { %2905 = sst [smem:[#allocation10_spill]] %s2461_s18  ;;  %p48_p0 = scmp.eq.s32.totalorder %s2477_s22, 0 }
   0xe   : > { %2906 = sst [smem:[#allocation11_spill]] %s2465_s19  ;;  %p2563_p1 = scmp.eq.s32.totalorder %s2891_s23, 0 }
   0xf   : > { %2907 = sst [smem:[#allocation12_spill]] %s2469_s20  ;;  %s66_s25 = sadd.s32 1, %s2445_s14 }
  0x10   : > { %p73_p2 = scmp.ne.s32.totalorder %s2445_s14, %s2441_s13  ;;  %p79_p3 = scmp.ne.s32.totalorder %s2441_s13, %s2437_s12 }
  0x11   : > { %p2078_p4 = scmp.lt.s32.totalorder %s2477_s22, 4  ;;  %s181_s27 = sand.u32 1, %s2477_s22  }
  0x12   : > { %p75_p5 = por %p73_p2, %p48_p0  ;;  %p2576_p6 = por %p79_p3, %p2563_p1 }
  0x13   : > { %s2892_s28 = sand.u32 1, %s2445_s14   ;;  %s1710_s30 = sshll.u32 %s2473_s21, 12 }
  0x14   : > { %s2909_s26 = scalar_select %p2576_p6, 1, 0 }
  0x15   : > { %s1568_s29 = sshll.u32 %s2892_s28, 8  ;;  %s2911_s1 = sld [smem:[#allocation15_spill]] }
  0x16   : > { %2910 = sst [smem:[#allocation13_spill]] %s2909_s26  ;;  %s185_s7 = scalar_lea.vmem [#allocation4], %s1568_s29 }
  0x17   : > { %s192_s8 = sshll.u32 %s185_s7, 4  ;;  %p2590_p7 = pnand %p2078_p4, %p75_p5  ;;  %s193_s8 = int_to_ptr.vmem [resolvable:$true] %s192_s8 }
  0x18   : > { %p1572_p8 = scmp.ge.s32.totalorder %s2477_s22, 1  ;;  %s2595_s10 = scalar_lea.sflag [#allocation5], %s181_s27 }
  0x19   : > { %p2900_p9 = pneg %p2590_p7  ;;  %s2312_s11 = scalar_lea.vmem %s193_s8, 4096 }
  0x1a   : > { %p2313_p10 = scmp.ne.s32.totalorder %s193_s8, %s2312_s11  ;;  %s2479_s12 = smov [#allocation4]  }
  0x1b   : > { %s191_s6 = scalar_lea.hbm %s2911_s1, %s1710_s30  ;;  %s2317_s29 = sshll.u32 %s2479_s12, 4  ;;  %s2318_s29 = int_to_ptr.vmem [resolvable:$false] %s2317_s29 }
  0x1c   : > { %p2315_p11 = pnand %p2313_p10, %p2900_p9  ;;  %s2319_s30 = scalar_lea.vmem %s2318_s29, 8192 }
  0x1d   : > { %p2320_p13 = scmp.lt.s32.totalorder %s193_s8, %s2318_s29  ;;  %p2321_p2 = scmp.lt.s32.totalorder %s2319_s30, %s2312_s11 }
  0x1e   : > { %p2316_p12 = pneg %p2315_p11 }
  0x1f   : > { %p2322_p3 = por %p2321_p2, %p2320_p13 }
  0x21   : > { %p2323_p5 = pnand %p2322_p3, %p2316_p12 }
  0x23   : > { %2326 = shalt.err (!%p2323_p5)
}
  0x24   : > { %s2480_s4 = smov 64   ;;  %s2481_s27 = smov 4  }
  0x25   : > { %2074 = dma.hbm_to_vmem [thread:$0]  (!%p2590_p7), %s191_s6, 4096, %s193_s8, %s2595_s10, %s2480_s4, %s2480_s4, %s2481_s27  }
  0x26   : > { %p217_p10 = scmp.lt.s32.totalorder %s2477_s22, 5  ;;  %s28_s7 = sadd.s32 1, %s2469_s20 }
  0x27   : > { %s31_s11 = sadd.s32 1, %s2473_s21  ;;  %p29_p12 = scmp.ge.s32.totalorder %s28_s7, 2 }
  0x28   : > { %p2608_p11 = pnand %p1572_p8, %p217_p10  ;;  %s40_s12 = sadd.s32 1, %s2457_s17 }
  0x29   : > { %p47_p13 = scmp.ne.s32.totalorder %s2457_s17, %s2453_s16  ;;  %p53_p2 = scmp.ne.s32.totalorder %s2453_s16, %s2449_s15 }
  0x2a   : > { %s2938_s7 = smov (%p29_p12, %s28_s7), 0  ;;  %s2940_s11 = smov (!%p29_p12, %s31_s11), %s2473_s21 }
  0x2b   : > { %2914 = sst [smem:[#allocation14_spill]] %s2938_s7  ;;  %s36_s6 = ssub.s32 %s2469_s20, %s2938_s7 }
  0x2c   : > { %p2626_p8 = por %p48_p0, %p47_p13  ;;  %p33_p3 = scmp.ge.s32.totalorder %s2940_s11, 2 }
  0x2d   : > { %p2632_p5 = por %p2563_p1, %p53_p2  ;;  %s157_s15 = sand.u32 1, %s2457_s17  }
  0x2e   : > { %s1709_s30 = sshll.u32 %s2469_s20, 7  ;;  %s2942_s11 = smov (%p33_p3, %s2940_s11), 0 }
  0x2f   : > { %s1563_s4 = sshll.u32 %s157_s15, 9  ;;  %s35_s27 = ssub.s32 %s2473_s21, %s2942_s11 }
  0x30   : > { %s37_s23 = sor.u32 %s36_s6, %s35_s27  ;;  %p64_p0 = scmp.eq.s32.totalorder %s35_s27, 0 }
  0x31   : > { %p38_p10 = scmp.eq.s32.totalorder %s37_s23, 0  ;;  %s1566_s28 = sshll.u32 %s2473_s21, 8 }
  0x32   : > { %s2646_s1 = scalar_select %p64_p0, %s2445_s14, %s66_s25  }
  0x33   : > { %s2649_s24 = scalar_select %p38_p10, %s2457_s17, %s40_s12  }
  0x34   : > { %s168_s7 = sadd.s32 %s1709_s30, %s1566_s28  ;;  %s161_s3 = scalar_lea.vmem [#allocation2], %s1563_s4 }
  0x35   : > { %s171_s19 = sshll.u32 %s161_s3, 4  ;;  %s1567_s20 = sshll.u32 %s168_s7, 6  ;;  %s172_s19 = int_to_ptr.vmem [resolvable:$true] %s171_s19 }
  0x36   : > { %s170_s13 = scalar_lea.hbm %s2887_s0, %s1567_s20  ;;  %p2658_p1 = pnand %p2078_p4, %p2626_p8 }
  0x37   : > { %s158_s23 = scalar_lea.sflag [#allocation3], %s157_s15  ;;  %s2340_s25 = scalar_lea.vmem %s172_s19, 8192 }
  0x38   : > { %p2329_p12 = pneg %p2658_p1  ;;  %p2341_p13 = scmp.ne.s32.totalorder %s172_s19, %s2340_s25 }
  0x39   : > { %s2482_s3 = smov [#allocation2]  }
  0x3a   : > { %p2343_p2 = pnand %p2341_p13, %p2329_p12  ;;  %s2345_s28 = sshll.u32 %s2482_s3, 4  ;;  %s2346_s28 = int_to_ptr.vmem [resolvable:$false] %s2345_s28 }
  0x3b   : > { %s2347_s7 = scalar_lea.vmem %s2346_s28, 16384  ;;  %p2348_p0 = scmp.lt.s32.totalorder %s172_s19, %s2346_s28 }
  0x3c   : > { %p2344_p3 = pneg %p2343_p2  ;;  %p2349_p10 = scmp.lt.s32.totalorder %s2347_s7, %s2340_s25 }
  0x3e   : > { %p2350_p9 = por %p2349_p10, %p2348_p0 }
  0x40   : > { %p2351_p6 = pnand %p2350_p9, %p2344_p3 }
  0x42   : > { %2354 = shalt.err (!%p2351_p6)
}
  0x43   : > { %s2483_s18 = smov 256   ;;  %s2484_s20 = smov 16  }
  0x44   : > { %2071 = dma.hbm_to_vmem [thread:$0]  (!%p2658_p1), %s170_s13, 8192, %s172_s19, %s158_s23, %s2483_s18, %s2483_s18, %s2484_s20  }
  0x45   : > { %s1571_s26 = sshll.u32 %s2473_s21, 4  ;;  %s2918_s12 = sand.u32 1, %s2445_s14  }
  0x46   : > { %s205_s8 = scalar_lea.vmem [#allocation6], %s2918_s12  ;;  %s210_s27 = scalar_lea.hbm %s2889_s2, %s1571_s26 }
  0x47   : > { %s212_s15 = sshll.u32 %s205_s8, 4  ;;  %p2919_p6 = pneg %p2590_p7  ;;  %s213_s15 = int_to_ptr.vmem [resolvable:$true] %s212_s15 }
  0x48   : > { %s2368_s25 = scalar_lea.vmem %s213_s15, 16  ;;  %s2485_s3 = smov [#allocation6]  }
  0x49   : > { %p2369_p4 = scmp.ne.s32.totalorder %s213_s15, %s2368_s25  ;;  %s2373_s28 = sshll.u32 %s2485_s3, 4  ;;  %s2374_s28 = int_to_ptr.vmem [resolvable:$false] %s2373_s28 }
  0x4a   : > { %s2375_s6 = scalar_lea.vmem %s2374_s28, 32  ;;  %p2376_p1 = scmp.lt.s32.totalorder %s213_s15, %s2374_s28 }
  0x4b   : > { %p2371_p9 = pnand %p2369_p4, %p2919_p6  ;;  %p2377_p12 = scmp.lt.s32.totalorder %s2375_s6, %s2368_s25 }
  0x4d   : > { %p2372_p8 = pneg %p2371_p9  ;;  %p2378_p13 = por %p2377_p12, %p2376_p1 }
  0x4f   : > { %p2379_p2 = pnand %p2378_p13, %p2372_p8 }
  0x51   : > { %2382 = shalt.err (!%p2379_p2)
}
  0x52   : > { %2077 = dma.hbm_to_vmem [thread:$0]  (!%p2590_p7), %s210_s27, 16, %s213_s15, %s2595_s10  }
  0x53   : > { %221 = sbr.rel (%p2608_p11) target bundleno = 461 (0x1cd), region = 32  ;;  %s223_s13 = sand.u32 (!%p2608_p11), 1, %s2453_s16  }
  0x54   : > { %s1573_s19 = sshll.u32 (!%p2608_p11), %s223_s13, 9  ;;  %s224_s23 = scalar_lea.sflag (!%p2608_p11), [#allocation3], %s223_s13 }
  0x55   : > { %s2681_s7 = scalar_lea.vmem (!%p2608_p11), [#allocation2], %s1573_s19 }
  0x58   : > { %2428 = dma.done.wait (%p2632_p5), %s224_s23, 8192  }
  0x59   : > { %2430 = vsyncadd (%p2632_p5), %s224_s23, 4294959104  ;;  %s2920_s18 = sadd.s32 4294967295, %s2477_s22   ;;  %s2921_s9 = sld [smem:[#allocation9_spill]] }
  0x5a   : > { %s2922_s10 = sld [smem:[#allocation13_spill]]  ;;  %s232_s20 = sand.u32 1, %s2920_s18  }
  0x5b   : > { %s233_s12 = scalar_lea.sflag [#allocation5], %s232_s20 }
  0x5f   : > { %s234_s5 = sand.u32 1, %s2921_s9  }
  0x60   : > { %s1574_s26 = sshll.u32 %s234_s5, 8  ;;  %p2923_p7 = scmp.ne.s32.totalorder %s2922_s10, 0 }
  0x61   : > { %s2692_s8 = scalar_lea.vmem [#allocation4], %s1574_s26 }
  0x62   : > { %2432 = dma.done.wait (%p2923_p7), %s233_s12, 4112  }
  0x63   : > { %2434 = vsyncadd (%p2923_p7), %s233_s12, 4294963184  ;;  %v2171_v0 = vld [vmem:[%s2692_s8 + $0x78] sm:$0xff]   ;;  %v2175_v4 = vld [vmem:[%s2692_s8 + $0x70] sm:$0xff]   ;;  %s2924_s29 = sld [smem:[#allocation10_spill]]  ;;  %s244_s27 = scalar_lea.vmem [#allocation6], %s234_s5 }
  0x64   : > { %v2172_v1 = vld [vmem:[%s2692_s8 + $0xf8] sm:$0xff]   ;;  %1838 = vmatprep.subr.bf16.mxu0 %v2171_v0  ;;  %v2176_v5 = vld [vmem:[%s2692_s8 + $0xf0] sm:$0xff]   ;;  %v2179_v8 = vld [vmem:[%s2692_s8 + $0x68] sm:$0xff]   ;;  %s2925_s15 = sld [smem:[#allocation11_spill]] }
  0x65   : > { %v2173_v2 = vld [vmem:[%s2692_s8 + $0x38] sm:$0xff]   ;;  %1950 = vmatprep.subr.bf16.mxu1 %v2172_v1  ;;  %v2177_v6 = vld [vmem:[%s2692_s8 + $0x30] sm:$0xff]   ;;  %v2180_v9 = vld [vmem:[%s2692_s8 + $0xe8] sm:$0xff]   ;;  %s2926_s13 = sld [smem:[#allocation16_spill]] }
  0x66   : > { %v2174_v3 = vld [vmem:[%s2692_s8 + $0xb8] sm:$0xff]   ;;  %1839 = vmatpush3.bf16.msra.mxu0 %v2173_v2  ;;  %v2178_v7 = vld [vmem:[%s2692_s8 + $0xb0] sm:$0xff]   ;;  %v2181_v10 = vld [vmem:[%s2692_s8 + $0x28] sm:$0xff]  }
  0x67   : > { %1951 = vmatpush3.bf16.msra.mxu1 %v2174_v3  ;;  %1840 = vmatprep.subr.bf16.mxu0 %v2175_v4  ;;  %v2182_v11 = vld [vmem:[%s2692_s8 + $0xa8] sm:$0xff]   ;;  %v2183_v12 = vld [vmem:[%s2692_s8 + $0x60] sm:$0xff]   ;;  %v2187_v16 = vld [vmem:[%s2692_s8 + $0x58] sm:$0xff]  }
  0x68   : > { %1952 = vmatprep.subr.bf16.mxu1 %v2176_v5  ;;  %v2184_v13 = vld [vmem:[%s2692_s8 + $0xe0] sm:$0xff]   ;;  %v2188_v17 = vld [vmem:[%s2692_s8 + $0xd8] sm:$0xff]   ;;  %v2191_v20 = vld [vmem:[%s2692_s8 + $0x50] sm:$0xff]  }
  0x69   : > { %v2185_v14 = vld [vmem:[%s2692_s8 + $0x20] sm:$0xff]   ;;  %v2189_v18 = vld [vmem:[%s2692_s8 + $0x18] sm:$0xff]   ;;  %v2192_v21 = vld [vmem:[%s2692_s8 + $0xd0] sm:$0xff]   ;;  %s1575_s30 = sshll.u32 %s2924_s29, 5 }
  0x6a   : > { %1841 = vmatpush3.bf16.msra.mxu0 %v2177_v6  ;;  %v2186_v15 = vld [vmem:[%s2692_s8 + $0xa0] sm:$0xff]   ;;  %v2190_v19 = vld [vmem:[%s2692_s8 + $0x98] sm:$0xff]   ;;  %v2193_v22 = vld [vmem:[%s2692_s8 + $0x10] sm:$0xff]   ;;  %p282_p11 = scmp.lt.s32.totalorder %s2925_s15, 1  ;;  %p284_p5 = scmp.lt.s32.totalorder %s1575_s30, 63 }
  0x6b   : > { %1953 = vmatpush3.bf16.msra.mxu1 %v2178_v7  ;;  %1842 = vmatprep.subr.bf16.mxu0 %v2179_v8  ;;  %v2194_v23 = vld [vmem:[%s2692_s8 + $0x90] sm:$0xff]   ;;  %v2195_v24 = vld [vmem:[%s2692_s8 + $0x48] sm:$0xff]   ;;  %v2199_v28 = vld [vmem:[%s2692_s8 + $0x40] sm:$0xff]  }
  0x6c   : > { %1954 = vmatprep.subr.bf16.mxu1 %v2180_v9  ;;  %v2196_v25 = vld [vmem:[%s2692_s8 + $0xc8] sm:$0xff]   ;;  %v2200_v29 = vld [vmem:[%s2692_s8 + $0xc0] sm:$0xff]   ;;  %s2944_s15 = smov (!%p282_p11, %s2925_s15), 1  ;;  %s2946_s30 = smov (!%p284_p5, %s1575_s30), 63 }
  0x6d   : > { %v2197_v26 = vld [vmem:[%s2692_s8 + $0x8] sm:$0xff]   ;;  %v2201_v30 = vld [vmem:[%s2692_s8] sm:$0xff]   ;;  %s1576_s4 = sshll.u32 %s2944_s15, 6 }
  0x6e   : > { %1843 = vmatpush3.bf16.msra.mxu0 %v2181_v10  ;;  %v2198_v27 = vld [vmem:[%s2692_s8 + $0x88] sm:$0xff]   ;;  %v2202_v31 = vld [vmem:[%s2692_s8 + $0x80] sm:$0xff]   ;;  %s287_s25 = sadd.s32 %s1576_s4, %s2946_s30 }
  0x6f   : > { %1955 = vmatpush3.bf16.msra.mxu1 %v2182_v11  ;;  %1844 = vmatprep.subr.bf16.mxu0 %v2183_v12  ;;  %v2203_v32 = vld [vmem:[%s2681_s7] ss:$16 sps:$4 sm:$0xff]   ;;  %v2205_v33 = vld [vmem:[%s2681_s7 + $0x4] ss:$16 sps:$4 sm:$0xff]   ;;  %v2206_v34 = vld [vmem:[%s2681_s7 + $0x8] ss:$16 sps:$4 sm:$0xff]  }
  0x70   : > { %1956 = vmatprep.subr.bf16.mxu1 %v2184_v13  ;;  %v2208_v35 = vld [vmem:[%s2681_s7 + $0xc] ss:$16 sps:$4 sm:$0xff]   ;;  %971 = vmatprep.mubr.bf16.mxu0 %v2205_v33  ;;  %v2209_v36 = vld [vmem:[%s2681_s7 + $0x24] ss:$16 sps:$4 sm:$0xff]   ;;  %v2213_v38 = vld [vmem:[%s2681_s7 + $0x20] ss:$16 sps:$4 sm:$0xff]  }
  0x71   : > { %1132 = vmatprep.mubr.bf16.mxu1 %v2208_v35  ;;  %v2211_v37 = vld [vmem:[%s2681_s7 + $0x2c] ss:$16 sps:$4 sm:$0xff]   ;;  %v2214_v39 = vld [vmem:[%s2681_s7 + $0x28] ss:$16 sps:$4 sm:$0xff]   ;;  %v2215_v40 = vld [vmem:[%s2681_s7 + $0x44] ss:$16 sps:$4 sm:$0xff]  }
  0x72   : > { %1845 = vmatpush3.bf16.msra.mxu0 %v2185_v14  ;;  %v2217_v41 = vld [vmem:[%s2681_s7 + $0x4c] ss:$16 sps:$4 sm:$0xff]   ;;  %v2219_v42 = vld [vmem:[%s2681_s7 + $0x40] ss:$16 sps:$4 sm:$0xff]   ;;  %v2220_v43 = vld [vmem:[%s2681_s7 + $0x48] ss:$16 sps:$4 sm:$0xff]  }
  0x73   : > { %1957 = vmatpush3.bf16.msra.mxu1 %v2186_v15  ;;  %1846 = vmatprep.subr.bf16.mxu0 %v2187_v16  ;;  %v2221_v44 = vld [vmem:[%s2681_s7 + $0x64] ss:$16 sps:$4 sm:$0xff]   ;;  %v2223_v45 = vld [vmem:[%s2681_s7 + $0x6c] ss:$16 sps:$4 sm:$0xff]   ;;  %v2225_v46 = vld [vmem:[%s2681_s7 + $0x60] ss:$16 sps:$4 sm:$0xff]  }
  0x74   : > { %1958 = vmatprep.subr.bf16.mxu1 %v2188_v17  ;;  %v2226_v47 = vld [vmem:[%s2681_s7 + $0x68] ss:$16 sps:$4 sm:$0xff]   ;;  %v2227_v48 = vld [vmem:[%s2681_s7 + $0x84] ss:$16 sps:$4 sm:$0xff]   ;;  %v2229_v49 = vld [vmem:[%s2681_s7 + $0x8c] ss:$16 sps:$4 sm:$0xff]  }
  0x75   : > { %v2231_v50 = vld [vmem:[%s2681_s7 + $0x80] ss:$16 sps:$4 sm:$0xff]   ;;  %v2232_v51 = vld [vmem:[%s2681_s7 + $0x88] ss:$16 sps:$4 sm:$0xff]   ;;  %v2233_v52 = vld [vmem:[%s2681_s7 + $0xa4] ss:$16 sps:$4 sm:$0xff]  }
  0x76   : > { %1847 = vmatpush3.bf16.msra.mxu0 %v2189_v18  ;;  %v2235_v53 = vld [vmem:[%s2681_s7 + $0xac] ss:$16 sps:$4 sm:$0xff]   ;;  %v2237_v54 = vld [vmem:[%s2681_s7 + $0xa0] ss:$16 sps:$4 sm:$0xff]   ;;  %v2238_v55 = vld [vmem:[%s2681_s7 + $0xa8] ss:$16 sps:$4 sm:$0xff]  }
  0x77   : > { %1959 = vmatpush3.bf16.msra.mxu1 %v2190_v19  ;;  %1848 = vmatprep.subr.bf16.mxu0 %v2191_v20  ;;  %v2239_v56 = vld [vmem:[%s2681_s7 + $0xc4] ss:$16 sps:$4 sm:$0xff]   ;;  %v2241_v57 = vld [vmem:[%s2681_s7 + $0xcc] ss:$16 sps:$4 sm:$0xff]   ;;  %v2243_v58 = vld [vmem:[%s2681_s7 + $0xc0] ss:$16 sps:$4 sm:$0xff]  }
  0x78   : > { %1960 = vmatprep.subr.bf16.mxu1 %v2192_v21  ;;  %v2244_v59 = vld [vmem:[%s2681_s7 + $0xc8] ss:$16 sps:$4 sm:$0xff]   ;;  %v2245_v60 = vld [vmem:[%s2681_s7 + $0xe4] ss:$16 sps:$4 sm:$0xff]   ;;  %v2247_v61 = vld [vmem:[%s2681_s7 + $0xec] ss:$16 sps:$4 sm:$0xff]  }
  0x79   : > { %v2249_v62 = vld [vmem:[%s2681_s7 + $0xe0] ss:$16 sps:$4 sm:$0xff]   ;;  %v2250_v63 = vld [vmem:[%s2681_s7 + $0xe8] ss:$16 sps:$4 sm:$0xff]   ;;  %v2251_v0 = vld [vmem:[%s2681_s7 + $0x104] ss:$16 sps:$4 sm:$0xff]  }
  0x7a   : > { %1849 = vmatpush3.bf16.msra.mxu0 %v2193_v22  ;;  %v2253_v1 = vld [vmem:[%s2681_s7 + $0x10c] ss:$16 sps:$4 sm:$0xff]   ;;  %v2255_v2 = vld [vmem:[%s2681_s7 + $0x100] ss:$16 sps:$4 sm:$0xff]   ;;  %v2256_v3 = vld [vmem:[%s2681_s7 + $0x108] ss:$16 sps:$4 sm:$0xff]  }
  0x7b   : > { %1961 = vmatpush3.bf16.msra.mxu1 %v2194_v23  ;;  %1850 = vmatprep.subr.bf16.mxu0 %v2195_v24  ;;  %v2257_v4 = vld [vmem:[%s2681_s7 + $0x124] ss:$16 sps:$4 sm:$0xff]   ;;  %v2259_v5 = vld [vmem:[%s2681_s7 + $0x12c] ss:$16 sps:$4 sm:$0xff]   ;;  %v2261_v6 = vld [vmem:[%s2681_s7 + $0x120] ss:$16 sps:$4 sm:$0xff]  }
  0x7c   : > { %1962 = vmatprep.subr.bf16.mxu1 %v2196_v25  ;;  %v2262_v7 = vld [vmem:[%s2681_s7 + $0x128] ss:$16 sps:$4 sm:$0xff]   ;;  %v2263_v8 = vld [vmem:[%s2681_s7 + $0x144] ss:$16 sps:$4 sm:$0xff]   ;;  %v2265_v9 = vld [vmem:[%s2681_s7 + $0x14c] ss:$16 sps:$4 sm:$0xff]  }
  0x7d   : > { %v2267_v10 = vld [vmem:[%s2681_s7 + $0x140] ss:$16 sps:$4 sm:$0xff]   ;;  %v2268_v11 = vld [vmem:[%s2681_s7 + $0x148] ss:$16 sps:$4 sm:$0xff]   ;;  %v2269_v12 = vld [vmem:[%s2681_s7 + $0x164] ss:$16 sps:$4 sm:$0xff]  }
  0x7e   : > { %1851 = vmatpush3.bf16.msra.mxu0 %v2197_v26  ;;  %v2271_v13 = vld [vmem:[%s2681_s7 + $0x16c] ss:$16 sps:$4 sm:$0xff]   ;;  %v2273_v14 = vld [vmem:[%s2681_s7 + $0x160] ss:$16 sps:$4 sm:$0xff]   ;;  %v2274_v15 = vld [vmem:[%s2681_s7 + $0x168] ss:$16 sps:$4 sm:$0xff]  }
  0x7f   : > { %1963 = vmatpush3.bf16.msra.mxu1 %v2198_v27  ;;  %1852 = vmatprep.subr.bf16.mxu0 %v2199_v28  ;;  %v2275_v16 = vld [vmem:[%s2681_s7 + $0x184] ss:$16 sps:$4 sm:$0xff]   ;;  %v2277_v17 = vld [vmem:[%s2681_s7 + $0x18c] ss:$16 sps:$4 sm:$0xff]   ;;  %v2279_v18 = vld [vmem:[%s2681_s7 + $0x180] ss:$16 sps:$4 sm:$0xff]  }
  0x80   : > { %1964 = vmatprep.subr.bf16.mxu1 %v2200_v29  ;;  %v2280_v19 = vld [vmem:[%s2681_s7 + $0x188] ss:$16 sps:$4 sm:$0xff]   ;;  %v2281_v20 = vld [vmem:[%s2681_s7 + $0x1a4] ss:$16 sps:$4 sm:$0xff]   ;;  %v2283_v21 = vld [vmem:[%s2681_s7 + $0x1ac] ss:$16 sps:$4 sm:$0xff]  }
  0x81   : > { %v2285_v22 = vld [vmem:[%s2681_s7 + $0x1a0] ss:$16 sps:$4 sm:$0xff]   ;;  %v2286_v23 = vld [vmem:[%s2681_s7 + $0x1a8] ss:$16 sps:$4 sm:$0xff]   ;;  %v2287_v24 = vld [vmem:[%s2681_s7 + $0x1c4] ss:$16 sps:$4 sm:$0xff]  }
  0x82   : > { %1853 = vmatpush3.bf16.msra.mxu0 %v2201_v30  ;;  %v2289_v25 = vld [vmem:[%s2681_s7 + $0x1cc] ss:$16 sps:$4 sm:$0xff]   ;;  %v2291_v26 = vld [vmem:[%s2681_s7 + $0x1c0] ss:$16 sps:$4 sm:$0xff]   ;;  %v2292_v27 = vld [vmem:[%s2681_s7 + $0x1c8] ss:$16 sps:$4 sm:$0xff]  }
  0x83   : > { %1965 = vmatpush3.bf16.msra.mxu1 %v2202_v31  ;;  %v2293_v28 = vld [vmem:[%s2681_s7 + $0x1e4] ss:$16 sps:$4 sm:$0xff]   ;;  %v2295_v29 = vld [vmem:[%s2681_s7 + $0x1ec] ss:$16 sps:$4 sm:$0xff]   ;;  %v2297_v30 = vld [vmem:[%s2681_s7 + $0x1e0] ss:$16 sps:$4 sm:$0xff]  }
  0x84   : > { %v2298_v31 = vld [vmem:[%s2681_s7 + $0x1e8] ss:$16 sps:$4 sm:$0xff]   ;;  %s1577_s3 = sshll.u32 %s287_s25, 2 }
  0x85   : > { %972 = vmatmul.mubr.bf16.vlgmr.msra.gmra.mxu0 %v2203_v32  ;;  %s2806_s19 = scalar_lea.vmem %s2926_s13, %s1577_s3 }
  0x86   : > { %1133 = vmatmul.mubr.bf16.vlgmr.msra.gmra.mxu1 %v2206_v34  ;;  %979 = vmatprep.mubr.bf16.mxu0 %v2209_v36 }
  0x87   : > { %1140 = vmatprep.mubr.bf16.mxu1 %v2211_v37  ;;  %v2799_v37 = vld [vmem:[%s244_s27] ss:$0 sm:$0xff] }
  0x8d   : > { %980 = vmatmul.mubr.bf16.gmra.mxu0 %v2213_v38 }
  0x8e   : > { %1141 = vmatmul.mubr.bf16.gmra.mxu1 %v2214_v39  ;;  %987 = vmatprep.mubr.bf16.mxu0 %v2215_v40 }
  0x8f   : > { %1148 = vmatprep.mubr.bf16.mxu1 %v2217_v41 }
  0x95   : > { %988 = vmatmul.mubr.bf16.gmra.mxu0 %v2219_v42 }
  0x96   : > { %1149 = vmatmul.mubr.bf16.gmra.mxu1 %v2220_v43  ;;  %995 = vmatprep.mubr.bf16.mxu0 %v2221_v44 }
  0x97   : > { %1156 = vmatprep.mubr.bf16.mxu1 %v2223_v45 }
  0x9d   : > { %996 = vmatmul.mubr.bf16.gmra.mxu0 %v2225_v46 }
  0x9e   : > { %1157 = vmatmul.mubr.bf16.gmra.mxu1 %v2226_v47  ;;  %1003 = vmatprep.mubr.bf16.mxu0 %v2227_v48 }
  0x9f   : > { %1164 = vmatprep.mubr.bf16.mxu1 %v2229_v49 }
  0xa5   : > { %1004 = vmatmul.mubr.bf16.gmra.mxu0 %v2231_v50 }
  0xa6   : > { %1165 = vmatmul.mubr.bf16.gmra.mxu1 %v2232_v51  ;;  %1011 = vmatprep.mubr.bf16.mxu0 %v2233_v52 }
  0xa7   : > { %1172 = vmatprep.mubr.bf16.mxu1 %v2235_v53 }
  0xad   : > { %1012 = vmatmul.mubr.bf16.gmra.mxu0 %v2237_v54 }
  0xae   : > { %1173 = vmatmul.mubr.bf16.gmra.mxu1 %v2238_v55  ;;  %1019 = vmatprep.mubr.bf16.mxu0 %v2239_v56 }
  0xaf   : > { %1180 = vmatprep.mubr.bf16.mxu1 %v2241_v57 }
  0xb5   : > { %1020 = vmatmul.mubr.bf16.gmra.mxu0 %v2243_v58 }
  0xb6   : > { %1181 = vmatmul.mubr.bf16.gmra.mxu1 %v2244_v59  ;;  %1027 = vmatprep.mubr.bf16.mxu0 %v2245_v60 }
  0xb7   : > { %1188 = vmatprep.mubr.bf16.mxu1 %v2247_v61 }
  0xbd   : > { %1028 = vmatmul.mubr.bf16.gmra.mxu0 %v2249_v62 }
  0xbe   : > { %1189 = vmatmul.mubr.bf16.gmra.mxu1 %v2250_v63  ;;  %1035 = vmatprep.mubr.bf16.mxu0 %v2251_v0 }
  0xbf   : > { %1196 = vmatprep.mubr.bf16.mxu1 %v2253_v1 }
  0xc5   : > { %1036 = vmatmul.mubr.bf16.gmra.mxu0 %v2255_v2 }
  0xc6   : > { %1197 = vmatmul.mubr.bf16.gmra.mxu1 %v2256_v3  ;;  %1043 = vmatprep.mubr.bf16.mxu0 %v2257_v4 }
  0xc7   : > { %1204 = vmatprep.mubr.bf16.mxu1 %v2259_v5 }
  0xcd   : > { %1044 = vmatmul.mubr.bf16.gmra.mxu0 %v2261_v6 }
  0xce   : > { %1205 = vmatmul.mubr.bf16.gmra.mxu1 %v2262_v7  ;;  %1051 = vmatprep.mubr.bf16.mxu0 %v2263_v8 }
  0xcf   : > { %1212 = vmatprep.mubr.bf16.mxu1 %v2265_v9 }
  0xd5   : > { %1052 = vmatmul.mubr.bf16.gmra.mxu0 %v2267_v10 }
  0xd6   : > { %1213 = vmatmul.mubr.bf16.gmra.mxu1 %v2268_v11  ;;  %1059 = vmatprep.mubr.bf16.mxu0 %v2269_v12 }
  0xd7   : > { %1220 = vmatprep.mubr.bf16.mxu1 %v2271_v13 }
  0xdd   : > { %1060 = vmatmul.mubr.bf16.gmra.mxu0 %v2273_v14 }
  0xde   : > { %1221 = vmatmul.mubr.bf16.gmra.mxu1 %v2274_v15  ;;  %1067 = vmatprep.mubr.bf16.mxu0 %v2275_v16 }
  0xdf   : > { %1228 = vmatprep.mubr.bf16.mxu1 %v2277_v17 }
  0xe5   : > { %1068 = vmatmul.mubr.bf16.gmra.mxu0 %v2279_v18 }
  0xe6   : > { %1229 = vmatmul.mubr.bf16.gmra.mxu1 %v2280_v19  ;;  %1075 = vmatprep.mubr.bf16.mxu0 %v2281_v20 }
  0xe7   : > { %1236 = vmatprep.mubr.bf16.mxu1 %v2283_v21 }
  0xed   : > { %1076 = vmatmul.mubr.bf16.gmra.mxu0 %v2285_v22 }
  0xee   : > { %1237 = vmatmul.mubr.bf16.gmra.mxu1 %v2286_v23  ;;  %1083 = vmatprep.mubr.bf16.mxu0 %v2287_v24 }
  0xef   : > { %1244 = vmatprep.mubr.bf16.mxu1 %v2289_v25 }
  0xf5   : > { %1084 = vmatmul.mubr.bf16.gmra.mxu0 %v2291_v26 }
  0xf6   : > { %1245 = vmatmul.mubr.bf16.gmra.mxu1 %v2292_v27  ;;  %1091 = vmatprep.mubr.bf16.mxu0 %v2293_v28 }
  0xf7   : > { %1252 = vmatprep.mubr.bf16.mxu1 %v2295_v29 }
  0xfd   : > { %1092 = vmatmul.mubr.bf16.gmra.mxu0 %v2297_v30 }
  0xfe   : > { %1253 = vmatmul.mubr.bf16.gmra.mxu1 %v2298_v31 }
 0x145   : > { %v1854_v32 = vpop.f32.mrf.mxu0 }
 0x146   : > { %v1966_v33 = vpop.f32.mrf.mxu1 }
 0x147   : > { %v1855_v34 = vpop.f32.mrf.mxu0 }
 0x148   : > { %v1856_v35 = vadd.f32 %v1855_v34, %v1854_v32  ;;  %v1967_v36 = vpop.f32.mrf.mxu1 }
 0x149   : > { %v1857_v38 = vpop.f32.mrf.mxu0  ;;  %v1968_v45 = vadd.f32 %v1967_v36, %v1966_v33 }
 0x14a   : > { %v1969_v39 = vpop.f32.mrf.mxu1  ;;  %v974_v41 = vadd.f32 %v1856_v35, %v2799_v37 }
 0x14b   : > { %v1858_v40 = vpop.f32.mrf.mxu0 }
 0x14c   : > { %v1859_v42 = vadd.f32 %v1858_v40, %v1857_v38  ;;  %v1970_v43 = vpop.f32.mrf.mxu1  ;;  %v1135_v50 = vadd.f32 %v1968_v45, %v974_v41 }
 0x14d   : > { %v1860_v44 = vpop.f32.mrf.mxu0  ;;  %v1971_v47 = vadd.f32 %v1970_v43, %v1969_v39 }
 0x14e   : > { %v977_v46 = vadd.f32 %v1859_v42, %v2799_v37  ;;  %v1972_v48 = vpop.f32.mrf.mxu1 }
 0x14f   : > { %v1861_v49 = vpop.f32.mrf.mxu0 }
 0x150   : > { %v1138_v51 = vadd.f32 %v1971_v47, %v977_v46  ;;  %v1862_v52 = vadd.f32 %v1861_v49, %v1860_v44  ;;  %v1973_v53 = vpop.f32.mrf.mxu1 }
 0x151   : > { %v1863_v54 = vpop.f32.mrf.mxu0  ;;  %v1974_v62 = vadd.f32 %v1973_v53, %v1972_v48 }
 0x152   : > { %v1746_v55 = vpack.c.bf16 %v1138_v51, %v1135_v50  ;;  %v1975_v56 = vpop.f32.mrf.mxu1  ;;  %v982_v58 = vadd.f32 %v1862_v52, %v2799_v37 }
 0x153   : > { %v1864_v57 = vpop.f32.mrf.mxu0 }
 0x154   : > { %1747 = vst [vmem:[%s2806_s19] sm:$0xff] %v1746_v55   ;;  %v1865_v59 = vadd.f32 %v1864_v57, %v1863_v54  ;;  %v1976_v60 = vpop.f32.mrf.mxu1  ;;  %v1143_v3 = vadd.f32 %v1974_v62, %v982_v58 }
 0x155   : > { %v1866_v61 = vpop.f32.mrf.mxu0  ;;  %v1977_v0 = vadd.f32 %v1976_v60, %v1975_v56 }
 0x156   : > { %v985_v63 = vadd.f32 %v1865_v59, %v2799_v37  ;;  %v1978_v1 = vpop.f32.mrf.mxu1 }
 0x157   : > { %v1867_v2 = vpop.f32.mrf.mxu0 }
 0x158   : > { %v1146_v4 = vadd.f32 %v1977_v0, %v985_v63  ;;  %v1868_v5 = vadd.f32 %v1867_v2, %v1866_v61  ;;  %v1979_v6 = vpop.f32.mrf.mxu1 }
 0x159   : > { %v1869_v7 = vpop.f32.mrf.mxu0  ;;  %v1980_v15 = vadd.f32 %v1979_v6, %v1978_v1 }
 0x15a   : > { %v1751_v8 = vpack.c.bf16 %v1146_v4, %v1143_v3  ;;  %v1981_v9 = vpop.f32.mrf.mxu1  ;;  %v990_v11 = vadd.f32 %v1868_v5, %v2799_v37 }
 0x15b   : > { %v1870_v10 = vpop.f32.mrf.mxu0 }
 0x15c   : > { %1823 = vst [vmem:[%s2806_s19 + $0x8] sm:$0xff] %v1751_v8   ;;  %v1871_v12 = vadd.f32 %v1870_v10, %v1869_v7  ;;  %v1982_v13 = vpop.f32.mrf.mxu1  ;;  %v1151_v20 = vadd.f32 %v1980_v15, %v990_v11 }
 0x15d   : > { %v1872_v14 = vpop.f32.mrf.mxu0  ;;  %v1983_v17 = vadd.f32 %v1982_v13, %v1981_v9 }
 0x15e   : > { %v993_v16 = vadd.f32 %v1871_v12, %v2799_v37  ;;  %v1984_v18 = vpop.f32.mrf.mxu1 }
 0x15f   : > { %v1873_v19 = vpop.f32.mrf.mxu0 }
 0x160   : > { %v1154_v21 = vadd.f32 %v1983_v17, %v993_v16  ;;  %v1874_v22 = vadd.f32 %v1873_v19, %v1872_v14  ;;  %v1985_v23 = vpop.f32.mrf.mxu1 }
 0x161   : > { %v1875_v24 = vpop.f32.mrf.mxu0  ;;  %v1986_v32 = vadd.f32 %v1985_v23, %v1984_v18 }
 0x162   : > { %v1756_v25 = vpack.c.bf16 %v1154_v21, %v1151_v20  ;;  %v1987_v26 = vpop.f32.mrf.mxu1  ;;  %v998_v28 = vadd.f32 %v1874_v22, %v2799_v37 }
 0x163   : > { %v1876_v27 = vpop.f32.mrf.mxu0 }
 0x164   : > { %1824 = vst [vmem:[%s2806_s19 + $0x10] sm:$0xff] %v1756_v25   ;;  %v1877_v29 = vadd.f32 %v1876_v27, %v1875_v24  ;;  %v1988_v30 = vpop.f32.mrf.mxu1  ;;  %v1159_v38 = vadd.f32 %v1986_v32, %v998_v28 }
 0x165   : > { %v1878_v31 = vpop.f32.mrf.mxu0  ;;  %v1989_v34 = vadd.f32 %v1988_v30, %v1987_v26 }
 0x166   : > { %v1001_v33 = vadd.f32 %v1877_v29, %v2799_v37  ;;  %v1990_v35 = vpop.f32.mrf.mxu1 }
 0x167   : > { %v1879_v36 = vpop.f32.mrf.mxu0 }
 0x168   : > { %v1162_v39 = vadd.f32 %v1989_v34, %v1001_v33  ;;  %v1880_v40 = vadd.f32 %v1879_v36, %v1878_v31  ;;  %v1991_v41 = vpop.f32.mrf.mxu1 }
 0x169   : > { %v1881_v42 = vpop.f32.mrf.mxu0  ;;  %v1992_v50 = vadd.f32 %v1991_v41, %v1990_v35 }
 0x16a   : > { %v1761_v43 = vpack.c.bf16 %v1162_v39, %v1159_v38  ;;  %v1993_v44 = vpop.f32.mrf.mxu1  ;;  %v1006_v46 = vadd.f32 %v1880_v40, %v2799_v37 }
 0x16b   : > { %v1882_v45 = vpop.f32.mrf.mxu0 }
 0x16c   : > { %1825 = vst [vmem:[%s2806_s19 + $0x18] sm:$0xff] %v1761_v43   ;;  %v1883_v47 = vadd.f32 %v1882_v45, %v1881_v42  ;;  %v1994_v48 = vpop.f32.mrf.mxu1  ;;  %v1167_v55 = vadd.f32 %v1992_v50, %v1006_v46 }
 0x16d   : > { %v1884_v49 = vpop.f32.mrf.mxu0  ;;  %v1995_v52 = vadd.f32 %v1994_v48, %v1993_v44 }
 0x16e   : > { %v1009_v51 = vadd.f32 %v1883_v47, %v2799_v37  ;;  %v1996_v53 = vpop.f32.mrf.mxu1 }
 0x16f   : > { %v1885_v54 = vpop.f32.mrf.mxu0 }
 0x170   : > { %v1170_v56 = vadd.f32 %v1995_v52, %v1009_v51  ;;  %v1886_v57 = vadd.f32 %v1885_v54, %v1884_v49  ;;  %v1997_v58 = vpop.f32.mrf.mxu1 }
 0x171   : > { %v1887_v59 = vpop.f32.mrf.mxu0  ;;  %v1998_v3 = vadd.f32 %v1997_v58, %v1996_v53 }
 0x172   : > { %v1766_v60 = vpack.c.bf16 %v1170_v56, %v1167_v55  ;;  %v1999_v61 = vpop.f32.mrf.mxu1  ;;  %v1014_v63 = vadd.f32 %v1886_v57, %v2799_v37 }
 0x173   : > { %v1888_v62 = vpop.f32.mrf.mxu0 }
 0x174   : > { %1826 = vst [vmem:[%s2806_s19 + $0x20] sm:$0xff] %v1766_v60   ;;  %v1889_v0 = vadd.f32 %v1888_v62, %v1887_v59  ;;  %v2000_v1 = vpop.f32.mrf.mxu1  ;;  %v1175_v8 = vadd.f32 %v1998_v3, %v1014_v63 }
 0x175   : > { %v1890_v2 = vpop.f32.mrf.mxu0  ;;  %v2001_v5 = vadd.f32 %v2000_v1, %v1999_v61 }
 0x176   : > { %v1017_v4 = vadd.f32 %v1889_v0, %v2799_v37  ;;  %v2002_v6 = vpop.f32.mrf.mxu1 }
 0x177   : > { %v1891_v7 = vpop.f32.mrf.mxu0 }
 0x178   : > { %v1178_v9 = vadd.f32 %v2001_v5, %v1017_v4  ;;  %v1892_v10 = vadd.f32 %v1891_v7, %v1890_v2  ;;  %v2003_v11 = vpop.f32.mrf.mxu1 }
 0x179   : > { %v1893_v12 = vpop.f32.mrf.mxu0  ;;  %v2004_v20 = vadd.f32 %v2003_v11, %v2002_v6 }
 0x17a   : > { %v1771_v13 = vpack.c.bf16 %v1178_v9, %v1175_v8  ;;  %v2005_v14 = vpop.f32.mrf.mxu1  ;;  %v1022_v16 = vadd.f32 %v1892_v10, %v2799_v37 }
 0x17b   : > { %v1894_v15 = vpop.f32.mrf.mxu0 }
 0x17c   : > { %1827 = vst [vmem:[%s2806_s19 + $0x28] sm:$0xff] %v1771_v13   ;;  %v1895_v17 = vadd.f32 %v1894_v15, %v1893_v12  ;;  %v2006_v18 = vpop.f32.mrf.mxu1  ;;  %v1183_v25 = vadd.f32 %v2004_v20, %v1022_v16 }
 0x17d   : > { %v1896_v19 = vpop.f32.mrf.mxu0  ;;  %v2007_v22 = vadd.f32 %v2006_v18, %v2005_v14 }
 0x17e   : > { %v1025_v21 = vadd.f32 %v1895_v17, %v2799_v37  ;;  %v2008_v23 = vpop.f32.mrf.mxu1 }
 0x17f   : > { %v1897_v24 = vpop.f32.mrf.mxu0 }
 0x180   : > { %v1186_v26 = vadd.f32 %v2007_v22, %v1025_v21  ;;  %v1898_v27 = vadd.f32 %v1897_v24, %v1896_v19  ;;  %v2009_v28 = vpop.f32.mrf.mxu1 }
 0x181   : > { %v1899_v29 = vpop.f32.mrf.mxu0  ;;  %v2010_v38 = vadd.f32 %v2009_v28, %v2008_v23 }
 0x182   : > { %v1776_v30 = vpack.c.bf16 %v1186_v26, %v1183_v25  ;;  %v2011_v31 = vpop.f32.mrf.mxu1  ;;  %v1030_v33 = vadd.f32 %v1898_v27, %v2799_v37 }
 0x183   : > { %v1900_v32 = vpop.f32.mrf.mxu0 }
 0x184   : > { %1828 = vst [vmem:[%s2806_s19 + $0x30] sm:$0xff] %v1776_v30   ;;  %v1901_v34 = vadd.f32 %v1900_v32, %v1899_v29  ;;  %v2012_v35 = vpop.f32.mrf.mxu1  ;;  %v1191_v43 = vadd.f32 %v2010_v38, %v1030_v33 }
 0x185   : > { %v1902_v36 = vpop.f32.mrf.mxu0  ;;  %v2013_v40 = vadd.f32 %v2012_v35, %v2011_v31 }
 0x186   : > { %v1033_v39 = vadd.f32 %v1901_v34, %v2799_v37  ;;  %v2014_v41 = vpop.f32.mrf.mxu1 }
 0x187   : > { %v1903_v42 = vpop.f32.mrf.mxu0 }
 0x188   : > { %v1194_v44 = vadd.f32 %v2013_v40, %v1033_v39  ;;  %v1904_v45 = vadd.f32 %v1903_v42, %v1902_v36  ;;  %v2015_v46 = vpop.f32.mrf.mxu1 }
 0x189   : > { %v1905_v47 = vpop.f32.mrf.mxu0  ;;  %v2016_v55 = vadd.f32 %v2015_v46, %v2014_v41 }
 0x18a   : > { %v1781_v48 = vpack.c.bf16 %v1194_v44, %v1191_v43  ;;  %v2017_v49 = vpop.f32.mrf.mxu1  ;;  %v1038_v51 = vadd.f32 %v1904_v45, %v2799_v37 }
 0x18b   : > { %v1906_v50 = vpop.f32.mrf.mxu0 }
 0x18c   : > { %1829 = vst [vmem:[%s2806_s19 + $0x38] sm:$0xff] %v1781_v48   ;;  %v1907_v52 = vadd.f32 %v1906_v50, %v1905_v47  ;;  %v2018_v53 = vpop.f32.mrf.mxu1  ;;  %v1199_v60 = vadd.f32 %v2016_v55, %v1038_v51 }
 0x18d   : > { %v1908_v54 = vpop.f32.mrf.mxu0  ;;  %v2019_v57 = vadd.f32 %v2018_v53, %v2017_v49 }
 0x18e   : > { %v1041_v56 = vadd.f32 %v1907_v52, %v2799_v37  ;;  %v2020_v58 = vpop.f32.mrf.mxu1 }
 0x18f   : > { %v1909_v59 = vpop.f32.mrf.mxu0 }
 0x190   : > { %v1202_v61 = vadd.f32 %v2019_v57, %v1041_v56  ;;  %v1910_v62 = vadd.f32 %v1909_v59, %v1908_v54  ;;  %v2021_v63 = vpop.f32.mrf.mxu1 }
 0x191   : > { %v1911_v0 = vpop.f32.mrf.mxu0  ;;  %v2022_v8 = vadd.f32 %v2021_v63, %v2020_v58 }
 0x192   : > { %v1786_v1 = vpack.c.bf16 %v1202_v61, %v1199_v60  ;;  %v2023_v2 = vpop.f32.mrf.mxu1  ;;  %v1046_v4 = vadd.f32 %v1910_v62, %v2799_v37 }
 0x193   : > { %v1912_v3 = vpop.f32.mrf.mxu0 }
 0x194   : > { %1830 = vst [vmem:[%s2806_s19 + $0x40] sm:$0xff] %v1786_v1   ;;  %v1913_v5 = vadd.f32 %v1912_v3, %v1911_v0  ;;  %v2024_v6 = vpop.f32.mrf.mxu1  ;;  %v1207_v13 = vadd.f32 %v2022_v8, %v1046_v4 }
 0x195   : > { %v1914_v7 = vpop.f32.mrf.mxu0  ;;  %v2025_v10 = vadd.f32 %v2024_v6, %v2023_v2 }
 0x196   : > { %v1049_v9 = vadd.f32 %v1913_v5, %v2799_v37  ;;  %v2026_v11 = vpop.f32.mrf.mxu1 }
 0x197   : > { %v1915_v12 = vpop.f32.mrf.mxu0 }
 0x198   : > { %v1210_v14 = vadd.f32 %v2025_v10, %v1049_v9  ;;  %v1916_v15 = vadd.f32 %v1915_v12, %v1914_v7  ;;  %v2027_v16 = vpop.f32.mrf.mxu1 }
 0x199   : > { %v1917_v17 = vpop.f32.mrf.mxu0  ;;  %v2028_v25 = vadd.f32 %v2027_v16, %v2026_v11 }
 0x19a   : > { %v1791_v18 = vpack.c.bf16 %v1210_v14, %v1207_v13  ;;  %v2029_v19 = vpop.f32.mrf.mxu1  ;;  %v1054_v21 = vadd.f32 %v1916_v15, %v2799_v37 }
 0x19b   : > { %v1918_v20 = vpop.f32.mrf.mxu0 }
 0x19c   : > { %1831 = vst [vmem:[%s2806_s19 + $0x48] sm:$0xff] %v1791_v18   ;;  %v1919_v22 = vadd.f32 %v1918_v20, %v1917_v17  ;;  %v2030_v23 = vpop.f32.mrf.mxu1  ;;  %v1215_v30 = vadd.f32 %v2028_v25, %v1054_v21 }
 0x19d   : > { %v1920_v24 = vpop.f32.mrf.mxu0  ;;  %v2031_v27 = vadd.f32 %v2030_v23, %v2029_v19 }
 0x19e   : > { %v1057_v26 = vadd.f32 %v1919_v22, %v2799_v37  ;;  %v2032_v28 = vpop.f32.mrf.mxu1 }
 0x19f   : > { %v1921_v29 = vpop.f32.mrf.mxu0 }
 0x1a0   : > { %v1218_v31 = vadd.f32 %v2031_v27, %v1057_v26  ;;  %v1922_v32 = vadd.f32 %v1921_v29, %v1920_v24  ;;  %v2033_v33 = vpop.f32.mrf.mxu1 }
 0x1a1   : > { %v1923_v34 = vpop.f32.mrf.mxu0  ;;  %v2034_v43 = vadd.f32 %v2033_v33, %v2032_v28 }
 0x1a2   : > { %v1796_v35 = vpack.c.bf16 %v1218_v31, %v1215_v30  ;;  %v2035_v36 = vpop.f32.mrf.mxu1  ;;  %v1062_v39 = vadd.f32 %v1922_v32, %v2799_v37 }
 0x1a3   : > { %v1924_v38 = vpop.f32.mrf.mxu0 }
 0x1a4   : > { %1832 = vst [vmem:[%s2806_s19 + $0x50] sm:$0xff] %v1796_v35   ;;  %v1925_v40 = vadd.f32 %v1924_v38, %v1923_v34  ;;  %v2036_v41 = vpop.f32.mrf.mxu1  ;;  %v1223_v48 = vadd.f32 %v2034_v43, %v1062_v39 }
 0x1a5   : > { %v1926_v42 = vpop.f32.mrf.mxu0  ;;  %v2037_v45 = vadd.f32 %v2036_v41, %v2035_v36 }
 0x1a6   : > { %v1065_v44 = vadd.f32 %v1925_v40, %v2799_v37  ;;  %v2038_v46 = vpop.f32.mrf.mxu1 }
 0x1a7   : > { %v1927_v47 = vpop.f32.mrf.mxu0 }
 0x1a8   : > { %v1226_v49 = vadd.f32 %v2037_v45, %v1065_v44  ;;  %v1928_v50 = vadd.f32 %v1927_v47, %v1926_v42  ;;  %v2039_v51 = vpop.f32.mrf.mxu1 }
 0x1a9   : > { %v1929_v52 = vpop.f32.mrf.mxu0  ;;  %v2040_v60 = vadd.f32 %v2039_v51, %v2038_v46 }
 0x1aa   : > { %v1801_v53 = vpack.c.bf16 %v1226_v49, %v1223_v48  ;;  %v2041_v54 = vpop.f32.mrf.mxu1  ;;  %v1070_v56 = vadd.f32 %v1928_v50, %v2799_v37 }
 0x1ab   : > { %v1930_v55 = vpop.f32.mrf.mxu0 }
 0x1ac   : > { %1833 = vst [vmem:[%s2806_s19 + $0x58] sm:$0xff] %v1801_v53   ;;  %v1931_v57 = vadd.f32 %v1930_v55, %v1929_v52  ;;  %v2042_v58 = vpop.f32.mrf.mxu1  ;;  %v1231_v1 = vadd.f32 %v2040_v60, %v1070_v56 }
 0x1ad   : > { %v1932_v59 = vpop.f32.mrf.mxu0  ;;  %v2043_v62 = vadd.f32 %v2042_v58, %v2041_v54 }
 0x1ae   : > { %v1073_v61 = vadd.f32 %v1931_v57, %v2799_v37  ;;  %v2044_v63 = vpop.f32.mrf.mxu1 }
 0x1af   : > { %v1933_v0 = vpop.f32.mrf.mxu0 }
 0x1b0   : > { %v1234_v2 = vadd.f32 %v2043_v62, %v1073_v61  ;;  %v1934_v3 = vadd.f32 %v1933_v0, %v1932_v59  ;;  %v2045_v4 = vpop.f32.mrf.mxu1 }
 0x1b1   : > { %v1935_v5 = vpop.f32.mrf.mxu0  ;;  %v2046_v13 = vadd.f32 %v2045_v4, %v2044_v63 }
 0x1b2   : > { %v1806_v6 = vpack.c.bf16 %v1234_v2, %v1231_v1  ;;  %v2047_v7 = vpop.f32.mrf.mxu1  ;;  %v1078_v9 = vadd.f32 %v1934_v3, %v2799_v37 }
 0x1b3   : > { %v1936_v8 = vpop.f32.mrf.mxu0 }
 0x1b4   : > { %1834 = vst [vmem:[%s2806_s19 + $0x60] sm:$0xff] %v1806_v6   ;;  %v1937_v10 = vadd.f32 %v1936_v8, %v1935_v5  ;;  %v2048_v11 = vpop.f32.mrf.mxu1  ;;  %v1239_v18 = vadd.f32 %v2046_v13, %v1078_v9 }
 0x1b5   : > { %v1938_v12 = vpop.f32.mrf.mxu0  ;;  %v2049_v15 = vadd.f32 %v2048_v11, %v2047_v7 }
 0x1b6   : > { %v1081_v14 = vadd.f32 %v1937_v10, %v2799_v37  ;;  %v2050_v16 = vpop.f32.mrf.mxu1 }
 0x1b7   : > { %v1939_v17 = vpop.f32.mrf.mxu0 }
 0x1b8   : > { %v1242_v19 = vadd.f32 %v2049_v15, %v1081_v14  ;;  %v1940_v20 = vadd.f32 %v1939_v17, %v1938_v12  ;;  %v2051_v21 = vpop.f32.mrf.mxu1 }
 0x1b9   : > { %v1941_v22 = vpop.f32.mrf.mxu0  ;;  %v2052_v30 = vadd.f32 %v2051_v21, %v2050_v16 }
 0x1ba   : > { %v1811_v23 = vpack.c.bf16 %v1242_v19, %v1239_v18  ;;  %v2053_v24 = vpop.f32.mrf.mxu1  ;;  %v1086_v26 = vadd.f32 %v1940_v20, %v2799_v37 }
 0x1bb   : > { %v1942_v25 = vpop.f32.mrf.mxu0 }
 0x1bc   : > { %1835 = vst [vmem:[%s2806_s19 + $0x68] sm:$0xff] %v1811_v23   ;;  %v1943_v27 = vadd.f32 %v1942_v25, %v1941_v22  ;;  %v2054_v28 = vpop.f32.mrf.mxu1  ;;  %v1247_v35 = vadd.f32 %v2052_v30, %v1086_v26 }
 0x1bd   : > { %v1944_v29 = vpop.f32.mrf.mxu0  ;;  %v2055_v32 = vadd.f32 %v2054_v28, %v2053_v24 }
 0x1be   : > { %v1089_v31 = vadd.f32 %v1943_v27, %v2799_v37  ;;  %v2056_v33 = vpop.f32.mrf.mxu1 }
 0x1bf   : > { %v1945_v34 = vpop.f32.mrf.mxu0 }
 0x1c0   : > { %v1250_v36 = vadd.f32 %v2055_v32, %v1089_v31  ;;  %v1946_v38 = vadd.f32 %v1945_v34, %v1944_v29  ;;  %v2057_v39 = vpop.f32.mrf.mxu1 }
 0x1c1   : > { %v1947_v40 = vpop.f32.mrf.mxu0  ;;  %v2058_v47 = vadd.f32 %v2057_v39, %v2056_v33 }
 0x1c2   : > { %v1816_v41 = vpack.c.bf16 %v1250_v36, %v1247_v35  ;;  %v2059_v42 = vpop.f32.mrf.mxu1  ;;  %v1094_v44 = vadd.f32 %v1946_v38, %v2799_v37 }
 0x1c3   : > { %v1948_v43 = vpop.f32.mrf.mxu0 }
 0x1c4   : > { %1836 = vst [vmem:[%s2806_s19 + $0x70] sm:$0xff] %v1816_v41   ;;  %v1949_v45 = vadd.f32 %v1948_v43, %v1947_v40  ;;  %v2060_v46 = vpop.f32.mrf.mxu1  ;;  %v1255_v50 = vadd.f32 %v2058_v47, %v1094_v44 }
 0x1c5   : > { %v2061_v49 = vadd.f32 %v2060_v46, %v2059_v42 }
 0x1c6   : > { %v1097_v48 = vadd.f32 %v1949_v45, %v2799_v37 }
 0x1c8   : > { %v1258_v51 = vadd.f32 %v2061_v49, %v1097_v48 }
 0x1ca   : > { %v1821_v52 = vpack.c.bf16 %v1258_v51, %v1255_v50 }
 0x1cc   : > { %1837 = vst [vmem:[%s2806_s19 + $0x78] sm:$0xff] %v1821_v52  }
 0x1cd PF: > { %s19_s22 = sadd.s32 1, %s2477_s22   ;;  %s2927_s12 = sld [smem:[#allocation9_spill]] }
 0x1ce   : > { %p16_p3 = scmp.ge.s32.totalorder %s19_s22, 6   ;;  %s2928_s18 = sld [smem:[#allocation12_spill]] }
 0x1cf   : > { %s2929_s20 = sld [smem:[#allocation14_spill]]  ;;  %s2930_s13 = smov %s2445_s14 }
 0x1d0   : > { %s2931_s14 = smov %s2646_s1  ;;  %s2932_s15 = smov %s2453_s16 }
 0x1d1   : > { %s2933_s16 = smov %s2457_s17  ;;  %s2934_s17 = smov %s2649_s24 }
 0x1d2   : > { %s2935_s19 = smov %s2473_s21  ;;  %s2936_s21 = smov %s2942_s11 }
 0x1d3   :  { %18 = sbr.rel (!%p16_p3) target bundleno = 12 (0xc), region = 96 }
 0x1d8   :  { %1451 = vsyncpa [#allocation3], 1 }
 0x1d9   :  { %1453 = vsyncpa [#allocation3 + $0x1], 1 }
 0x1da   :  { %1454 = vsyncpa [#allocation5], 1 }
 0x1db   :  { %1456 = vsyncpa [#allocation5 + $0x1], 1 }

// kernel: hetero_gnn_forward.7
= control target key start
LH: loop header
LB: loop body
LE: loop exit
PB: predicated region body
PF: predicated region fallthrough
CT: control target
= control target key end

     0   :  { %s4152_s0 = inlined_call_operand.vmem [shape: s32[6], index: 0, kind: input, shape index: {}]   ;;  %s4153_s5 = inlined_call_operand.vmem [shape: bf16[6,512,512], index: 5, kind: input, shape index: {}]   ;;  %s4154_s6 = inlined_call_operand.vmem [shape: bf16[2,512,640], index: 6, kind: input, shape index: {}, may-alias: {6,7}]   ;;  %s4155_s7 = inlined_call_operand.vmem [shape: bf16[2,512,640], index: 7, kind: input, shape index: {}, may-alias: {6,7}]   ;;  %s4156_s8 = inlined_call_operand.hbm [shape: f32[2,1,128], index: 8, kind: input, shape index: {}]   ;;  %s4157_s9 = inlined_call_operand.vmem [shape: bf16[2,512,128], index: 9, kind: output, shape index: {}]   ;;  %s4158_s1 = inlined_call_operand.vmem [shape: s32[6], index: 1, kind: input, shape index: {}]   ;;  %s4159_s2 = inlined_call_operand.vmem [shape: s32[6], index: 2, kind: input, shape index: {}]   ;;  %s4160_s3 = inlined_call_operand.hbm [shape: s32[6], index: 3, kind: input, shape index: {}]   ;;  %s4161_s4 = inlined_call_operand.hbm [shape: s32[6], index: 4, kind: input, shape index: {}]  }
   0x1   :  { %4171 = sst [smem:[#allocation24_spill]] %s4153_s5  ;;  %s14_s11 = sshll.u32 %s4152_s0, 4  ;;  %s15_s11 = int_to_ptr.vmem [resolvable:$true] %s14_s11 }
   0x2   :  { %4172 = sst [smem:[#allocation25_spill]] %s4154_s6  ;;  %s18_s14 = sshll.u32 %s4158_s1, 4  ;;  %s19_s14 = int_to_ptr.vmem [resolvable:$true] %s18_s14 }
   0x3   :  { %4173 = sst [smem:[#allocation26_spill]] %s4155_s7  ;;  %s3308_s15 = scalar_lea.vmem %s15_s11, 16 }
   0x4   :  { %4174 = sst [smem:[#allocation27_spill]] %s4156_s8  ;;  %p3309_p0 = scmp.ne.s32.totalorder %s15_s11, %s3308_s15 }
   0x5   :  { %4175 = sst [smem:[#allocation28_spill]] %s4157_s9  ;;  %p3313_p1 = scmp.lt.s32.totalorder %s15_s11, %s15_s11 }
   0x6   :  { %p3314_p2 = scmp.lt.s32.totalorder %s3308_s15, %s3308_s15 }
   0x8   :  { %p3315_p3 = por %p3314_p2, %p3313_p1 }
   0xa   :  { %p3316_p4 = pnand %p3315_p3, %p3309_p0 }
   0xc   :  { %3319 = shalt.err (!%p3316_p4)  }
   0xd   :  { %s3488_s16 = smov [#allocation4]   ;;  %s3320_s17 = scalar_lea.vmem %s19_s14, 16 }
   0xe   :  { %17 = dma.vmem_to_smem %s15_s11, 16, %s3488_s16, [#allocation3] }
   0xf   :  { %p3321_p5 = scmp.ne.s32.totalorder %s19_s14, %s3320_s17  ;;  %p3325_p6 = scmp.lt.s32.totalorder %s19_s14, %s19_s14 }
  0x10   :  { %p3326_p7 = scmp.lt.s32.totalorder %s3320_s17, %s3320_s17 }
  0x12   :  { %p3327_p8 = por %p3326_p7, %p3325_p6 }
  0x14   :  { %p3328_p9 = pnand %p3327_p8, %p3321_p5 }
  0x16   :  { %3331 = shalt.err (!%p3328_p9)  }
  0x17   :  { %s3489_s0 = smov [#allocation5]   ;;  %s22_s19 = sshll.u32 %s4159_s2, 4  ;;  %s23_s19 = int_to_ptr.vmem [resolvable:$true] %s22_s19 }
  0x18   :  { %21 = dma.vmem_to_smem %s19_s14, 16, %s3489_s0, [#allocation3] }
  0x19   :  { %s3332_s20 = scalar_lea.vmem %s23_s19, 16  ;;  %p3337_p11 = scmp.lt.s32.totalorder %s23_s19, %s23_s19 }
  0x1a   :  { %p3333_p10 = scmp.ne.s32.totalorder %s23_s19, %s3332_s20  ;;  %p3338_p12 = scmp.lt.s32.totalorder %s3332_s20, %s3332_s20 }
  0x1c   :  { %p3339_p13 = por %p3338_p12, %p3337_p11 }
  0x1e   :  { %p3340_p0 = pnand %p3339_p13, %p3333_p10 }
  0x20   :  { %3343 = shalt.err (!%p3340_p0)  }
  0x21   :  { %s3490_s21 = smov [#allocation6]   ;;  %s3491_s22 = smov [#allocation7]  }
  0x22   :  { %25 = dma.vmem_to_smem %s23_s19, 16, %s3490_s21, [#allocation3] }
  0x23   :  { %27 = dma.hbm_to_smem %s4160_s3, 16, %s3491_s22, [#allocation3] }
  0x24   :  { %s3492_s25 = smov [#allocation8]  }
  0x25   :  { %29 = dma.hbm_to_smem %s4161_s4, 16, %s3492_s25, [#allocation3] }
  0x26   :  { %3434 = dma.done.wait [#allocation3], 80 }
  0x27   :  { %3435 = vsyncadd [#allocation3], 4294967216 }
  0x28   :  { %31 = sfence }
  0x29   :  { %32 = vsyncpa [#allocation12], 0 }
  0x2a   :  { %34 = vsyncpa [#allocation12 + $0x1], 0  ;;  %s3559_s2 = smov 0   ;;  %s3561_s28 = smov 0  }
  0x2b   :  { %s3563_s29 = smov 0   ;;  %s3565_s30 = smov 0  }
  0x2c   :  { %s3567_s10 = smov 0   ;;  %s3569_s3 = smov 0  }
  0x2d   :  { %s3571_s11 = smov 0   ;;  %s3573_s4 = smov 0  }
  0x2e   :  { %s3575_s12 = smov 0   ;;  %s3577_s13 = smov 0  }
  0x2f   :  { %s3579_s14 = smov 0   ;;  %s3581_s15 = smov 0  }
  0x30 LB: > { %4176 = sst [smem:[#allocation16_spill]] %s3454_s30  ;;  %s55_s17 = sadd.s32 1, %s3478_s13  ;;  %s3486_s15 = sphi %s3581_s15, %s40_s15   ;;  %s3482_s14 = sphi %s3579_s14, %s4203_s14   ;;  %s3478_s13 = sphi %s3577_s13, %s4202_s13   ;;  %s3474_s12 = sphi %s3575_s12, %s4201_s12   ;;  %s3470_s4 = sphi %s3573_s4, %s4200_s4   ;;  %s3466_s11 = sphi %s3571_s11, %s4210_s11   ;;  %s3462_s3 = sphi %s3569_s3, %s4209_s3   ;;  %s3458_s10 = sphi %s3567_s10, %s4208_s10   ;;  %s3454_s30 = sphi %s3565_s30, %s4207_s30   ;;  %s3450_s29 = sphi %s3563_s29, %s4206_s29   ;;  %s3446_s28 = sphi %s3561_s28, %s4205_s28   ;;  %s3442_s2 = sphi %s3559_s2, %s4204_s2  }
  0x31   : > { %4177 = sst [smem:[#allocation17_spill]] %s3462_s3  ;;  %p57_p1 = scmp.ge.s32.totalorder %s55_s17, 6 }
  0x32   : > { %4178 = sst [smem:[#allocation18_spill]] %s3470_s4  ;;  %s59_s0 = sadd.s32 1, %s3482_s14 }
  0x33   : > { %4179 = sst [smem:[#allocation19_spill]] %s3474_s12  ;;  %s104_s18 = sadd.s32 1, %s3466_s11 }
  0x34   : > { %4180 = sst [smem:[#allocation20_spill]] %s3478_s13  ;;  %s4212_s17 = smov (%p57_p1, %s55_s17), 0 }
  0x35   : > { %4181 = sst [smem:[#allocation21_spill]] %s3482_s14  ;;  %s4214_s0 = smov (!%p57_p1, %s59_s0), %s3482_s14 }
  0x36   : > { %s93_s1 = sld [smem:[#allocation4 + %s3478_s13]]  ;;  %p111_p2 = scmp.ne.s32.totalorder %s3466_s11, %s3462_s3 }
  0x37   : > { %4182 = sst [smem:[#allocation22_spill]] %s4212_s17  ;;  %p61_p3 = scmp.ge.s32.totalorder %s4214_s0, 2 }
  0x38   : > { %s94_s19 = sld [smem:[#allocation6 + %s3478_s13]]  ;;  %p112_p4 = scmp.eq.s32.totalorder %s3486_s15, 0 }
  0x39   : > { %s95_s20 = sld [smem:[#allocation4 + %s4212_s17]]  ;;  %s4216_s0 = smov (%p61_p3, %s4214_s0), 0 }
  0x3a   : > { %s96_s21 = sld [smem:[#allocation6 + %s4212_s17]]  ;;  %p3637_p5 = por %p112_p4, %p111_p2 }
  0x3b   : > { %4183 = sst [smem:[#allocation23_spill]] %s4216_s0  ;;  %s130_s25 = ssub.s32 %s3482_s14, %s4216_s0 }
  0x3c   : > { %s127_s23 = sld [smem:[#allocation5 + %s3478_s13]]  ;;  %s134_s26 = sadd.s32 1, %s3458_s10 }
  0x3d   : > { %s128_s24 = sld [smem:[#allocation5 + %s4212_s17]]  ;;  %p141_p6 = scmp.ne.s32.totalorder %s3458_s10, %s3454_s30 }
  0x3e   : > { %s157_s16 = sld [smem:[#allocation5 + %s3478_s13]]  ;;  %s162_s3 = sadd.s32 1, %s3450_s29 }
  0x3f   : > { %s97_s27 = ssub.s32 %s93_s1, %s95_s20  ;;  %p3651_p7 = por %p141_p6, %p112_p4 }
  0x40   : > { %s100_s9 = ssub.s32 %s94_s19, %s96_s21  ;;  %s158_s12 = sld [smem:[#allocation5 + %s4212_s17]] }
  0x41   : > { %s101_s4 = sor.u32 %s100_s9, %s97_s27  ;;  %p169_p9 = scmp.ne.s32.totalorder %s3450_s29, %s3446_s28 }
  0x42   : > { %p102_p8 = scmp.eq.s32.totalorder %s101_s4, 0  ;;  %p175_p12 = scmp.ne.s32.totalorder %s3446_s28, %s3442_s2 }
  0x43   : > { %s129_s0 = ssub.s32 %s127_s23, %s128_s24  ;;  %p3664_p10 = por %p169_p9, %p112_p4 }
  0x44   : > { %s3660_s8 = scalar_select %p102_p8, %s3466_s11, %s104_s18  }
  0x45   : > { %s131_s30 = sor.u32 %s130_s25, %s129_s0  ;;  %s4187_s20 = sadd.s32 4294967295, %s3486_s15  }
  0x46   : > { %p132_p11 = scmp.eq.s32.totalorder %s131_s30, 0  ;;  %s159_s19 = ssub.s32 %s157_s16, %s158_s12 }
  0x47   : > { %p176_p13 = scmp.eq.s32.totalorder %s4187_s20, 0  ;;  %p160_p0 = scmp.eq.s32.totalorder %s159_s19, 0 }
  0x48   : > { %s3673_s9 = scalar_select %p132_p11, %s3458_s10, %s134_s26  }
  0x49   : > { %p3675_p1 = por %p176_p13, %p175_p12  ;;  %p2461_p2 = scmp.ge.s32.totalorder %s3486_s15, 12 }
  0x4a   : > { %s3680_s18 = scalar_select %p160_p0, %s3450_s29, %s162_s3  }
  0x4b   : > { %225 = sbr.rel (%p2461_p2) target bundleno = 200 (0xc8), region = 16 }
  0x50   : > { %247 = sbr.rel (!%p3637_p5) target bundleno = 134 (0x86), region = 24  ;;  %s252_s2 = sld [smem:[#allocation4 + %s3478_s13]] (%p3637_p5) }
  0x51   : > { %s253_s30 = sld [smem:[#allocation6 + %s3478_s13]] (%p3637_p5)  ;;  %s249_s12 = sand.u32 (%p3637_p5), 1, %s3466_s11  }
  0x52   : > { %s2462_s16 = sshll.u32 (%p3637_p5), %s249_s12, 8  ;;  %s4189_s6 = sld [smem:[#allocation25_spill]] (%p3637_p5) }
  0x53   : > { %s3696_s22 = scalar_lea.vmem (%p3637_p5), [#allocation9], %s2462_s16 }
  0x56   : > { %s3074_s0 = smul.u32 320, %s252_s2 }
  0x58   : > { %s258_s21 = sadd.s32 %s3074_s0, %s253_s30 }
  0x59   : > { %s2463_s23 = sshll.u32 %s258_s21, 2 }
  0x5a   : > { %s3691_s3 = scalar_lea.vmem %s4189_s6, %s2463_s23 }
  0x5b   : > { %v277_v0 = vld [vmem:[%s3691_s3] sm:$0xf]  ;;  %v279_v1 = vld [vmem:[%s3691_s3 + $0x14] sm:$0xf]  ;;  %v281_v2 = vld [vmem:[%s3691_s3 + $0x28] sm:$0xf] }
  0x5c   : > { %278 = vst [vmem:[%s3696_s22] sm:$0xf] %v277_v0  ;;  %280 = vst [vmem:[%s3696_s22 + $0x4] sm:$0xf] %v279_v1  ;;  %v283_v3 = vld [vmem:[%s3691_s3 + $0x3c] sm:$0xf] }
  0x5d   : > { %282 = vst [vmem:[%s3696_s22 + $0x8] sm:$0xf] %v281_v2  ;;  %v285_v4 = vld [vmem:[%s3691_s3 + $0x50] sm:$0xf]  ;;  %v287_v5 = vld [vmem:[%s3691_s3 + $0x64] sm:$0xf] }
  0x5e   : > { %284 = vst [vmem:[%s3696_s22 + $0xc] sm:$0xf] %v283_v3  ;;  %286 = vst [vmem:[%s3696_s22 + $0x10] sm:$0xf] %v285_v4  ;;  %v289_v6 = vld [vmem:[%s3691_s3 + $0x78] sm:$0xf] }
  0x5f   : > { %288 = vst [vmem:[%s3696_s22 + $0x14] sm:$0xf] %v287_v5  ;;  %v291_v7 = vld [vmem:[%s3691_s3 + $0x8c] sm:$0xf]  ;;  %v293_v8 = vld [vmem:[%s3691_s3 + $0xa0] sm:$0xf] }
  0x60   : > { %290 = vst [vmem:[%s3696_s22 + $0x18] sm:$0xf] %v289_v6  ;;  %292 = vst [vmem:[%s3696_s22 + $0x1c] sm:$0xf] %v291_v7  ;;  %v295_v9 = vld [vmem:[%s3691_s3 + $0xb4] sm:$0xf] }
  0x61   : > { %294 = vst [vmem:[%s3696_s22 + $0x20] sm:$0xf] %v293_v8  ;;  %v297_v10 = vld [vmem:[%s3691_s3 + $0xc8] sm:$0xf]  ;;  %v299_v11 = vld [vmem:[%s3691_s3 + $0xdc] sm:$0xf] }
  0x62   : > { %296 = vst [vmem:[%s3696_s22 + $0x24] sm:$0xf] %v295_v9  ;;  %298 = vst [vmem:[%s3696_s22 + $0x28] sm:$0xf] %v297_v10  ;;  %v301_v12 = vld [vmem:[%s3691_s3 + $0xf0] sm:$0xf] }
  0x63   : > { %300 = vst [vmem:[%s3696_s22 + $0x2c] sm:$0xf] %v299_v11  ;;  %v303_v13 = vld [vmem:[%s3691_s3 + $0x104] sm:$0xf]  ;;  %v305_v14 = vld [vmem:[%s3691_s3 + $0x118] sm:$0xf] }
  0x64   : > { %302 = vst [vmem:[%s3696_s22 + $0x30] sm:$0xf] %v301_v12  ;;  %304 = vst [vmem:[%s3696_s22 + $0x34] sm:$0xf] %v303_v13  ;;  %v307_v15 = vld [vmem:[%s3691_s3 + $0x12c] sm:$0xf] }
  0x65   : > { %306 = vst [vmem:[%s3696_s22 + $0x38] sm:$0xf] %v305_v14  ;;  %v309_v16 = vld [vmem:[%s3691_s3 + $0x140] sm:$0xf]  ;;  %v311_v17 = vld [vmem:[%s3691_s3 + $0x154] sm:$0xf] }
  0x66   : > { %308 = vst [vmem:[%s3696_s22 + $0x3c] sm:$0xf] %v307_v15  ;;  %310 = vst [vmem:[%s3696_s22 + $0x40] sm:$0xf] %v309_v16  ;;  %v313_v18 = vld [vmem:[%s3691_s3 + $0x168] sm:$0xf] }
  0x67   : > { %312 = vst [vmem:[%s3696_s22 + $0x44] sm:$0xf] %v311_v17  ;;  %v315_v19 = vld [vmem:[%s3691_s3 + $0x17c] sm:$0xf]  ;;  %v317_v20 = vld [vmem:[%s3691_s3 + $0x190] sm:$0xf] }
  0x68   : > { %314 = vst [vmem:[%s3696_s22 + $0x48] sm:$0xf] %v313_v18  ;;  %316 = vst [vmem:[%s3696_s22 + $0x4c] sm:$0xf] %v315_v19  ;;  %v319_v21 = vld [vmem:[%s3691_s3 + $0x1a4] sm:$0xf] }
  0x69   : > { %318 = vst [vmem:[%s3696_s22 + $0x50] sm:$0xf] %v317_v20  ;;  %v321_v22 = vld [vmem:[%s3691_s3 + $0x1b8] sm:$0xf]  ;;  %v323_v23 = vld [vmem:[%s3691_s3 + $0x1cc] sm:$0xf] }
  0x6a   : > { %320 = vst [vmem:[%s3696_s22 + $0x54] sm:$0xf] %v319_v21  ;;  %322 = vst [vmem:[%s3696_s22 + $0x58] sm:$0xf] %v321_v22  ;;  %v325_v24 = vld [vmem:[%s3691_s3 + $0x1e0] sm:$0xf] }
  0x6b   : > { %324 = vst [vmem:[%s3696_s22 + $0x5c] sm:$0xf] %v323_v23  ;;  %v327_v25 = vld [vmem:[%s3691_s3 + $0x1f4] sm:$0xf]  ;;  %v329_v26 = vld [vmem:[%s3691_s3 + $0x208] sm:$0xf] }
  0x6c   : > { %326 = vst [vmem:[%s3696_s22 + $0x60] sm:$0xf] %v325_v24  ;;  %328 = vst [vmem:[%s3696_s22 + $0x64] sm:$0xf] %v327_v25  ;;  %v331_v27 = vld [vmem:[%s3691_s3 + $0x21c] sm:$0xf] }
  0x6d   : > { %330 = vst [vmem:[%s3696_s22 + $0x68] sm:$0xf] %v329_v26  ;;  %v333_v28 = vld [vmem:[%s3691_s3 + $0x230] sm:$0xf]  ;;  %v335_v29 = vld [vmem:[%s3691_s3 + $0x244] sm:$0xf] }
  0x6e   : > { %332 = vst [vmem:[%s3696_s22 + $0x6c] sm:$0xf] %v331_v27  ;;  %334 = vst [vmem:[%s3696_s22 + $0x70] sm:$0xf] %v333_v28  ;;  %v337_v30 = vld [vmem:[%s3691_s3 + $0x258] sm:$0xf] }
  0x6f   : > { %336 = vst [vmem:[%s3696_s22 + $0x74] sm:$0xf] %v335_v29  ;;  %v339_v31 = vld [vmem:[%s3691_s3 + $0x26c] sm:$0xf]  ;;  %v341_v32 = vld [vmem:[%s3691_s3 + $0x280] sm:$0xf] }
  0x70   : > { %338 = vst [vmem:[%s3696_s22 + $0x78] sm:$0xf] %v337_v30  ;;  %340 = vst [vmem:[%s3696_s22 + $0x7c] sm:$0xf] %v339_v31  ;;  %v343_v33 = vld [vmem:[%s3691_s3 + $0x294] sm:$0xf] }
  0x71   : > { %342 = vst [vmem:[%s3696_s22 + $0x80] sm:$0xf] %v341_v32  ;;  %v345_v34 = vld [vmem:[%s3691_s3 + $0x2a8] sm:$0xf]  ;;  %v347_v35 = vld [vmem:[%s3691_s3 + $0x2bc] sm:$0xf] }
  0x72   : > { %344 = vst [vmem:[%s3696_s22 + $0x84] sm:$0xf] %v343_v33  ;;  %346 = vst [vmem:[%s3696_s22 + $0x88] sm:$0xf] %v345_v34  ;;  %v349_v36 = vld [vmem:[%s3691_s3 + $0x2d0] sm:$0xf] }
  0x73   : > { %348 = vst [vmem:[%s3696_s22 + $0x8c] sm:$0xf] %v347_v35  ;;  %v351_v37 = vld [vmem:[%s3691_s3 + $0x2e4] sm:$0xf]  ;;  %v353_v38 = vld [vmem:[%s3691_s3 + $0x2f8] sm:$0xf] }
  0x74   : > { %350 = vst [vmem:[%s3696_s22 + $0x90] sm:$0xf] %v349_v36  ;;  %352 = vst [vmem:[%s3696_s22 + $0x94] sm:$0xf] %v351_v37  ;;  %v355_v39 = vld [vmem:[%s3691_s3 + $0x30c] sm:$0xf] }
  0x75   : > { %354 = vst [vmem:[%s3696_s22 + $0x98] sm:$0xf] %v353_v38  ;;  %v357_v40 = vld [vmem:[%s3691_s3 + $0x320] sm:$0xf]  ;;  %v359_v41 = vld [vmem:[%s3691_s3 + $0x334] sm:$0xf] }
  0x76   : > { %356 = vst [vmem:[%s3696_s22 + $0x9c] sm:$0xf] %v355_v39  ;;  %358 = vst [vmem:[%s3696_s22 + $0xa0] sm:$0xf] %v357_v40  ;;  %v361_v42 = vld [vmem:[%s3691_s3 + $0x348] sm:$0xf] }
  0x77   : > { %360 = vst [vmem:[%s3696_s22 + $0xa4] sm:$0xf] %v359_v41  ;;  %v363_v43 = vld [vmem:[%s3691_s3 + $0x35c] sm:$0xf]  ;;  %v365_v44 = vld [vmem:[%s3691_s3 + $0x370] sm:$0xf] }
  0x78   : > { %362 = vst [vmem:[%s3696_s22 + $0xa8] sm:$0xf] %v361_v42  ;;  %364 = vst [vmem:[%s3696_s22 + $0xac] sm:$0xf] %v363_v43  ;;  %v367_v45 = vld [vmem:[%s3691_s3 + $0x384] sm:$0xf] }
  0x79   : > { %366 = vst [vmem:[%s3696_s22 + $0xb0] sm:$0xf] %v365_v44  ;;  %v369_v46 = vld [vmem:[%s3691_s3 + $0x398] sm:$0xf]  ;;  %v371_v47 = vld [vmem:[%s3691_s3 + $0x3ac] sm:$0xf] }
  0x7a   : > { %368 = vst [vmem:[%s3696_s22 + $0xb4] sm:$0xf] %v367_v45  ;;  %370 = vst [vmem:[%s3696_s22 + $0xb8] sm:$0xf] %v369_v46  ;;  %v373_v48 = vld [vmem:[%s3691_s3 + $0x3c0] sm:$0xf] }
  0x7b   : > { %372 = vst [vmem:[%s3696_s22 + $0xbc] sm:$0xf] %v371_v47  ;;  %v375_v49 = vld [vmem:[%s3691_s3 + $0x3d4] sm:$0xf]  ;;  %v377_v50 = vld [vmem:[%s3691_s3 + $0x3e8] sm:$0xf] }
  0x7c   : > { %374 = vst [vmem:[%s3696_s22 + $0xc0] sm:$0xf] %v373_v48  ;;  %376 = vst [vmem:[%s3696_s22 + $0xc4] sm:$0xf] %v375_v49  ;;  %v379_v51 = vld [vmem:[%s3691_s3 + $0x3fc] sm:$0xf] }
  0x7d   : > { %378 = vst [vmem:[%s3696_s22 + $0xc8] sm:$0xf] %v377_v50  ;;  %v381_v52 = vld [vmem:[%s3691_s3 + $0x410] sm:$0xf]  ;;  %v383_v53 = vld [vmem:[%s3691_s3 + $0x424] sm:$0xf] }
  0x7e   : > { %380 = vst [vmem:[%s3696_s22 + $0xcc] sm:$0xf] %v379_v51  ;;  %382 = vst [vmem:[%s3696_s22 + $0xd0] sm:$0xf] %v381_v52  ;;  %v385_v54 = vld [vmem:[%s3691_s3 + $0x438] sm:$0xf] }
  0x7f   : > { %384 = vst [vmem:[%s3696_s22 + $0xd4] sm:$0xf] %v383_v53  ;;  %v387_v55 = vld [vmem:[%s3691_s3 + $0x44c] sm:$0xf]  ;;  %v389_v56 = vld [vmem:[%s3691_s3 + $0x460] sm:$0xf] }
  0x80   : > { %386 = vst [vmem:[%s3696_s22 + $0xd8] sm:$0xf] %v385_v54  ;;  %388 = vst [vmem:[%s3696_s22 + $0xdc] sm:$0xf] %v387_v55  ;;  %v391_v57 = vld [vmem:[%s3691_s3 + $0x474] sm:$0xf] }
  0x81   : > { %390 = vst [vmem:[%s3696_s22 + $0xe0] sm:$0xf] %v389_v56  ;;  %v393_v58 = vld [vmem:[%s3691_s3 + $0x488] sm:$0xf]  ;;  %v395_v59 = vld [vmem:[%s3691_s3 + $0x49c] sm:$0xf] }
  0x82   : > { %392 = vst [vmem:[%s3696_s22 + $0xe4] sm:$0xf] %v391_v57  ;;  %394 = vst [vmem:[%s3696_s22 + $0xe8] sm:$0xf] %v393_v58  ;;  %v397_v60 = vld [vmem:[%s3691_s3 + $0x4b0] sm:$0xf] }
  0x83   : > { %396 = vst [vmem:[%s3696_s22 + $0xec] sm:$0xf] %v395_v59  ;;  %v399_v61 = vld [vmem:[%s3691_s3 + $0x4c4] sm:$0xf]  ;;  %v401_v62 = vld [vmem:[%s3691_s3 + $0x4d8] sm:$0xf] }
  0x84   : > { %398 = vst [vmem:[%s3696_s22 + $0xf0] sm:$0xf] %v397_v60  ;;  %400 = vst [vmem:[%s3696_s22 + $0xf4] sm:$0xf] %v399_v61  ;;  %v403_v63 = vld [vmem:[%s3691_s3 + $0x4ec] sm:$0xf] }
  0x85   : > { %402 = vst [vmem:[%s3696_s22 + $0xf8] sm:$0xf] %v401_v62  ;;  %404 = vst [vmem:[%s3696_s22 + $0xfc] sm:$0xf] %v403_v63 }
  0x86 PF: > { %556 = sbr.rel (!%p3651_p7) target bundleno = 167 (0xa7), region = 65  ;;  %s561_s26 = sld [smem:[#allocation5 + %s3478_s13]] (%p3651_p7) }
  0x87   : > { %s558_s27 = sand.u32 (%p3651_p7), 1, %s3458_s10   ;;  %s2344_s19 = smul.u32 (%p3651_p7), 160, %s3482_s14 }
  0x88   : > { %s2464_s20 = sshll.u32 (%p3651_p7), %s558_s27, 7  ;;  %s4190_s7 = sld [smem:[#allocation26_spill]] (%p3651_p7) }
  0x89   : > { %s3836_s5 = scalar_lea.vmem (%p3651_p7), [#allocation10], %s2464_s20 }
  0x8c   : > { %s2345_s2 = smul.u32 320, %s561_s26 }
  0x8e   : > { %s2346_s30 = sadd.s32 %s2345_s2, %s2344_s19 }
  0x8f   : > { %s2465_s12 = sshll.u32 %s2346_s30, 2 }
  0x90   : > { %s3831_s21 = scalar_lea.vmem %s4190_s7, %s2465_s12 }
  0x91   : > { %v2466_v0 = vld [vmem:[%s3831_s21 + $0x10] sm:$0xf]  ;;  %v2467_v1 = vld [vmem:[%s3831_s21 + $0x24] sm:$0xf]  ;;  %v2468_v2 = vld [vmem:[%s3831_s21 + $0x38] sm:$0xf] }
  0x92   : > { %586 = vst [vmem:[%s3836_s5] sm:$0xf] %v2466_v0  ;;  %588 = vst [vmem:[%s3836_s5 + $0x4] sm:$0xf] %v2467_v1  ;;  %v2469_v3 = vld [vmem:[%s3831_s21 + $0x4c] sm:$0xf] }
  0x93   : > { %590 = vst [vmem:[%s3836_s5 + $0x8] sm:$0xf] %v2468_v2  ;;  %v2470_v4 = vld [vmem:[%s3831_s21 + $0x60] sm:$0xf]  ;;  %v2471_v5 = vld [vmem:[%s3831_s21 + $0x74] sm:$0xf] }
  0x94   : > { %592 = vst [vmem:[%s3836_s5 + $0xc] sm:$0xf] %v2469_v3  ;;  %594 = vst [vmem:[%s3836_s5 + $0x10] sm:$0xf] %v2470_v4  ;;  %v2472_v6 = vld [vmem:[%s3831_s21 + $0x88] sm:$0xf] }
  0x95   : > { %596 = vst [vmem:[%s3836_s5 + $0x14] sm:$0xf] %v2471_v5  ;;  %v2473_v7 = vld [vmem:[%s3831_s21 + $0x9c] sm:$0xf]  ;;  %v2474_v8 = vld [vmem:[%s3831_s21 + $0xb0] sm:$0xf] }
  0x96   : > { %598 = vst [vmem:[%s3836_s5 + $0x18] sm:$0xf] %v2472_v6  ;;  %600 = vst [vmem:[%s3836_s5 + $0x1c] sm:$0xf] %v2473_v7  ;;  %v2475_v9 = vld [vmem:[%s3831_s21 + $0xc4] sm:$0xf] }
  0x97   : > { %602 = vst [vmem:[%s3836_s5 + $0x20] sm:$0xf] %v2474_v8  ;;  %v2476_v10 = vld [vmem:[%s3831_s21 + $0xd8] sm:$0xf]  ;;  %v2477_v11 = vld [vmem:[%s3831_s21 + $0xec] sm:$0xf] }
  0x98   : > { %604 = vst [vmem:[%s3836_s5 + $0x24] sm:$0xf] %v2475_v9  ;;  %606 = vst [vmem:[%s3836_s5 + $0x28] sm:$0xf] %v2476_v10  ;;  %v2478_v12 = vld [vmem:[%s3831_s21 + $0x100] sm:$0xf] }
  0x99   : > { %608 = vst [vmem:[%s3836_s5 + $0x2c] sm:$0xf] %v2477_v11  ;;  %v2479_v13 = vld [vmem:[%s3831_s21 + $0x114] sm:$0xf]  ;;  %v2480_v14 = vld [vmem:[%s3831_s21 + $0x128] sm:$0xf] }
  0x9a   : > { %610 = vst [vmem:[%s3836_s5 + $0x30] sm:$0xf] %v2478_v12  ;;  %612 = vst [vmem:[%s3836_s5 + $0x34] sm:$0xf] %v2479_v13  ;;  %v2481_v15 = vld [vmem:[%s3831_s21 + $0x13c] sm:$0xf] }
  0x9b   : > { %614 = vst [vmem:[%s3836_s5 + $0x38] sm:$0xf] %v2480_v14  ;;  %v2482_v16 = vld [vmem:[%s3831_s21 + $0x150] sm:$0xf]  ;;  %v2483_v17 = vld [vmem:[%s3831_s21 + $0x164] sm:$0xf] }
  0x9c   : > { %616 = vst [vmem:[%s3836_s5 + $0x3c] sm:$0xf] %v2481_v15  ;;  %618 = vst [vmem:[%s3836_s5 + $0x40] sm:$0xf] %v2482_v16  ;;  %v2484_v18 = vld [vmem:[%s3831_s21 + $0x178] sm:$0xf] }
  0x9d   : > { %620 = vst [vmem:[%s3836_s5 + $0x44] sm:$0xf] %v2483_v17  ;;  %v2485_v19 = vld [vmem:[%s3831_s21 + $0x18c] sm:$0xf]  ;;  %v2486_v20 = vld [vmem:[%s3831_s21 + $0x1a0] sm:$0xf] }
  0x9e   : > { %622 = vst [vmem:[%s3836_s5 + $0x48] sm:$0xf] %v2484_v18  ;;  %624 = vst [vmem:[%s3836_s5 + $0x4c] sm:$0xf] %v2485_v19  ;;  %v2487_v21 = vld [vmem:[%s3831_s21 + $0x1b4] sm:$0xf] }
  0x9f   : > { %626 = vst [vmem:[%s3836_s5 + $0x50] sm:$0xf] %v2486_v20  ;;  %v2488_v22 = vld [vmem:[%s3831_s21 + $0x1c8] sm:$0xf]  ;;  %v2489_v23 = vld [vmem:[%s3831_s21 + $0x1dc] sm:$0xf] }
  0xa0   : > { %628 = vst [vmem:[%s3836_s5 + $0x54] sm:$0xf] %v2487_v21  ;;  %630 = vst [vmem:[%s3836_s5 + $0x58] sm:$0xf] %v2488_v22  ;;  %v2490_v24 = vld [vmem:[%s3831_s21 + $0x1f0] sm:$0xf] }
  0xa1   : > { %632 = vst [vmem:[%s3836_s5 + $0x5c] sm:$0xf] %v2489_v23  ;;  %v2491_v25 = vld [vmem:[%s3831_s21 + $0x204] sm:$0xf]  ;;  %v2492_v26 = vld [vmem:[%s3831_s21 + $0x218] sm:$0xf] }
  0xa2   : > { %634 = vst [vmem:[%s3836_s5 + $0x60] sm:$0xf] %v2490_v24  ;;  %636 = vst [vmem:[%s3836_s5 + $0x64] sm:$0xf] %v2491_v25  ;;  %v2493_v27 = vld [vmem:[%s3831_s21 + $0x22c] sm:$0xf] }
  0xa3   : > { %638 = vst [vmem:[%s3836_s5 + $0x68] sm:$0xf] %v2492_v26  ;;  %v2494_v28 = vld [vmem:[%s3831_s21 + $0x240] sm:$0xf]  ;;  %v2495_v29 = vld [vmem:[%s3831_s21 + $0x254] sm:$0xf] }
  0xa4   : > { %640 = vst [vmem:[%s3836_s5 + $0x6c] sm:$0xf] %v2493_v27  ;;  %642 = vst [vmem:[%s3836_s5 + $0x70] sm:$0xf] %v2494_v28  ;;  %v2496_v30 = vld [vmem:[%s3831_s21 + $0x268] sm:$0xf] }
  0xa5   : > { %644 = vst [vmem:[%s3836_s5 + $0x74] sm:$0xf] %v2495_v29  ;;  %v2497_v31 = vld [vmem:[%s3831_s21 + $0x27c] sm:$0xf]  ;;  %646 = vst [vmem:[%s3836_s5 + $0x78] sm:$0xf] %v2496_v30 }
  0xa6   : > { %648 = vst [vmem:[%s3836_s5 + $0x7c] sm:$0xf] %v2497_v31 }
  0xa7 PF: > { %s737_s23 = sand.u32 1, %s3450_s29   ;;  %s4191_s2 = sld [smem:[#allocation27_spill]] }
  0xa8   : > { %s3075_s24 = scalar_select %p3664_p10, [#allocation5], [#allocation13] }
  0xa9   : > { %s3076_s25 = scalar_select %p3664_p10, %s3478_s13, 0 }
  0xaa   : > { %s740_s22 = scalar_lea.vmem [#allocation11], %s737_s23  ;;  %s738_s12 = scalar_lea.sflag [#allocation12], %s737_s23 }
  0xab   : > { %s741_s3 = sld [smem:[%s3075_s24 + %s3076_s25]]  ;;  %s748_s26 = sshll.u32 %s740_s22, 4  ;;  %s749_s26 = int_to_ptr.vmem [resolvable:$true] %s748_s26 }
  0xad   : > { %s4192_s16 = smov %s4191_s2 }
  0xae   : > { %s3364_s6 = scalar_lea.hbm %s4192_s16, 32 }
  0xb1   : > { %s2498_s27 = sshll.u32 %s741_s3, 4 }
  0xb2   : > { %s746_s30 = scalar_lea.hbm %s4191_s2, %s2498_s27 }
  0xb3   : > { %s3360_s0 = scalar_lea.hbm %s746_s30, 16  ;;  %p3365_p6 = scmp.lt.s32.totalorder %s746_s30, %s4192_s16 }
  0xb4   : > { %p3361_p3 = scmp.ne.s32.totalorder %s746_s30, %s3360_s0  ;;  %p3366_p7 = scmp.lt.s32.totalorder %s3364_s6, %s3360_s0 }
  0xb6   : > { %p3362_p4 = pnand %p3361_p3, %p3664_p10  ;;  %p3367_p8 = por %p3366_p7, %p3365_p6 }
  0xb8   : > { %p3363_p5 = pneg %p3362_p4 }
  0xba   : > { %p3368_p9 = pnand %p3367_p8, %p3363_p5 }
  0xbc   : > { %3371 = shalt.err (!%p3368_p9)
}
  0xbd   : > { %s3372_s25 = scalar_lea.vmem %s749_s26, 16  ;;  %s3493_s23 = smov [#allocation11]  }
  0xbe   : > { %p3373_p11 = scmp.ne.s32.totalorder %s749_s26, %s3372_s25  ;;  %s3376_s3 = sshll.u32 %s3493_s23, 4  ;;  %s3377_s3 = int_to_ptr.vmem [resolvable:$false] %s3376_s3 }
  0xbf   : > { %s3378_s22 = scalar_lea.vmem %s3377_s3, 32  ;;  %p3379_p0 = scmp.lt.s32.totalorder %s749_s26, %s3377_s3 }
  0xc0   : > { %p3374_p12 = pnand %p3373_p11, %p3664_p10  ;;  %p3380_p2 = scmp.lt.s32.totalorder %s3378_s22, %s3372_s25 }
  0xc2   : > { %p3375_p13 = pneg %p3374_p12  ;;  %p3381_p3 = por %p3380_p2, %p3379_p0 }
  0xc4   : > { %p3382_p4 = pnand %p3381_p3, %p3375_p13 }
  0xc6   : > { %3385 = shalt.err (!%p3382_p4)
}
  0xc7   : > { %3077 = dma.hbm_to_vmem [thread:$0]  (%p3664_p10), %s746_s30, 16, %s749_s26, %s738_s12  }
  0xc8 PF: > { %p2499_p5 = scmp.ge.s32.totalorder %s3486_s15, 1  ;;  %p753_p6 = scmp.lt.s32.totalorder %s3486_s15, 13 }
  0xca   : > { %p754_p7 = pnand %p2499_p5, %p753_p6 }
  0xcb   : > { %s4193_s6 = sld [smem:[#allocation17_spill]] (!%p754_p7)  ;;  %s773_s0 = sand.u32 (!%p754_p7), 1, %s3446_s28  }
  0xcc   : > { %757 = sbr.rel (%p754_p7) target bundleno = 625 (0x271), region = 110  ;;  %s4194_s7 = sld [smem:[#allocation16_spill]] (!%p754_p7) }
  0xcd   : > { %s774_s26 = scalar_lea.sflag (!%p754_p7), [#allocation12], %s773_s0  ;;  %s776_s30 = scalar_lea.vmem (!%p754_p7), [#allocation11], %s773_s0 }
  0xd1   : > { %s760_s27 = sand.u32 1, %s4193_s6  }
  0xd2   : > { %s767_s19 = sand.u32 1, %s4194_s7   ;;  %s2500_s20 = sshll.u32 %s760_s27, 8 }
  0xd3   : > { %s2501_s2 = sshll.u32 %s767_s19, 7  ;;  %s3925_s21 = scalar_lea.vmem [#allocation9], %s2500_s20 }
  0xd4   : > { %s3927_s1 = scalar_lea.vmem [#allocation10], %s2501_s2 }
  0xd5   : > { %3437 = dma.done.wait (%p3675_p1), %s774_s26, 16  }
  0xd6   : > { %3439 = vsyncadd (%p3675_p1), %s774_s26, 4294967280  ;;  %s4195_s12 = sld [smem:[#allocation19_spill]] }
  0xd7   : > { %s4196_s5 = sld [smem:[#allocation18_spill]] }
  0xd8   : > { %s4197_s20 = sld [smem:[#allocation24_spill]] }
  0xd9   : > { %s4198_s14 = sld [smem:[#allocation28_spill]] }
  0xdc   : > { %s2502_s24 = sshll.u32 %s4195_s12, 5 }
  0xdd   : > { %p829_p10 = scmp.lt.s32.totalorder %s4196_s5, 5  ;;  %p831_p8 = scmp.lt.s32.totalorder %s2502_s24, 63 }
  0xde   : > { %s849_s25 = sld [smem:[#allocation5 + %s4196_s5]] }
  0xdf   : > { %s830_s23 = scalar_select %p829_p10, %s4196_s5, 5 }
  0xe0   : > { %s4218_s24 = smov (!%p831_p8, %s2502_s24), 63  ;;  %s863_s22 = sld [smem:[#allocation7 + %s4196_s5]] }
  0xe1   : > { %s2504_s3 = sshll.u32 %s830_s23, 8  ;;  %s2503_s6 = sshll.u32 %s4218_s24, 2 }
  0xe2   : > { %s838_s7 = sadd.s32 %s2504_s3, %s2503_s6 }
  0xe3   : > { %s2505_s27 = sshll.u32 %s838_s7, 2 }
  0xe4   : > { %p851_p9 = scmp.lt.s32.totalorder %s849_s25, 1  ;;  %s3941_s2 = scalar_lea.vmem %s4197_s20, %s2505_s27 }
  0xe6   : > { %s4220_s25 = smov (!%p851_p9, %s849_s25), 1  ;;  %p864_p1 = scmp.eq.s32.totalorder %s863_s22, 1 }
  0xe7   : > { %s2507_s0 = sshll.u32 %s4220_s25, 6  ;;  %v2677_v32 = vld [vmem:[%s3927_s1] sm:$0xff] (%p864_p1)   ;;  %v2820_v34 = vld [vmem:[%s3927_s1 + $0x8] sm:$0xff] (%p864_p1)   ;;  %v2821_v39 = vld [vmem:[%s3927_s1 + $0x10] sm:$0xff] (%p864_p1)  }
  0xe8   : > { %s856_s26 = sadd.s32 %s2507_s0, %s4218_s24  ;;  %868 = sbr.rel (!%p864_p1) target bundleno = 252 (0xfc), region = 126  ;;  %v3949_v33 = vld [vmem:[%s776_s30] ss:$0 sm:$0xff] (%p864_p1)  ;;  %v2678_v35 = vunpack.c.l.bf16 (%p864_p1), %v2677_v32  ;;  %v2679_v36 = vunpack.c.h.bf16 (%p864_p1), %v2677_v32  ;;  %v2682_v37 = vunpack.c.l.bf16 (%p864_p1), %v2820_v34  ;;  %v2683_v38 = vunpack.c.h.bf16 (%p864_p1), %v2820_v34  ;;  %v2822_v40 = vld [vmem:[%s3927_s1 + $0x18] sm:$0xff] (%p864_p1)   ;;  %v2824_v46 = vld [vmem:[%s3927_s1 + $0x28] sm:$0xff] (%p864_p1)  }
  0xe9   : > { %s2508_s12 = sshll.u32 %s856_s26, 2  ;;  %v2686_v41 = vunpack.c.l.bf16 (%p864_p1), %v2821_v39  ;;  %v2687_v42 = vunpack.c.h.bf16 (%p864_p1), %v2821_v39  ;;  %v2690_v43 = vunpack.c.l.bf16 (%p864_p1), %v2822_v40  ;;  %v2691_v44 = vunpack.c.h.bf16 (%p864_p1), %v2822_v40  ;;  %v2823_v45 = vld [vmem:[%s3927_s1 + $0x20] sm:$0xff] (%p864_p1)   ;;  %v2825_v51 = vld [vmem:[%s3927_s1 + $0x30] sm:$0xff] (%p864_p1)   ;;  %v2826_v52 = vld [vmem:[%s3927_s1 + $0x38] sm:$0xff] (%p864_p1)  }
  0xea   : > { %s3946_s13 = scalar_lea.vmem %s4198_s14, %s2508_s12  ;;  %v940_v47 = vadd.f32 (%p864_p1), %v2678_v35, %v3949_v33  ;;  %v941_v48 = vadd.f32 (%p864_p1), %v2679_v36, %v3949_v33  ;;  %v942_v49 = vadd.f32 (%p864_p1), %v2682_v37, %v3949_v33  ;;  %v943_v50 = vadd.f32 (%p864_p1), %v2683_v38, %v3949_v33  ;;  %v2827_v1 = vld [vmem:[%s3927_s1 + $0x40] sm:$0xff] (%p864_p1)   ;;  %v2828_v2 = vld [vmem:[%s3927_s1 + $0x48] sm:$0xff] (%p864_p1)   ;;  %v2829_v7 = vld [vmem:[%s3927_s1 + $0x50] sm:$0xff] (%p864_p1)  }
  0xeb   : > { %v944_v53 = vadd.f32 (%p864_p1), %v2686_v41, %v3949_v33  ;;  %v945_v54 = vadd.f32 (%p864_p1), %v2687_v42, %v3949_v33  ;;  %v946_v55 = vadd.f32 (%p864_p1), %v2690_v43, %v3949_v33  ;;  %v947_v56 = vadd.f32 (%p864_p1), %v2691_v44, %v3949_v33  ;;  %v2830_v8 = vld [vmem:[%s3927_s1 + $0x58] sm:$0xff] (%p864_p1)   ;;  %v2831_v21 = vld [vmem:[%s3927_s1 + $0x60] sm:$0xff] (%p864_p1)   ;;  %v2832_v22 = vld [vmem:[%s3927_s1 + $0x68] sm:$0xff] (%p864_p1)  }
  0xec   : > { %972 = vst [vmem:[#allocation2 + $0xb0] sm:$0xff] (%p864_p1), %v940_v47  ;;  %973 = vst [vmem:[#allocation2] sm:$0xff] (%p864_p1), %v941_v48  ;;  %v2694_v57 = vunpack.c.l.bf16 (%p864_p1), %v2823_v45  ;;  %v2695_v58 = vunpack.c.h.bf16 (%p864_p1), %v2823_v45  ;;  %v2698_v59 = vunpack.c.l.bf16 (%p864_p1), %v2824_v46  ;;  %v2699_v60 = vunpack.c.h.bf16 (%p864_p1), %v2824_v46  ;;  %v2833_v27 = vld [vmem:[%s3927_s1 + $0x70] sm:$0xff] (%p864_p1)   ;;  %v2834_v28 = vld [vmem:[%s3927_s1 + $0x78] sm:$0xff] (%p864_p1)  }
  0xed   : > { %974 = vst [vmem:[#allocation2 + $0xd8] sm:$0xff] %v942_v49  ;;  %975 = vst [vmem:[#allocation2 + $0x18] sm:$0xff] %v943_v50  ;;  %v2702_v61 = vunpack.c.l.bf16 %v2825_v51  ;;  %v2703_v62 = vunpack.c.h.bf16 %v2825_v51  ;;  %v2706_v63 = vunpack.c.l.bf16 %v2826_v52  ;;  %v2707_v0 = vunpack.c.h.bf16 %v2826_v52 }
  0xee   : > { %976 = vst [vmem:[#allocation2 + $0x50] sm:$0xff] %v944_v53  ;;  %977 = vst [vmem:[#allocation2 + $0x68] sm:$0xff] %v945_v54  ;;  %v948_v3 = vadd.f32 %v2694_v57, %v3949_v33  ;;  %v949_v4 = vadd.f32 %v2695_v58, %v3949_v33  ;;  %v950_v5 = vadd.f32 %v2698_v59, %v3949_v33  ;;  %v2710_v13 = vunpack.c.l.bf16 %v2827_v1 }
  0xef   : > { %978 = vst [vmem:[#allocation2 + $0x30] sm:$0xff] %v946_v55  ;;  %979 = vst [vmem:[#allocation2 + $0x48] sm:$0xff] %v947_v56  ;;  %v951_v6 = vadd.f32 %v2699_v60, %v3949_v33  ;;  %v952_v9 = vadd.f32 %v2702_v61, %v3949_v33  ;;  %v953_v10 = vadd.f32 %v2703_v62, %v3949_v33  ;;  %v2711_v14 = vunpack.c.h.bf16 %v2827_v1 }
  0xf0   : > { %v954_v11 = vadd.f32 %v2706_v63, %v3949_v33  ;;  %v955_v12 = vadd.f32 %v2707_v0, %v3949_v33  ;;  %980 = vst [vmem:[#allocation2 + $0x80] sm:$0xff] %v948_v3  ;;  %981 = vst [vmem:[#allocation2 + $0x88] sm:$0xff] %v949_v4  ;;  %v2714_v15 = vunpack.c.l.bf16 %v2828_v2  ;;  %v2715_v16 = vunpack.c.h.bf16 %v2828_v2 }
  0xf1   : > { %982 = vst [vmem:[#allocation2 + $0xe8] sm:$0xff] %v950_v5  ;;  %983 = vst [vmem:[#allocation2 + $0xb8] sm:$0xff] %v951_v6  ;;  %v2718_v17 = vunpack.c.l.bf16 %v2829_v7  ;;  %v2719_v18 = vunpack.c.h.bf16 %v2829_v7  ;;  %v2722_v19 = vunpack.c.l.bf16 %v2830_v8  ;;  %v2723_v20 = vunpack.c.h.bf16 %v2830_v8 }
  0xf2   : > { %984 = vst [vmem:[#allocation2 + $0x60] sm:$0xff] %v952_v9  ;;  %985 = vst [vmem:[#allocation2 + $0xf0] sm:$0xff] %v953_v10  ;;  %v956_v23 = vadd.f32 %v2710_v13, %v3949_v33  ;;  %v957_v24 = vadd.f32 %v2711_v14, %v3949_v33  ;;  %v958_v25 = vadd.f32 %v2714_v15, %v3949_v33  ;;  %v2726_v34 = vunpack.c.l.bf16 %v2831_v21 }
  0xf3   : > { %986 = vst [vmem:[#allocation2 + $0x8] sm:$0xff] %v954_v11  ;;  %987 = vst [vmem:[#allocation2 + $0x78] sm:$0xff] %v955_v12  ;;  %v959_v26 = vadd.f32 %v2715_v16, %v3949_v33  ;;  %v960_v29 = vadd.f32 %v2718_v17, %v3949_v33  ;;  %v961_v30 = vadd.f32 %v2719_v18, %v3949_v33  ;;  %v2727_v35 = vunpack.c.h.bf16 %v2831_v21 }
  0xf4   : > { %v962_v31 = vadd.f32 %v2722_v19, %v3949_v33  ;;  %v963_v32 = vadd.f32 %v2723_v20, %v3949_v33  ;;  %988 = vst [vmem:[#allocation2 + $0x38] sm:$0xff] %v956_v23  ;;  %989 = vst [vmem:[#allocation2 + $0x58] sm:$0xff] %v957_v24  ;;  %v2730_v36 = vunpack.c.l.bf16 %v2832_v22  ;;  %v2731_v37 = vunpack.c.h.bf16 %v2832_v22 }
  0xf5   : > { %990 = vst [vmem:[#allocation2 + $0x40] sm:$0xff] %v958_v25  ;;  %991 = vst [vmem:[#allocation2 + $0xc8] sm:$0xff] %v959_v26  ;;  %v2734_v38 = vunpack.c.l.bf16 %v2833_v27  ;;  %v2735_v39 = vunpack.c.h.bf16 %v2833_v27  ;;  %v2738_v40 = vunpack.c.l.bf16 %v2834_v28  ;;  %v2739_v41 = vunpack.c.h.bf16 %v2834_v28 }
  0xf6   : > { %992 = vst [vmem:[#allocation2 + $0xe0] sm:$0xff] %v960_v29  ;;  %993 = vst [vmem:[#allocation2 + $0x90] sm:$0xff] %v961_v30  ;;  %v964_v42 = vadd.f32 %v2726_v34, %v3949_v33  ;;  %v965_v43 = vadd.f32 %v2727_v35, %v3949_v33  ;;  %v966_v44 = vadd.f32 %v2730_v36, %v3949_v33 }
  0xf7   : > { %994 = vst [vmem:[#allocation2 + $0x70] sm:$0xff] %v962_v31  ;;  %995 = vst [vmem:[#allocation2 + $0xc0] sm:$0xff] %v963_v32  ;;  %v967_v45 = vadd.f32 %v2731_v37, %v3949_v33  ;;  %v968_v46 = vadd.f32 %v2734_v38, %v3949_v33  ;;  %v969_v47 = vadd.f32 %v2735_v39, %v3949_v33 }
  0xf8   : > { %v970_v48 = vadd.f32 %v2738_v40, %v3949_v33  ;;  %v971_v49 = vadd.f32 %v2739_v41, %v3949_v33  ;;  %996 = vst [vmem:[#allocation2 + $0xa8] sm:$0xff] %v964_v42  ;;  %997 = vst [vmem:[#allocation2 + $0xd0] sm:$0xff] %v965_v43 }
  0xf9   : > { %998 = vst [vmem:[#allocation2 + $0x10] sm:$0xff] %v966_v44  ;;  %999 = vst [vmem:[#allocation2 + $0x28] sm:$0xff] %v967_v45 }
  0xfa   : > { %1000 = vst [vmem:[#allocation2 + $0xa0] sm:$0xff] %v968_v46  ;;  %1001 = vst [vmem:[#allocation2 + $0xf8] sm:$0xff] %v969_v47 }
  0xfb   : > { %1002 = vst [vmem:[#allocation2 + $0x20] sm:$0xff] %v970_v48  ;;  %1003 = vst [vmem:[#allocation2 + $0x98] sm:$0xff] %v971_v49 }
  0xfc PF: > { %v3180_v50 = vld [vmem:[%s3925_s21 + $0x78] sm:$0xff]   ;;  %v3184_v53 = vld [vmem:[%s3925_s21 + $0x70] sm:$0xff]   ;;  %v3188_v57 = vld [vmem:[%s3925_s21 + $0x68] sm:$0xff]   ;;  %s4199_s14 = sld [smem:[#allocation18_spill]] }
  0xfd   : > { %v3181_v33 = vld [vmem:[%s3925_s21 + $0xf8] sm:$0xff]   ;;  %2850 = vmatprep.subr.bf16.mxu0 %v3180_v50  ;;  %v3185_v54 = vld [vmem:[%s3925_s21 + $0xf0] sm:$0xff]   ;;  %v3189_v58 = vld [vmem:[%s3925_s21 + $0xe8] sm:$0xff]  }
  0xfe   : > { %v3182_v51 = vld [vmem:[%s3925_s21 + $0x38] sm:$0xff]   ;;  %2962 = vmatprep.subr.bf16.mxu1 %v3181_v33  ;;  %v3186_v55 = vld [vmem:[%s3925_s21 + $0x30] sm:$0xff]   ;;  %v3190_v59 = vld [vmem:[%s3925_s21 + $0x28] sm:$0xff]  }
  0xff   : > { %v3183_v52 = vld [vmem:[%s3925_s21 + $0xb8] sm:$0xff]   ;;  %2851 = vmatpush3.bf16.msra.mxu0 %v3182_v51  ;;  %v3187_v56 = vld [vmem:[%s3925_s21 + $0xb0] sm:$0xff]   ;;  %v3191_v60 = vld [vmem:[%s3925_s21 + $0xa8] sm:$0xff]  }
 0x100   : > { %2963 = vmatpush3.bf16.msra.mxu1 %v3183_v52  ;;  %2852 = vmatprep.subr.bf16.mxu0 %v3184_v53  ;;  %v3192_v61 = vld [vmem:[%s3925_s21 + $0x60] sm:$0xff]   ;;  %v3196_v1 = vld [vmem:[%s3925_s21 + $0x58] sm:$0xff]   ;;  %v3200_v5 = vld [vmem:[%s3925_s21 + $0x50] sm:$0xff]  }
 0x101   : > { %2964 = vmatprep.subr.bf16.mxu1 %v3185_v54  ;;  %v3193_v62 = vld [vmem:[%s3925_s21 + $0xe0] sm:$0xff]   ;;  %v3197_v2 = vld [vmem:[%s3925_s21 + $0xd8] sm:$0xff]   ;;  %v3201_v6 = vld [vmem:[%s3925_s21 + $0xd0] sm:$0xff]  }
 0x102   : > { %v3194_v63 = vld [vmem:[%s3925_s21 + $0x20] sm:$0xff]   ;;  %v3198_v3 = vld [vmem:[%s3925_s21 + $0x18] sm:$0xff]   ;;  %v3202_v7 = vld [vmem:[%s3925_s21 + $0x10] sm:$0xff]   ;;  %s4095_s17 = sld [smem:[#allocation8 + %s4199_s14]] }
 0x103   : > { %2853 = vmatpush3.bf16.msra.mxu0 %v3186_v55  ;;  %v3195_v0 = vld [vmem:[%s3925_s21 + $0xa0] sm:$0xff]   ;;  %v3199_v4 = vld [vmem:[%s3925_s21 + $0x98] sm:$0xff]   ;;  %v3203_v8 = vld [vmem:[%s3925_s21 + $0x90] sm:$0xff]  }
 0x104   : > { %2965 = vmatpush3.bf16.msra.mxu1 %v3187_v56  ;;  %2854 = vmatprep.subr.bf16.mxu0 %v3188_v57  ;;  %v3204_v9 = vld [vmem:[%s3925_s21 + $0x48] sm:$0xff]   ;;  %v3208_v13 = vld [vmem:[%s3925_s21 + $0x40] sm:$0xff]  }
 0x105   : > { %2966 = vmatprep.subr.bf16.mxu1 %v3189_v58  ;;  %v3205_v10 = vld [vmem:[%s3925_s21 + $0xc8] sm:$0xff]   ;;  %v3209_v14 = vld [vmem:[%s3925_s21 + $0xc0] sm:$0xff]  }
 0x106   : > { %v3206_v11 = vld [vmem:[%s3925_s21 + $0x8] sm:$0xff]   ;;  %v3210_v15 = vld [vmem:[%s3925_s21] sm:$0xff]  }
 0x107   : > { %2855 = vmatpush3.bf16.msra.mxu0 %v3190_v59  ;;  %v3207_v12 = vld [vmem:[%s3925_s21 + $0x88] sm:$0xff]   ;;  %v3211_v16 = vld [vmem:[%s3925_s21 + $0x80] sm:$0xff]  }
 0x108   : > { %2967 = vmatpush3.bf16.msra.mxu1 %v3191_v60  ;;  %2856 = vmatprep.subr.bf16.mxu0 %v3192_v61  ;;  %v3212_v17 = vld [vmem:[%s3941_s2] ss:$16 sps:$4 sm:$0xff]   ;;  %v3214_v18 = vld [vmem:[%s3941_s2 + $0x4] ss:$16 sps:$4 sm:$0xff]   ;;  %v3215_v19 = vld [vmem:[%s3941_s2 + $0x8] ss:$16 sps:$4 sm:$0xff]  }
 0x109   : > { %2968 = vmatprep.subr.bf16.mxu1 %v3193_v62  ;;  %v3217_v20 = vld [vmem:[%s3941_s2 + $0xc] ss:$16 sps:$4 sm:$0xff]   ;;  %1708 = vmatprep.mubr.bf16.mxu0 %v3214_v18  ;;  %v3218_v21 = vld [vmem:[%s3941_s2 + $0x24] ss:$16 sps:$4 sm:$0xff]   ;;  %v3222_v23 = vld [vmem:[%s3941_s2 + $0x20] ss:$16 sps:$4 sm:$0xff]  }
 0x10a   : > { %1869 = vmatprep.mubr.bf16.mxu1 %v3217_v20  ;;  %v3220_v22 = vld [vmem:[%s3941_s2 + $0x2c] ss:$16 sps:$4 sm:$0xff]   ;;  %v3223_v24 = vld [vmem:[%s3941_s2 + $0x28] ss:$16 sps:$4 sm:$0xff]   ;;  %v3224_v25 = vld [vmem:[%s3941_s2 + $0x44] ss:$16 sps:$4 sm:$0xff]  }
 0x10b   : > { %2857 = vmatpush3.bf16.msra.mxu0 %v3194_v63  ;;  %v3226_v26 = vld [vmem:[%s3941_s2 + $0x4c] ss:$16 sps:$4 sm:$0xff]   ;;  %v3228_v27 = vld [vmem:[%s3941_s2 + $0x40] ss:$16 sps:$4 sm:$0xff]   ;;  %v3229_v28 = vld [vmem:[%s3941_s2 + $0x48] ss:$16 sps:$4 sm:$0xff]  }
 0x10c   : > { %2969 = vmatpush3.bf16.msra.mxu1 %v3195_v0  ;;  %2858 = vmatprep.subr.bf16.mxu0 %v3196_v1  ;;  %v3230_v29 = vld [vmem:[%s3941_s2 + $0x64] ss:$16 sps:$4 sm:$0xff]   ;;  %v3232_v30 = vld [vmem:[%s3941_s2 + $0x6c] ss:$16 sps:$4 sm:$0xff]   ;;  %v3234_v31 = vld [vmem:[%s3941_s2 + $0x60] ss:$16 sps:$4 sm:$0xff]  }
 0x10d   : > { %2970 = vmatprep.subr.bf16.mxu1 %v3197_v2  ;;  %v3235_v32 = vld [vmem:[%s3941_s2 + $0x68] ss:$16 sps:$4 sm:$0xff]   ;;  %v3236_v34 = vld [vmem:[%s3941_s2 + $0x84] ss:$16 sps:$4 sm:$0xff]   ;;  %v3238_v35 = vld [vmem:[%s3941_s2 + $0x8c] ss:$16 sps:$4 sm:$0xff]  }
 0x10e   : > { %v3240_v36 = vld [vmem:[%s3941_s2 + $0x80] ss:$16 sps:$4 sm:$0xff]   ;;  %v3241_v37 = vld [vmem:[%s3941_s2 + $0x88] ss:$16 sps:$4 sm:$0xff]   ;;  %v3242_v38 = vld [vmem:[%s3941_s2 + $0xa4] ss:$16 sps:$4 sm:$0xff]  }
 0x10f   : > { %2859 = vmatpush3.bf16.msra.mxu0 %v3198_v3  ;;  %v3244_v39 = vld [vmem:[%s3941_s2 + $0xac] ss:$16 sps:$4 sm:$0xff]   ;;  %v3246_v40 = vld [vmem:[%s3941_s2 + $0xa0] ss:$16 sps:$4 sm:$0xff]   ;;  %v3247_v41 = vld [vmem:[%s3941_s2 + $0xa8] ss:$16 sps:$4 sm:$0xff]  }
 0x110   : > { %2971 = vmatpush3.bf16.msra.mxu1 %v3199_v4  ;;  %2860 = vmatprep.subr.bf16.mxu0 %v3200_v5  ;;  %v3248_v42 = vld [vmem:[%s3941_s2 + $0xc4] ss:$16 sps:$4 sm:$0xff]   ;;  %v3250_v43 = vld [vmem:[%s3941_s2 + $0xcc] ss:$16 sps:$4 sm:$0xff]   ;;  %v3252_v44 = vld [vmem:[%s3941_s2 + $0xc0] ss:$16 sps:$4 sm:$0xff]  }
 0x111   : > { %2972 = vmatprep.subr.bf16.mxu1 %v3201_v6  ;;  %v3253_v45 = vld [vmem:[%s3941_s2 + $0xc8] ss:$16 sps:$4 sm:$0xff]   ;;  %v3254_v46 = vld [vmem:[%s3941_s2 + $0xe4] ss:$16 sps:$4 sm:$0xff]   ;;  %v3256_v47 = vld [vmem:[%s3941_s2 + $0xec] ss:$16 sps:$4 sm:$0xff]  }
 0x112   : > { %v3258_v48 = vld [vmem:[%s3941_s2 + $0xe0] ss:$16 sps:$4 sm:$0xff]   ;;  %v3259_v49 = vld [vmem:[%s3941_s2 + $0xe8] ss:$16 sps:$4 sm:$0xff]   ;;  %v3260_v50 = vld [vmem:[%s3941_s2 + $0x104] ss:$16 sps:$4 sm:$0xff]  }
 0x113   : > { %2861 = vmatpush3.bf16.msra.mxu0 %v3202_v7  ;;  %v3262_v33 = vld [vmem:[%s3941_s2 + $0x10c] ss:$16 sps:$4 sm:$0xff]   ;;  %v3264_v51 = vld [vmem:[%s3941_s2 + $0x100] ss:$16 sps:$4 sm:$0xff]   ;;  %v3265_v52 = vld [vmem:[%s3941_s2 + $0x108] ss:$16 sps:$4 sm:$0xff]  }
 0x114   : > { %2973 = vmatpush3.bf16.msra.mxu1 %v3203_v8  ;;  %2862 = vmatprep.subr.bf16.mxu0 %v3204_v9  ;;  %v3266_v53 = vld [vmem:[%s3941_s2 + $0x124] ss:$16 sps:$4 sm:$0xff]   ;;  %v3268_v54 = vld [vmem:[%s3941_s2 + $0x12c] ss:$16 sps:$4 sm:$0xff]   ;;  %v3270_v55 = vld [vmem:[%s3941_s2 + $0x120] ss:$16 sps:$4 sm:$0xff]  }
 0x115   : > { %2974 = vmatprep.subr.bf16.mxu1 %v3205_v10  ;;  %v3271_v56 = vld [vmem:[%s3941_s2 + $0x128] ss:$16 sps:$4 sm:$0xff]   ;;  %v3272_v57 = vld [vmem:[%s3941_s2 + $0x144] ss:$16 sps:$4 sm:$0xff]   ;;  %v3274_v58 = vld [vmem:[%s3941_s2 + $0x14c] ss:$16 sps:$4 sm:$0xff]  }
 0x116   : > { %v3276_v59 = vld [vmem:[%s3941_s2 + $0x140] ss:$16 sps:$4 sm:$0xff]   ;;  %v3277_v60 = vld [vmem:[%s3941_s2 + $0x148] ss:$16 sps:$4 sm:$0xff]   ;;  %v3278_v61 = vld [vmem:[%s3941_s2 + $0x164] ss:$16 sps:$4 sm:$0xff]  }
 0x117   : > { %2863 = vmatpush3.bf16.msra.mxu0 %v3206_v11  ;;  %v3280_v62 = vld [vmem:[%s3941_s2 + $0x16c] ss:$16 sps:$4 sm:$0xff]   ;;  %v3282_v63 = vld [vmem:[%s3941_s2 + $0x160] ss:$16 sps:$4 sm:$0xff]   ;;  %v3283_v0 = vld [vmem:[%s3941_s2 + $0x168] ss:$16 sps:$4 sm:$0xff]  }
 0x118   : > { %2975 = vmatpush3.bf16.msra.mxu1 %v3207_v12  ;;  %2864 = vmatprep.subr.bf16.mxu0 %v3208_v13  ;;  %v3284_v1 = vld [vmem:[%s3941_s2 + $0x184] ss:$16 sps:$4 sm:$0xff]   ;;  %v3286_v2 = vld [vmem:[%s3941_s2 + $0x18c] ss:$16 sps:$4 sm:$0xff]   ;;  %v3288_v3 = vld [vmem:[%s3941_s2 + $0x180] ss:$16 sps:$4 sm:$0xff]  }
 0x119   : > { %2976 = vmatprep.subr.bf16.mxu1 %v3209_v14  ;;  %v3289_v4 = vld [vmem:[%s3941_s2 + $0x188] ss:$16 sps:$4 sm:$0xff]   ;;  %v3290_v5 = vld [vmem:[%s3941_s2 + $0x1a4] ss:$16 sps:$4 sm:$0xff]   ;;  %v3292_v6 = vld [vmem:[%s3941_s2 + $0x1ac] ss:$16 sps:$4 sm:$0xff]  }
 0x11a   : > { %v3294_v7 = vld [vmem:[%s3941_s2 + $0x1a0] ss:$16 sps:$4 sm:$0xff]   ;;  %v3295_v8 = vld [vmem:[%s3941_s2 + $0x1a8] ss:$16 sps:$4 sm:$0xff]   ;;  %v3296_v9 = vld [vmem:[%s3941_s2 + $0x1c4] ss:$16 sps:$4 sm:$0xff]  }
 0x11b   : > { %2865 = vmatpush3.bf16.msra.mxu0 %v3210_v15  ;;  %v3298_v10 = vld [vmem:[%s3941_s2 + $0x1cc] ss:$16 sps:$4 sm:$0xff]   ;;  %v3300_v11 = vld [vmem:[%s3941_s2 + $0x1c0] ss:$16 sps:$4 sm:$0xff]   ;;  %v3301_v12 = vld [vmem:[%s3941_s2 + $0x1c8] ss:$16 sps:$4 sm:$0xff]  }
 0x11c   : > { %2977 = vmatpush3.bf16.msra.mxu1 %v3211_v16  ;;  %v3302_v13 = vld [vmem:[%s3941_s2 + $0x1e4] ss:$16 sps:$4 sm:$0xff]   ;;  %v3304_v14 = vld [vmem:[%s3941_s2 + $0x1ec] ss:$16 sps:$4 sm:$0xff]   ;;  %v3306_v15 = vld [vmem:[%s3941_s2 + $0x1e0] ss:$16 sps:$4 sm:$0xff]  }
 0x11d   : > { %v3307_v16 = vld [vmem:[%s3941_s2 + $0x1e8] ss:$16 sps:$4 sm:$0xff]   ;;  %p2063_p11 = scmp.eq.s32.totalorder %s4095_s17, 1 }
 0x11e   : > { %1709 = vmatmul.mubr.bf16.vlgmr.msra.gmra.mxu0 %v3212_v17 }
 0x11f   : > { %1870 = vmatmul.mubr.bf16.vlgmr.msra.gmra.mxu1 %v3215_v19  ;;  %1716 = vmatprep.mubr.bf16.mxu0 %v3218_v21 }
 0x120   : > { %1877 = vmatprep.mubr.bf16.mxu1 %v3220_v22 }
 0x126   : > { %1717 = vmatmul.mubr.bf16.gmra.mxu0 %v3222_v23 }
 0x127   : > { %1878 = vmatmul.mubr.bf16.gmra.mxu1 %v3223_v24  ;;  %1724 = vmatprep.mubr.bf16.mxu0 %v3224_v25  ;;  %v1004_v24 = vld [vmem:[#allocation2 + $0xb0] sm:$0xff] }
 0x128   : > { %1885 = vmatprep.mubr.bf16.mxu1 %v3226_v26 }
 0x12e   : > { %1725 = vmatmul.mubr.bf16.gmra.mxu0 %v3228_v27 }
 0x12f   : > { %1886 = vmatmul.mubr.bf16.gmra.mxu1 %v3229_v28  ;;  %1732 = vmatprep.mubr.bf16.mxu0 %v3230_v29 }
 0x130   : > { %1893 = vmatprep.mubr.bf16.mxu1 %v3232_v30 }
 0x136   : > { %1733 = vmatmul.mubr.bf16.gmra.mxu0 %v3234_v31 }
 0x137   : > { %1894 = vmatmul.mubr.bf16.gmra.mxu1 %v3235_v32  ;;  %1740 = vmatprep.mubr.bf16.mxu0 %v3236_v34  ;;  %v1005_v34 = vld [vmem:[#allocation2] sm:$0xff] }
 0x138   : > { %1901 = vmatprep.mubr.bf16.mxu1 %v3238_v35 }
 0x13e   : > { %1741 = vmatmul.mubr.bf16.gmra.mxu0 %v3240_v36 }
 0x13f   : > { %1902 = vmatmul.mubr.bf16.gmra.mxu1 %v3241_v37  ;;  %1748 = vmatprep.mubr.bf16.mxu0 %v3242_v38 }
 0x140   : > { %1909 = vmatprep.mubr.bf16.mxu1 %v3244_v39 }
 0x146   : > { %1749 = vmatmul.mubr.bf16.gmra.mxu0 %v3246_v40 }
 0x147   : > { %1910 = vmatmul.mubr.bf16.gmra.mxu1 %v3247_v41  ;;  %1756 = vmatprep.mubr.bf16.mxu0 %v3248_v42 }
 0x148   : > { %1917 = vmatprep.mubr.bf16.mxu1 %v3250_v43  ;;  %v1006_v43 = vld [vmem:[#allocation2 + $0xd8] sm:$0xff] }
 0x14e   : > { %1757 = vmatmul.mubr.bf16.gmra.mxu0 %v3252_v44 }
 0x14f   : > { %1918 = vmatmul.mubr.bf16.gmra.mxu1 %v3253_v45  ;;  %1764 = vmatprep.mubr.bf16.mxu0 %v3254_v46 }
 0x150   : > { %1925 = vmatprep.mubr.bf16.mxu1 %v3256_v47 }
 0x156   : > { %1765 = vmatmul.mubr.bf16.gmra.mxu0 %v3258_v48 }
 0x157   : > { %1926 = vmatmul.mubr.bf16.gmra.mxu1 %v3259_v49  ;;  %1772 = vmatprep.mubr.bf16.mxu0 %v3260_v50 }
 0x158   : > { %1933 = vmatprep.mubr.bf16.mxu1 %v3262_v33 }
 0x15e   : > { %1773 = vmatmul.mubr.bf16.gmra.mxu0 %v3264_v51  ;;  %v1007_v51 = vld [vmem:[#allocation2 + $0x18] sm:$0xff] }
 0x15f   : > { %1934 = vmatmul.mubr.bf16.gmra.mxu1 %v3265_v52  ;;  %1780 = vmatprep.mubr.bf16.mxu0 %v3266_v53 }
 0x160   : > { %1941 = vmatprep.mubr.bf16.mxu1 %v3268_v54 }
 0x166   : > { %1781 = vmatmul.mubr.bf16.gmra.mxu0 %v3270_v55 }
 0x167   : > { %1942 = vmatmul.mubr.bf16.gmra.mxu1 %v3271_v56  ;;  %1788 = vmatprep.mubr.bf16.mxu0 %v3272_v57 }
 0x168   : > { %1949 = vmatprep.mubr.bf16.mxu1 %v3274_v58 }
 0x16e   : > { %1789 = vmatmul.mubr.bf16.gmra.mxu0 %v3276_v59 }
 0x16f   : > { %1950 = vmatmul.mubr.bf16.gmra.mxu1 %v3277_v60  ;;  %1796 = vmatprep.mubr.bf16.mxu0 %v3278_v61  ;;  %v1008_v60 = vld [vmem:[#allocation2 + $0x50] sm:$0xff] }
 0x170   : > { %1957 = vmatprep.mubr.bf16.mxu1 %v3280_v62 }
 0x176   : > { %1797 = vmatmul.mubr.bf16.gmra.mxu0 %v3282_v63 }
 0x177   : > { %1958 = vmatmul.mubr.bf16.gmra.mxu1 %v3283_v0  ;;  %1804 = vmatprep.mubr.bf16.mxu0 %v3284_v1 }
 0x178   : > { %1965 = vmatprep.mubr.bf16.mxu1 %v3286_v2 }
 0x17e   : > { %1805 = vmatmul.mubr.bf16.gmra.mxu0 %v3288_v3 }
 0x17f   : > { %1966 = vmatmul.mubr.bf16.gmra.mxu1 %v3289_v4  ;;  %1812 = vmatprep.mubr.bf16.mxu0 %v3290_v5  ;;  %v1009_v5 = vld [vmem:[#allocation2 + $0x68] sm:$0xff] }
 0x180   : > { %1973 = vmatprep.mubr.bf16.mxu1 %v3292_v6 }
 0x186   : > { %1813 = vmatmul.mubr.bf16.gmra.mxu0 %v3294_v7 }
 0x187   : > { %1974 = vmatmul.mubr.bf16.gmra.mxu1 %v3295_v8  ;;  %1820 = vmatprep.mubr.bf16.mxu0 %v3296_v9 }
 0x188   : > { %1981 = vmatprep.mubr.bf16.mxu1 %v3298_v10 }
 0x18e   : > { %1821 = vmatmul.mubr.bf16.gmra.mxu0 %v3300_v11 }
 0x18f   : > { %1982 = vmatmul.mubr.bf16.gmra.mxu1 %v3301_v12  ;;  %1828 = vmatprep.mubr.bf16.mxu0 %v3302_v13 }
 0x190   : > { %1989 = vmatprep.mubr.bf16.mxu1 %v3304_v14  ;;  %v1010_v14 = vld [vmem:[#allocation2 + $0x30] sm:$0xff] }
 0x196   : > { %1829 = vmatmul.mubr.bf16.gmra.mxu0 %v3306_v15 }
 0x197   : > { %1990 = vmatmul.mubr.bf16.gmra.mxu1 %v3307_v16 }
 0x1de   : > { %v2866_v17 = vpop.f32.mrf.mxu0 }
 0x1df   : > { %v2978_v18 = vpop.f32.mrf.mxu1 }
 0x1e0   : > { %v2867_v19 = vpop.f32.mrf.mxu0 }
 0x1e1   : > { %v2868_v20 = vadd.f32 %v2867_v19, %v2866_v17  ;;  %v2979_v21 = vpop.f32.mrf.mxu1 }
 0x1e2   : > { %v2980_v22 = vadd.f32 %v2979_v21, %v2978_v18  ;;  %v2869_v23 = vpop.f32.mrf.mxu0 }
 0x1e3   : > { %v2981_v25 = vpop.f32.mrf.mxu1 }
 0x1e4   : > { %v1872_v26 = vadd.f32 %v2980_v22, %v2868_v20  ;;  %v2870_v27 = vpop.f32.mrf.mxu0 }
 0x1e5   : > { %v2871_v28 = vadd.f32 %v2870_v27, %v2869_v23  ;;  %v2982_v29 = vpop.f32.mrf.mxu1  ;;  %v1011_v23 = vld [vmem:[#allocation2 + $0x48] sm:$0xff] }
 0x1e6   : > { %v1998_v30 = vadd.f32 %v1872_v26, %v1004_v24  ;;  %v2983_v31 = vadd.f32 %v2982_v29, %v2981_v25  ;;  %v2872_v32 = vpop.f32.mrf.mxu0 }
 0x1e7   : > { %v2984_v35 = vpop.f32.mrf.mxu1 }
 0x1e8   : > { %2030 = vst [vmem:[#allocation2 + $0xb0] sm:$0xff] %v1998_v30  ;;  %v1875_v36 = vadd.f32 %v2983_v31, %v2871_v28  ;;  %v2873_v37 = vpop.f32.mrf.mxu0 }
 0x1e9   : > { %v2874_v38 = vadd.f32 %v2873_v37, %v2872_v32  ;;  %v2985_v39 = vpop.f32.mrf.mxu1  ;;  %v1012_v32 = vld [vmem:[#allocation2 + $0x80] sm:$0xff] }
 0x1ea   : > { %v1999_v40 = vadd.f32 %v1875_v36, %v1005_v34  ;;  %v2986_v41 = vadd.f32 %v2985_v39, %v2984_v35  ;;  %v2875_v42 = vpop.f32.mrf.mxu0 }
 0x1eb   : > { %v2987_v44 = vpop.f32.mrf.mxu1 }
 0x1ec   : > { %2031 = vst [vmem:[#allocation2] sm:$0xff] %v1999_v40  ;;  %v1880_v45 = vadd.f32 %v2986_v41, %v2874_v38  ;;  %v2876_v46 = vpop.f32.mrf.mxu0 }
 0x1ed   : > { %v2877_v47 = vadd.f32 %v2876_v46, %v2875_v42  ;;  %v2988_v48 = vpop.f32.mrf.mxu1  ;;  %v1013_v42 = vld [vmem:[#allocation2 + $0x88] sm:$0xff] }
 0x1ee   : > { %v2000_v49 = vadd.f32 %v1880_v45, %v1006_v43  ;;  %v2989_v50 = vadd.f32 %v2988_v48, %v2987_v44  ;;  %v2878_v33 = vpop.f32.mrf.mxu0 }
 0x1ef   : > { %v2990_v52 = vpop.f32.mrf.mxu1 }
 0x1f0   : > { %2032 = vst [vmem:[#allocation2 + $0xd8] sm:$0xff] %v2000_v49  ;;  %v1883_v53 = vadd.f32 %v2989_v50, %v2877_v47  ;;  %v2879_v54 = vpop.f32.mrf.mxu0 }
 0x1f1   : > { %v2880_v55 = vadd.f32 %v2879_v54, %v2878_v33  ;;  %v2991_v56 = vpop.f32.mrf.mxu1  ;;  %v1014_v33 = vld [vmem:[#allocation2 + $0xe8] sm:$0xff] }
 0x1f2   : > { %v2001_v57 = vadd.f32 %v1883_v53, %v1007_v51  ;;  %v2992_v58 = vadd.f32 %v2991_v56, %v2990_v52  ;;  %v2881_v59 = vpop.f32.mrf.mxu0 }
 0x1f3   : > { %v2993_v61 = vpop.f32.mrf.mxu1 }
 0x1f4   : > { %2033 = vst [vmem:[#allocation2 + $0x18] sm:$0xff] %v2001_v57  ;;  %v1888_v62 = vadd.f32 %v2992_v58, %v2880_v55  ;;  %v2882_v63 = vpop.f32.mrf.mxu0 }
 0x1f5   : > { %v2883_v0 = vadd.f32 %v2882_v63, %v2881_v59  ;;  %v2994_v1 = vpop.f32.mrf.mxu1  ;;  %v1015_v59 = vld [vmem:[#allocation2 + $0xb8] sm:$0xff] }
 0x1f6   : > { %v2002_v2 = vadd.f32 %v1888_v62, %v1008_v60  ;;  %v2995_v3 = vadd.f32 %v2994_v1, %v2993_v61  ;;  %v2884_v4 = vpop.f32.mrf.mxu0 }
 0x1f7   : > { %v2996_v6 = vpop.f32.mrf.mxu1 }
 0x1f8   : > { %2034 = vst [vmem:[#allocation2 + $0x50] sm:$0xff] %v2002_v2  ;;  %v1891_v7 = vadd.f32 %v2995_v3, %v2883_v0  ;;  %v2885_v8 = vpop.f32.mrf.mxu0 }
 0x1f9   : > { %v2886_v9 = vadd.f32 %v2885_v8, %v2884_v4  ;;  %v2997_v10 = vpop.f32.mrf.mxu1  ;;  %v1016_v4 = vld [vmem:[#allocation2 + $0x60] sm:$0xff] }
 0x1fa   : > { %v2003_v11 = vadd.f32 %v1891_v7, %v1009_v5  ;;  %v2998_v12 = vadd.f32 %v2997_v10, %v2996_v6  ;;  %v2887_v13 = vpop.f32.mrf.mxu0 }
 0x1fb   : > { %v2999_v15 = vpop.f32.mrf.mxu1 }
 0x1fc   : > { %2035 = vst [vmem:[#allocation2 + $0x68] sm:$0xff] %v2003_v11  ;;  %v1896_v16 = vadd.f32 %v2998_v12, %v2886_v9  ;;  %v2888_v17 = vpop.f32.mrf.mxu0 }
 0x1fd   : > { %v2889_v18 = vadd.f32 %v2888_v17, %v2887_v13  ;;  %v3000_v19 = vpop.f32.mrf.mxu1  ;;  %v1017_v13 = vld [vmem:[#allocation2 + $0xf0] sm:$0xff] }
 0x1fe   : > { %v2004_v20 = vadd.f32 %v1896_v16, %v1010_v14  ;;  %v3001_v21 = vadd.f32 %v3000_v19, %v2999_v15  ;;  %v2890_v22 = vpop.f32.mrf.mxu0 }
 0x1ff   : > { %v3002_v24 = vpop.f32.mrf.mxu1 }
 0x200   : > { %2036 = vst [vmem:[#allocation2 + $0x30] sm:$0xff] %v2004_v20  ;;  %v1899_v25 = vadd.f32 %v3001_v21, %v2889_v18  ;;  %v2891_v26 = vpop.f32.mrf.mxu0 }
 0x201   : > { %v2892_v27 = vadd.f32 %v2891_v26, %v2890_v22  ;;  %v3003_v28 = vpop.f32.mrf.mxu1  ;;  %v1018_v22 = vld [vmem:[#allocation2 + $0x8] sm:$0xff] }
 0x202   : > { %v2005_v29 = vadd.f32 %v1899_v25, %v1011_v23  ;;  %v3004_v30 = vadd.f32 %v3003_v28, %v3002_v24  ;;  %v2893_v31 = vpop.f32.mrf.mxu0 }
 0x203   : > { %v3005_v34 = vpop.f32.mrf.mxu1 }
 0x204   : > { %2037 = vst [vmem:[#allocation2 + $0x48] sm:$0xff] %v2005_v29  ;;  %v1904_v35 = vadd.f32 %v3004_v30, %v2892_v27  ;;  %v2894_v36 = vpop.f32.mrf.mxu0 }
 0x205   : > { %v2895_v37 = vadd.f32 %v2894_v36, %v2893_v31  ;;  %v3006_v38 = vpop.f32.mrf.mxu1  ;;  %v1019_v31 = vld [vmem:[#allocation2 + $0x78] sm:$0xff] }
 0x206   : > { %v2006_v39 = vadd.f32 %v1904_v35, %v1012_v32  ;;  %v3007_v40 = vadd.f32 %v3006_v38, %v3005_v34  ;;  %v2896_v41 = vpop.f32.mrf.mxu0 }
 0x207   : > { %v3008_v43 = vpop.f32.mrf.mxu1 }
 0x208   : > { %2038 = vst [vmem:[#allocation2 + $0x80] sm:$0xff] %v2006_v39  ;;  %v1907_v44 = vadd.f32 %v3007_v40, %v2895_v37  ;;  %v2897_v45 = vpop.f32.mrf.mxu0 }
 0x209   : > { %v2898_v46 = vadd.f32 %v2897_v45, %v2896_v41  ;;  %v3009_v47 = vpop.f32.mrf.mxu1  ;;  %v1020_v41 = vld [vmem:[#allocation2 + $0x38] sm:$0xff] }
 0x20a   : > { %v2007_v48 = vadd.f32 %v1907_v44, %v1013_v42  ;;  %v3010_v49 = vadd.f32 %v3009_v47, %v3008_v43  ;;  %v2899_v50 = vpop.f32.mrf.mxu0 }
 0x20b   : > { %v3011_v51 = vpop.f32.mrf.mxu1 }
 0x20c   : > { %2039 = vst [vmem:[#allocation2 + $0x88] sm:$0xff] %v2007_v48  ;;  %v1912_v52 = vadd.f32 %v3010_v49, %v2898_v46  ;;  %v2900_v53 = vpop.f32.mrf.mxu0 }
 0x20d   : > { %v2901_v54 = vadd.f32 %v2900_v53, %v2899_v50  ;;  %v3012_v55 = vpop.f32.mrf.mxu1  ;;  %v1021_v50 = vld [vmem:[#allocation2 + $0x58] sm:$0xff] }
 0x20e   : > { %v2008_v56 = vadd.f32 %v1912_v52, %v1014_v33  ;;  %v3013_v57 = vadd.f32 %v3012_v55, %v3011_v51  ;;  %v2902_v58 = vpop.f32.mrf.mxu0 }
 0x20f   : > { %v3014_v60 = vpop.f32.mrf.mxu1 }
 0x210   : > { %2040 = vst [vmem:[#allocation2 + $0xe8] sm:$0xff] %v2008_v56  ;;  %v1915_v61 = vadd.f32 %v3013_v57, %v2901_v54  ;;  %v2903_v62 = vpop.f32.mrf.mxu0 }
 0x211   : > { %v2904_v63 = vadd.f32 %v2903_v62, %v2902_v58  ;;  %v3015_v0 = vpop.f32.mrf.mxu1  ;;  %v1022_v58 = vld [vmem:[#allocation2 + $0x40] sm:$0xff] }
 0x212   : > { %v2009_v1 = vadd.f32 %v1915_v61, %v1015_v59  ;;  %v3016_v2 = vadd.f32 %v3015_v0, %v3014_v60  ;;  %v2905_v3 = vpop.f32.mrf.mxu0 }
 0x213   : > { %v3017_v5 = vpop.f32.mrf.mxu1 }
 0x214   : > { %2041 = vst [vmem:[#allocation2 + $0xb8] sm:$0xff] %v2009_v1  ;;  %v1920_v6 = vadd.f32 %v3016_v2, %v2904_v63  ;;  %v2906_v7 = vpop.f32.mrf.mxu0 }
 0x215   : > { %v2907_v8 = vadd.f32 %v2906_v7, %v2905_v3  ;;  %v3018_v9 = vpop.f32.mrf.mxu1  ;;  %v1023_v3 = vld [vmem:[#allocation2 + $0xc8] sm:$0xff] }
 0x216   : > { %v2010_v10 = vadd.f32 %v1920_v6, %v1016_v4  ;;  %v3019_v11 = vadd.f32 %v3018_v9, %v3017_v5  ;;  %v2908_v12 = vpop.f32.mrf.mxu0 }
 0x217   : > { %v3020_v14 = vpop.f32.mrf.mxu1 }
 0x218   : > { %2042 = vst [vmem:[#allocation2 + $0x60] sm:$0xff] %v2010_v10  ;;  %v1923_v15 = vadd.f32 %v3019_v11, %v2907_v8  ;;  %v2909_v16 = vpop.f32.mrf.mxu0 }
 0x219   : > { %v2910_v17 = vadd.f32 %v2909_v16, %v2908_v12  ;;  %v3021_v18 = vpop.f32.mrf.mxu1  ;;  %v1024_v12 = vld [vmem:[#allocation2 + $0xe0] sm:$0xff] }
 0x21a   : > { %v2011_v19 = vadd.f32 %v1923_v15, %v1017_v13  ;;  %v3022_v20 = vadd.f32 %v3021_v18, %v3020_v14  ;;  %v2911_v21 = vpop.f32.mrf.mxu0 }
 0x21b   : > { %v3023_v23 = vpop.f32.mrf.mxu1 }
 0x21c   : > { %2043 = vst [vmem:[#allocation2 + $0xf0] sm:$0xff] %v2011_v19  ;;  %v1928_v24 = vadd.f32 %v3022_v20, %v2910_v17  ;;  %v2912_v25 = vpop.f32.mrf.mxu0 }
 0x21d   : > { %v2913_v26 = vadd.f32 %v2912_v25, %v2911_v21  ;;  %v3024_v27 = vpop.f32.mrf.mxu1  ;;  %v1025_v21 = vld [vmem:[#allocation2 + $0x90] sm:$0xff] }
 0x21e   : > { %v2012_v28 = vadd.f32 %v1928_v24, %v1018_v22  ;;  %v3025_v29 = vadd.f32 %v3024_v27, %v3023_v23  ;;  %v2914_v30 = vpop.f32.mrf.mxu0 }
 0x21f   : > { %v3026_v32 = vpop.f32.mrf.mxu1 }
 0x220   : > { %2044 = vst [vmem:[#allocation2 + $0x8] sm:$0xff] %v2012_v28  ;;  %v1931_v34 = vadd.f32 %v3025_v29, %v2913_v26  ;;  %v2915_v35 = vpop.f32.mrf.mxu0 }
 0x221   : > { %v2916_v36 = vadd.f32 %v2915_v35, %v2914_v30  ;;  %v3027_v37 = vpop.f32.mrf.mxu1  ;;  %v1026_v30 = vld [vmem:[#allocation2 + $0x70] sm:$0xff] }
 0x222   : > { %v2013_v38 = vadd.f32 %v1931_v34, %v1019_v31  ;;  %v3028_v39 = vadd.f32 %v3027_v37, %v3026_v32  ;;  %v2917_v40 = vpop.f32.mrf.mxu0 }
 0x223   : > { %v3029_v42 = vpop.f32.mrf.mxu1 }
 0x224   : > { %2045 = vst [vmem:[#allocation2 + $0x78] sm:$0xff] %v2013_v38  ;;  %v1936_v43 = vadd.f32 %v3028_v39, %v2916_v36  ;;  %v2918_v44 = vpop.f32.mrf.mxu0 }
 0x225   : > { %v2919_v45 = vadd.f32 %v2918_v44, %v2917_v40  ;;  %v3030_v46 = vpop.f32.mrf.mxu1  ;;  %v1027_v40 = vld [vmem:[#allocation2 + $0xc0] sm:$0xff] }
 0x226   : > { %v2014_v47 = vadd.f32 %v1936_v43, %v1020_v41  ;;  %v3031_v48 = vadd.f32 %v3030_v46, %v3029_v42  ;;  %v2920_v49 = vpop.f32.mrf.mxu0 }
 0x227   : > { %v3032_v33 = vpop.f32.mrf.mxu1 }
 0x228   : > { %2046 = vst [vmem:[#allocation2 + $0x38] sm:$0xff] %v2014_v47  ;;  %v1939_v51 = vadd.f32 %v3031_v48, %v2919_v45  ;;  %v2921_v52 = vpop.f32.mrf.mxu0 }
 0x229   : > { %v2922_v53 = vadd.f32 %v2921_v52, %v2920_v49  ;;  %v3033_v54 = vpop.f32.mrf.mxu1  ;;  %v1028_v49 = vld [vmem:[#allocation2 + $0xa8] sm:$0xff] }
 0x22a   : > { %v2015_v55 = vadd.f32 %v1939_v51, %v1021_v50  ;;  %v3034_v56 = vadd.f32 %v3033_v54, %v3032_v33  ;;  %v2923_v57 = vpop.f32.mrf.mxu0 }
 0x22b   : > { %v3035_v59 = vpop.f32.mrf.mxu1 }
 0x22c   : > { %2047 = vst [vmem:[#allocation2 + $0x58] sm:$0xff] %v2015_v55  ;;  %v1944_v60 = vadd.f32 %v3034_v56, %v2922_v53  ;;  %v2924_v61 = vpop.f32.mrf.mxu0 }
 0x22d   : > { %v2925_v62 = vadd.f32 %v2924_v61, %v2923_v57  ;;  %v3036_v63 = vpop.f32.mrf.mxu1  ;;  %v1029_v57 = vld [vmem:[#allocation2 + $0xd0] sm:$0xff] }
 0x22e   : > { %v2016_v0 = vadd.f32 %v1944_v60, %v1022_v58  ;;  %v3037_v1 = vadd.f32 %v3036_v63, %v3035_v59  ;;  %v2926_v2 = vpop.f32.mrf.mxu0 }
 0x22f   : > { %v3038_v4 = vpop.f32.mrf.mxu1 }
 0x230   : > { %2048 = vst [vmem:[#allocation2 + $0x40] sm:$0xff] %v2016_v0  ;;  %v1947_v5 = vadd.f32 %v3037_v1, %v2925_v62  ;;  %v2927_v6 = vpop.f32.mrf.mxu0 }
 0x231   : > { %v2928_v7 = vadd.f32 %v2927_v6, %v2926_v2  ;;  %v3039_v8 = vpop.f32.mrf.mxu1  ;;  %v1030_v2 = vld [vmem:[#allocation2 + $0x10] sm:$0xff] }
 0x232   : > { %v2017_v9 = vadd.f32 %v1947_v5, %v1023_v3  ;;  %v3040_v10 = vadd.f32 %v3039_v8, %v3038_v4  ;;  %v2929_v11 = vpop.f32.mrf.mxu0 }
 0x233   : > { %v3041_v13 = vpop.f32.mrf.mxu1 }
 0x234   : > { %2049 = vst [vmem:[#allocation2 + $0xc8] sm:$0xff] %v2017_v9  ;;  %v1952_v14 = vadd.f32 %v3040_v10, %v2928_v7  ;;  %v2930_v15 = vpop.f32.mrf.mxu0 }
 0x235   : > { %v2931_v16 = vadd.f32 %v2930_v15, %v2929_v11  ;;  %v3042_v17 = vpop.f32.mrf.mxu1  ;;  %v1031_v11 = vld [vmem:[#allocation2 + $0x28] sm:$0xff] }
 0x236   : > { %v2018_v18 = vadd.f32 %v1952_v14, %v1024_v12  ;;  %v3043_v19 = vadd.f32 %v3042_v17, %v3041_v13  ;;  %v2932_v20 = vpop.f32.mrf.mxu0 }
 0x237   : > { %v3044_v22 = vpop.f32.mrf.mxu1 }
 0x238   : > { %2050 = vst [vmem:[#allocation2 + $0xe0] sm:$0xff] %v2018_v18  ;;  %v1955_v23 = vadd.f32 %v3043_v19, %v2931_v16  ;;  %v2933_v24 = vpop.f32.mrf.mxu0 }
 0x239   : > { %v2934_v25 = vadd.f32 %v2933_v24, %v2932_v20  ;;  %v3045_v26 = vpop.f32.mrf.mxu1  ;;  %v1032_v20 = vld [vmem:[#allocation2 + $0xa0] sm:$0xff] }
 0x23a   : > { %v2019_v27 = vadd.f32 %v1955_v23, %v1025_v21  ;;  %v3046_v28 = vadd.f32 %v3045_v26, %v3044_v22  ;;  %v2935_v29 = vpop.f32.mrf.mxu0 }
 0x23b   : > { %v3047_v31 = vpop.f32.mrf.mxu1 }
 0x23c   : > { %2051 = vst [vmem:[#allocation2 + $0x90] sm:$0xff] %v2019_v27  ;;  %v1960_v32 = vadd.f32 %v3046_v28, %v2934_v25  ;;  %v2936_v34 = vpop.f32.mrf.mxu0 }
 0x23d   : > { %v2937_v35 = vadd.f32 %v2936_v34, %v2935_v29  ;;  %v3048_v36 = vpop.f32.mrf.mxu1  ;;  %v1033_v29 = vld [vmem:[#allocation2 + $0xf8] sm:$0xff] }
 0x23e   : > { %v2020_v37 = vadd.f32 %v1960_v32, %v1026_v30  ;;  %v3049_v38 = vadd.f32 %v3048_v36, %v3047_v31  ;;  %v2938_v39 = vpop.f32.mrf.mxu0 }
 0x23f   : > { %v3050_v41 = vpop.f32.mrf.mxu1 }
 0x240   : > { %2052 = vst [vmem:[#allocation2 + $0x70] sm:$0xff] %v2020_v37  ;;  %v1963_v42 = vadd.f32 %v3049_v38, %v2937_v35  ;;  %v2939_v43 = vpop.f32.mrf.mxu0 }
 0x241   : > { %v2940_v44 = vadd.f32 %v2939_v43, %v2938_v39  ;;  %v3051_v45 = vpop.f32.mrf.mxu1  ;;  %v1034_v39 = vld [vmem:[#allocation2 + $0x20] sm:$0xff] }
 0x242   : > { %v2021_v46 = vadd.f32 %v1963_v42, %v1027_v40  ;;  %v3052_v47 = vadd.f32 %v3051_v45, %v3050_v41  ;;  %v2941_v48 = vpop.f32.mrf.mxu0 }
 0x243   : > { %v3053_v50 = vpop.f32.mrf.mxu1 }
 0x244   : > { %2053 = vst [vmem:[#allocation2 + $0xc0] sm:$0xff] %v2021_v46  ;;  %v1968_v33 = vadd.f32 %v3052_v47, %v2940_v44  ;;  %v2942_v51 = vpop.f32.mrf.mxu0  ;;  %v1035_v47 = vld [vmem:[#allocation2 + $0x98] sm:$0xff] }
 0x245   : > { %v2943_v52 = vadd.f32 %v2942_v51, %v2941_v48  ;;  %v3054_v53 = vpop.f32.mrf.mxu1  ;;  %v2070_v51 = vld [vmem:[#allocation2 + $0xd8] sm:$0xff] (%p2063_p11) }
 0x246   : > { %v2022_v54 = vadd.f32 %v1968_v33, %v1028_v49  ;;  %v3055_v55 = vadd.f32 %v3054_v53, %v3053_v50  ;;  %v2944_v56 = vpop.f32.mrf.mxu0  ;;  %v2068_v50 = vld [vmem:[#allocation2 + $0xb0] sm:$0xff] (%p2063_p11)  ;;  %v2069_v33 = vld [vmem:[#allocation2] sm:$0xff] (%p2063_p11) }
 0x247   : > { %v3056_v58 = vpop.f32.mrf.mxu1  ;;  %v2101_v53 = vmax.f32 (%p2063_p11), %v2069_v33, 0.0 }
 0x248   : > { %2054 = vst [vmem:[#allocation2 + $0xa8] sm:$0xff] %v2022_v54  ;;  %v1971_v59 = vadd.f32 %v3055_v55, %v2943_v52  ;;  %v2945_v60 = vpop.f32.mrf.mxu0  ;;  %v2100_v52 = vmax.f32 (%p2063_p11), %v2068_v50, 0.0  ;;  %v2071_v54 = vld [vmem:[#allocation2 + $0x18] sm:$0xff] (%p2063_p11)  ;;  %v2102_v55 = vmax.f32 (%p2063_p11), %v2070_v51, 0.0 }
 0x249   : > { %v2946_v61 = vadd.f32 %v2945_v60, %v2944_v56  ;;  %v3057_v62 = vpop.f32.mrf.mxu1  ;;  %v2072_v56 = vld [vmem:[#allocation2 + $0x50] sm:$0xff] (%p2063_p11) }
 0x24a   : > { %v2023_v63 = vadd.f32 %v1971_v59, %v1029_v57  ;;  %v3058_v0 = vadd.f32 %v3057_v62, %v3056_v58  ;;  %v2947_v1 = vpop.f32.mrf.mxu0  ;;  %v2073_v57 = vld [vmem:[#allocation2 + $0x68] sm:$0xff] (%p2063_p11)  ;;  %v2103_v58 = vmax.f32 (%p2063_p11), %v2071_v54, 0.0  ;;  %v2104_v59 = vmax.f32 (%p2063_p11), %v2072_v56, 0.0 }
 0x24b   : > { %v3059_v3 = vpop.f32.mrf.mxu1  ;;  %v2105_v60 = vmax.f32 (%p2063_p11), %v2073_v57, 0.0  ;;  %v2075_v62 = vld [vmem:[#allocation2 + $0x48] sm:$0xff] (%p2063_p11) }
 0x24c   : > { %2055 = vst [vmem:[#allocation2 + $0xd0] sm:$0xff] %v2023_v63  ;;  %v1976_v4 = vadd.f32 %v3058_v0, %v2946_v61  ;;  %v2948_v5 = vpop.f32.mrf.mxu0  ;;  %v2074_v61 = vld [vmem:[#allocation2 + $0x30] sm:$0xff] (%p2063_p11)  ;;  %v2076_v63 = vld [vmem:[#allocation2 + $0x80] sm:$0xff] (%p2063_p11)  ;;  %v2743_v0 = vpack.c.bf16 (%p2063_p11), %v2101_v53, %v2100_v52 }
 0x24d   : > { %v2949_v6 = vadd.f32 %v2948_v5, %v2947_v1  ;;  %v3060_v7 = vpop.f32.mrf.mxu1  ;;  %v2106_v1 = vmax.f32 (%p2063_p11), %v2074_v61, 0.0  ;;  %v2078_v5 = vld [vmem:[#allocation2 + $0xe8] sm:$0xff] (%p2063_p11) }
 0x24e   : > { %v2024_v8 = vadd.f32 %v1976_v4, %v1030_v2  ;;  %v3061_v9 = vadd.f32 %v3060_v7, %v3059_v3  ;;  %v2950_v10 = vpop.f32.mrf.mxu0  ;;  %v2107_v2 = vmax.f32 (%p2063_p11), %v2075_v62, 0.0  ;;  %v2077_v3 = vld [vmem:[#allocation2 + $0x88] sm:$0xff] (%p2063_p11)  ;;  %v2108_v4 = vmax.f32 (%p2063_p11), %v2076_v63, 0.0  ;;  %2744 = vst [vmem:[%s3946_s13] sm:$0xff] (%p2063_p11), %v2743_v0  }
 0x24f   : > { %v3062_v12 = vpop.f32.mrf.mxu1  ;;  %v2748_v7 = vpack.c.bf16 (%p2063_p11), %v2103_v58, %v2102_v55 }
 0x250   : > { %2056 = vst [vmem:[#allocation2 + $0x10] sm:$0xff] %v2024_v8  ;;  %v1979_v13 = vadd.f32 %v3061_v9, %v2949_v6  ;;  %v2951_v14 = vpop.f32.mrf.mxu0  ;;  %v2079_v6 = vld [vmem:[#allocation2 + $0xb8] sm:$0xff] (%p2063_p11)  ;;  %v2753_v8 = vpack.c.bf16 (%p2063_p11), %v2105_v60, %v2104_v59  ;;  %v2109_v9 = vmax.f32 (%p2063_p11), %v2077_v3, 0.0 }
 0x251   : > { %v2952_v15 = vadd.f32 %v2951_v14, %v2950_v10  ;;  %v3063_v16 = vpop.f32.mrf.mxu1  ;;  %v2110_v10 = vmax.f32 (%p2063_p11), %v2078_v5, 0.0  ;;  %v2758_v14 = vpack.c.bf16 (%p2063_p11), %v2107_v2, %v2106_v1  ;;  %2835 = vst [vmem:[%s3946_s13 + $0x8] sm:$0xff] (%p2063_p11), %v2748_v7  }
 0x252   : > { %v2025_v17 = vadd.f32 %v1979_v13, %v1031_v11  ;;  %v3064_v18 = vadd.f32 %v3063_v16, %v3062_v12  ;;  %v2953_v19 = vpop.f32.mrf.mxu0  ;;  %v2080_v11 = vld [vmem:[#allocation2 + $0x60] sm:$0xff] (%p2063_p11)  ;;  %v2081_v12 = vld [vmem:[#allocation2 + $0xf0] sm:$0xff] (%p2063_p11)  ;;  %v2082_v13 = vld [vmem:[#allocation2 + $0x8] sm:$0xff] (%p2063_p11)  ;;  %2836 = vst [vmem:[%s3946_s13 + $0x10] sm:$0xff] (%p2063_p11), %v2753_v8  }
 0x253   : > { %v3065_v21 = vpop.f32.mrf.mxu1  ;;  %v2112_v16 = vmax.f32 (%p2063_p11), %v2080_v11, 0.0  ;;  %2837 = vst [vmem:[%s3946_s13 + $0x18] sm:$0xff] (%p2063_p11), %v2758_v14  }
 0x254   : > { %2057 = vst [vmem:[#allocation2 + $0x28] sm:$0xff] %v2025_v17  ;;  %v1984_v22 = vadd.f32 %v3064_v18, %v2952_v15  ;;  %v2954_v23 = vpop.f32.mrf.mxu0  ;;  %v2111_v15 = vmax.f32 (%p2063_p11), %v2079_v6, 0.0  ;;  %v2113_v17 = vmax.f32 (%p2063_p11), %v2081_v12, 0.0  ;;  %v2083_v18 = vld [vmem:[#allocation2 + $0x78] sm:$0xff] (%p2063_p11) }
 0x255   : > { %v2955_v24 = vadd.f32 %v2954_v23, %v2953_v19  ;;  %v3066_v25 = vpop.f32.mrf.mxu1  ;;  %v2084_v19 = vld [vmem:[#allocation2 + $0x38] sm:$0xff] (%p2063_p11)  ;;  %v2115_v23 = vmax.f32 (%p2063_p11), %v2083_v18, 0.0 }
 0x256   : > { %v2026_v26 = vadd.f32 %v1984_v22, %v1032_v20  ;;  %v3067_v27 = vadd.f32 %v3066_v25, %v3065_v21  ;;  %v2956_v28 = vpop.f32.mrf.mxu0  ;;  %v2085_v20 = vld [vmem:[#allocation2 + $0x58] sm:$0xff] (%p2063_p11)  ;;  %v2763_v21 = vpack.c.bf16 (%p2063_p11), %v2109_v9, %v2108_v4  ;;  %v2114_v22 = vmax.f32 (%p2063_p11), %v2082_v13, 0.0  ;;  %v2086_v25 = vld [vmem:[#allocation2 + $0x40] sm:$0xff] (%p2063_p11) }
 0x257   : > { %v3068_v30 = vpop.f32.mrf.mxu1 }
 0x258   : > { %2058 = vst [vmem:[#allocation2 + $0xa0] sm:$0xff] %v2026_v26  ;;  %v1987_v31 = vadd.f32 %v3067_v27, %v2955_v24  ;;  %v2957_v32 = vpop.f32.mrf.mxu0  ;;  %v2116_v24 = vmax.f32 (%p2063_p11), %v2084_v19, 0.0  ;;  %v2087_v26 = vld [vmem:[#allocation2 + $0xc8] sm:$0xff] (%p2063_p11)  ;;  %v2088_v27 = vld [vmem:[#allocation2 + $0xe0] sm:$0xff] (%p2063_p11)  ;;  %2838 = vst [vmem:[%s3946_s13 + $0x20] sm:$0xff] (%p2063_p11), %v2763_v21  }
 0x259   : > { %v2958_v34 = vadd.f32 %v2957_v32, %v2956_v28  ;;  %v3069_v35 = vpop.f32.mrf.mxu1  ;;  %v2768_v28 = vpack.c.bf16 (%p2063_p11), %v2111_v15, %v2110_v10  ;;  %v2089_v32 = vld [vmem:[#allocation2 + $0x90] sm:$0xff] (%p2063_p11) }
 0x25a   : > { %v2027_v36 = vadd.f32 %v1987_v31, %v1033_v29  ;;  %v3070_v37 = vadd.f32 %v3069_v35, %v3068_v30  ;;  %v2959_v38 = vpop.f32.mrf.mxu0  ;;  %v2773_v29 = vpack.c.bf16 (%p2063_p11), %v2113_v17, %v2112_v16  ;;  %v2117_v30 = vmax.f32 (%p2063_p11), %v2085_v20, 0.0  ;;  %v2091_v35 = vld [vmem:[#allocation2 + $0xc0] sm:$0xff] (%p2063_p11) }
 0x25b   : > { %v3071_v40 = vpop.f32.mrf.mxu1  ;;  %v2118_v31 = vmax.f32 (%p2063_p11), %v2086_v25, 0.0  ;;  %2839 = vst [vmem:[%s3946_s13 + $0x28] sm:$0xff] (%p2063_p11), %v2768_v28  }
 0x25c   : > { %2059 = vst [vmem:[#allocation2 + $0xf8] sm:$0xff] %v2027_v36  ;;  %v1992_v41 = vadd.f32 %v3070_v37, %v2958_v34  ;;  %v2960_v42 = vpop.f32.mrf.mxu0  ;;  %v2090_v34 = vld [vmem:[#allocation2 + $0x70] sm:$0xff] (%p2063_p11)  ;;  %v2778_v36 = vpack.c.bf16 (%p2063_p11), %v2115_v23, %v2114_v22  ;;  %v2119_v37 = vmax.f32 (%p2063_p11), %v2087_v26, 0.0  ;;  %2840 = vst [vmem:[%s3946_s13 + $0x30] sm:$0xff] (%p2063_p11), %v2773_v29  }
 0x25d   : > { %v2961_v43 = vadd.f32 %v2960_v42, %v2959_v38  ;;  %v3072_v44 = vpop.f32.mrf.mxu1  ;;  %v2120_v38 = vmax.f32 (%p2063_p11), %v2088_v27, 0.0  ;;  %v2094_v42 = vld [vmem:[#allocation2 + $0x10] sm:$0xff] (%p2063_p11) }
 0x25e   : > { %v2028_v45 = vadd.f32 %v1992_v41, %v1034_v39  ;;  %v3073_v46 = vadd.f32 %v3072_v44, %v3071_v40  ;;  %v2121_v39 = vmax.f32 (%p2063_p11), %v2089_v32, 0.0  ;;  %v2092_v40 = vld [vmem:[#allocation2 + $0xa8] sm:$0xff] (%p2063_p11)  ;;  %v2093_v41 = vld [vmem:[#allocation2 + $0xd0] sm:$0xff] (%p2063_p11)  ;;  %v2122_v44 = vmax.f32 (%p2063_p11), %v2090_v34, 0.0  ;;  %2841 = vst [vmem:[%s3946_s13 + $0x38] sm:$0xff] (%p2063_p11), %v2778_v36  }
 0x25f   : > { %v2788_v50 = vpack.c.bf16 (%p2063_p11), %v2119_v37, %v2118_v31  ;;  %v2125_v51 = vmax.f32 (%p2063_p11), %v2093_v41, 0.0  ;;  %v2126_v52 = vmax.f32 (%p2063_p11), %v2094_v42, 0.0 }
 0x260   : > { %2060 = vst [vmem:[#allocation2 + $0x20] sm:$0xff] %v2028_v45  ;;  %v1995_v48 = vadd.f32 %v3073_v46, %v2961_v43  ;;  %2067 = sbr.rel (!%p2063_p11) target bundleno = 625 (0x271), region = 130  ;;  %v2783_v43 = vpack.c.bf16 (%p2063_p11), %v2117_v30, %v2116_v24  ;;  %v2123_v45 = vmax.f32 (%p2063_p11), %v2091_v35, 0.0  ;;  %v2124_v46 = vmax.f32 (%p2063_p11), %v2092_v40, 0.0 }
 0x261   : > { %v2793_v33 = vpack.c.bf16 (%p2063_p11), %v2121_v39, %v2120_v38  ;;  %2843 = vst [vmem:[%s3946_s13 + $0x48] sm:$0xff] (%p2063_p11), %v2788_v50  }
 0x262   : > { %v2029_v49 = vadd.f32 %v1995_v48, %v1035_v47  ;;  %v2095_v47 = vld [vmem:[#allocation2 + $0x28] sm:$0xff] (%p2063_p11)  ;;  %v2096_v48 = vld [vmem:[#allocation2 + $0xa0] sm:$0xff] (%p2063_p11)  ;;  %2842 = vst [vmem:[%s3946_s13 + $0x40] sm:$0xff] (%p2063_p11), %v2783_v43   ;;  %v2798_v55 = vpack.c.bf16 (%p2063_p11), %v2123_v45, %v2122_v44  ;;  %v2803_v59 = vpack.c.bf16 (%p2063_p11), %v2125_v51, %v2124_v46 }
 0x263   : > { %v2127_v56 = vmax.f32 (%p2063_p11), %v2095_v47, 0.0  ;;  %v2128_v57 = vmax.f32 (%p2063_p11), %v2096_v48, 0.0  ;;  %2844 = vst [vmem:[%s3946_s13 + $0x50] sm:$0xff] (%p2063_p11), %v2793_v33  }
 0x264   : > { %2061 = vst [vmem:[#allocation2 + $0x98] sm:$0xff] %v2029_v49  ;;  %v2097_v49 = vld [vmem:[#allocation2 + $0xf8] sm:$0xff] (%p2063_p11)  ;;  %2845 = vst [vmem:[%s3946_s13 + $0x58] sm:$0xff] (%p2063_p11), %v2798_v55  }
 0x265   : > { %v2129_v58 = vmax.f32 %v2097_v49, 0.0  ;;  %v2808_v62 = vpack.c.bf16 %v2127_v56, %v2126_v52  ;;  %2846 = vst [vmem:[%s3946_s13 + $0x60] sm:$0xff] %v2803_v59  }
 0x267   : > { %v2098_v53 = vld [vmem:[#allocation2 + $0x20] sm:$0xff]  ;;  %v2813_v63 = vpack.c.bf16 %v2129_v58, %v2128_v57  ;;  %2847 = vst [vmem:[%s3946_s13 + $0x68] sm:$0xff] %v2808_v62  }
 0x268   : > { %v2130_v60 = vmax.f32 %v2098_v53, 0.0 }
 0x269   : > { %2848 = vst [vmem:[%s3946_s13 + $0x70] sm:$0xff] %v2813_v63  }
 0x26b   : > { %v2099_v54 = vld [vmem:[#allocation2 + $0x98] sm:$0xff] }
 0x26c   : > { %v2131_v61 = vmax.f32 %v2099_v54, 0.0 }
 0x26e   : > { %v2818_v0 = vpack.c.bf16 %v2131_v61, %v2130_v60 }
 0x270   : > { %2849 = vst [vmem:[%s3946_s13 + $0x78] sm:$0xff] %v2818_v0  }
 0x271 PF: > { %s40_s15 = sadd.s32 1, %s3486_s15   ;;  %s4200_s4 = sld [smem:[#allocation20_spill]] }
 0x272   : > { %p37_p12 = scmp.ge.s32.totalorder %s40_s15, 14   ;;  %s4201_s12 = sld [smem:[#allocation21_spill]] }
 0x273   : > { %s4202_s13 = sld [smem:[#allocation22_spill]]  ;;  %s4204_s2 = smov %s3446_s28 }
 0x274   : > { %s4203_s14 = sld [smem:[#allocation23_spill]]  ;;  %s4205_s28 = smov %s3450_s29 }
 0x275   : > { %s4206_s29 = smov %s3680_s18  ;;  %s4207_s30 = smov %s3458_s10 }
 0x276   : > { %s4208_s10 = smov %s3673_s9  ;;  %s4209_s3 = smov %s3466_s11 }
 0x277   : > { %s4210_s11 = smov %s3660_s8  ;;  %39 = sbr.rel (!%p37_p12) target bundleno = 48 (0x30), region = 185 }
 0x27c   :  { %2325 = vsyncpa [#allocation12], 1 }
 0x27d   :  { %2327 = vsyncpa [#allocation12 + $0x1], 1 }

// kernel: hetero_gnn_forward.6
= control target key start
LH: loop header
LB: loop body
LE: loop exit
PB: predicated region body
PF: predicated region fallthrough
CT: control target
= control target key end

     0   :  { %s2373_s9 = smov 0   ;;  %s2375_s10 = smov 0   ;;  %s2660_s0 = inlined_call_operand.vmem [shape: bf16[2,512,128], index: 0, kind: input, shape index: {}]   ;;  %s2661_s1 = inlined_call_operand.vmem [shape: bf16[2,128,640], index: 1, kind: input, shape index: {}]   ;;  %s2662_s2 = inlined_call_operand.vmem [shape: bf16[2,512,640], index: 2, kind: output, shape index: {}]  }
   0x1   :  { %s2377_s11 = smov 0   ;;  %s2379_s12 = smov 0  }
   0x2   :  { %s2381_s13 = smov 0  }
   0x3 LB: > { %s21_s14 = sadd.s32 1, %s2347_s11  ;;  %s24_s15 = sadd.s32 1, %s2351_s12  ;;  %s2355_s13 = sphi %s2381_s13, %s12_s13   ;;  %s2351_s12 = sphi %s2379_s12, %s2666_s12   ;;  %s2347_s11 = sphi %s2377_s11, %s2665_s11   ;;  %s2343_s10 = sphi %s2375_s10, %s2664_s10   ;;  %s2339_s9 = sphi %s2373_s9, %s2663_s9  }
   0x4   : > { %p22_p0 = scmp.ge.s32.totalorder %s21_s14, 2  ;;  %p1857_p1 = scmp.ge.s32.totalorder %s2355_s13, 1 }
   0x5   : > { %p143_p2 = scmp.lt.s32.totalorder %s2355_s13, 5 }
   0x6   : > { %s2668_s14 = smov (%p22_p0, %s21_s14), 0  ;;  %s2670_s15 = smov (!%p22_p0, %s24_s15), %s2351_s12 }
   0x7   : > { %p144_p3 = pnand %p1857_p1, %p143_p2  ;;  %p26_p4 = scmp.ge.s32.totalorder %s2670_s15, 2 }
   0x8   : > { %p180_p5 = scmp.lt.s32.totalorder (!%p144_p3), %s2343_s10, 1  ;;  %s1858_s16 = sshll.u32 (!%p144_p3), %s2339_s9, 5 }
   0x9   : > { %s2672_s15 = smov (%p26_p4, %s2670_s15), 0  ;;  %147 = sbr.rel (%p144_p3) target bundleno = 405 (0x195), region = 28 }
   0xa   : > { %p182_p6 = scmp.lt.s32.totalorder (!%p144_p3), %s1858_s16, 63 }
   0xe   : > { %v2357_v0 = vmov 0   ;;  %s2674_s10 = smov (!%p180_p5, %s2343_s10), 1  ;;  %s2676_s16 = smov (!%p182_p6, %s1858_s16), 63 }
   0xf   : > { %622 = vmatprep.mubr.bf16.mxu0 %v2357_v0  ;;  %742 = vmatprep.mubr.bf16.mxu1 %v2357_v0  ;;  %s2202_s17 = smul.u32 320, %s2674_s10  ;;  %s1859_s22 = sshll.u32 %s2674_s10, 6 }
  0x10   : > { %s2203_s18 = smul.u32 5, %s2676_s16  ;;  %s185_s24 = sadd.s32 %s1859_s22, %s2676_s16 }
  0x11   : > { %s2408_s21 = scalar_lea.vmem %s2661_s1, %s2202_s17  ;;  %s1860_s25 = sshll.u32 %s185_s24, 2 }
  0x12   : > { %v2245_v1 = vld [vmem:[%s2408_s21 + $0x11c] ss:$20 sps:$4 sm:$0xff]   ;;  %s2411_s23 = sadd.s32 %s2203_s18, %s2202_s17  ;;  %v2247_v2 = vld [vmem:[%s2408_s21 + $0x118] ss:$20 sps:$4 sm:$0xff]   ;;  %v2248_v3 = vld [vmem:[%s2408_s21 + $0xf4] ss:$20 sps:$4 sm:$0xff]   ;;  %s2422_s28 = scalar_lea.vmem %s2660_s0, %s1860_s25 }
  0x13   : > { %590 = vmatprep.subr.bf16.mxu0 %v2245_v1  ;;  %2186 = vmatprep.subr.bf16.mxu1 %v2245_v1  ;;  %v2250_v4 = vld [vmem:[%s2408_s21 + $0xf0] ss:$20 sps:$4 sm:$0xff]   ;;  %v2251_v5 = vld [vmem:[%s2408_s21 + $0xcc] ss:$20 sps:$4 sm:$0xff]   ;;  %v2253_v6 = vld [vmem:[%s2408_s21 + $0xc8] ss:$20 sps:$4 sm:$0xff]  }
  0x14   : > { %591 = vmatpush1.bf16.msra.mxu0 %v2247_v2  ;;  %2194 = vmatpush1.bf16.msra.mxu1 %v2247_v2  ;;  %v2254_v7 = vld [vmem:[%s2408_s21 + $0xa4] ss:$20 sps:$4 sm:$0xff]   ;;  %v2256_v8 = vld [vmem:[%s2408_s21 + $0xa0] ss:$20 sps:$4 sm:$0xff]   ;;  %v2257_v9 = vld [vmem:[%s2408_s21 + $0x7c] ss:$20 sps:$4 sm:$0xff]  }
  0x15   : > { %592 = vmatprep.subr.bf16.mxu0 %v2248_v3  ;;  %2187 = vmatprep.subr.bf16.mxu1 %v2248_v3  ;;  %v2259_v10 = vld [vmem:[%s2408_s21 + $0x78] ss:$20 sps:$4 sm:$0xff]   ;;  %v2260_v11 = vld [vmem:[%s2408_s21 + $0x54] ss:$20 sps:$4 sm:$0xff]   ;;  %v2262_v12 = vld [vmem:[%s2408_s21 + $0x50] ss:$20 sps:$4 sm:$0xff]  }
  0x16   : > { %v2263_v13 = vld [vmem:[%s2408_s21 + $0x2c] ss:$20 sps:$4 sm:$0xff]   ;;  %v2265_v14 = vld [vmem:[%s2408_s21 + $0x28] ss:$20 sps:$4 sm:$0xff]   ;;  %v2266_v15 = vld [vmem:[%s2408_s21 + $0x4] ss:$20 sps:$4 sm:$0xff]  }
  0x17   : > { %v2268_v16 = vld [vmem:[%s2408_s21] ss:$20 sps:$4 sm:$0xff]   ;;  %v2273_v17 = vld [vmem:[%s2408_s21 + $0x124] ss:$20 sps:$4 sm:$0xff]   ;;  %v2274_v18 = vld [vmem:[%s2408_s21 + $0x128] ss:$20 sps:$4 sm:$0xff]  }
  0x18   : > { %593 = vmatpush1.bf16.msra.mxu0 %v2250_v4  ;;  %2195 = vmatpush1.bf16.msra.mxu1 %v2250_v4  ;;  %v2436_v19 = vld [vmem:[%s2422_s28] sm:$0xff]   ;;  %v2277_v22 = vld [vmem:[%s2408_s21 + $0xfc] ss:$20 sps:$4 sm:$0xff]   ;;  %v2275_v24 = vld [vmem:[%s2408_s21 + $0xf8] ss:$20 sps:$4 sm:$0xff]   ;;  %s1863_s29 = sshll.u32 %s2411_s23, 2 }
  0x19   : > { %594 = vmatprep.subr.bf16.mxu0 %v2251_v5  ;;  %2188 = vmatprep.subr.bf16.mxu1 %v2251_v5  ;;  %v2439_v20 = vld [vmem:[%s2422_s28 + $0x60] sm:$0xff]   ;;  %v2282_v25 = vld [vmem:[%s2408_s21 + $0xd4] ss:$20 sps:$4 sm:$0xff]   ;;  %v2300_v26 = vld [vmem:[%s2408_s21 + $0xd8] ss:$20 sps:$4 sm:$0xff]   ;;  %s2547_s4 = scalar_lea.vmem %s2662_s2, %s1863_s29 }
  0x1a   : > { %v2271_v21 = vld [vmem:[%s2408_s21 + $0x120] ss:$20 sps:$4 sm:$0xff]   ;;  %v2452_v27 = vld [vmem:[%s2422_s28 + $0x8] sm:$0xff]   ;;  %v2280_v29 = vld [vmem:[%s2408_s21 + $0xd0] ss:$20 sps:$4 sm:$0xff]  }
  0x1b   : > { %v2286_v23 = vld [vmem:[%s2408_s21 + $0x100] ss:$20 sps:$4 sm:$0xff]   ;;  %v2455_v28 = vld [vmem:[%s2422_s28 + $0x68] sm:$0xff]   ;;  %v2305_v31 = vld [vmem:[%s2408_s21 + $0xb0] ss:$20 sps:$4 sm:$0xff]  }
  0x1c   : > { %595 = vmatpush1.bf16.msra.mxu0 %v2253_v6  ;;  %2196 = vmatpush1.bf16.msra.mxu1 %v2253_v6  ;;  %v2285_v30 = vld [vmem:[%s2408_s21 + $0xac] ss:$20 sps:$4 sm:$0xff]   ;;  %v2283_v32 = vld [vmem:[%s2408_s21 + $0xa8] ss:$20 sps:$4 sm:$0xff]   ;;  %v2291_v33 = vld [vmem:[%s2408_s21 + $0x84] ss:$20 sps:$4 sm:$0xff]  }
  0x1d   : > { %596 = vmatprep.subr.bf16.mxu0 %v2254_v7  ;;  %2189 = vmatprep.subr.bf16.mxu1 %v2254_v7  ;;  %v2467_v34 = vld [vmem:[%s2422_s28 + $0x10] sm:$0xff]   ;;  %v2308_v38 = vld [vmem:[%s2408_s21 + $0x88] ss:$20 sps:$4 sm:$0xff]   ;;  %v2292_v39 = vld [vmem:[%s2408_s21 + $0x58] ss:$20 sps:$4 sm:$0xff]  }
  0x1e   : > { %v2470_v35 = vld [vmem:[%s2422_s28 + $0x70] sm:$0xff]   ;;  %v2483_v42 = vld [vmem:[%s2422_s28 + $0x18] sm:$0xff]   ;;  %v2303_v45 = vld [vmem:[%s2408_s21 + $0xc] ss:$20 sps:$4 sm:$0xff]  }
  0x1f   : > { %v2289_v36 = vld [vmem:[%s2408_s21 + $0x80] ss:$20 sps:$4 sm:$0xff]   ;;  %v2294_v37 = vld [vmem:[%s2408_s21 + $0x5c] ss:$20 sps:$4 sm:$0xff]   ;;  %v2313_v46 = vld [vmem:[%s2408_s21 + $0x38] ss:$20 sps:$4 sm:$0xff]  }
  0x20   : > { %597 = vmatpush1.bf16.msra.mxu0 %v2256_v8  ;;  %2197 = vmatpush1.bf16.msra.mxu1 %v2256_v8  ;;  %v2310_v40 = vld [vmem:[%s2408_s21 + $0x60] ss:$20 sps:$4 sm:$0xff]   ;;  %v2486_v43 = vld [vmem:[%s2422_s28 + $0x78] sm:$0xff]   ;;  %v2297_v44 = vld [vmem:[%s2408_s21 + $0x30] ss:$20 sps:$4 sm:$0xff]  }
  0x21   : > { %598 = vmatprep.subr.bf16.mxu0 %v2257_v9  ;;  %2190 = vmatprep.subr.bf16.mxu1 %v2257_v9  ;;  %v2299_v41 = vld [vmem:[%s2408_s21 + $0x34] ss:$20 sps:$4 sm:$0xff]   ;;  %v2304_v48 = vld [vmem:[%s2422_s28 + $0x20] sm:$0xff]   ;;  %v2309_v52 = vld [vmem:[%s2422_s28 + $0x38] sm:$0xff]  }
  0x22   : > { %v2301_v47 = vld [vmem:[%s2408_s21 + $0x8] ss:$20 sps:$4 sm:$0xff]   ;;  %v2315_v49 = vld [vmem:[%s2408_s21 + $0x10] ss:$20 sps:$4 sm:$0xff]  }
  0x23   : > { %v2306_v50 = vld [vmem:[%s2422_s28 + $0x28] sm:$0xff]   ;;  %v2307_v51 = vld [vmem:[%s2422_s28 + $0x30] sm:$0xff]   ;;  %v2311_v53 = vld [vmem:[%s2422_s28 + $0x40] sm:$0xff]  }
  0x24   : > { %599 = vmatpush1.bf16.msra.mxu0 %v2259_v10  ;;  %2198 = vmatpush1.bf16.msra.mxu1 %v2259_v10  ;;  %v2312_v54 = vld [vmem:[%s2422_s28 + $0x48] sm:$0xff]   ;;  %v2314_v55 = vld [vmem:[%s2422_s28 + $0x50] sm:$0xff]   ;;  %v2316_v56 = vld [vmem:[%s2422_s28 + $0x58] sm:$0xff]  }
  0x25   : > { %600 = vmatprep.subr.bf16.mxu0 %v2260_v11  ;;  %2191 = vmatprep.subr.bf16.mxu1 %v2260_v11 }
  0x28   : > { %601 = vmatpush1.bf16.msra.mxu0 %v2262_v12  ;;  %2199 = vmatpush1.bf16.msra.mxu1 %v2262_v12 }
  0x29   : > { %602 = vmatprep.subr.bf16.mxu0 %v2263_v13  ;;  %2192 = vmatprep.subr.bf16.mxu1 %v2263_v13 }
  0x2c   : > { %603 = vmatpush1.bf16.msra.mxu0 %v2265_v14  ;;  %2200 = vmatpush1.bf16.msra.mxu1 %v2265_v14 }
  0x2d   : > { %604 = vmatprep.subr.bf16.mxu0 %v2266_v15  ;;  %2193 = vmatprep.subr.bf16.mxu1 %v2266_v15 }
  0x30   : > { %605 = vmatpush1.bf16.msra.mxu0 %v2268_v16  ;;  %2201 = vmatpush1.bf16.msra.mxu1 %v2268_v16 }
  0x31   : > { %783 = vmatprep.subr.bf16.mxu1 %v2273_v17  ;;  %2138 = vmatprep.subr.bf16.mxu0 %v2274_v18 }
  0x33   : > { %623 = vmatmul.mubr.bf16.vlgmr.msra.gmra.mxu0 %v2436_v19  ;;  %743 = vmatmul.mubr.bf16.vlgmr.msra.gmra.mxu1 %v2439_v20 }
  0x34   : > { %784 = vmatpush1.bf16.msra.mxu1 %v2271_v21  ;;  %2139 = vmatpush3.bf16.msra.mxu0 %v2274_v18 }
  0x35   : > { %785 = vmatprep.subr.bf16.mxu1 %v2277_v22  ;;  %632 = vmatprep.mubr.bf16.mxu0 %v2357_v0 }
  0x36   : > { %752 = vmatprep.mubr.bf16.mxu1 %v2357_v0  ;;  %2140 = vmatprep.subr.bf16.mxu0 %v2286_v23 }
  0x38   : > { %786 = vmatpush1.bf16.msra.mxu1 %v2275_v24  ;;  %2141 = vmatpush3.bf16.msra.mxu0 %v2286_v23 }
  0x39   : > { %787 = vmatprep.subr.bf16.mxu1 %v2282_v25  ;;  %2142 = vmatprep.subr.bf16.mxu0 %v2300_v26 }
  0x3b   : > { %633 = vmatmul.mubr.bf16.gmra.mxu0 %v2452_v27  ;;  %753 = vmatmul.mubr.bf16.gmra.mxu1 %v2455_v28 }
  0x3c   : > { %788 = vmatpush1.bf16.msra.mxu1 %v2280_v29  ;;  %642 = vmatprep.mubr.bf16.mxu0 %v2357_v0 }
  0x3d   : > { %789 = vmatprep.subr.bf16.mxu1 %v2285_v30  ;;  %762 = vmatprep.mubr.bf16.mxu1 %v2357_v0 }
  0x3e   : > { %2143 = vmatpush3.bf16.msra.mxu0 %v2300_v26 }
  0x3f   : > { %2144 = vmatprep.subr.bf16.mxu0 %v2305_v31 }
  0x40   : > { %790 = vmatpush1.bf16.msra.mxu1 %v2283_v32 }
  0x41   : > { %791 = vmatprep.subr.bf16.mxu1 %v2291_v33 }
  0x42   : > { %2145 = vmatpush3.bf16.msra.mxu0 %v2305_v31 }
  0x43   : > { %643 = vmatmul.mubr.bf16.gmra.mxu0 %v2467_v34  ;;  %763 = vmatmul.mubr.bf16.gmra.mxu1 %v2470_v35 }
  0x44   : > { %792 = vmatpush1.bf16.msra.mxu1 %v2289_v36  ;;  %652 = vmatprep.mubr.bf16.mxu0 %v2357_v0 }
  0x45   : > { %793 = vmatprep.subr.bf16.mxu1 %v2294_v37  ;;  %772 = vmatprep.mubr.bf16.mxu1 %v2357_v0 }
  0x46   : > { %2146 = vmatprep.subr.bf16.mxu0 %v2308_v38 }
  0x47   : > { %2147 = vmatpush3.bf16.msra.mxu0 %v2308_v38 }
  0x48   : > { %794 = vmatpush1.bf16.msra.mxu1 %v2292_v39  ;;  %2148 = vmatprep.subr.bf16.mxu0 %v2310_v40 }
  0x49   : > { %795 = vmatprep.subr.bf16.mxu1 %v2299_v41 }
  0x4b   : > { %653 = vmatmul.mubr.bf16.gmra.mxu0 %v2483_v42  ;;  %773 = vmatmul.mubr.bf16.gmra.mxu1 %v2486_v43 }
  0x4c   : > { %796 = vmatpush1.bf16.msra.mxu1 %v2297_v44  ;;  %662 = vmatprep.mubr.bf16.mxu0 %v2357_v0 }
  0x4d   : > { %797 = vmatprep.subr.bf16.mxu1 %v2303_v45  ;;  %815 = vmatprep.mubr.bf16.mxu1 %v2357_v0 }
  0x4e   : > { %2149 = vmatpush3.bf16.msra.mxu0 %v2310_v40 }
  0x4f   : > { %2150 = vmatprep.subr.bf16.mxu0 %v2313_v46 }
  0x50   : > { %798 = vmatpush1.bf16.msra.mxu1 %v2301_v47 }
  0x52   : > { %2151 = vmatpush3.bf16.msra.mxu0 %v2313_v46 }
  0x53   : > { %663 = vmatmul.mubr.bf16.gmra.mxu0 %v2304_v48  ;;  %816 = vmatmul.mubr.bf16.vlgmr.msra.gmra.mxu1 %v2436_v19 }
  0x54   : > { %672 = vmatprep.mubr.bf16.mxu0 %v2357_v0  ;;  %825 = vmatprep.mubr.bf16.mxu1 %v2357_v0 }
  0x55   : > { %2152 = vmatprep.subr.bf16.mxu0 %v2315_v49 }
  0x56   : > { %2153 = vmatpush3.bf16.msra.mxu0 %v2315_v49 }
  0x5b   : > { %673 = vmatmul.mubr.bf16.gmra.mxu0 %v2306_v50  ;;  %826 = vmatmul.mubr.bf16.gmra.mxu1 %v2452_v27 }
  0x5c   : > { %682 = vmatprep.mubr.bf16.mxu0 %v2357_v0  ;;  %835 = vmatprep.mubr.bf16.mxu1 %v2357_v0 }
  0x63   : > { %683 = vmatmul.mubr.bf16.gmra.mxu0 %v2307_v51  ;;  %836 = vmatmul.mubr.bf16.gmra.mxu1 %v2467_v34 }
  0x64   : > { %692 = vmatprep.mubr.bf16.mxu0 %v2357_v0  ;;  %845 = vmatprep.mubr.bf16.mxu1 %v2357_v0 }
  0x6b   : > { %693 = vmatmul.mubr.bf16.gmra.mxu0 %v2309_v52  ;;  %846 = vmatmul.mubr.bf16.gmra.mxu1 %v2483_v42 }
  0x6c   : > { %702 = vmatprep.mubr.bf16.mxu0 %v2357_v0  ;;  %855 = vmatprep.mubr.bf16.mxu1 %v2357_v0 }
  0x73   : > { %703 = vmatmul.mubr.bf16.gmra.mxu0 %v2311_v53  ;;  %856 = vmatmul.mubr.bf16.gmra.mxu1 %v2304_v48 }
  0x74   : > { %712 = vmatprep.mubr.bf16.mxu0 %v2357_v0  ;;  %865 = vmatprep.mubr.bf16.mxu1 %v2357_v0 }
  0x7b   : > { %713 = vmatmul.mubr.bf16.gmra.mxu0 %v2312_v54  ;;  %866 = vmatmul.mubr.bf16.gmra.mxu1 %v2306_v50 }
  0x7c   : > { %722 = vmatprep.mubr.bf16.mxu0 %v2357_v0  ;;  %875 = vmatprep.mubr.bf16.mxu1 %v2357_v0 }
  0x83   : > { %723 = vmatmul.mubr.bf16.gmra.mxu0 %v2314_v55  ;;  %876 = vmatmul.mubr.bf16.gmra.mxu1 %v2307_v51 }
  0x84   : > { %732 = vmatprep.mubr.bf16.mxu0 %v2357_v0  ;;  %885 = vmatprep.mubr.bf16.mxu1 %v2357_v0 }
  0x8b   : > { %733 = vmatmul.mubr.bf16.gmra.mxu0 %v2316_v56  ;;  %886 = vmatmul.mubr.bf16.gmra.mxu1 %v2309_v52 }
  0x8c   : > { %895 = vmatprep.mubr.bf16.mxu1 %v2357_v0  ;;  %2154 = vmatprep.mubr.bf16.mxu0 %v2436_v19 }
  0x93   : > { %896 = vmatmul.mubr.bf16.gmra.mxu1 %v2311_v53  ;;  %2155 = vmatmul.mubr.bf16.vlgmr.msra.gmra.mxu0 %v2452_v27 }
  0x94   : > { %905 = vmatprep.mubr.bf16.mxu1 %v2357_v0  ;;  %2158 = vmatprep.mubr.bf16.mxu0 %v2467_v34 }
  0x9b   : > { %906 = vmatmul.mubr.bf16.gmra.mxu1 %v2312_v54  ;;  %2159 = vmatmul.mubr.bf16.gmra.mxu0 %v2483_v42 }
  0x9c   : > { %915 = vmatprep.mubr.bf16.mxu1 %v2357_v0  ;;  %2162 = vmatprep.mubr.bf16.mxu0 %v2304_v48 }
  0xa3   : > { %916 = vmatmul.mubr.bf16.gmra.mxu1 %v2314_v55  ;;  %2163 = vmatmul.mubr.bf16.gmra.mxu0 %v2306_v50 }
  0xa4   : > { %925 = vmatprep.mubr.bf16.mxu1 %v2357_v0  ;;  %2166 = vmatprep.mubr.bf16.mxu0 %v2307_v51 }
  0xab   : > { %926 = vmatmul.mubr.bf16.gmra.mxu1 %v2316_v56  ;;  %2167 = vmatmul.mubr.bf16.gmra.mxu0 %v2309_v52 }
  0xac   : > { %935 = vmatprep.mubr.bf16.mxu1 %v2357_v0  ;;  %2170 = vmatprep.mubr.bf16.mxu0 %v2311_v53 }
  0xb3   : > { %936 = vmatmul.mubr.bf16.gmra.mxu1 %v2439_v20  ;;  %2171 = vmatmul.mubr.bf16.gmra.mxu0 %v2312_v54 }
  0xb4   : > { %945 = vmatprep.mubr.bf16.mxu1 %v2357_v0  ;;  %2174 = vmatprep.mubr.bf16.mxu0 %v2314_v55 }
  0xbb   : > { %946 = vmatmul.mubr.bf16.gmra.mxu1 %v2455_v28  ;;  %2175 = vmatmul.mubr.bf16.gmra.mxu0 %v2316_v56 }
  0xbc   : > { %955 = vmatprep.mubr.bf16.mxu1 %v2357_v0  ;;  %2178 = vmatprep.mubr.bf16.mxu0 %v2439_v20 }
  0xc3   : > { %956 = vmatmul.mubr.bf16.gmra.mxu1 %v2470_v35  ;;  %2179 = vmatmul.mubr.bf16.gmra.mxu0 %v2455_v28 }
  0xc4   : > { %965 = vmatprep.mubr.bf16.mxu1 %v2357_v0  ;;  %2182 = vmatprep.mubr.bf16.mxu0 %v2470_v35 }
  0xcb   : > { %966 = vmatmul.mubr.bf16.gmra.mxu1 %v2486_v43  ;;  %2183 = vmatmul.mubr.bf16.gmra.mxu0 %v2486_v43 }
  0xf3   : > { %v624_v57 = vpop.f32.mrf.mxu0  ;;  %v744_v58 = vpop.f32.mrf.mxu1 }
  0xf5   : > { %v626_v59 = vpop.f32.mrf.mxu0  ;;  %v746_v60 = vpop.f32.mrf.mxu1 }
  0xf6   : > { %v2018_v61 = vpack.c.bf16 %v626_v59, %v624_v57  ;;  %v2090_v62 = vpack.c.bf16 %v746_v60, %v744_v58 }
  0xf7   : > { %v628_v63 = vpop.f32.mrf.mxu0  ;;  %v748_v0 = vpop.f32.mrf.mxu1 }
  0xf8   : > { %1649 = vst [vmem:[%s2547_s4] sm:$0xff] %v2018_v61  ;;  %1721 = vst [vmem:[%s2547_s4 + $0x1e0] sm:$0xff] %v2090_v62 }
  0xf9   : > { %v630_v1 = vpop.f32.mrf.mxu0  ;;  %v750_v2 = vpop.f32.mrf.mxu1 }
  0xfa   : > { %v2021_v3 = vpack.c.bf16 %v630_v1, %v628_v63  ;;  %v2093_v4 = vpack.c.bf16 %v750_v2, %v748_v0 }
  0xfb   : > { %v634_v5 = vpop.f32.mrf.mxu0  ;;  %v754_v6 = vpop.f32.mrf.mxu1 }
  0xfc   : > { %1652 = vst [vmem:[%s2547_s4 + $0x14] sm:$0xff] %v2021_v3  ;;  %1724 = vst [vmem:[%s2547_s4 + $0x1f4] sm:$0xff] %v2093_v4 }
  0xfd   : > { %v636_v7 = vpop.f32.mrf.mxu0  ;;  %v756_v8 = vpop.f32.mrf.mxu1 }
  0xfe   : > { %v2024_v9 = vpack.c.bf16 %v636_v7, %v634_v5  ;;  %v2096_v10 = vpack.c.bf16 %v756_v8, %v754_v6 }
  0xff   : > { %v638_v11 = vpop.f32.mrf.mxu0  ;;  %v758_v12 = vpop.f32.mrf.mxu1 }
 0x100   : > { %1655 = vst [vmem:[%s2547_s4 + $0x28] sm:$0xff] %v2024_v9  ;;  %1727 = vst [vmem:[%s2547_s4 + $0x208] sm:$0xff] %v2096_v10 }
 0x101   : > { %v640_v13 = vpop.f32.mrf.mxu0  ;;  %v760_v14 = vpop.f32.mrf.mxu1 }
 0x102   : > { %v2027_v15 = vpack.c.bf16 %v640_v13, %v638_v11  ;;  %v2099_v16 = vpack.c.bf16 %v760_v14, %v758_v12 }
 0x103   : > { %v644_v17 = vpop.f32.mrf.mxu0  ;;  %v764_v18 = vpop.f32.mrf.mxu1 }
 0x104   : > { %1658 = vst [vmem:[%s2547_s4 + $0x3c] sm:$0xff] %v2027_v15  ;;  %1730 = vst [vmem:[%s2547_s4 + $0x21c] sm:$0xff] %v2099_v16 }
 0x105   : > { %v646_v19 = vpop.f32.mrf.mxu0  ;;  %v766_v20 = vpop.f32.mrf.mxu1 }
 0x106   : > { %v2030_v21 = vpack.c.bf16 %v646_v19, %v644_v17  ;;  %v2102_v22 = vpack.c.bf16 %v766_v20, %v764_v18 }
 0x107   : > { %v648_v23 = vpop.f32.mrf.mxu0  ;;  %v768_v24 = vpop.f32.mrf.mxu1 }
 0x108   : > { %1661 = vst [vmem:[%s2547_s4 + $0x50] sm:$0xff] %v2030_v21  ;;  %1733 = vst [vmem:[%s2547_s4 + $0x230] sm:$0xff] %v2102_v22 }
 0x109   : > { %v650_v25 = vpop.f32.mrf.mxu0  ;;  %v770_v26 = vpop.f32.mrf.mxu1 }
 0x10a   : > { %v2033_v27 = vpack.c.bf16 %v650_v25, %v648_v23  ;;  %v2105_v28 = vpack.c.bf16 %v770_v26, %v768_v24 }
 0x10b   : > { %v654_v29 = vpop.f32.mrf.mxu0  ;;  %v774_v30 = vpop.f32.mrf.mxu1 }
 0x10c   : > { %1664 = vst [vmem:[%s2547_s4 + $0x64] sm:$0xff] %v2033_v27  ;;  %1736 = vst [vmem:[%s2547_s4 + $0x244] sm:$0xff] %v2105_v28 }
 0x10d   : > { %v656_v31 = vpop.f32.mrf.mxu0  ;;  %v776_v32 = vpop.f32.mrf.mxu1 }
 0x10e   : > { %v2036_v33 = vpack.c.bf16 %v656_v31, %v654_v29  ;;  %v2108_v34 = vpack.c.bf16 %v776_v32, %v774_v30 }
 0x10f   : > { %v658_v35 = vpop.f32.mrf.mxu0  ;;  %v778_v36 = vpop.f32.mrf.mxu1 }
 0x110   : > { %1667 = vst [vmem:[%s2547_s4 + $0x78] sm:$0xff] %v2036_v33  ;;  %1739 = vst [vmem:[%s2547_s4 + $0x258] sm:$0xff] %v2108_v34 }
 0x111   : > { %v660_v37 = vpop.f32.mrf.mxu0  ;;  %v780_v38 = vpop.f32.mrf.mxu1 }
 0x112   : > { %v2039_v39 = vpack.c.bf16 %v660_v37, %v658_v35  ;;  %v2111_v40 = vpack.c.bf16 %v780_v38, %v778_v36 }
 0x113   : > { %v664_v41 = vpop.f32.mrf.mxu0  ;;  %v817_v42 = vpop.f32.mrf.mxu1 }
 0x114   : > { %1670 = vst [vmem:[%s2547_s4 + $0x8c] sm:$0xff] %v2039_v39  ;;  %1742 = vst [vmem:[%s2547_s4 + $0x26c] sm:$0xff] %v2111_v40 }
 0x115   : > { %v666_v43 = vpop.f32.mrf.mxu0  ;;  %v819_v44 = vpop.f32.mrf.mxu1 }
 0x116   : > { %v2042_v45 = vpack.c.bf16 %v666_v43, %v664_v41  ;;  %v2019_v46 = vpack.c.bf16 %v819_v44, %v817_v42 }
 0x117   : > { %v668_v47 = vpop.f32.mrf.mxu0  ;;  %v821_v48 = vpop.f32.mrf.mxu1 }
 0x118   : > { %1673 = vst [vmem:[%s2547_s4 + $0xa0] sm:$0xff] %v2042_v45  ;;  %1650 = vst [vmem:[%s2547_s4 + $0x8] sm:$0xff] %v2019_v46 }
 0x119   : > { %v670_v49 = vpop.f32.mrf.mxu0  ;;  %v823_v50 = vpop.f32.mrf.mxu1 }
 0x11a   : > { %v2045_v51 = vpack.c.bf16 %v670_v49, %v668_v47  ;;  %v2022_v52 = vpack.c.bf16 %v823_v50, %v821_v48 }
 0x11b   : > { %v674_v53 = vpop.f32.mrf.mxu0  ;;  %v827_v54 = vpop.f32.mrf.mxu1 }
 0x11c   : > { %1676 = vst [vmem:[%s2547_s4 + $0xb4] sm:$0xff] %v2045_v51  ;;  %1653 = vst [vmem:[%s2547_s4 + $0x1c] sm:$0xff] %v2022_v52 }
 0x11d   : > { %v676_v55 = vpop.f32.mrf.mxu0  ;;  %v829_v56 = vpop.f32.mrf.mxu1 }
 0x11e   : > { %v2048_v57 = vpack.c.bf16 %v676_v55, %v674_v53  ;;  %v2025_v58 = vpack.c.bf16 %v829_v56, %v827_v54 }
 0x11f   : > { %v678_v59 = vpop.f32.mrf.mxu0  ;;  %v831_v60 = vpop.f32.mrf.mxu1 }
 0x120   : > { %1679 = vst [vmem:[%s2547_s4 + $0xc8] sm:$0xff] %v2048_v57  ;;  %1656 = vst [vmem:[%s2547_s4 + $0x30] sm:$0xff] %v2025_v58 }
 0x121   : > { %v680_v61 = vpop.f32.mrf.mxu0  ;;  %v833_v62 = vpop.f32.mrf.mxu1 }
 0x122   : > { %v2051_v63 = vpack.c.bf16 %v680_v61, %v678_v59  ;;  %v2028_v0 = vpack.c.bf16 %v833_v62, %v831_v60 }
 0x123   : > { %v684_v1 = vpop.f32.mrf.mxu0  ;;  %v837_v2 = vpop.f32.mrf.mxu1 }
 0x124   : > { %1682 = vst [vmem:[%s2547_s4 + $0xdc] sm:$0xff] %v2051_v63  ;;  %1659 = vst [vmem:[%s2547_s4 + $0x44] sm:$0xff] %v2028_v0 }
 0x125   : > { %v686_v3 = vpop.f32.mrf.mxu0  ;;  %v839_v4 = vpop.f32.mrf.mxu1 }
 0x126   : > { %v2054_v5 = vpack.c.bf16 %v686_v3, %v684_v1  ;;  %v2031_v6 = vpack.c.bf16 %v839_v4, %v837_v2 }
 0x127   : > { %v688_v7 = vpop.f32.mrf.mxu0  ;;  %v841_v8 = vpop.f32.mrf.mxu1 }
 0x128   : > { %1685 = vst [vmem:[%s2547_s4 + $0xf0] sm:$0xff] %v2054_v5  ;;  %1662 = vst [vmem:[%s2547_s4 + $0x58] sm:$0xff] %v2031_v6 }
 0x129   : > { %v690_v9 = vpop.f32.mrf.mxu0  ;;  %v843_v10 = vpop.f32.mrf.mxu1 }
 0x12a   : > { %v2057_v11 = vpack.c.bf16 %v690_v9, %v688_v7  ;;  %v2034_v12 = vpack.c.bf16 %v843_v10, %v841_v8 }
 0x12b   : > { %v694_v13 = vpop.f32.mrf.mxu0  ;;  %v847_v14 = vpop.f32.mrf.mxu1 }
 0x12c   : > { %1688 = vst [vmem:[%s2547_s4 + $0x104] sm:$0xff] %v2057_v11  ;;  %1665 = vst [vmem:[%s2547_s4 + $0x6c] sm:$0xff] %v2034_v12 }
 0x12d   : > { %v696_v15 = vpop.f32.mrf.mxu0  ;;  %v849_v16 = vpop.f32.mrf.mxu1 }
 0x12e   : > { %v2060_v17 = vpack.c.bf16 %v696_v15, %v694_v13  ;;  %v2037_v18 = vpack.c.bf16 %v849_v16, %v847_v14 }
 0x12f   : > { %v698_v19 = vpop.f32.mrf.mxu0  ;;  %v851_v20 = vpop.f32.mrf.mxu1 }
 0x130   : > { %1691 = vst [vmem:[%s2547_s4 + $0x118] sm:$0xff] %v2060_v17  ;;  %1668 = vst [vmem:[%s2547_s4 + $0x80] sm:$0xff] %v2037_v18 }
 0x131   : > { %v700_v21 = vpop.f32.mrf.mxu0  ;;  %v853_v22 = vpop.f32.mrf.mxu1 }
 0x132   : > { %v2063_v23 = vpack.c.bf16 %v700_v21, %v698_v19  ;;  %v2040_v24 = vpack.c.bf16 %v853_v22, %v851_v20 }
 0x133   : > { %v704_v25 = vpop.f32.mrf.mxu0  ;;  %v857_v26 = vpop.f32.mrf.mxu1 }
 0x134   : > { %1694 = vst [vmem:[%s2547_s4 + $0x12c] sm:$0xff] %v2063_v23  ;;  %1671 = vst [vmem:[%s2547_s4 + $0x94] sm:$0xff] %v2040_v24 }
 0x135   : > { %v706_v27 = vpop.f32.mrf.mxu0  ;;  %v859_v28 = vpop.f32.mrf.mxu1 }
 0x136   : > { %v2066_v29 = vpack.c.bf16 %v706_v27, %v704_v25  ;;  %v2043_v30 = vpack.c.bf16 %v859_v28, %v857_v26 }
 0x137   : > { %v708_v31 = vpop.f32.mrf.mxu0  ;;  %v861_v32 = vpop.f32.mrf.mxu1 }
 0x138   : > { %1697 = vst [vmem:[%s2547_s4 + $0x140] sm:$0xff] %v2066_v29  ;;  %1674 = vst [vmem:[%s2547_s4 + $0xa8] sm:$0xff] %v2043_v30 }
 0x139   : > { %v710_v33 = vpop.f32.mrf.mxu0  ;;  %v863_v34 = vpop.f32.mrf.mxu1 }
 0x13a   : > { %v2069_v35 = vpack.c.bf16 %v710_v33, %v708_v31  ;;  %v2046_v36 = vpack.c.bf16 %v863_v34, %v861_v32 }
 0x13b   : > { %v714_v37 = vpop.f32.mrf.mxu0  ;;  %v867_v38 = vpop.f32.mrf.mxu1 }
 0x13c   : > { %1700 = vst [vmem:[%s2547_s4 + $0x154] sm:$0xff] %v2069_v35  ;;  %1677 = vst [vmem:[%s2547_s4 + $0xbc] sm:$0xff] %v2046_v36 }
 0x13d   : > { %v716_v39 = vpop.f32.mrf.mxu0  ;;  %v869_v40 = vpop.f32.mrf.mxu1 }
 0x13e   : > { %v2072_v41 = vpack.c.bf16 %v716_v39, %v714_v37  ;;  %v2049_v42 = vpack.c.bf16 %v869_v40, %v867_v38 }
 0x13f   : > { %v718_v43 = vpop.f32.mrf.mxu0  ;;  %v871_v44 = vpop.f32.mrf.mxu1 }
 0x140   : > { %1703 = vst [vmem:[%s2547_s4 + $0x168] sm:$0xff] %v2072_v41  ;;  %1680 = vst [vmem:[%s2547_s4 + $0xd0] sm:$0xff] %v2049_v42 }
 0x141   : > { %v720_v45 = vpop.f32.mrf.mxu0  ;;  %v873_v46 = vpop.f32.mrf.mxu1 }
 0x142   : > { %v2075_v47 = vpack.c.bf16 %v720_v45, %v718_v43  ;;  %v2052_v48 = vpack.c.bf16 %v873_v46, %v871_v44 }
 0x143   : > { %v724_v49 = vpop.f32.mrf.mxu0  ;;  %v877_v50 = vpop.f32.mrf.mxu1 }
 0x144   : > { %1706 = vst [vmem:[%s2547_s4 + $0x17c] sm:$0xff] %v2075_v47  ;;  %1683 = vst [vmem:[%s2547_s4 + $0xe4] sm:$0xff] %v2052_v48 }
 0x145   : > { %v726_v51 = vpop.f32.mrf.mxu0  ;;  %v879_v52 = vpop.f32.mrf.mxu1 }
 0x146   : > { %v2078_v53 = vpack.c.bf16 %v726_v51, %v724_v49  ;;  %v2055_v54 = vpack.c.bf16 %v879_v52, %v877_v50 }
 0x147   : > { %v728_v55 = vpop.f32.mrf.mxu0  ;;  %v881_v56 = vpop.f32.mrf.mxu1 }
 0x148   : > { %1709 = vst [vmem:[%s2547_s4 + $0x190] sm:$0xff] %v2078_v53  ;;  %1686 = vst [vmem:[%s2547_s4 + $0xf8] sm:$0xff] %v2055_v54 }
 0x149   : > { %v730_v57 = vpop.f32.mrf.mxu0  ;;  %v883_v58 = vpop.f32.mrf.mxu1 }
 0x14a   : > { %v2081_v59 = vpack.c.bf16 %v730_v57, %v728_v55  ;;  %v2058_v60 = vpack.c.bf16 %v883_v58, %v881_v56 }
 0x14b   : > { %v734_v61 = vpop.f32.mrf.mxu0  ;;  %v887_v62 = vpop.f32.mrf.mxu1 }
 0x14c   : > { %1712 = vst [vmem:[%s2547_s4 + $0x1a4] sm:$0xff] %v2081_v59  ;;  %1689 = vst [vmem:[%s2547_s4 + $0x10c] sm:$0xff] %v2058_v60 }
 0x14d   : > { %v736_v63 = vpop.f32.mrf.mxu0  ;;  %v889_v0 = vpop.f32.mrf.mxu1 }
 0x14e   : > { %v2084_v1 = vpack.c.bf16 %v736_v63, %v734_v61  ;;  %v2061_v2 = vpack.c.bf16 %v889_v0, %v887_v62 }
 0x14f   : > { %v738_v3 = vpop.f32.mrf.mxu0  ;;  %v891_v4 = vpop.f32.mrf.mxu1 }
 0x150   : > { %1715 = vst [vmem:[%s2547_s4 + $0x1b8] sm:$0xff] %v2084_v1  ;;  %1692 = vst [vmem:[%s2547_s4 + $0x120] sm:$0xff] %v2061_v2 }
 0x151   : > { %v740_v5 = vpop.f32.mrf.mxu0  ;;  %v893_v6 = vpop.f32.mrf.mxu1 }
 0x152   : > { %v2087_v7 = vpack.c.bf16 %v740_v5, %v738_v3  ;;  %v2064_v8 = vpack.c.bf16 %v893_v6, %v891_v4 }
 0x153   : > { %v897_v9 = vpop.f32.mrf.mxu1  ;;  %v2156_v10 = vpop.f32.mrf.mxu0 }
 0x154   : > { %1718 = vst [vmem:[%s2547_s4 + $0x1cc] sm:$0xff] %v2087_v7  ;;  %1695 = vst [vmem:[%s2547_s4 + $0x134] sm:$0xff] %v2064_v8  ;;  %v2026_v11 = vpack.c.bf16 %v2156_v10, %v2156_v10 }
 0x155   : > { %v899_v12 = vpop.f32.mrf.mxu1  ;;  %v1010_v13 = vpop.f32.mrf.mxu0 }
 0x156   : > { %1657 = vst [vmem:[%s2547_s4 + $0x38] sm:$0xf] %v2026_v11  ;;  %v2067_v14 = vpack.c.bf16 %v899_v12, %v897_v9  ;;  %v2020_v15 = vpack.c.bf16 %v1010_v13, %v1010_v13 }
 0x157   : > { %v901_v16 = vpop.f32.mrf.mxu1  ;;  %v2157_v17 = vpop.f32.mrf.mxu0 }
 0x158   : > { %1698 = vst [vmem:[%s2547_s4 + $0x148] sm:$0xff] %v2067_v14  ;;  %1651 = vst [vmem:[%s2547_s4 + $0x10] sm:$0xf] %v2020_v15  ;;  %v2029_v18 = vpack.c.bf16 %v2157_v17, %v2157_v17 }
 0x159   : > { %v903_v19 = vpop.f32.mrf.mxu1  ;;  %v1013_v20 = vpop.f32.mrf.mxu0 }
 0x15a   : > { %1660 = vst [vmem:[%s2547_s4 + $0x4c] sm:$0xf] %v2029_v18  ;;  %v2070_v21 = vpack.c.bf16 %v903_v19, %v901_v16  ;;  %v2023_v22 = vpack.c.bf16 %v1013_v20, %v1013_v20 }
 0x15b   : > { %v907_v23 = vpop.f32.mrf.mxu1  ;;  %v2160_v24 = vpop.f32.mrf.mxu0 }
 0x15c   : > { %1701 = vst [vmem:[%s2547_s4 + $0x15c] sm:$0xff] %v2070_v21  ;;  %1654 = vst [vmem:[%s2547_s4 + $0x24] sm:$0xf] %v2023_v22  ;;  %v2038_v25 = vpack.c.bf16 %v2160_v24, %v2160_v24 }
 0x15d   : > { %v909_v26 = vpop.f32.mrf.mxu1  ;;  %v1026_v27 = vpop.f32.mrf.mxu0 }
 0x15e   : > { %1669 = vst [vmem:[%s2547_s4 + $0x88] sm:$0xf] %v2038_v25  ;;  %v2073_v28 = vpack.c.bf16 %v909_v26, %v907_v23  ;;  %v2032_v29 = vpack.c.bf16 %v1026_v27, %v1026_v27 }
 0x15f   : > { %v911_v30 = vpop.f32.mrf.mxu1  ;;  %v2161_v31 = vpop.f32.mrf.mxu0 }
 0x160   : > { %1704 = vst [vmem:[%s2547_s4 + $0x170] sm:$0xff] %v2073_v28  ;;  %1663 = vst [vmem:[%s2547_s4 + $0x60] sm:$0xf] %v2032_v29  ;;  %v2041_v32 = vpack.c.bf16 %v2161_v31, %v2161_v31 }
 0x161   : > { %v913_v33 = vpop.f32.mrf.mxu1  ;;  %v1029_v34 = vpop.f32.mrf.mxu0 }
 0x162   : > { %1672 = vst [vmem:[%s2547_s4 + $0x9c] sm:$0xf] %v2041_v32  ;;  %v2076_v35 = vpack.c.bf16 %v913_v33, %v911_v30  ;;  %v2035_v36 = vpack.c.bf16 %v1029_v34, %v1029_v34 }
 0x163   : > { %v917_v37 = vpop.f32.mrf.mxu1  ;;  %v2164_v38 = vpop.f32.mrf.mxu0 }
 0x164   : > { %1707 = vst [vmem:[%s2547_s4 + $0x184] sm:$0xff] %v2076_v35  ;;  %1666 = vst [vmem:[%s2547_s4 + $0x74] sm:$0xf] %v2035_v36  ;;  %v2050_v39 = vpack.c.bf16 %v2164_v38, %v2164_v38 }
 0x165   : > { %v919_v40 = vpop.f32.mrf.mxu1  ;;  %v1042_v41 = vpop.f32.mrf.mxu0 }
 0x166   : > { %1681 = vst [vmem:[%s2547_s4 + $0xd8] sm:$0xf] %v2050_v39  ;;  %v2079_v42 = vpack.c.bf16 %v919_v40, %v917_v37  ;;  %v2044_v43 = vpack.c.bf16 %v1042_v41, %v1042_v41 }
 0x167   : > { %v921_v44 = vpop.f32.mrf.mxu1  ;;  %v2165_v45 = vpop.f32.mrf.mxu0 }
 0x168   : > { %1710 = vst [vmem:[%s2547_s4 + $0x198] sm:$0xff] %v2079_v42  ;;  %1675 = vst [vmem:[%s2547_s4 + $0xb0] sm:$0xf] %v2044_v43  ;;  %v2053_v46 = vpack.c.bf16 %v2165_v45, %v2165_v45 }
 0x169   : > { %v923_v47 = vpop.f32.mrf.mxu1  ;;  %v1045_v48 = vpop.f32.mrf.mxu0 }
 0x16a   : > { %1684 = vst [vmem:[%s2547_s4 + $0xec] sm:$0xf] %v2053_v46  ;;  %v2082_v49 = vpack.c.bf16 %v923_v47, %v921_v44  ;;  %v2047_v50 = vpack.c.bf16 %v1045_v48, %v1045_v48 }
 0x16b   : > { %v927_v51 = vpop.f32.mrf.mxu1  ;;  %v2168_v52 = vpop.f32.mrf.mxu0 }
 0x16c   : > { %1713 = vst [vmem:[%s2547_s4 + $0x1ac] sm:$0xff] %v2082_v49  ;;  %1678 = vst [vmem:[%s2547_s4 + $0xc4] sm:$0xf] %v2047_v50  ;;  %v2062_v53 = vpack.c.bf16 %v2168_v52, %v2168_v52 }
 0x16d   : > { %v929_v54 = vpop.f32.mrf.mxu1  ;;  %v1058_v55 = vpop.f32.mrf.mxu0 }
 0x16e   : > { %1693 = vst [vmem:[%s2547_s4 + $0x128] sm:$0xf] %v2062_v53  ;;  %v2085_v56 = vpack.c.bf16 %v929_v54, %v927_v51  ;;  %v2056_v57 = vpack.c.bf16 %v1058_v55, %v1058_v55 }
 0x16f   : > { %v931_v58 = vpop.f32.mrf.mxu1  ;;  %v2169_v59 = vpop.f32.mrf.mxu0 }
 0x170   : > { %1716 = vst [vmem:[%s2547_s4 + $0x1c0] sm:$0xff] %v2085_v56  ;;  %1687 = vst [vmem:[%s2547_s4 + $0x100] sm:$0xf] %v2056_v57  ;;  %v2065_v60 = vpack.c.bf16 %v2169_v59, %v2169_v59 }
 0x171   : > { %v933_v61 = vpop.f32.mrf.mxu1  ;;  %v1061_v62 = vpop.f32.mrf.mxu0 }
 0x172   : > { %1696 = vst [vmem:[%s2547_s4 + $0x13c] sm:$0xf] %v2065_v60  ;;  %v2088_v63 = vpack.c.bf16 %v933_v61, %v931_v58  ;;  %v2059_v0 = vpack.c.bf16 %v1061_v62, %v1061_v62 }
 0x173   : > { %v937_v1 = vpop.f32.mrf.mxu1  ;;  %v2172_v2 = vpop.f32.mrf.mxu0 }
 0x174   : > { %1719 = vst [vmem:[%s2547_s4 + $0x1d4] sm:$0xff] %v2088_v63  ;;  %1690 = vst [vmem:[%s2547_s4 + $0x114] sm:$0xf] %v2059_v0  ;;  %v2074_v3 = vpack.c.bf16 %v2172_v2, %v2172_v2 }
 0x175   : > { %v939_v4 = vpop.f32.mrf.mxu1  ;;  %v1074_v5 = vpop.f32.mrf.mxu0 }
 0x176   : > { %1705 = vst [vmem:[%s2547_s4 + $0x178] sm:$0xf] %v2074_v3  ;;  %v2091_v6 = vpack.c.bf16 %v939_v4, %v937_v1  ;;  %v2068_v7 = vpack.c.bf16 %v1074_v5, %v1074_v5 }
 0x177   : > { %v941_v8 = vpop.f32.mrf.mxu1  ;;  %v2173_v9 = vpop.f32.mrf.mxu0 }
 0x178   : > { %1722 = vst [vmem:[%s2547_s4 + $0x1e8] sm:$0xff] %v2091_v6  ;;  %1699 = vst [vmem:[%s2547_s4 + $0x150] sm:$0xf] %v2068_v7  ;;  %v2077_v10 = vpack.c.bf16 %v2173_v9, %v2173_v9 }
 0x179   : > { %v943_v11 = vpop.f32.mrf.mxu1  ;;  %v1077_v12 = vpop.f32.mrf.mxu0 }
 0x17a   : > { %1708 = vst [vmem:[%s2547_s4 + $0x18c] sm:$0xf] %v2077_v10  ;;  %v2094_v13 = vpack.c.bf16 %v943_v11, %v941_v8  ;;  %v2071_v14 = vpack.c.bf16 %v1077_v12, %v1077_v12 }
 0x17b   : > { %v947_v15 = vpop.f32.mrf.mxu1  ;;  %v2176_v16 = vpop.f32.mrf.mxu0 }
 0x17c   : > { %1725 = vst [vmem:[%s2547_s4 + $0x1fc] sm:$0xff] %v2094_v13  ;;  %1702 = vst [vmem:[%s2547_s4 + $0x164] sm:$0xf] %v2071_v14  ;;  %v2086_v17 = vpack.c.bf16 %v2176_v16, %v2176_v16 }
 0x17d   : > { %v949_v18 = vpop.f32.mrf.mxu1  ;;  %v1090_v19 = vpop.f32.mrf.mxu0 }
 0x17e   : > { %1717 = vst [vmem:[%s2547_s4 + $0x1c8] sm:$0xf] %v2086_v17  ;;  %v2097_v20 = vpack.c.bf16 %v949_v18, %v947_v15  ;;  %v2080_v21 = vpack.c.bf16 %v1090_v19, %v1090_v19 }
 0x17f   : > { %v951_v22 = vpop.f32.mrf.mxu1  ;;  %v2177_v23 = vpop.f32.mrf.mxu0 }
 0x180   : > { %1728 = vst [vmem:[%s2547_s4 + $0x210] sm:$0xff] %v2097_v20  ;;  %1711 = vst [vmem:[%s2547_s4 + $0x1a0] sm:$0xf] %v2080_v21  ;;  %v2089_v24 = vpack.c.bf16 %v2177_v23, %v2177_v23 }
 0x181   : > { %v953_v25 = vpop.f32.mrf.mxu1  ;;  %v1093_v26 = vpop.f32.mrf.mxu0 }
 0x182   : > { %1720 = vst [vmem:[%s2547_s4 + $0x1dc] sm:$0xf] %v2089_v24  ;;  %v2100_v27 = vpack.c.bf16 %v953_v25, %v951_v22  ;;  %v2083_v28 = vpack.c.bf16 %v1093_v26, %v1093_v26 }
 0x183   : > { %v957_v29 = vpop.f32.mrf.mxu1  ;;  %v2180_v30 = vpop.f32.mrf.mxu0 }
 0x184   : > { %1731 = vst [vmem:[%s2547_s4 + $0x224] sm:$0xff] %v2100_v27  ;;  %1714 = vst [vmem:[%s2547_s4 + $0x1b4] sm:$0xf] %v2083_v28  ;;  %v2098_v31 = vpack.c.bf16 %v2180_v30, %v2180_v30 }
 0x185   : > { %v959_v32 = vpop.f32.mrf.mxu1  ;;  %v1106_v33 = vpop.f32.mrf.mxu0 }
 0x186   : > { %1729 = vst [vmem:[%s2547_s4 + $0x218] sm:$0xf] %v2098_v31  ;;  %v2103_v34 = vpack.c.bf16 %v959_v32, %v957_v29  ;;  %v2092_v35 = vpack.c.bf16 %v1106_v33, %v1106_v33 }
 0x187   : > { %v961_v36 = vpop.f32.mrf.mxu1  ;;  %v2181_v37 = vpop.f32.mrf.mxu0 }
 0x188   : > { %1734 = vst [vmem:[%s2547_s4 + $0x238] sm:$0xff] %v2103_v34  ;;  %1723 = vst [vmem:[%s2547_s4 + $0x1f0] sm:$0xf] %v2092_v35  ;;  %v2101_v38 = vpack.c.bf16 %v2181_v37, %v2181_v37 }
 0x189   : > { %v963_v39 = vpop.f32.mrf.mxu1  ;;  %v1109_v40 = vpop.f32.mrf.mxu0 }
 0x18a   : > { %1732 = vst [vmem:[%s2547_s4 + $0x22c] sm:$0xf] %v2101_v38  ;;  %v2106_v41 = vpack.c.bf16 %v963_v39, %v961_v36  ;;  %v2095_v42 = vpack.c.bf16 %v1109_v40, %v1109_v40 }
 0x18b   : > { %v967_v43 = vpop.f32.mrf.mxu1  ;;  %v2184_v44 = vpop.f32.mrf.mxu0 }
 0x18c   : > { %1737 = vst [vmem:[%s2547_s4 + $0x24c] sm:$0xff] %v2106_v41  ;;  %1726 = vst [vmem:[%s2547_s4 + $0x204] sm:$0xf] %v2095_v42  ;;  %v2110_v45 = vpack.c.bf16 %v2184_v44, %v2184_v44 }
 0x18d   : > { %v969_v46 = vpop.f32.mrf.mxu1  ;;  %v1122_v47 = vpop.f32.mrf.mxu0 }
 0x18e   : > { %1741 = vst [vmem:[%s2547_s4 + $0x268] sm:$0xf] %v2110_v45  ;;  %v2109_v48 = vpack.c.bf16 %v969_v46, %v967_v43  ;;  %v2104_v49 = vpack.c.bf16 %v1122_v47, %v1122_v47 }
 0x18f   : > { %v971_v50 = vpop.f32.mrf.mxu1  ;;  %v2185_v51 = vpop.f32.mrf.mxu0 }
 0x190   : > { %1740 = vst [vmem:[%s2547_s4 + $0x260] sm:$0xff] %v2109_v48  ;;  %1735 = vst [vmem:[%s2547_s4 + $0x240] sm:$0xf] %v2104_v49  ;;  %v2113_v52 = vpack.c.bf16 %v2185_v51, %v2185_v51 }
 0x191   : > { %v973_v53 = vpop.f32.mrf.mxu1  ;;  %v1125_v54 = vpop.f32.mrf.mxu0 }
 0x192   : > { %1744 = vst [vmem:[%s2547_s4 + $0x27c] sm:$0xf] %v2113_v52  ;;  %v2112_v55 = vpack.c.bf16 %v973_v53, %v971_v50  ;;  %v2107_v56 = vpack.c.bf16 %v1125_v54, %v1125_v54 }
 0x194   : > { %1743 = vst [vmem:[%s2547_s4 + $0x274] sm:$0xff] %v2112_v55  ;;  %1738 = vst [vmem:[%s2547_s4 + $0x254] sm:$0xf] %v2107_v56 }
 0x195 PF: > { %s12_s13 = sadd.s32 1, %s2355_s13   ;;  %s2663_s9 = smov %s2347_s11 }
 0x196   : > { %p9_p7 = scmp.ge.s32.totalorder %s12_s13, 6   ;;  %s2664_s10 = smov %s2351_s12 }
 0x197   : > { %s2665_s11 = smov %s2668_s14  ;;  %s2666_s12 = smov %s2672_s15 }
 0x198   :  { %11 = sbr.rel (!%p9_p7) target bundleno = 3 (0x3), region = 61 }

</bundles_post_ra>
